<compile_context>
chip_gen: v7x
topology: tpu7x:2x2x1
jax: 0.10.0
libtpu: 0.0.40
codegen_flags: <defaults>
</compile_context>

<pallas_src>
import functools
import math

import jax
import jax.numpy as jnp
from jax.experimental import pallas as pl
from jax.experimental.pallas import tpu as pltpu


# ---------------------------------------------------------------------------
# Host-side glue
# ---------------------------------------------------------------------------
def _linear_interp_matrix(out_size, in_size):
    """(out_size, in_size) f32 matrix for 1-D linear interpolation with
    align_corners=True (PyTorch convention)."""
    if out_size == 1:
        src = jnp.zeros((1,), jnp.float32)
    else:
        src = jnp.arange(out_size, dtype=jnp.float32) * (
            (in_size - 1) / (out_size - 1)
        )
    i0 = jnp.clip(jnp.floor(src).astype(jnp.int32), 0, in_size - 1)
    i1 = jnp.minimum(i0 + 1, in_size - 1)
    w1 = src - i0.astype(jnp.float32)
    w0 = 1.0 - w1
    cols = jnp.arange(in_size)[None, :]
    m = (w0[:, None] * (cols == i0[:, None]).astype(jnp.float32)
         + w1[:, None] * (cols == i1[:, None]).astype(jnp.float32))
    return m  # always float32 (PyTorch computes interp weights in f32)


def _pick_block_rows(B, per_row_bytes, fixed_bytes, budget, *, row_align=1,
                     min_steps=8):
    """Pick the per-grid-step batch block TB (a divisor of B).

    Policy: largest block that fits the VMEM budget, then shrink (among valid
    divisors) until the grid keeps ~min_steps steps so the BlockSpec pipeline
    can overlap inbound/outbound DMA with compute and a 2-TensorCore chip
    (v7x) gets balanced work under dimension_semantics=('parallel',).
    `row_align` keeps the second-to-last block dim tileable when the batch is
    the second-to-last dim of a 2-D block (8 sublanes for f32, 16 for bf16).
    """
    divisors = [d for d in range(1, B + 1) if B % d == 0]
    allowed = [d for d in divisors if d == B or d % row_align == 0]
    fit = [d for d in allowed if fixed_bytes + d * per_row_bytes <= budget]
    if not fit:
        fit = [min(allowed)]
    fit.sort(reverse=True)
    tb = fit[0]
    target = min(min_steps, B)
    if B // tb < target:
        for d in fit:
            if B // d >= target:
                tb = d
                break
        else:
            tb = fit[-1]  # target unreachable: take the most steps we can get
    return tb


# ---------------------------------------------------------------------------
# Kernels
# ---------------------------------------------------------------------------
def _fused_resize_kernel(x_ref, m_ref, o_ref):
    # x_ref: (TB, H*W)        lane-dense input rows (one field slab per row)
    # m_ref: (H*W, Ho*Wo) f32 fused resize operator, `factor` folded in
    # o_ref: (TB, Ho*Wo)      lane-dense output rows (unmasked wide stores)
    x = x_ref[...].astype(jnp.float32)
    y = jnp.dot(x, m_ref[...],
                precision=jax.lax.Precision.HIGHEST,   # f32 parity with PyTorch
                preferred_element_type=jnp.float32)
    o_ref[...] = y.astype(o_ref.dtype)


def _separable_resize_kernel(x_ref, ww_t_ref, wh_ref, o_ref, *, merge_rows):
    # x_ref   : (TB, H, W)
    # ww_t_ref: (W, W_out)   f32, pre-transposed W-interp matrix (host glue)
    # wh_ref  : (H_out, H)   f32, H-interp matrix with `factor` folded in
    # o_ref   : (TB, H_out, W_out)
    TB, H, W = x_ref.shape
    x = x_ref[...].astype(jnp.float32)
    ww_t = ww_t_ref[...]
    wh = wh_ref[...]
    prec = jax.lax.Precision.HIGHEST

    if merge_rows:
        # W-resize for all TB*H rows in ONE MXU matmul; the leading-dim merge
        # is a layout no-op because H is a multiple of the f32 sublane count.
        t = jnp.dot(x.reshape(TB * H, W), ww_t, precision=prec,
                    preferred_element_type=jnp.float32)
        t3 = t.reshape(TB, H, ww_t.shape[1])
    else:
        t3 = None

    # H-resize: TB canonical 2-D (H_out, H) @ (H, W_out) MXU matmuls, statically
    # unrolled -- no broadcast_to of wh and no batched einsum (perf feedback).
    for b in range(TB):
        row = t3[b] if merge_rows else jnp.dot(
            x[b], ww_t, precision=prec, preferred_element_type=jnp.float32)
        o_ref[b] = jnp.dot(wh, row, precision=prec,
                           preferred_element_type=jnp.float32).astype(o_ref.dtype)


# ---------------------------------------------------------------------------
# Wrapper
# ---------------------------------------------------------------------------
_FUSED_MATRIX_MAX_BYTES = 2 * 1024 * 1024  # fused operator kept <= 2 MiB


def resize_transform(x, vel_resize, ndims=2):
    """Pallas equivalent of ResizeTransform.forward for ndims == 2 (bilinear).

    x: (N, C, H, W) -- same NCHW layout as the PyTorch module.
    """
    assert ndims == 2, "this kernel implements the bilinear (ndims=2) path"
    # TODO(synk): ndims==1 (linear) / ndims==3 (trilinear) paths not implemented.
    factor = 1.0 / float(vel_resize)
    if factor == 1.0:
        return x

    N, C, H, W = x.shape
    H_out = int(math.floor(H * factor))  # matches PyTorch: floor(in * scale)
    W_out = int(math.floor(W * factor))
    B = N * C
    itemsize = x.dtype.itemsize

    # Interpolation weights (f32, factor folded into the H matrix).
    wh = factor * _linear_interp_matrix(H_out, H)        # (H_out, H), f32
    ww = _linear_interp_matrix(W_out, W)                  # (W_out, W), f32

    # Generation-aware VMEM sizing: 128 MiB on v5e/v6e, 64 MiB per TC on v7x.
    try:
        vmem_cap = int(pltpu.get_tpu_info().vmem_capacity_bytes)
    except Exception:
        vmem_cap = 64 * 1024 * 1024  # conservative fallback (v7x per-TC size)
    vmem_budget = int(vmem_cap * 0.65)   # what our explicit accounting may use
    vmem_limit = int(vmem_cap * 0.85)    # headroom for compiler scratch

    compiler_params = pltpu.CompilerParams(
        dimension_semantics=("parallel",),
        vmem_limit_bytes=vmem_limit,
    )

    kron_bytes = (H * W) * (H_out * W_out) * 4
    if kron_bytes <= _FUSED_MATRIX_MAX_BYTES:
        # ---- Fused path (small fields) ------------------------------------
        # out[b, :] = x[b, :] @ (factor * kron(wh, ww))^T : a single matmul
        # with lane-dense loads (last dim H*W) and lane-dense stores
        # (last dim Ho*Wo); no in-kernel reshape/transpose/broadcast.
        HW, HoWo = H * W, H_out * W_out
        kron_m = jnp.einsum("oh,pw->hwop", wh, ww).reshape(HW, HoWo)  # exact

        row_align = 8 * max(1, 4 // itemsize)   # sublane tile of the 2-D block
        per_row = (HW + HoWo) * itemsize * 2 + (HW + HoWo) * 4
        # The constant operand's index_map never changes, so Pallas re-fetches
        # it only once; we still budget two buffers for its VMEM allocation.
        fixed = kron_bytes * 2
        tb = _pick_block_rows(B, per_row, fixed, vmem_budget,
                              row_align=row_align)
        grid_b = B // tb

        out_flat = pl.pallas_call(
            _fused_resize_kernel,
            out_shape=jax.ShapeDtypeStruct((B, HoWo), x.dtype),
            grid_spec=pltpu.PrefetchScalarGridSpec(
                num_scalar_prefetch=0,
                grid=(grid_b,),
                in_specs=[
                    pl.BlockSpec((tb, HW), lambda b: (b, 0)),
                    pl.BlockSpec((HW, HoWo), lambda b: (0, 0)),
                ],
                out_specs=pl.BlockSpec((tb, HoWo), lambda b: (b, 0)),
            ),
            compiler_params=compiler_params,
        )(x.reshape(B, HW), kron_m)
        return out_flat.reshape(N, C, H_out, W_out)

    # ---- Separable path (larger fields) ------------------------------------
    ww_t = ww.T                           # (W, W_out), pre-transposed on host
    merge_rows = (H % 8 == 0)             # (TB,H,W)->(TB*H,W) is a layout no-op
    per_slab = (H * W + H_out * W_out) * itemsize * 2 \
        + (H * W + H * W_out + H_out * W_out) * 4
    fixed = (W * W_out + H_out * H) * 4 * 2
    tb = _pick_block_rows(B, per_slab, fixed, vmem_budget, row_align=1)
    grid_b = B // tb
    # TODO(synk): fields too large for even a single-slab block would need an
    # additional spatial (H) grid axis; not required for velocity-field sizes.

    kernel = functools.partial(_separable_resize_kernel, merge_rows=merge_rows)
    out3 = pl.pallas_call(
        kernel,
        out_shape=jax.ShapeDtypeStruct((B, H_out, W_out), x.dtype),
        grid_spec=pltpu.PrefetchScalarGridSpec(
            num_scalar_prefetch=0,
            grid=(grid_b,),
            in_specs=[
                pl.BlockSpec((tb, H, W), lambda b: (b, 0, 0)),
                pl.BlockSpec((W, W_out), lambda b: (0, 0)),
                pl.BlockSpec((H_out, H), lambda b: (0, 0)),
            ],
            out_specs=pl.BlockSpec((tb, H_out, W_out), lambda b: (b, 0, 0)),
        ),
        compiler_params=compiler_params,
    )(x.reshape(B, H, W), ww_t, wh)
    return out3.reshape(N, C, H_out, W_out)


# ---------------------------------------------------------------------------
# Pure-JAX reference (same math, same f32/HIGHEST settings)
# ---------------------------------------------------------------------------
def _reference(x, vel_resize):
    factor = 1.0 / float(vel_resize)
    if factor == 1.0:
        return x
    N, C, H, W = x.shape
    H_out, W_out = int(math.floor(H * factor)), int(math.floor(W * factor))
    wh = _linear_interp_matrix(H_out, H)
    ww = _linear_interp_matrix(W_out, W)
    y = jnp.einsum("oh,nchw,pw->ncop", wh, x.astype(jnp.float32), ww,
                   precision=jax.lax.Precision.HIGHEST)
    return (factor * y).astype(x.dtype)


if __name__ == "__main__":
    key = jax.random.PRNGKey(0)
    x = jax.random.normal(key, (2, 4, 16, 16), dtype=jnp.float32)

    # Upsample branch (vel_resize = 0.5 -> factor = 2: scale then interpolate).
    out_up = jax.block_until_ready(resize_transform(x, 0.5, ndims=2))
    ref_up = _reference(x, 0.5)
    assert out_up.shape == (2, 4, 32, 32), out_up.shape
    assert jnp.allclose(out_up, ref_up, atol=1e-5, rtol=1e-5), "upsample mismatch"

    # Downsample branch (vel_resize = 2.0 -> factor = 0.5: interpolate then scale).
    out_dn = jax.block_until_ready(resize_transform(x, 2.0, ndims=2))
    ref_dn = _reference(x, 2.0)
    assert out_dn.shape == (2, 4, 8, 8), out_dn.shape
    assert jnp.allclose(out_dn, ref_dn, atol=1e-5, rtol=1e-5), "downsample mismatch"

    # Identity branch (factor == 1).
    out_id = jax.block_until_ready(resize_transform(x, 1.0, ndims=2))
    assert out_id.shape == x.shape

    # Larger field exercises the separable (two-matmul) path.
    x_big = jax.random.normal(jax.random.PRNGKey(0), (1, 2, 96, 128),
                              dtype=jnp.float32)
    out_big = jax.block_until_ready(resize_transform(x_big, 0.5, ndims=2))
    ref_big = _reference(x_big, 0.5)
    assert out_big.shape == (1, 2, 192, 256), out_big.shape
    assert jnp.allclose(out_big, ref_big, atol=1e-5, rtol=1e-5), "separable mismatch"

    print("KERNEL_OK")
</pallas_src>

<mosaic_0001>
module attributes {stable_mosaic.version = 11 : i64} {
  func.func @_fused_resize_kernel(%arg0: i32, %arg1: memref<8x256xf32, #tpu.memory_space<vmem>>, %arg2: memref<256x1024xf32, #tpu.memory_space<vmem>>, %arg3: memref<8x1024xf32, #tpu.memory_space<vmem>>) attributes {dimension_semantics = [#tpu.dimension_semantics<parallel>], iteration_bounds = array<i64: 1>, scalar_prefetch = 0 : i64, scratch_operands = 0 : i64, tpu.core_type = #tpu.core_type<tc>, window_params = [{transform_indices = @transform_0, window_bounds = array<i64: 8, 256>}, {pipeline_mode = #tpu.pipeline_mode<synchronous>, transform_indices = @transform_1, window_bounds = array<i64: 256, 1024>}, {transform_indices = @transform_2, window_bounds = array<i64: 8, 1024>}]} {
    %c0 = arith.constant 0 : index
    %c0_0 = arith.constant 0 : index
    %0 = vector.load %arg1[%c0, %c0_0] : memref<8x256xf32, #tpu.memory_space<vmem>>, vector<8x256xf32>
    %c0_1 = arith.constant 0 : index
    %c0_2 = arith.constant 0 : index
    %1 = vector.load %arg2[%c0_1, %c0_2] : memref<256x1024xf32, #tpu.memory_space<vmem>>, vector<256x1024xf32>
    %cst = arith.constant dense<0.000000e+00> : vector<8x1024xf32>
    %2 = tpu.matmul %0, %1, %cst {dimension_numbers = #tpu.dot_dimension_numbers<[1], [0], [0], [1], [0, 0, 1, 1], [], []>, precision = #tpu.contract_precision<fp32>} : vector<8x256xf32>, vector<256x1024xf32>, vector<8x1024xf32> -> vector<8x1024xf32>
    %c0_3 = arith.constant 0 : index
    %c0_4 = arith.constant 0 : index
    %3 = vector.load %arg3[%c0_3, %c0_4] : memref<8x1024xf32, #tpu.memory_space<vmem>>, vector<8x1024xf32>
    tpu.vector_store %arg3[%c0_3, %c0_4], %2 {strides = array<i32>} : memref<8x1024xf32, #tpu.memory_space<vmem>>, vector<8x1024xf32>,
    return
  }
  func.func @transform_0(%arg0: i32) -> (i32, i32) {
    %c0_i32 = arith.constant 0 : i32
    %c0_i32_0 = arith.constant 0 : i32
    return %arg0, %c0_i32 : i32, i32
  }
  func.func @transform_1(%arg0: i32) -> (i32, i32) {
    %c0_i32 = arith.constant 0 : i32
    %c0_i32_0 = arith.constant 0 : i32
    %c0_i32_1 = arith.constant 0 : i32
    return %c0_i32, %c0_i32_0 : i32, i32
  }
  func.func @transform_2(%arg0: i32) -> (i32, i32) {
    %c0_i32 = arith.constant 0 : i32
    %c0_i32_0 = arith.constant 0 : i32
    return %arg0, %c0_i32 : i32, i32
  }
}

</mosaic_0001>

<bundles_post_ra>
// kernel: tpu_custom_call.1
= control target key start
LH: loop header
LB: loop body
LE: loop exit
PB: predicated region body
PF: predicated region fallthrough
CT: control target
= control target key end

     0   :  { %7 = vsyncpa [#allocation3], 0  ;;  %s10679_s0 = inlined_call_operand.hbm [shape: f32[8,256], index: 0, kind: input, shape index: {}]   ;;  %s10680_s1 = inlined_call_operand.hbm [shape: f32[256,1024], index: 1, kind: input, shape index: {}]   ;;  %s10681_s2 = inlined_call_operand.hbm [shape: f32[8,1024], index: 2, kind: output, shape index: {}]  }
   0x1   :  { %8 = vsyncpa [#allocation6], 0 }
   0x2   :  { %9 = vsyncpa [#allocation4], 0  ;;  %s7109_s9 = smov [#allocation2]   ;;  %s7110_s11 = smov [#allocation5]  }
   0x3   :  { %s16_s10 = sshll.u32 %s7109_s9, 4  ;;  %s25_s12 = sshll.u32 %s7110_s11, 4  ;;  %s17_s10 = int_to_ptr.vmem [resolvable:$true] %s16_s10  ;;  %s7129_s12 = int_to_ptr.vmem [resolvable:$true] %s25_s12 }
   0x4   :  { %s7037_s15 = scalar_lea.hbm %s10679_s0, 256 }
   0x5   :  { %p7038_p0 = scmp.ne.s32.totalorder %s10679_s0, %s7037_s15  ;;  %p7041_p1 = scmp.lt.u32.totalorder %s7037_s15, %s10679_s0 }
   0x7   :  { %p7043_p2 = pnand %p7041_p1, %p7038_p0 }
   0x9   :  { %7046 = shalt.err (!%p7043_p2)
}
   0xa   :  { %s7047_s20 = scalar_lea.vmem %s17_s10, 256  ;;  %p7052_p4 = scmp.lt.s32.totalorder %s17_s10, %s17_s10 }
   0xb   :  { %p7048_p3 = scmp.ne.s32.totalorder %s17_s10, %s7047_s20  ;;  %p7053_p5 = scmp.lt.s32.totalorder %s7047_s20, %s7047_s20 }
   0xd   :  { %p7054_p6 = por %p7053_p5, %p7052_p4 }
   0xf   :  { %p7055_p7 = pnand %p7054_p6, %p7048_p3 }
  0x11   :  { %7058 = shalt.err (!%p7055_p7)
}
  0x12   :  { %19 = dma.hbm_to_vmem [thread:$0]  %s10679_s0, 256, %s17_s10, [#allocation3]  }
  0x13   :  { %s7059_s25 = scalar_lea.hbm %s10680_s1, 32768 }
  0x14   :  { %p7060_p8 = scmp.ne.s32.totalorder %s10680_s1, %s7059_s25  ;;  %p7063_p9 = scmp.lt.u32.totalorder %s7059_s25, %s10680_s1 }
  0x16   :  { %p7065_p10 = pnand %p7063_p9, %p7060_p8 }
  0x18   :  { %7068 = shalt.err (!%p7065_p10)
}
  0x19   :  { %s7069_s30 = scalar_lea.vmem %s7129_s12, 32768  ;;  %p7074_p12 = scmp.lt.s32.totalorder %s7129_s12, %s7129_s12 }
  0x1a   :  { %p7070_p11 = scmp.ne.s32.totalorder %s7129_s12, %s7069_s30  ;;  %p7075_p13 = scmp.lt.s32.totalorder %s7069_s30, %s7069_s30 }
  0x1c   :  { %p7076_p0 = por %p7075_p13, %p7074_p12 }
  0x1e   :  { %p7077_p1 = pnand %p7076_p0, %p7070_p11 }
  0x20   :  { %7080 = shalt.err (!%p7077_p1)
}
  0x21   :  { %s7111_s0 = smov 1024   ;;  %s7112_s3 = smov 64  }
  0x22   :  { %31 = dma.hbm_to_vmem [thread:$0]  %s10680_s1, 32768, %s7129_s12, [#allocation6], %s7111_s0, %s7111_s0, %s7112_s3  }
  0x23   :  { %7103 = dma.done.wait [#allocation3], 256  }
  0x24   :  { %7104 = vsyncadd [#allocation3], 4294967040 }
  0x25   :  { %7105 = dma.done.wait [#allocation6], 32768  }
  0x26   :  { %7106 = vsyncadd [#allocation6], 4294934528  ;;  %v41_v0 = vld [vmem:[#allocation5 + $0x8] sm:$0xff]  ;;  %v43_v2 = vld [vmem:[#allocation5 + $0x18] sm:$0xff]  ;;  %s7113_s1 = smov [#allocation7]  }
  0x27   :  { %v49_v1 = vld [vmem:[#allocation5 + $0x48] sm:$0xff]  ;;  %v296_v3 = vand.u32 4294901760, %v41_v0  ;;  %v51_v5 = vld [vmem:[#allocation5 + $0x58] sm:$0xff]  ;;  %v1580_v6 = vand.u32 4294901760, %v43_v2  ;;  %v40_v7 = vld [vmem:[#allocation5] sm:$0xff]  ;;  %s5446_s6 = sshll.u32 %s7113_s1, 4  ;;  %s5447_s6 = int_to_ptr.vmem [resolvable:$true] %s5446_s6 }
  0x28   :  { %v300_v4 = vand.u32 4294901760, %v49_v1  ;;  %v48_v8 = vld [vmem:[#allocation5 + $0x40] sm:$0xff]  ;;  %v1584_v9 = vand.u32 4294901760, %v51_v5  ;;  %v298_v10 = vand.u32 4294901760, %v40_v7  ;;  %v42_v12 = vld [vmem:[#allocation5 + $0x10] sm:$0xff]  ;;  %v57_v14 = vld [vmem:[#allocation5 + $0x88] sm:$0xff]  ;;  %p7086_p3 = scmp.lt.s32.totalorder %s5447_s6, %s5447_s6 }
  0x29   :  { %v302_v11 = vand.u32 4294901760, %v48_v8  ;;  %v50_v13 = vld [vmem:[#allocation5 + $0x50] sm:$0xff]  ;;  %v7162_v16 = vsub.f32 %v41_v0, %v296_v3  ;;  %v7166_v18 = vsub.f32 %v43_v2, %v1580_v6  ;;  %v65_v19 = vld [vmem:[#allocation5 + $0xc8] sm:$0xff]  ;;  %v59_v20 = vld [vmem:[#allocation5 + $0x98] sm:$0xff]  ;;  %v1582_v28 = vand.u32 4294901760, %v42_v12  ;;  %s7081_s7 = scalar_lea.vmem %s5447_s6, 1024 }
  0x2a   :  { %v7160_v15 = vpack.c.bf16 %v300_v4, %v296_v3  ;;  %v7164_v17 = vsub.f32 %v49_v1, %v300_v4  ;;  %v67_v21 = vld [vmem:[#allocation5 + $0xd8] sm:$0xff]  ;;  %v7168_v22 = vpack.c.bf16 %v1584_v9, %v1580_v6  ;;  %v7170_v23 = vsub.f32 %v51_v5, %v1584_v9  ;;  %v56_v26 = vld [vmem:[#allocation5 + $0x80] sm:$0xff]  ;;  %v58_v36 = vld [vmem:[#allocation5 + $0x90] sm:$0xff]  ;;  %p7082_p2 = scmp.ne.s32.totalorder %s5447_s6, %s7081_s7  ;;  %p7087_p4 = scmp.lt.s32.totalorder %s7081_s7, %s7081_s7 }
  0x2b   :  { %11561 = vst [vmem:[#allocation12_spill] sm:$0xff] %v7162_v16  ;;  %11563 = vst [vmem:[#allocation14_spill] sm:$0xff] %v7166_v18  ;;  %v7172_v24 = vpack.c.bf16 %v302_v11, %v298_v10  ;;  %v7174_v25 = vsub.f32 %v40_v7, %v298_v10  ;;  %v7177_v27 = vsub.f32 %v48_v8, %v302_v11  ;;  %v1586_v29 = vand.u32 4294901760, %v50_v13  ;;  %v64_v31 = vld [vmem:[#allocation5 + $0xc0] sm:$0xff]  ;;  %v66_v37 = vld [vmem:[#allocation5 + $0xd0] sm:$0xff] }
  0x2c   :  { %11560 = vst [vmem:[#allocation11_spill] sm:$0xff] %v7160_v15  ;;  %11562 = vst [vmem:[#allocation13_spill] sm:$0xff] %v7164_v17  ;;  %5457 = vmatprep.subr.bf16.mxu0 %v7160_v15  ;;  %v304_v30 = vand.u32 4294901760, %v57_v14  ;;  %5841 = vmatprep.subr.bf16.mxu1 %v7168_v22  ;;  %v308_v32 = vand.u32 4294901760, %v65_v19  ;;  %v1588_v33 = vand.u32 4294901760, %v59_v20  ;;  %v1592_v34 = vand.u32 4294901760, %v67_v21  ;;  %p7088_p5 = por %p7087_p4, %p7086_p3 }
  0x2d   :  { %11564 = vst [vmem:[#allocation15_spill] sm:$0xff] %v7168_v22  ;;  %11565 = vst [vmem:[#allocation16_spill] sm:$0xff] %v7170_v23  ;;  %5459 = vmatpush1.bf16.msra.mxu0 %v7172_v24  ;;  %v306_v35 = vand.u32 4294901760, %v56_v26  ;;  %v7181_v38 = vpack.c.bf16 %v1586_v29, %v1582_v28  ;;  %v7183_v39 = vsub.f32 %v42_v12, %v1582_v28  ;;  %v73_v42 = vld [vmem:[#allocation5 + $0x108] sm:$0xff]  ;;  %v75_v44 = vld [vmem:[#allocation5 + $0x118] sm:$0xff]  ;;  %v310_v51 = vand.u32 4294901760, %v64_v31 }
  0x2e   :  { %11566 = vst [vmem:[#allocation17_spill] sm:$0xff] %v7172_v24  ;;  %11567 = vst [vmem:[#allocation18_spill] sm:$0xff] %v7174_v25  ;;  %v7185_v40 = vsub.f32 %v50_v13, %v1586_v29  ;;  %v7187_v41 = vsub.f32 %v57_v14, %v304_v30  ;;  %v81_v43 = vld [vmem:[#allocation5 + $0x148] sm:$0xff]  ;;  %v7189_v45 = vpack.c.bf16 %v308_v32, %v304_v30  ;;  %v83_v49 = vld [vmem:[#allocation5 + $0x158] sm:$0xff]  ;;  %v1590_v53 = vand.u32 4294901760, %v58_v36  ;;  %p7089_p6 = pnand %p7088_p5, %p7082_p2 }
  0x2f   :  { %11568 = vst [vmem:[#allocation19_spill] sm:$0xff] %v7177_v27  ;;  %11569 = vst [vmem:[#allocation20_spill] sm:$0xff] %v7181_v38  ;;  %v7191_v46 = vsub.f32 %v65_v19, %v308_v32  ;;  %v7193_v47 = vpack.c.bf16 %v1592_v34, %v1588_v33  ;;  %v7195_v48 = vsub.f32 %v59_v20, %v1588_v33  ;;  %5843 = vmatpush1.bf16.msra.mxu1 %v7181_v38  ;;  %v72_v58 = vld [vmem:[#allocation5 + $0x100] sm:$0xff]  ;;  %v74_v0 = vld [vmem:[#allocation5 + $0x110] sm:$0xff] }
  0x30   :  { %11570 = vst [vmem:[#allocation21_spill] sm:$0xff] %v7183_v39  ;;  %11571 = vst [vmem:[#allocation22_spill] sm:$0xff] %v7185_v40  ;;  %v7198_v50 = vsub.f32 %v67_v21, %v1592_v34  ;;  %v7200_v52 = vsub.f32 %v56_v26, %v306_v35  ;;  %5461 = vmatprep.subr.bf16.mxu0 %v7189_v45  ;;  %v1594_v54 = vand.u32 4294901760, %v66_v37  ;;  %v312_v55 = vand.u32 4294901760, %v73_v42  ;;  %v80_v59 = vld [vmem:[#allocation5 + $0x140] sm:$0xff]  ;;  %v82_v1 = vld [vmem:[#allocation5 + $0x150] sm:$0xff] }
  0x31   :  { %11572 = vst [vmem:[#allocation23_spill] sm:$0xff] %v7187_v41  ;;  %11573 = vst [vmem:[#allocation24_spill] sm:$0xff] %v7189_v45  ;;  %5845 = vmatprep.subr.bf16.mxu1 %v7193_v47  ;;  %v316_v56 = vand.u32 4294901760, %v81_v43  ;;  %v1596_v57 = vand.u32 4294901760, %v75_v44  ;;  %v7204_v60 = vpack.c.bf16 %v310_v51, %v306_v35  ;;  %v7206_v61 = vsub.f32 %v64_v31, %v310_v51  ;;  %v89_v2 = vld [vmem:[#allocation5 + $0x188] sm:$0xff]  ;;  %v91_v8 = vld [vmem:[#allocation5 + $0x198] sm:$0xff] }
  0x32   :  { %11574 = vst [vmem:[#allocation25_spill] sm:$0xff] %v7191_v46  ;;  %11575 = vst [vmem:[#allocation26_spill] sm:$0xff] %v7193_v47  ;;  %v7208_v62 = vsub.f32 %v58_v36, %v1590_v53  ;;  %v1600_v63 = vand.u32 4294901760, %v83_v49  ;;  %v7210_v3 = vpack.c.bf16 %v1594_v54, %v1590_v53  ;;  %v7212_v4 = vsub.f32 %v66_v37, %v1594_v54  ;;  %v97_v7 = vld [vmem:[#allocation5 + $0x1c8] sm:$0xff]  ;;  %v99_v9 = vld [vmem:[#allocation5 + $0x1d8] sm:$0xff] }
  0x33   :  { %11576 = vst [vmem:[#allocation27_spill] sm:$0xff] %v7195_v48  ;;  %11577 = vst [vmem:[#allocation28_spill] sm:$0xff] %v7198_v50  ;;  %v7214_v5 = vpack.c.bf16 %v316_v56, %v312_v55  ;;  %v7216_v6 = vsub.f32 %v73_v42, %v312_v55  ;;  %5463 = vmatpush1.bf16.msra.mxu0 %v7204_v60  ;;  %v7219_v10 = vsub.f32 %v81_v43, %v316_v56  ;;  %v88_v31 = vld [vmem:[#allocation5 + $0x180] sm:$0xff]  ;;  %v90_v37 = vld [vmem:[#allocation5 + $0x190] sm:$0xff] }
  0x34   :  { %11578 = vst [vmem:[#allocation29_spill] sm:$0xff] %v7200_v52  ;;  %11579 = vst [vmem:[#allocation30_spill] sm:$0xff] %v7204_v60  ;;  %v7221_v11 = vpack.c.bf16 %v1600_v63, %v1596_v57  ;;  %v7223_v12 = vsub.f32 %v75_v44, %v1596_v57  ;;  %v7225_v13 = vsub.f32 %v83_v49, %v1600_v63  ;;  %5847 = vmatpush1.bf16.msra.mxu1 %v7210_v3  ;;  %v96_v36 = vld [vmem:[#allocation5 + $0x1c0] sm:$0xff]  ;;  %v98_v42 = vld [vmem:[#allocation5 + $0x1d0] sm:$0xff] }
  0x35   :  { %11580 = vst [vmem:[#allocation31_spill] sm:$0xff] %v7206_v61  ;;  %11581 = vst [vmem:[#allocation32_spill] sm:$0xff] %v7208_v62  ;;  %5465 = vmatprep.subr.bf16.mxu0 %v7214_v5  ;;  %v314_v14 = vand.u32 4294901760, %v72_v58  ;;  %v318_v19 = vand.u32 4294901760, %v80_v59  ;;  %v1598_v20 = vand.u32 4294901760, %v74_v0  ;;  %v1602_v21 = vand.u32 4294901760, %v82_v1 }
  0x36   :  { %11582 = vst [vmem:[#allocation33_spill] sm:$0xff] %v7210_v3  ;;  %11583 = vst [vmem:[#allocation34_spill] sm:$0xff] %v7212_v4  ;;  %5849 = vmatprep.subr.bf16.mxu1 %v7221_v11  ;;  %v320_v26 = vand.u32 4294901760, %v89_v2  ;;  %v324_v28 = vand.u32 4294901760, %v97_v7  ;;  %v1604_v29 = vand.u32 4294901760, %v91_v8  ;;  %v1608_v30 = vand.u32 4294901760, %v99_v9 }
  0x37   :  { %11584 = vst [vmem:[#allocation35_spill] sm:$0xff] %v7214_v5  ;;  %11585 = vst [vmem:[#allocation36_spill] sm:$0xff] %v7216_v6  ;;  %v7230_v32 = vpack.c.bf16 %v318_v19, %v314_v14  ;;  %v7232_v33 = vsub.f32 %v72_v58, %v314_v14  ;;  %v7234_v34 = vsub.f32 %v80_v59, %v318_v19  ;;  %v105_v53 = vld [vmem:[#allocation5 + $0x208] sm:$0xff]  ;;  %v107_v55 = vld [vmem:[#allocation5 + $0x218] sm:$0xff]  ;;  %v322_v59 = vand.u32 4294901760, %v88_v31 }
  0x38   :  { %11586 = vst [vmem:[#allocation37_spill] sm:$0xff] %v7219_v10  ;;  %11587 = vst [vmem:[#allocation38_spill] sm:$0xff] %v7221_v11  ;;  %v7236_v35 = vpack.c.bf16 %v1602_v21, %v1598_v20  ;;  %v7238_v43 = vsub.f32 %v74_v0, %v1598_v20  ;;  %v7240_v44 = vsub.f32 %v82_v1, %v1602_v21  ;;  %v113_v54 = vld [vmem:[#allocation5 + $0x248] sm:$0xff]  ;;  %v326_v0 = vand.u32 4294901760, %v96_v36  ;;  %v115_v14 = vld [vmem:[#allocation5 + $0x258] sm:$0xff] }
  0x39   :  { %11588 = vst [vmem:[#allocation39_spill] sm:$0xff] %v7223_v12  ;;  %11589 = vst [vmem:[#allocation40_spill] sm:$0xff] %v7225_v13  ;;  %v7242_v49 = vpack.c.bf16 %v324_v28, %v320_v26  ;;  %v7244_v51 = vsub.f32 %v89_v2, %v320_v26  ;;  %5467 = vmatpush1.bf16.msra.mxu0 %v7230_v32  ;;  %v7248_v56 = vsub.f32 %v97_v7, %v324_v28  ;;  %v104_v26 = vld [vmem:[#allocation5 + $0x200] sm:$0xff]  ;;  %v129_v11 = vld [vmem:[#allocation5 + $0x2c8] sm:$0xff] }
  0x3a   :  { %11590 = vst [vmem:[#allocation41_spill] sm:$0xff] %v7230_v32  ;;  %11591 = vst [vmem:[#allocation42_spill] sm:$0xff] %v7232_v33  ;;  %5851 = vmatpush1.bf16.msra.mxu1 %v7236_v35  ;;  %v7250_v57 = vpack.c.bf16 %v1608_v30, %v1604_v29  ;;  %v7252_v58 = vsub.f32 %v91_v8, %v1604_v29  ;;  %v7255_v63 = vsub.f32 %v99_v9, %v1608_v30  ;;  %v112_v28 = vld [vmem:[#allocation5 + $0x240] sm:$0xff]  ;;  %v106_v8 = vld [vmem:[#allocation5 + $0x210] sm:$0xff] }
  0x3b   :  { %11592 = vst [vmem:[#allocation43_spill] sm:$0xff] %v7234_v34  ;;  %11593 = vst [vmem:[#allocation44_spill] sm:$0xff] %v7236_v35  ;;  %5469 = vmatprep.subr.bf16.mxu0 %v7242_v49  ;;  %v1606_v1 = vand.u32 4294901760, %v90_v37  ;;  %v1610_v2 = vand.u32 4294901760, %v98_v42  ;;  %v7258_v19 = vsub.f32 %v88_v31, %v322_v59  ;;  %v328_v20 = vand.u32 4294901760, %v105_v53  ;;  %v121_v32 = vld [vmem:[#allocation5 + $0x288] sm:$0xff] }
  0x3c   :  { %11594 = vst [vmem:[#allocation45_spill] sm:$0xff] %v7238_v43  ;;  %11595 = vst [vmem:[#allocation46_spill] sm:$0xff] %v7240_v44  ;;  %5853 = vmatprep.subr.bf16.mxu1 %v7250_v57  ;;  %v332_v7 = vand.u32 4294901760, %v113_v54  ;;  %v1612_v21 = vand.u32 4294901760, %v107_v55  ;;  %v7260_v29 = vpack.c.bf16 %v326_v0, %v322_v59  ;;  %v7262_v35 = vsub.f32 %v96_v36, %v326_v0  ;;  %v123_v47 = vld [vmem:[#allocation5 + $0x298] sm:$0xff]  ;;  %v122_v38 = vld [vmem:[#allocation5 + $0x290] sm:$0xff] }
  0x3d   :  { %11596 = vst [vmem:[#allocation47_spill] sm:$0xff] %v7242_v49  ;;  %11597 = vst [vmem:[#allocation48_spill] sm:$0xff] %v7244_v51  ;;  %v7264_v9 = vpack.c.bf16 %v1610_v2, %v1606_v1  ;;  %v7266_v30 = vsub.f32 %v90_v37, %v1606_v1  ;;  %v114_v49 = vld [vmem:[#allocation5 + $0x250] sm:$0xff]  ;;  %v7272_v3 = vsub.f32 %v105_v53, %v328_v20  ;;  %v1616_v36 = vand.u32 4294901760, %v115_v14  ;;  %v131_v53 = vld [vmem:[#allocation5 + $0x2d8] sm:$0xff] }
  0x3e   :  { %11598 = vst [vmem:[#allocation49_spill] sm:$0xff] %v7248_v56  ;;  %11599 = vst [vmem:[#allocation50_spill] sm:$0xff] %v7250_v57  ;;  %v7268_v57 = vsub.f32 %v98_v42, %v1610_v2  ;;  %v7270_v31 = vpack.c.bf16 %v332_v7, %v328_v20  ;;  %v7274_v5 = vsub.f32 %v113_v54, %v332_v7  ;;  %5471 = vmatpush1.bf16.msra.mxu0 %v7260_v29  ;;  %v130_v15 = vld [vmem:[#allocation5 + $0x2d0] sm:$0xff] }
  0x3f   :  { %11600 = vst [vmem:[#allocation51_spill] sm:$0xff] %v7252_v58  ;;  %11601 = vst [vmem:[#allocation52_spill] sm:$0xff] %v7255_v63  ;;  %5855 = vmatpush1.bf16.msra.mxu1 %v7264_v9  ;;  %v7278_v59 = vsub.f32 %v107_v55, %v1612_v21  ;;  %v330_v37 = vand.u32 4294901760, %v104_v26  ;;  %v334_v0 = vand.u32 4294901760, %v112_v28  ;;  %v1614_v1 = vand.u32 4294901760, %v106_v8  ;;  %v120_v55 = vld [vmem:[#allocation5 + $0x280] sm:$0xff] }
  0x40   :  { %11602 = vst [vmem:[#allocation53_spill] sm:$0xff] %v7258_v19  ;;  %11603 = vst [vmem:[#allocation54_spill] sm:$0xff] %v7260_v29  ;;  %5473 = vmatprep.subr.bf16.mxu0 %v7270_v31  ;;  %v1618_v42 = vand.u32 4294901760, %v114_v49  ;;  %v336_v2 = vand.u32 4294901760, %v121_v32  ;;  %v340_v60 = vand.u32 4294901760, %v129_v11  ;;  %v7281_v20 = vpack.c.bf16 %v1616_v36, %v1612_v21  ;;  %v128_v29 = vld [vmem:[#allocation5 + $0x2c0] sm:$0xff] }
  0x41   :  { %11604 = vst [vmem:[#allocation55_spill] sm:$0xff] %v7262_v35  ;;  %11605 = vst [vmem:[#allocation56_spill] sm:$0xff] %v7264_v9  ;;  %v7283_v54 = vsub.f32 %v115_v14, %v1616_v36  ;;  %v7285_v7 = vpack.c.bf16 %v334_v0, %v330_v37  ;;  %v7287_v9 = vsub.f32 %v104_v26, %v330_v37  ;;  %v137_v21 = vld [vmem:[#allocation5 + $0x308] sm:$0xff]  ;;  %v338_v37 = vand.u32 4294901760, %v120_v55 }
  0x42   :  { %11606 = vst [vmem:[#allocation57_spill] sm:$0xff] %v7266_v30  ;;  %11607 = vst [vmem:[#allocation58_spill] sm:$0xff] %v7268_v57  ;;  %v7289_v45 = vsub.f32 %v112_v28, %v334_v0  ;;  %v7293_v24 = vsub.f32 %v106_v8, %v1614_v1  ;;  %v7295_v22 = vsub.f32 %v114_v49, %v1618_v42  ;;  %5857 = vmatprep.subr.bf16.mxu1 %v7281_v20 }
  0x43   :  { %11608 = vst [vmem:[#allocation59_spill] sm:$0xff] %v7270_v31  ;;  %11609 = vst [vmem:[#allocation60_spill] sm:$0xff] %v7272_v3  ;;  %v7291_v31 = vpack.c.bf16 %v1618_v42, %v1614_v1  ;;  %5475 = vmatpush1.bf16.msra.mxu0 %v7285_v7  ;;  %v7299_v14 = vpack.c.bf16 %v340_v60, %v336_v2  ;;  %v7301_v26 = vsub.f32 %v121_v32, %v336_v2 }
  0x44   :  { %11610 = vst [vmem:[#allocation61_spill] sm:$0xff] %v7274_v5  ;;  %11611 = vst [vmem:[#allocation62_spill] sm:$0xff] %v7278_v59  ;;  %v145_v59 = vld [vmem:[#allocation5 + $0x348] sm:$0xff]  ;;  %v7303_v36 = vsub.f32 %v129_v11, %v340_v60  ;;  %v1620_v28 = vand.u32 4294901760, %v123_v47  ;;  %v1624_v8 = vand.u32 4294901760, %v131_v53  ;;  %v342_v49 = vand.u32 4294901760, %v128_v29 }
  0x45   :  { %11612 = vst [vmem:[#allocation63_spill] sm:$0xff] %v7281_v20  ;;  %11613 = vst [vmem:[#allocation64_spill] sm:$0xff] %v7283_v54  ;;  %5859 = vmatpush1.bf16.msra.mxu1 %v7291_v31  ;;  %v1622_v0 = vand.u32 4294901760, %v122_v38  ;;  %5477 = vmatprep.subr.bf16.mxu0 %v7299_v14  ;;  %v1626_v42 = vand.u32 4294901760, %v130_v15  ;;  %v344_v20 = vand.u32 4294901760, %v137_v21  ;;  %v7315_v2 = vsub.f32 %v120_v55, %v338_v37  ;;  %v161_v54 = vld [vmem:[#allocation5 + $0x3c8] sm:$0xff] }
  0x46   :  { %11614 = vst [vmem:[#allocation65_spill] sm:$0xff] %v7285_v7  ;;  %11615 = vst [vmem:[#allocation66_spill] sm:$0xff] %v7287_v9  ;;  %v7307_v1 = vsub.f32 %v123_v47, %v1620_v28  ;;  %v348_v7 = vand.u32 4294901760, %v145_v59  ;;  %v7309_v32 = vpack.c.bf16 %v1624_v8, %v1620_v28  ;;  %v7311_v60 = vsub.f32 %v131_v53, %v1624_v8  ;;  %v146_v9 = vld [vmem:[#allocation5 + $0x350] sm:$0xff]  ;;  %v153_v28 = vld [vmem:[#allocation5 + $0x388] sm:$0xff] }
  0x47   :  { %11616 = vst [vmem:[#allocation67_spill] sm:$0xff] %v7289_v45  ;;  %11617 = vst [vmem:[#allocation68_spill] sm:$0xff] %v7291_v31  ;;  %v7313_v11 = vpack.c.bf16 %v342_v49, %v338_v37  ;;  %v136_v31 = vld [vmem:[#allocation5 + $0x300] sm:$0xff]  ;;  %v7317_v45 = vsub.f32 %v128_v29, %v342_v49  ;;  %v7319_v47 = vpack.c.bf16 %v1626_v42, %v1622_v0 }
  0x48   :  { %11618 = vst [vmem:[#allocation69_spill] sm:$0xff] %v7293_v24  ;;  %11619 = vst [vmem:[#allocation70_spill] sm:$0xff] %v7295_v22  ;;  %v139_v22 = vld [vmem:[#allocation5 + $0x318] sm:$0xff]  ;;  %5861 = vmatprep.subr.bf16.mxu1 %v7309_v32  ;;  %v7327_v53 = vpack.c.bf16 %v348_v7, %v344_v20  ;;  %v7329_v55 = vsub.f32 %v137_v21, %v344_v20  ;;  %v7331_v8 = vsub.f32 %v145_v59, %v348_v7 }
  0x49   :  { %11620 = vst [vmem:[#allocation71_spill] sm:$0xff] %v7299_v14  ;;  %11621 = vst [vmem:[#allocation72_spill] sm:$0xff] %v7301_v26  ;;  %v147_v24 = vld [vmem:[#allocation5 + $0x358] sm:$0xff]  ;;  %v138_v26 = vld [vmem:[#allocation5 + $0x310] sm:$0xff]  ;;  %v7321_v14 = vsub.f32 %v122_v38, %v1622_v0  ;;  %5479 = vmatpush1.bf16.msra.mxu0 %v7313_v11  ;;  %v1628_v29 = vand.u32 4294901760, %v139_v22  ;;  %5863 = vmatpush1.bf16.msra.mxu1 %v7319_v47  ;;  %v346_v37 = vand.u32 4294901760, %v136_v31 }
  0x4a   :  { %11622 = vst [vmem:[#allocation73_spill] sm:$0xff] %v7303_v36  ;;  %11623 = vst [vmem:[#allocation74_spill] sm:$0xff] %v7307_v1  ;;  %v144_v36 = vld [vmem:[#allocation5 + $0x340] sm:$0xff]  ;;  %v7323_v1 = vsub.f32 %v130_v15, %v1626_v42  ;;  %v1632_v38 = vand.u32 4294901760, %v147_v24  ;;  %v1630_v49 = vand.u32 4294901760, %v138_v26  ;;  %5481 = vmatprep.subr.bf16.mxu0 %v7327_v53  ;;  %v1634_v42 = vand.u32 4294901760, %v146_v9 }
  0x4b   :  { %11624 = vst [vmem:[#allocation75_spill] sm:$0xff] %v7309_v32  ;;  %11625 = vst [vmem:[#allocation76_spill] sm:$0xff] %v7311_v60  ;;  %v350_v15 = vand.u32 4294901760, %v144_v36  ;;  %v7335_v0 = vsub.f32 %v139_v22, %v1628_v29  ;;  %v352_v32 = vand.u32 4294901760, %v153_v28  ;;  %v7343_v21 = vsub.f32 %v136_v31, %v346_v37  ;;  %v177_v60 = vld [vmem:[#allocation5 + $0x448] sm:$0xff] }
  0x4c   :  { %11626 = vst [vmem:[#allocation77_spill] sm:$0xff] %v7313_v11  ;;  %11627 = vst [vmem:[#allocation78_spill] sm:$0xff] %v7315_v2  ;;  %v356_v11 = vand.u32 4294901760, %v161_v54  ;;  %v7337_v20 = vpack.c.bf16 %v1632_v38, %v1628_v29  ;;  %v7339_v59 = vsub.f32 %v147_v24, %v1632_v38  ;;  %v7347_v22 = vpack.c.bf16 %v1634_v42, %v1630_v49  ;;  %v162_v2 = vld [vmem:[#allocation5 + $0x3d0] sm:$0xff]  ;;  %v169_v29 = vld [vmem:[#allocation5 + $0x408] sm:$0xff] }
  0x4d   :  { %11628 = vst [vmem:[#allocation79_spill] sm:$0xff] %v7317_v45  ;;  %11629 = vst [vmem:[#allocation80_spill] sm:$0xff] %v7319_v47  ;;  %v7341_v7 = vpack.c.bf16 %v350_v15, %v346_v37  ;;  %v152_v47 = vld [vmem:[#allocation5 + $0x380] sm:$0xff]  ;;  %v7345_v45 = vsub.f32 %v144_v36, %v350_v15  ;;  %v7357_v31 = vsub.f32 %v153_v28, %v352_v32 }
  0x4e   :  { %11630 = vst [vmem:[#allocation81_spill] sm:$0xff] %v7321_v14  ;;  %11631 = vst [vmem:[#allocation82_spill] sm:$0xff] %v7323_v1  ;;  %v155_v1 = vld [vmem:[#allocation5 + $0x398] sm:$0xff]  ;;  %5865 = vmatprep.subr.bf16.mxu1 %v7337_v20  ;;  %v7355_v24 = vpack.c.bf16 %v356_v11, %v352_v32  ;;  %v7359_v38 = vsub.f32 %v161_v54, %v356_v11  ;;  %v354_v37 = vand.u32 4294901760, %v152_v47 }
  0x4f   :  { %11632 = vst [vmem:[#allocation83_spill] sm:$0xff] %v7327_v53  ;;  %11633 = vst [vmem:[#allocation84_spill] sm:$0xff] %v7329_v55  ;;  %v163_v14 = vld [vmem:[#allocation5 + $0x3d8] sm:$0xff]  ;;  %v154_v55 = vld [vmem:[#allocation5 + $0x390] sm:$0xff]  ;;  %v7349_v53 = vsub.f32 %v138_v26, %v1630_v49  ;;  %5483 = vmatpush1.bf16.msra.mxu0 %v7341_v7  ;;  %v1636_v36 = vand.u32 4294901760, %v155_v1  ;;  %5867 = vmatpush1.bf16.msra.mxu1 %v7347_v22 }
  0x50   :  { %11634 = vst [vmem:[#allocation85_spill] sm:$0xff] %v7331_v8  ;;  %11635 = vst [vmem:[#allocation86_spill] sm:$0xff] %v7335_v0  ;;  %v160_v8 = vld [vmem:[#allocation5 + $0x3c0] sm:$0xff]  ;;  %v7351_v0 = vsub.f32 %v146_v9, %v1634_v42  ;;  %v1640_v26 = vand.u32 4294901760, %v163_v14  ;;  %v1638_v15 = vand.u32 4294901760, %v154_v55  ;;  %5485 = vmatprep.subr.bf16.mxu0 %v7355_v24  ;;  %v1642_v42 = vand.u32 4294901760, %v162_v2 }
  0x51   :  { %11636 = vst [vmem:[#allocation87_spill] sm:$0xff] %v7337_v20  ;;  %11637 = vst [vmem:[#allocation88_spill] sm:$0xff] %v7339_v59  ;;  %v358_v9 = vand.u32 4294901760, %v160_v8  ;;  %v7363_v49 = vsub.f32 %v155_v1, %v1636_v36  ;;  %v360_v20 = vand.u32 4294901760, %v169_v29  ;;  %v7371_v28 = vsub.f32 %v152_v47, %v354_v37  ;;  %v193_v59 = vld [vmem:[#allocation5 + $0x4c8] sm:$0xff] }
  0x52   :  { %11638 = vst [vmem:[#allocation89_spill] sm:$0xff] %v7341_v7  ;;  %11639 = vst [vmem:[#allocation90_spill] sm:$0xff] %v7343_v21  ;;  %v364_v7 = vand.u32 4294901760, %v177_v60  ;;  %v7365_v32 = vpack.c.bf16 %v1640_v26, %v1636_v36  ;;  %v7367_v54 = vsub.f32 %v163_v14, %v1640_v26  ;;  %v7375_v1 = vpack.c.bf16 %v1642_v42, %v1638_v15  ;;  %v178_v21 = vld [vmem:[#allocation5 + $0x450] sm:$0xff]  ;;  %v185_v36 = vld [vmem:[#allocation5 + $0x488] sm:$0xff] }
  0x53   :  { %11640 = vst [vmem:[#allocation91_spill] sm:$0xff] %v7345_v45  ;;  %11641 = vst [vmem:[#allocation92_spill] sm:$0xff] %v7347_v22  ;;  %v7369_v11 = vpack.c.bf16 %v358_v9, %v354_v37  ;;  %v168_v22 = vld [vmem:[#allocation5 + $0x400] sm:$0xff]  ;;  %v7373_v45 = vsub.f32 %v160_v8, %v358_v9  ;;  %v7385_v47 = vsub.f32 %v169_v29, %v360_v20 }
  0x54   :  { %11642 = vst [vmem:[#allocation93_spill] sm:$0xff] %v7349_v53  ;;  %11643 = vst [vmem:[#allocation94_spill] sm:$0xff] %v7351_v0  ;;  %v171_v0 = vld [vmem:[#allocation5 + $0x418] sm:$0xff]  ;;  %5869 = vmatprep.subr.bf16.mxu1 %v7365_v32  ;;  %v7383_v14 = vpack.c.bf16 %v364_v7, %v360_v20  ;;  %v7387_v26 = vsub.f32 %v177_v60, %v364_v7  ;;  %v362_v37 = vand.u32 4294901760, %v168_v22 }
  0x55   :  { %11644 = vst [vmem:[#allocation95_spill] sm:$0xff] %v7355_v24  ;;  %11645 = vst [vmem:[#allocation96_spill] sm:$0xff] %v7357_v31  ;;  %v179_v53 = vld [vmem:[#allocation5 + $0x458] sm:$0xff]  ;;  %v170_v31 = vld [vmem:[#allocation5 + $0x410] sm:$0xff]  ;;  %v7377_v24 = vsub.f32 %v154_v55, %v1638_v15  ;;  %5487 = vmatpush1.bf16.msra.mxu0 %v7369_v11  ;;  %v1644_v8 = vand.u32 4294901760, %v171_v0  ;;  %5871 = vmatpush1.bf16.msra.mxu1 %v7375_v1 }
  0x56   :  { %11646 = vst [vmem:[#allocation97_spill] sm:$0xff] %v7359_v38  ;;  %11647 = vst [vmem:[#allocation98_spill] sm:$0xff] %v7363_v49  ;;  %v176_v38 = vld [vmem:[#allocation5 + $0x440] sm:$0xff]  ;;  %v7379_v49 = vsub.f32 %v162_v2, %v1642_v42  ;;  %v1648_v55 = vand.u32 4294901760, %v179_v53  ;;  %v1646_v9 = vand.u32 4294901760, %v170_v31  ;;  %5489 = vmatprep.subr.bf16.mxu0 %v7383_v14  ;;  %v1650_v42 = vand.u32 4294901760, %v178_v21 }
  0x57   :  { %11648 = vst [vmem:[#allocation99_spill] sm:$0xff] %v7365_v32  ;;  %11649 = vst [vmem:[#allocation100_spill] sm:$0xff] %v7367_v54  ;;  %v366_v2 = vand.u32 4294901760, %v176_v38  ;;  %v7391_v15 = vsub.f32 %v171_v0, %v1644_v8  ;;  %v368_v32 = vand.u32 4294901760, %v185_v36  ;;  %v7399_v29 = vsub.f32 %v168_v22, %v362_v37  ;;  %v209_v54 = vld [vmem:[#allocation5 + $0x548] sm:$0xff] }
  0x58   :  { %11650 = vst [vmem:[#allocation101_spill] sm:$0xff] %v7369_v11  ;;  %11651 = vst [vmem:[#allocation102_spill] sm:$0xff] %v7371_v28  ;;  %v372_v11 = vand.u32 4294901760, %v193_v59  ;;  %v7393_v20 = vpack.c.bf16 %v1648_v55, %v1644_v8  ;;  %v7395_v60 = vsub.f32 %v179_v53, %v1648_v55  ;;  %v7403_v0 = vpack.c.bf16 %v1650_v42, %v1646_v9  ;;  %v194_v28 = vld [vmem:[#allocation5 + $0x4d0] sm:$0xff]  ;;  %v201_v8 = vld [vmem:[#allocation5 + $0x508] sm:$0xff] }
  0x59   :  { %11652 = vst [vmem:[#allocation103_spill] sm:$0xff] %v7373_v45  ;;  %11653 = vst [vmem:[#allocation104_spill] sm:$0xff] %v7375_v1  ;;  %v7397_v7 = vpack.c.bf16 %v366_v2, %v362_v37  ;;  %v184_v1 = vld [vmem:[#allocation5 + $0x480] sm:$0xff]  ;;  %v7401_v45 = vsub.f32 %v176_v38, %v366_v2  ;;  %v7413_v22 = vsub.f32 %v185_v36, %v368_v32 }
  0x5a   :  { %11654 = vst [vmem:[#allocation105_spill] sm:$0xff] %v7377_v24  ;;  %11655 = vst [vmem:[#allocation106_spill] sm:$0xff] %v7379_v49  ;;  %v187_v49 = vld [vmem:[#allocation5 + $0x498] sm:$0xff]  ;;  %5873 = vmatprep.subr.bf16.mxu1 %v7393_v20  ;;  %v7411_v53 = vpack.c.bf16 %v372_v11, %v368_v32  ;;  %v7415_v55 = vsub.f32 %v193_v59, %v372_v11  ;;  %v370_v37 = vand.u32 4294901760, %v184_v1 }
  0x5b   :  { %11656 = vst [vmem:[#allocation107_spill] sm:$0xff] %v7383_v14  ;;  %11657 = vst [vmem:[#allocation108_spill] sm:$0xff] %v7385_v47  ;;  %v195_v24 = vld [vmem:[#allocation5 + $0x4d8] sm:$0xff]  ;;  %v186_v47 = vld [vmem:[#allocation5 + $0x490] sm:$0xff]  ;;  %v7405_v14 = vsub.f32 %v170_v31, %v1646_v9  ;;  %5491 = vmatpush1.bf16.msra.mxu0 %v7397_v7  ;;  %v1652_v38 = vand.u32 4294901760, %v187_v49  ;;  %5875 = vmatpush1.bf16.msra.mxu1 %v7403_v0 }
  0x5c   :  { %11658 = vst [vmem:[#allocation109_spill] sm:$0xff] %v7387_v26  ;;  %11659 = vst [vmem:[#allocation110_spill] sm:$0xff] %v7391_v15  ;;  %v192_v26 = vld [vmem:[#allocation5 + $0x4c0] sm:$0xff]  ;;  %v7407_v15 = vsub.f32 %v178_v21, %v1650_v42  ;;  %v1656_v31 = vand.u32 4294901760, %v195_v24  ;;  %v1654_v2 = vand.u32 4294901760, %v186_v47  ;;  %5493 = vmatprep.subr.bf16.mxu0 %v7411_v53  ;;  %v1658_v42 = vand.u32 4294901760, %v194_v28 }
  0x5d   :  { %11660 = vst [vmem:[#allocation111_spill] sm:$0xff] %v7393_v20  ;;  %11661 = vst [vmem:[#allocation112_spill] sm:$0xff] %v7395_v60  ;;  %v374_v21 = vand.u32 4294901760, %v192_v26  ;;  %v7419_v9 = vsub.f32 %v187_v49, %v1652_v38  ;;  %v376_v20 = vand.u32 4294901760, %v201_v8  ;;  %v7427_v36 = vsub.f32 %v184_v1, %v370_v37  ;;  %v225_v60 = vld [vmem:[#allocation5 + $0x5c8] sm:$0xff] }
  0x5e   :  { %11662 = vst [vmem:[#allocation113_spill] sm:$0xff] %v7397_v7  ;;  %11663 = vst [vmem:[#allocation114_spill] sm:$0xff] %v7399_v29  ;;  %v380_v7 = vand.u32 4294901760, %v209_v54  ;;  %v7421_v32 = vpack.c.bf16 %v1656_v31, %v1652_v38  ;;  %v7423_v59 = vsub.f32 %v195_v24, %v1656_v31  ;;  %v7431_v49 = vpack.c.bf16 %v1658_v42, %v1654_v2  ;;  %v210_v29 = vld [vmem:[#allocation5 + $0x550] sm:$0xff]  ;;  %v217_v38 = vld [vmem:[#allocation5 + $0x588] sm:$0xff] }
  0x5f   :  { %11664 = vst [vmem:[#allocation115_spill] sm:$0xff] %v7401_v45  ;;  %11665 = vst [vmem:[#allocation116_spill] sm:$0xff] %v7403_v0  ;;  %v7425_v11 = vpack.c.bf16 %v374_v21, %v370_v37  ;;  %v200_v0 = vld [vmem:[#allocation5 + $0x500] sm:$0xff]  ;;  %v7429_v45 = vsub.f32 %v192_v26, %v374_v21  ;;  %v7441_v1 = vsub.f32 %v201_v8, %v376_v20 }
  0x60   :  { %11666 = vst [vmem:[#allocation117_spill] sm:$0xff] %v7405_v14  ;;  %11667 = vst [vmem:[#allocation118_spill] sm:$0xff] %v7407_v15  ;;  %v203_v15 = vld [vmem:[#allocation5 + $0x518] sm:$0xff]  ;;  %5877 = vmatprep.subr.bf16.mxu1 %v7421_v32  ;;  %v7439_v24 = vpack.c.bf16 %v380_v7, %v376_v20  ;;  %v7443_v31 = vsub.f32 %v209_v54, %v380_v7  ;;  %v378_v37 = vand.u32 4294901760, %v200_v0 }
  0x61   :  { %11668 = vst [vmem:[#allocation119_spill] sm:$0xff] %v7411_v53  ;;  %11669 = vst [vmem:[#allocation120_spill] sm:$0xff] %v7413_v22  ;;  %v211_v14 = vld [vmem:[#allocation5 + $0x558] sm:$0xff]  ;;  %v202_v22 = vld [vmem:[#allocation5 + $0x510] sm:$0xff]  ;;  %v7433_v53 = vsub.f32 %v186_v47, %v1654_v2  ;;  %5495 = vmatpush1.bf16.msra.mxu0 %v7425_v11  ;;  %v1660_v26 = vand.u32 4294901760, %v203_v15  ;;  %5879 = vmatpush1.bf16.msra.mxu1 %v7431_v49 }
  0x62   :  { %11670 = vst [vmem:[#allocation121_spill] sm:$0xff] %v7415_v55  ;;  %11671 = vst [vmem:[#allocation122_spill] sm:$0xff] %v7419_v9  ;;  %v208_v55 = vld [vmem:[#allocation5 + $0x540] sm:$0xff]  ;;  %v7435_v9 = vsub.f32 %v194_v28, %v1658_v42  ;;  %v1664_v47 = vand.u32 4294901760, %v211_v14  ;;  %v1662_v21 = vand.u32 4294901760, %v202_v22  ;;  %5497 = vmatprep.subr.bf16.mxu0 %v7439_v24  ;;  %v1666_v42 = vand.u32 4294901760, %v210_v29 }
  0x63   :  { %11672 = vst [vmem:[#allocation123_spill] sm:$0xff] %v7421_v32  ;;  %11673 = vst [vmem:[#allocation124_spill] sm:$0xff] %v7423_v59  ;;  %v382_v28 = vand.u32 4294901760, %v208_v55  ;;  %v7447_v2 = vsub.f32 %v203_v15, %v1660_v26  ;;  %v384_v32 = vand.u32 4294901760, %v217_v38  ;;  %v7455_v8 = vsub.f32 %v200_v0, %v378_v37  ;;  %v241_v59 = vld [vmem:[#allocation5 + $0x648] sm:$0xff] }
  0x64   :  { %11674 = vst [vmem:[#allocation125_spill] sm:$0xff] %v7425_v11  ;;  %11675 = vst [vmem:[#allocation126_spill] sm:$0xff] %v7427_v36  ;;  %v388_v11 = vand.u32 4294901760, %v225_v60  ;;  %v7449_v20 = vpack.c.bf16 %v1664_v47, %v1660_v26  ;;  %v7451_v54 = vsub.f32 %v211_v14, %v1664_v47  ;;  %v7459_v15 = vpack.c.bf16 %v1666_v42, %v1662_v21  ;;  %v226_v36 = vld [vmem:[#allocation5 + $0x5d0] sm:$0xff]  ;;  %v233_v26 = vld [vmem:[#allocation5 + $0x608] sm:$0xff] }
  0x65   :  { %11676 = vst [vmem:[#allocation127_spill] sm:$0xff] %v7429_v45  ;;  %11677 = vst [vmem:[#allocation128_spill] sm:$0xff] %v7431_v49  ;;  %v7453_v7 = vpack.c.bf16 %v382_v28, %v378_v37  ;;  %v216_v49 = vld [vmem:[#allocation5 + $0x580] sm:$0xff]  ;;  %v7457_v45 = vsub.f32 %v208_v55, %v382_v28  ;;  %v7469_v0 = vsub.f32 %v217_v38, %v384_v32 }
  0x66   :  { %11678 = vst [vmem:[#allocation129_spill] sm:$0xff] %v7433_v53  ;;  %11679 = vst [vmem:[#allocation130_spill] sm:$0xff] %v7435_v9  ;;  %v219_v9 = vld [vmem:[#allocation5 + $0x598] sm:$0xff]  ;;  %5881 = vmatprep.subr.bf16.mxu1 %v7449_v20  ;;  %v7467_v14 = vpack.c.bf16 %v388_v11, %v384_v32  ;;  %v7471_v47 = vsub.f32 %v225_v60, %v388_v11  ;;  %v386_v37 = vand.u32 4294901760, %v216_v49 }
  0x67   :  { %11680 = vst [vmem:[#allocation131_spill] sm:$0xff] %v7439_v24  ;;  %11681 = vst [vmem:[#allocation132_spill] sm:$0xff] %v7441_v1  ;;  %v227_v53 = vld [vmem:[#allocation5 + $0x5d8] sm:$0xff]  ;;  %v218_v1 = vld [vmem:[#allocation5 + $0x590] sm:$0xff]  ;;  %v7461_v24 = vsub.f32 %v202_v22, %v1662_v21  ;;  %5499 = vmatpush1.bf16.msra.mxu0 %v7453_v7  ;;  %v1668_v55 = vand.u32 4294901760, %v219_v9  ;;  %5883 = vmatpush1.bf16.msra.mxu1 %v7459_v15 }
  0x68   :  { %11682 = vst [vmem:[#allocation133_spill] sm:$0xff] %v7443_v31  ;;  %11683 = vst [vmem:[#allocation134_spill] sm:$0xff] %v7447_v2  ;;  %v224_v31 = vld [vmem:[#allocation5 + $0x5c0] sm:$0xff]  ;;  %v7463_v2 = vsub.f32 %v210_v29, %v1666_v42  ;;  %v1672_v22 = vand.u32 4294901760, %v227_v53  ;;  %v1670_v28 = vand.u32 4294901760, %v218_v1  ;;  %5501 = vmatprep.subr.bf16.mxu0 %v7467_v14  ;;  %v1674_v42 = vand.u32 4294901760, %v226_v36 }
  0x69   :  { %11684 = vst [vmem:[#allocation135_spill] sm:$0xff] %v7449_v20  ;;  %11685 = vst [vmem:[#allocation136_spill] sm:$0xff] %v7451_v54  ;;  %v390_v29 = vand.u32 4294901760, %v224_v31  ;;  %v7475_v21 = vsub.f32 %v219_v9, %v1668_v55  ;;  %v392_v20 = vand.u32 4294901760, %v233_v26  ;;  %v7483_v38 = vsub.f32 %v216_v49, %v386_v37  ;;  %v257_v54 = vld [vmem:[#allocation5 + $0x6c8] sm:$0xff] }
  0x6a   :  { %11686 = vst [vmem:[#allocation137_spill] sm:$0xff] %v7453_v7  ;;  %11687 = vst [vmem:[#allocation138_spill] sm:$0xff] %v7455_v8  ;;  %v396_v7 = vand.u32 4294901760, %v241_v59  ;;  %v7477_v32 = vpack.c.bf16 %v1672_v22, %v1668_v55  ;;  %v7479_v60 = vsub.f32 %v227_v53, %v1672_v22  ;;  %v7487_v9 = vpack.c.bf16 %v1674_v42, %v1670_v28  ;;  %v242_v8 = vld [vmem:[#allocation5 + $0x650] sm:$0xff]  ;;  %v249_v55 = vld [vmem:[#allocation5 + $0x688] sm:$0xff] }
  0x6b   :  { %11688 = vst [vmem:[#allocation139_spill] sm:$0xff] %v7457_v45  ;;  %11689 = vst [vmem:[#allocation140_spill] sm:$0xff] %v7459_v15  ;;  %v7481_v11 = vpack.c.bf16 %v390_v29, %v386_v37  ;;  %v232_v15 = vld [vmem:[#allocation5 + $0x600] sm:$0xff]  ;;  %v7485_v45 = vsub.f32 %v224_v31, %v390_v29  ;;  %v7497_v49 = vsub.f32 %v233_v26, %v392_v20 }
  0x6c   :  { %11690 = vst [vmem:[#allocation141_spill] sm:$0xff] %v7461_v24  ;;  %11691 = vst [vmem:[#allocation142_spill] sm:$0xff] %v7463_v2  ;;  %v235_v2 = vld [vmem:[#allocation5 + $0x618] sm:$0xff]  ;;  %5885 = vmatprep.subr.bf16.mxu1 %v7477_v32  ;;  %v7495_v53 = vpack.c.bf16 %v396_v7, %v392_v20  ;;  %v7499_v22 = vsub.f32 %v241_v59, %v396_v7  ;;  %v394_v37 = vand.u32 4294901760, %v232_v15 }
  0x6d   :  { %11692 = vst [vmem:[#allocation143_spill] sm:$0xff] %v7467_v14  ;;  %11693 = vst [vmem:[#allocation144_spill] sm:$0xff] %v7469_v0  ;;  %v243_v24 = vld [vmem:[#allocation5 + $0x658] sm:$0xff]  ;;  %v234_v0 = vld [vmem:[#allocation5 + $0x610] sm:$0xff]  ;;  %v7489_v14 = vsub.f32 %v218_v1, %v1670_v28  ;;  %5503 = vmatpush1.bf16.msra.mxu0 %v7481_v11  ;;  %v1676_v31 = vand.u32 4294901760, %v235_v2  ;;  %5887 = vmatpush1.bf16.msra.mxu1 %v7487_v9 }
  0x6e   :  { %11694 = vst [vmem:[#allocation145_spill] sm:$0xff] %v7471_v47  ;;  %11695 = vst [vmem:[#allocation146_spill] sm:$0xff] %v7475_v21  ;;  %v240_v47 = vld [vmem:[#allocation5 + $0x640] sm:$0xff]  ;;  %v7491_v21 = vsub.f32 %v226_v36, %v1674_v42  ;;  %v1680_v1 = vand.u32 4294901760, %v243_v24  ;;  %v1678_v29 = vand.u32 4294901760, %v234_v0  ;;  %5505 = vmatprep.subr.bf16.mxu0 %v7495_v53  ;;  %v1682_v42 = vand.u32 4294901760, %v242_v8 }
  0x6f   :  { %11696 = vst [vmem:[#allocation147_spill] sm:$0xff] %v7477_v32  ;;  %11697 = vst [vmem:[#allocation148_spill] sm:$0xff] %v7479_v60  ;;  %v398_v36 = vand.u32 4294901760, %v240_v47  ;;  %v7503_v28 = vsub.f32 %v235_v2, %v1676_v31  ;;  %v400_v32 = vand.u32 4294901760, %v249_v55  ;;  %v7511_v26 = vsub.f32 %v232_v15, %v394_v37  ;;  %v273_v60 = vld [vmem:[#allocation5 + $0x748] sm:$0xff] }
  0x70   :  { %11698 = vst [vmem:[#allocation149_spill] sm:$0xff] %v7481_v11  ;;  %11699 = vst [vmem:[#allocation150_spill] sm:$0xff] %v7483_v38  ;;  %v404_v11 = vand.u32 4294901760, %v257_v54  ;;  %v7505_v20 = vpack.c.bf16 %v1680_v1, %v1676_v31  ;;  %v7507_v59 = vsub.f32 %v243_v24, %v1680_v1  ;;  %v7515_v2 = vpack.c.bf16 %v1682_v42, %v1678_v29  ;;  %v258_v38 = vld [vmem:[#allocation5 + $0x6d0] sm:$0xff]  ;;  %v265_v31 = vld [vmem:[#allocation5 + $0x708] sm:$0xff] }
  0x71   :  { %11700 = vst [vmem:[#allocation151_spill] sm:$0xff] %v7485_v45  ;;  %11701 = vst [vmem:[#allocation152_spill] sm:$0xff] %v7487_v9  ;;  %v7509_v7 = vpack.c.bf16 %v398_v36, %v394_v37  ;;  %v248_v9 = vld [vmem:[#allocation5 + $0x680] sm:$0xff]  ;;  %v7513_v45 = vsub.f32 %v240_v47, %v398_v36  ;;  %v7525_v15 = vsub.f32 %v249_v55, %v400_v32 }
  0x72   :  { %11702 = vst [vmem:[#allocation153_spill] sm:$0xff] %v7489_v14  ;;  %11703 = vst [vmem:[#allocation154_spill] sm:$0xff] %v7491_v21  ;;  %v251_v21 = vld [vmem:[#allocation5 + $0x698] sm:$0xff]  ;;  %5889 = vmatprep.subr.bf16.mxu1 %v7505_v20  ;;  %v7523_v24 = vpack.c.bf16 %v404_v11, %v400_v32  ;;  %v7527_v1 = vsub.f32 %v257_v54, %v404_v11  ;;  %v402_v37 = vand.u32 4294901760, %v248_v9 }
  0x73   :  { %11704 = vst [vmem:[#allocation155_spill] sm:$0xff] %v7495_v53  ;;  %11705 = vst [vmem:[#allocation156_spill] sm:$0xff] %v7497_v49  ;;  %v259_v14 = vld [vmem:[#allocation5 + $0x6d8] sm:$0xff]  ;;  %v250_v49 = vld [vmem:[#allocation5 + $0x690] sm:$0xff]  ;;  %v7517_v53 = vsub.f32 %v234_v0, %v1678_v29  ;;  %5507 = vmatpush1.bf16.msra.mxu0 %v7509_v7  ;;  %v1684_v47 = vand.u32 4294901760, %v251_v21  ;;  %5891 = vmatpush1.bf16.msra.mxu1 %v7515_v2 }
  0x74   :  { %11706 = vst [vmem:[#allocation157_spill] sm:$0xff] %v7499_v22  ;;  %11707 = vst [vmem:[#allocation158_spill] sm:$0xff] %v7503_v28  ;;  %v256_v22 = vld [vmem:[#allocation5 + $0x6c0] sm:$0xff]  ;;  %v7519_v28 = vsub.f32 %v242_v8, %v1682_v42  ;;  %v1688_v0 = vand.u32 4294901760, %v259_v14  ;;  %v1686_v36 = vand.u32 4294901760, %v250_v49  ;;  %5509 = vmatprep.subr.bf16.mxu0 %v7523_v24  ;;  %v1690_v42 = vand.u32 4294901760, %v258_v38 }
  0x75   :  { %11708 = vst [vmem:[#allocation159_spill] sm:$0xff] %v7505_v20  ;;  %11709 = vst [vmem:[#allocation160_spill] sm:$0xff] %v7507_v59  ;;  %v406_v8 = vand.u32 4294901760, %v256_v22  ;;  %v7531_v29 = vsub.f32 %v251_v21, %v1684_v47  ;;  %v408_v20 = vand.u32 4294901760, %v265_v31  ;;  %v7539_v55 = vsub.f32 %v248_v9, %v402_v37  ;;  %v289_v59 = vld [vmem:[#allocation5 + $0x7c8] sm:$0xff] }
  0x76   :  { %11710 = vst [vmem:[#allocation161_spill] sm:$0xff] %v7509_v7  ;;  %11711 = vst [vmem:[#allocation162_spill] sm:$0xff] %v7511_v26  ;;  %v412_v7 = vand.u32 4294901760, %v273_v60  ;;  %v7533_v32 = vpack.c.bf16 %v1688_v0, %v1684_v47  ;;  %v7535_v54 = vsub.f32 %v259_v14, %v1688_v0  ;;  %v7543_v21 = vpack.c.bf16 %v1690_v42, %v1686_v36  ;;  %v274_v26 = vld [vmem:[#allocation5 + $0x750] sm:$0xff]  ;;  %v281_v47 = vld [vmem:[#allocation5 + $0x788] sm:$0xff] }
  0x77   :  { %11712 = vst [vmem:[#allocation163_spill] sm:$0xff] %v7513_v45  ;;  %11713 = vst [vmem:[#allocation164_spill] sm:$0xff] %v7515_v2  ;;  %v7537_v11 = vpack.c.bf16 %v406_v8, %v402_v37  ;;  %v264_v2 = vld [vmem:[#allocation5 + $0x700] sm:$0xff]  ;;  %v7541_v45 = vsub.f32 %v256_v22, %v406_v8  ;;  %v7553_v9 = vsub.f32 %v265_v31, %v408_v20 }
  0x78   :  { %11714 = vst [vmem:[#allocation165_spill] sm:$0xff] %v7517_v53  ;;  %11715 = vst [vmem:[#allocation166_spill] sm:$0xff] %v7519_v28  ;;  %v267_v28 = vld [vmem:[#allocation5 + $0x718] sm:$0xff]  ;;  %5893 = vmatprep.subr.bf16.mxu1 %v7533_v32  ;;  %v7551_v14 = vpack.c.bf16 %v412_v7, %v408_v20  ;;  %v7555_v0 = vsub.f32 %v273_v60, %v412_v7  ;;  %v410_v37 = vand.u32 4294901760, %v264_v2 }
  0x79   :  { %11716 = vst [vmem:[#allocation167_spill] sm:$0xff] %v7523_v24  ;;  %11717 = vst [vmem:[#allocation168_spill] sm:$0xff] %v7525_v15  ;;  %v275_v53 = vld [vmem:[#allocation5 + $0x758] sm:$0xff]  ;;  %v266_v15 = vld [vmem:[#allocation5 + $0x710] sm:$0xff]  ;;  %v7545_v24 = vsub.f32 %v250_v49, %v1686_v36  ;;  %5511 = vmatpush1.bf16.msra.mxu0 %v7537_v11  ;;  %v1692_v22 = vand.u32 4294901760, %v267_v28  ;;  %5895 = vmatpush1.bf16.msra.mxu1 %v7543_v21 }
  0x7a   :  { %11718 = vst [vmem:[#allocation169_spill] sm:$0xff] %v7527_v1  ;;  %11719 = vst [vmem:[#allocation170_spill] sm:$0xff] %v7531_v29  ;;  %v272_v1 = vld [vmem:[#allocation5 + $0x740] sm:$0xff]  ;;  %v7547_v29 = vsub.f32 %v258_v38, %v1690_v42  ;;  %v1696_v49 = vand.u32 4294901760, %v275_v53  ;;  %v1694_v8 = vand.u32 4294901760, %v266_v15  ;;  %5513 = vmatprep.subr.bf16.mxu0 %v7551_v14  ;;  %v1698_v42 = vand.u32 4294901760, %v274_v26 }
  0x7b   :  { %11720 = vst [vmem:[#allocation171_spill] sm:$0xff] %v7533_v32  ;;  %11721 = vst [vmem:[#allocation172_spill] sm:$0xff] %v7535_v54  ;;  %v414_v38 = vand.u32 4294901760, %v272_v1  ;;  %v7559_v36 = vsub.f32 %v267_v28, %v1692_v22  ;;  %v416_v32 = vand.u32 4294901760, %v281_v47  ;;  %v7567_v31 = vsub.f32 %v264_v2, %v410_v37 }
  0x7c   :  { %11722 = vst [vmem:[#allocation173_spill] sm:$0xff] %v7537_v11  ;;  %11723 = vst [vmem:[#allocation174_spill] sm:$0xff] %v7539_v55  ;;  %v420_v11 = vand.u32 4294901760, %v289_v59  ;;  %v7561_v20 = vpack.c.bf16 %v1696_v49, %v1692_v22  ;;  %v7563_v60 = vsub.f32 %v275_v53, %v1696_v49  ;;  %v7571_v28 = vpack.c.bf16 %v1698_v42, %v1694_v8  ;;  %v290_v55 = vld [vmem:[#allocation5 + $0x7d0] sm:$0xff]  ;;  %v39_v22 = vld [vmem:[#allocation2 + $0x8] sm:$0xff] }
  0x7d   :  { %11724 = vst [vmem:[#allocation175_spill] sm:$0xff] %v7541_v45  ;;  %11725 = vst [vmem:[#allocation176_spill] sm:$0xff] %v7543_v21  ;;  %v7565_v7 = vpack.c.bf16 %v414_v38, %v410_v37  ;;  %v280_v21 = vld [vmem:[#allocation5 + $0x780] sm:$0xff]  ;;  %v7569_v45 = vsub.f32 %v272_v1, %v414_v38  ;;  %v7581_v2 = vsub.f32 %v281_v47, %v416_v32 }
  0x7e   :  { %11726 = vst [vmem:[#allocation177_spill] sm:$0xff] %v7545_v24  ;;  %11727 = vst [vmem:[#allocation178_spill] sm:$0xff] %v7547_v29  ;;  %v283_v29 = vld [vmem:[#allocation5 + $0x798] sm:$0xff]  ;;  %5897 = vmatprep.subr.bf16.mxu1 %v7561_v20  ;;  %v7579_v53 = vpack.c.bf16 %v420_v11, %v416_v32  ;;  %v7583_v49 = vsub.f32 %v289_v59, %v420_v11 }
  0x7f   :  { %11728 = vst [vmem:[#allocation179_spill] sm:$0xff] %v7551_v14  ;;  %11729 = vst [vmem:[#allocation180_spill] sm:$0xff] %v7553_v9  ;;  %v291_v24 = vld [vmem:[#allocation5 + $0x7d8] sm:$0xff]  ;;  %v282_v9 = vld [vmem:[#allocation5 + $0x790] sm:$0xff]  ;;  %v7573_v14 = vsub.f32 %v266_v15, %v1694_v8  ;;  %5515 = vmatpush1.bf16.msra.mxu0 %v7565_v7  ;;  %v1700_v1 = vand.u32 4294901760, %v283_v29  ;;  %5899 = vmatpush1.bf16.msra.mxu1 %v7571_v28  ;;  %v418_v15 = vand.u32 4294901760, %v280_v21 }
  0x80   :  { %11730 = vst [vmem:[#allocation181_spill] sm:$0xff] %v7555_v0  ;;  %11731 = vst [vmem:[#allocation182_spill] sm:$0xff] %v7559_v36  ;;  %v288_v0 = vld [vmem:[#allocation5 + $0x7c0] sm:$0xff]  ;;  %v7575_v36 = vsub.f32 %v274_v26, %v1698_v42  ;;  %v1704_v37 = vand.u32 4294901760, %v291_v24  ;;  %v1702_v26 = vand.u32 4294901760, %v282_v9  ;;  %5517 = vmatprep.subr.bf16.mxu0 %v7579_v53  ;;  %v1706_v42 = vand.u32 4294901760, %v290_v55 }
  0x81   :  { %11732 = vst [vmem:[#allocation183_spill] sm:$0xff] %v7561_v20  ;;  %11733 = vst [vmem:[#allocation184_spill] sm:$0xff] %v7563_v60  ;;  %v422_v38 = vand.u32 4294901760, %v288_v0  ;;  %v7587_v8 = vsub.f32 %v283_v29, %v1700_v1  ;;  %v7589_v20 = vand.u32 4294901760, %v39_v22  ;;  %v7598_v47 = vsub.f32 %v280_v21, %v418_v15 }
  0x82   :  { %11734 = vst [vmem:[#allocation185_spill] sm:$0xff] %v7565_v7  ;;  %11735 = vst [vmem:[#allocation186_spill] sm:$0xff] %v7567_v31  ;;  %v10886_v7 = vand.u32 4294901760, %v7162_v16  ;;  %v7592_v32 = vpack.c.bf16 %v1704_v37, %v1700_v1  ;;  %v7594_v59 = vsub.f32 %v291_v24, %v1704_v37  ;;  %v7604_v29 = vsub.f32 %v282_v9, %v1702_v26 }
  0x83   :  { %11736 = vst [vmem:[#allocation187_spill] sm:$0xff] %v7569_v45  ;;  %11737 = vst [vmem:[#allocation188_spill] sm:$0xff] %v7571_v28  ;;  %v7596_v11 = vpack.c.bf16 %v422_v38, %v418_v15  ;;  %v38_v28 = vld [vmem:[#allocation2] sm:$0xff]  ;;  %v7611_v24 = vsub.f32 %v39_v22, %v7589_v20  ;;  %v10894_v1 = vand.u32 4294901760, %v7166_v18  ;;  %v11757_v15 = vand.u32 4294901760, %v7174_v25 }
  0x84   :  { %11738 = vst [vmem:[#allocation189_spill] sm:$0xff] %v7573_v14  ;;  %11739 = vst [vmem:[#allocation190_spill] sm:$0xff] %v7575_v36  ;;  %5901 = vmatprep.subr.bf16.mxu1 %v7592_v32  ;;  %v444_v21 = vsub.f32 %v7162_v16, %v10886_v7  ;;  %v7620_v9 = vand.u32 4294901760, %v38_v28 }
  0x85   :  { %11740 = vst [vmem:[#allocation191_spill] sm:$0xff] %v7579_v53  ;;  %11741 = vst [vmem:[#allocation192_spill] sm:$0xff] %v7581_v2  ;;  %v7602_v2 = vpack.c.bf16 %v1706_v42, %v1702_v26  ;;  %v7606_v53 = vsub.f32 %v290_v55, %v1706_v42  ;;  %5519 = vmatpush1.bf16.msra.mxu0 %v7596_v11  ;;  %v10899_v55 = vand.u32 4294901760, %v7170_v23  ;;  %v7625_v22 = vand.u32 4294901760, %v7611_v24 }
  0x86   :  { %11742 = vst [vmem:[#allocation193_spill] sm:$0xff] %v7583_v49  ;;  %11743 = vst [vmem:[#allocation194_spill] sm:$0xff] %v7587_v8  ;;  %v7600_v49 = vsub.f32 %v288_v0, %v422_v38  ;;  %v10891_v0 = vand.u32 4294901760, %v7164_v17  ;;  %v445_v38 = vand.u32 4294901760, %v444_v21  ;;  %v1728_v42 = vsub.f32 %v7166_v18, %v10894_v1 }
  0x87   :  { %11744 = vst [vmem:[#allocation195_spill] sm:$0xff] %v7589_v20  ;;  %11745 = vst [vmem:[#allocation196_spill] sm:$0xff] %v7592_v32  ;;  %5903 = vmatpush1.bf16.msra.mxu1 %v7602_v2  ;;  %v1740_v7 = vsub.f32 %v7170_v23, %v10899_v55  ;;  %v7637_v37 = vsub.f32 %v38_v28, %v7620_v9  ;;  %v11758_v21 = vand.u32 4294901760, %v7177_v27  ;;  %v10909_v18 = vand.u32 4294901760, %v7183_v39 }
  0x88   :  { %11746 = vst [vmem:[#allocation197_spill] sm:$0xff] %v7594_v59  ;;  %11747 = vst [vmem:[#allocation198_spill] sm:$0xff] %v7596_v11  ;;  %v456_v26 = vsub.f32 %v7164_v17, %v10891_v0  ;;  %v427_v0 = vsub.f32 %v7611_v24, %v7625_v22  ;;  %v1729_v1 = vand.u32 4294901760, %v1728_v42 }
  0x89   :  { %11748 = vst [vmem:[#allocation199_spill] sm:$0xff] %v7598_v47  ;;  %11749 = vst [vmem:[#allocation200_spill] sm:$0xff] %v7600_v49  ;;  %v462_v11 = vsub.f32 %v7177_v27, %v11758_v21  ;;  %v1741_v17 = vand.u32 4294901760, %v1740_v7  ;;  %v7649_v55 = vand.u32 4294901760, %v7637_v37  ;;  %v1734_v21 = vsub.f32 %v7183_v39, %v10909_v18 }
  0x8a   :  { %11750 = vst [vmem:[#allocation201_spill] sm:$0xff] %v7602_v2  ;;  %11751 = vst [vmem:[#allocation202_spill] sm:$0xff] %v7604_v29  ;;  %v450_v2 = vsub.f32 %v7174_v25, %v11757_v15  ;;  %v457_v32 = vand.u32 4294901760, %v456_v26  ;;  %v7651_v23 = vand.u32 4294901760, %v427_v0  ;;  %v10908_v27 = vand.u32 4294901760, %v7185_v40 }
  0x8b   :  { %11752 = vst [vmem:[#allocation203_spill] sm:$0xff] %v7606_v53  ;;  %11753 = vst [vmem:[#allocation204_spill] sm:$0xff] %v7611_v24  ;;  %v433_v26 = vsub.f32 %v7637_v37, %v7649_v55  ;;  %v10912_v7 = vand.u32 4294901760, %v7187_v41  ;;  %v10911_v0 = vand.u32 4294901760, %v7195_v48  ;;  %v10920_v18 = vand.u32 4294901760, %v7208_v62 }
  0x8c   :  { %11754 = vst [vmem:[#allocation205_spill] sm:$0xff] %v7620_v9  ;;  %11755 = vst [vmem:[#allocation206_spill] sm:$0xff] %v7625_v22  ;;  %v451_v28 = vand.u32 4294901760, %v450_v2  ;;  %v463_v9 = vand.u32 4294901760, %v462_v11  ;;  %v5520_v15 = vpack.c.bf16 %v457_v32, %v445_v38  ;;  %v5904_v22 = vpack.c.bf16 %v1741_v17, %v1729_v1  ;;  %429 = vmatprep.mubr.f32.mxu0 %v7651_v23 }
  0x8d   :  { %11756 = vst [vmem:[#allocation207_spill] sm:$0xff] %v7637_v37  ;;  %11759 = vst [vmem:[#allocation208_spill] sm:$0xff] %v7649_v55  ;;  %v1735_v2 = vand.u32 4294901760, %v1734_v21  ;;  %v1746_v32 = vsub.f32 %v7185_v40, %v10908_v27  ;;  %v10910_v11 = vand.u32 4294901760, %v7191_v46  ;;  %1713 = vmatprep.mubr.f32.mxu1 %v7651_v23  ;;  %v7667_v17 = vand.u32 4294901760, %v433_v26 }
  0x8e   :  { %11760 = vst [vmem:[#allocation209_spill] sm:$0xff] %v7651_v23  ;;  %v5522_v42 = vpack.c.bf16 %v463_v9, %v451_v28  ;;  %5521 = vmatprep.subr.bf16.mxu0 %v5520_v15  ;;  %5905 = vmatprep.subr.bf16.mxu1 %v5904_v22  ;;  %v468_v1 = vsub.f32 %v7187_v41, %v10912_v7  ;;  %v10917_v9 = vand.u32 4294901760, %v7198_v50  ;;  %v10918_v38 = vand.u32 4294901760, %v7200_v52 }
  0x8f   :  { %11761 = vst [vmem:[#allocation210_spill] sm:$0xff] %v7667_v17  ;;  %v1747_v28 = vand.u32 4294901760, %v1746_v32  ;;  %v480_v15 = vsub.f32 %v7191_v46, %v10910_v11  ;;  %v1752_v21 = vsub.f32 %v7195_v48, %v10911_v0  ;;  %v10919_v22 = vand.u32 4294901760, %v7206_v61  ;;  %435 = vmatmul.mubr.f32.vlgmr.msra.gmra.mrb[0].mxu0 %v7667_v17  ;;  %1719 = vmatmul.mubr.f32.vlgmr.msra.gmra.mrb[0].mxu1 %v7667_v17 }
  0x90   :  { %v469_v26 = vand.u32 4294901760, %v468_v1  ;;  %v1764_v27 = vsub.f32 %v7198_v50, %v10917_v9  ;;  %v474_v32 = vsub.f32 %v7200_v52, %v10918_v38  ;;  %5523 = vmatpush1.bf16.msra.mxu0 %v5522_v42  ;;  %826 = vmatprep.mubr.f32.mxu0 %v7589_v20  ;;  %v1758_v9 = vsub.f32 %v7208_v62, %v10920_v18 }
  0x91   :  { %v5906_v11 = vpack.c.bf16 %v1747_v28, %v1735_v2  ;;  %v481_v0 = vand.u32 4294901760, %v480_v15  ;;  %v1753_v7 = vand.u32 4294901760, %v1752_v21  ;;  %v486_v23 = vsub.f32 %v7206_v61, %v10919_v22  ;;  %2110 = vmatprep.mubr.f32.mxu1 %v7589_v20 }
  0x92   :  { %v1765_v1 = vand.u32 4294901760, %v1764_v27  ;;  %v475_v17 = vand.u32 4294901760, %v474_v32  ;;  %v10921_v38 = vand.u32 4294901760, %v7212_v4  ;;  %v10924_v28 = vand.u32 4294901760, %v7216_v6 }
  0x93   :  { %5907 = vmatpush1.bf16.msra.mxu1 %v5906_v11  ;;  %v5524_v42 = vpack.c.bf16 %v481_v0, %v469_v26  ;;  %v487_v2 = vand.u32 4294901760, %v486_v23  ;;  %v10922_v15 = vand.u32 4294901760, %v7219_v10  ;;  %v1759_v22 = vand.u32 4294901760, %v1758_v9 }
  0x94   :  { %v5908_v21 = vpack.c.bf16 %v1765_v1, %v1753_v7  ;;  %v1770_v27 = vsub.f32 %v7212_v4, %v10921_v38  ;;  %v10923_v32 = vand.u32 4294901760, %v7223_v12  ;;  %v492_v11 = vsub.f32 %v7216_v6, %v10924_v28 }
  0x95   :  { %5525 = vmatprep.subr.bf16.mxu0 %v5524_v42  ;;  %v5526_v18 = vpack.c.bf16 %v487_v2, %v475_v17  ;;  %v504_v23 = vsub.f32 %v7219_v10, %v10922_v15  ;;  %v10925_v0 = vand.u32 4294901760, %v7225_v13  ;;  %v10926_v26 = vand.u32 4294901760, %v7232_v33 }
  0x96   :  { %5909 = vmatprep.subr.bf16.mxu1 %v5908_v21  ;;  %v1771_v7 = vand.u32 4294901760, %v1770_v27  ;;  %v1776_v9 = vsub.f32 %v7223_v12, %v10923_v32  ;;  %v10936_v17 = vand.u32 4294901760, %v7234_v34  ;;  %v493_v1 = vand.u32 4294901760, %v492_v11 }
  0x97   :  { %5527 = vmatpush1.bf16.msra.mxu0 %v5526_v18  ;;  %v505_v42 = vand.u32 4294901760, %v504_v23  ;;  %v1788_v2 = vsub.f32 %v7225_v13, %v10925_v0  ;;  %v10930_v38 = vand.u32 4294901760, %v7238_v43  ;;  %v498_v27 = vsub.f32 %v7232_v33, %v10926_v26 }
  0x98   :  { %v5910_v15 = vpack.c.bf16 %v1771_v7, %v1759_v22  ;;  %v1777_v21 = vand.u32 4294901760, %v1776_v9  ;;  %v510_v32 = vsub.f32 %v7234_v34, %v10936_v17  ;;  %v10929_v23 = vand.u32 4294901760, %v7240_v44 }
  0x99   :  { %v5528_v28 = vpack.c.bf16 %v505_v42, %v493_v1  ;;  %v1789_v18 = vand.u32 4294901760, %v1788_v2  ;;  %v1782_v11 = vsub.f32 %v7238_v43, %v10930_v38  ;;  %v499_v0 = vand.u32 4294901760, %v498_v27 }
  0x9a   :  { %5911 = vmatpush1.bf16.msra.mxu1 %v5910_v15  ;;  %v511_v22 = vand.u32 4294901760, %v510_v32  ;;  %v10933_v7 = vand.u32 4294901760, %v7244_v51  ;;  %v10931_v9 = vand.u32 4294901760, %v7248_v56  ;;  %v1794_v1 = vsub.f32 %v7240_v44, %v10929_v23 }
  0x9b   :  { %5529 = vmatprep.subr.bf16.mxu0 %v5528_v28  ;;  %v5912_v26 = vpack.c.bf16 %v1789_v18, %v1777_v21  ;;  %v1783_v20 = vand.u32 4294901760, %v1782_v11  ;;  %v10932_v42 = vand.u32 4294901760, %v7252_v58  ;;  %v10934_v27 = vand.u32 4294901760, %v7255_v63 }
  0x9c   :  { %v5530_v2 = vpack.c.bf16 %v511_v22, %v499_v0  ;;  %v516_v15 = vsub.f32 %v7244_v51, %v10933_v7  ;;  %v528_v32 = vsub.f32 %v7248_v56, %v10931_v9  ;;  %v1795_v28 = vand.u32 4294901760, %v1794_v1 }
  0x9d   :  { %5913 = vmatprep.subr.bf16.mxu1 %v5912_v26  ;;  %v1800_v21 = vsub.f32 %v7252_v58, %v10932_v42  ;;  %v10935_v18 = vand.u32 4294901760, %v7258_v19  ;;  %v10937_v0 = vand.u32 4294901760, %v7262_v35  ;;  %v1812_v23 = vsub.f32 %v7255_v63, %v10934_v27 }
  0x9e   :  { %5531 = vmatpush1.bf16.msra.mxu0 %v5530_v2  ;;  %v517_v11 = vand.u32 4294901760, %v516_v15  ;;  %v529_v22 = vand.u32 4294901760, %v528_v32  ;;  %v10938_v38 = vand.u32 4294901760, %v7266_v30  ;;  %v5914_v9 = vpack.c.bf16 %v1795_v28, %v1783_v20 }
  0x9f   :  { %v1801_v26 = vand.u32 4294901760, %v1800_v21  ;;  %v522_v1 = vsub.f32 %v7258_v19, %v10935_v18  ;;  %v534_v42 = vsub.f32 %v7262_v35, %v10937_v0  ;;  %v1813_v2 = vand.u32 4294901760, %v1812_v23 }
  0xa0   :  { %v5532_v7 = vpack.c.bf16 %v529_v22, %v517_v11  ;;  %v1806_v15 = vsub.f32 %v7266_v30, %v10938_v38  ;;  %v10939_v32 = vand.u32 4294901760, %v7268_v57  ;;  %5915 = vmatpush1.bf16.msra.mxu1 %v5914_v9  ;;  %v10942_v28 = vand.u32 4294901760, %v7272_v3  ;;  %v11762_v11 = vld [vmem:[#allocation62_spill] sm:$0xff]  ;;  %v11769_v30 = vld [vmem:[#allocation73_spill] sm:$0xff] }
  0xa1   :  { %v523_v27 = vand.u32 4294901760, %v522_v1  ;;  %v535_v20 = vand.u32 4294901760, %v534_v42  ;;  %v10943_v21 = vand.u32 4294901760, %v7274_v5  ;;  %v5916_v18 = vpack.c.bf16 %v1813_v2, %v1801_v26  ;;  %v11763_v1 = vld [vmem:[#allocation64_spill] sm:$0xff]  ;;  %v11764_v2 = vld [vmem:[#allocation66_spill] sm:$0xff] }
  0xa2   :  { %5533 = vmatprep.subr.bf16.mxu0 %v5532_v7  ;;  %v1807_v17 = vand.u32 4294901760, %v1806_v15  ;;  %v1818_v23 = vsub.f32 %v7268_v57, %v10939_v32  ;;  %v10948_v22 = vand.u32 4294901760, %v11762_v11  ;;  %v540_v9 = vsub.f32 %v7272_v3, %v10942_v28  ;;  %v11765_v32 = vld [vmem:[#allocation67_spill] sm:$0xff] }
  0xa3   :  { %v5534_v0 = vpack.c.bf16 %v535_v20, %v523_v27  ;;  %v552_v42 = vsub.f32 %v7274_v5, %v10943_v21  ;;  %v10950_v38 = vand.u32 4294901760, %v11763_v1  ;;  %5917 = vmatprep.subr.bf16.mxu1 %v5916_v18  ;;  %v10956_v15 = vand.u32 4294901760, %v11764_v2  ;;  %v11766_v21 = vld [vmem:[#allocation69_spill] sm:$0xff] }
  0xa4   :  { %v1819_v7 = vand.u32 4294901760, %v1818_v23  ;;  %v1824_v26 = vsub.f32 %v11762_v11, %v10948_v22  ;;  %v10958_v27 = vand.u32 4294901760, %v11765_v32  ;;  %v541_v20 = vand.u32 4294901760, %v540_v9 }
  0xa5   :  { %5535 = vmatpush1.bf16.msra.mxu0 %v5534_v0  ;;  %v553_v55 = vand.u32 4294901760, %v552_v42  ;;  %v1836_v28 = vsub.f32 %v11763_v1, %v10950_v38  ;;  %v10959_v37 = vand.u32 4294901760, %v11766_v21  ;;  %v546_v23 = vsub.f32 %v11764_v2, %v10956_v15  ;;  %v11767_v42 = vld [vmem:[#allocation70_spill] sm:$0xff] }
  0xa6   :  { %v5918_v57 = vpack.c.bf16 %v1819_v7, %v1807_v17  ;;  %v1825_v18 = vand.u32 4294901760, %v1824_v26  ;;  %v558_v22 = vsub.f32 %v11765_v32, %v10958_v27  ;;  %v10960_v38 = vand.u32 4294901760, %v11767_v42  ;;  %v11768_v7 = vld [vmem:[#allocation72_spill] sm:$0xff] }
  0xa7   :  { %v5536_v11 = vpack.c.bf16 %v553_v55, %v541_v20  ;;  %v1837_v0 = vand.u32 4294901760, %v1836_v28  ;;  %v1830_v9 = vsub.f32 %v11766_v21, %v10959_v37  ;;  %v547_v1 = vand.u32 4294901760, %v546_v23  ;;  %v11770_v28 = vld [vmem:[#allocation74_spill] sm:$0xff]  ;;  %v11771_v23 = vld [vmem:[#allocation76_spill] sm:$0xff] }
  0xa8   :  { %5919 = vmatpush1.bf16.msra.mxu1 %v5918_v57  ;;  %v559_v17 = vand.u32 4294901760, %v558_v22  ;;  %v10962_v26 = vand.u32 4294901760, %v11768_v7  ;;  %v10963_v24 = vand.u32 4294901760, %v11769_v30  ;;  %v1842_v55 = vsub.f32 %v11767_v42, %v10960_v38  ;;  %v11773_v38 = vld [vmem:[#allocation79_spill] sm:$0xff] }
  0xa9   :  { %5537 = vmatprep.subr.bf16.mxu0 %v5536_v11  ;;  %v5920_v15 = vpack.c.bf16 %v1837_v0, %v1825_v18  ;;  %v1831_v2 = vand.u32 4294901760, %v1830_v9  ;;  %v10966_v20 = vand.u32 4294901760, %v11770_v28  ;;  %v10968_v37 = vand.u32 4294901760, %v11771_v23  ;;  %v11772_v0 = vld [vmem:[#allocation78_spill] sm:$0xff] }
  0xaa   :  { %v5538_v27 = vpack.c.bf16 %v559_v17, %v547_v1  ;;  %v564_v57 = vsub.f32 %v11768_v7, %v10962_v26  ;;  %v576_v22 = vsub.f32 %v11769_v30, %v10963_v24  ;;  %v1843_v11 = vand.u32 4294901760, %v1842_v55  ;;  %v11774_v24 = vld [vmem:[#allocation81_spill] sm:$0xff] }
  0xab   :  { %5921 = vmatprep.subr.bf16.mxu1 %v5920_v15  ;;  %v1848_v18 = vsub.f32 %v11770_v28, %v10966_v20  ;;  %v10972_v9 = vand.u32 4294901760, %v11772_v0  ;;  %v10974_v1 = vand.u32 4294901760, %v11773_v38  ;;  %v1860_v26 = vsub.f32 %v11771_v23, %v10968_v37  ;;  %v11777_v7 = vld [vmem:[#allocation85_spill] sm:$0xff] }
  0xac   :  { %5539 = vmatpush1.bf16.msra.mxu0 %v5538_v27  ;;  %v565_v17 = vand.u32 4294901760, %v564_v57  ;;  %v577_v42 = vand.u32 4294901760, %v576_v22  ;;  %v10975_v21 = vand.u32 4294901760, %v11774_v24  ;;  %v5922_v30 = vpack.c.bf16 %v1843_v11, %v1831_v2  ;;  %v11775_v22 = vld [vmem:[#allocation82_spill] sm:$0xff]  ;;  %v11776_v11 = vld [vmem:[#allocation84_spill] sm:$0xff] }
  0xad   :  { %v1849_v15 = vand.u32 4294901760, %v1848_v18  ;;  %v570_v55 = vsub.f32 %v11772_v0, %v10972_v9  ;;  %v582_v20 = vsub.f32 %v11773_v38, %v10974_v1  ;;  %v1861_v27 = vand.u32 4294901760, %v1860_v26  ;;  %v11778_v26 = vld [vmem:[#allocation86_spill] sm:$0xff] }
  0xae   :  { %v5540_v28 = vpack.c.bf16 %v577_v42, %v565_v17  ;;  %v1854_v57 = vsub.f32 %v11774_v24, %v10975_v21  ;;  %v10976_v37 = vand.u32 4294901760, %v11775_v22  ;;  %5923 = vmatpush1.bf16.msra.mxu1 %v5922_v30  ;;  %v10978_v18 = vand.u32 4294901760, %v11776_v11 }
  0xaf   :  { %v571_v23 = vand.u32 4294901760, %v570_v55  ;;  %v583_v2 = vand.u32 4294901760, %v582_v20  ;;  %v10979_v32 = vand.u32 4294901760, %v11777_v7  ;;  %v5924_v9 = vpack.c.bf16 %v1861_v27, %v1849_v15  ;;  %v11779_v55 = vld [vmem:[#allocation88_spill] sm:$0xff]  ;;  %v11780_v27 = vld [vmem:[#allocation90_spill] sm:$0xff] }
  0xb0   :  { %5541 = vmatprep.subr.bf16.mxu0 %v5540_v28  ;;  %v1855_v0 = vand.u32 4294901760, %v1854_v57  ;;  %v1866_v42 = vsub.f32 %v11775_v22, %v10976_v37  ;;  %v10982_v17 = vand.u32 4294901760, %v11778_v26  ;;  %v588_v30 = vsub.f32 %v11776_v11, %v10978_v18  ;;  %v11781_v37 = vld [vmem:[#allocation91_spill] sm:$0xff]  ;;  %v11785_v11 = vld [vmem:[#allocation97_spill] sm:$0xff] }
  0xb1   :  { %v5542_v1 = vpack.c.bf16 %v583_v2, %v571_v23  ;;  %v600_v20 = vsub.f32 %v11777_v7, %v10979_v32  ;;  %v10984_v21 = vand.u32 4294901760, %v11779_v55  ;;  %5925 = vmatprep.subr.bf16.mxu1 %v5924_v9  ;;  %v10988_v57 = vand.u32 4294901760, %v11780_v27  ;;  %v11782_v32 = vld [vmem:[#allocation93_spill] sm:$0xff] }
  0xb2   :  { %v1867_v28 = vand.u32 4294901760, %v1866_v42  ;;  %v1872_v15 = vsub.f32 %v11778_v26, %v10982_v17  ;;  %v10990_v23 = vand.u32 4294901760, %v11781_v37  ;;  %v589_v2 = vand.u32 4294901760, %v588_v30 }
  0xb3   :  { %5543 = vmatpush1.bf16.msra.mxu0 %v5542_v1  ;;  %v601_v22 = vand.u32 4294901760, %v600_v20  ;;  %v1884_v18 = vsub.f32 %v11779_v55, %v10984_v21  ;;  %v10991_v24 = vand.u32 4294901760, %v11782_v32  ;;  %v594_v42 = vsub.f32 %v11780_v27, %v10988_v57  ;;  %v11783_v20 = vld [vmem:[#allocation94_spill] sm:$0xff] }
  0xb4   :  { %v5926_v7 = vpack.c.bf16 %v1867_v28, %v1855_v0  ;;  %v1873_v9 = vand.u32 4294901760, %v1872_v15  ;;  %v606_v17 = vsub.f32 %v11781_v37, %v10990_v23  ;;  %v10992_v21 = vand.u32 4294901760, %v11783_v20  ;;  %v11784_v28 = vld [vmem:[#allocation96_spill] sm:$0xff] }
  0xb5   :  { %v5544_v26 = vpack.c.bf16 %v601_v22, %v589_v2  ;;  %v1885_v1 = vand.u32 4294901760, %v1884_v18  ;;  %v1878_v30 = vsub.f32 %v11782_v32, %v10991_v24  ;;  %v595_v55 = vand.u32 4294901760, %v594_v42  ;;  %v11786_v18 = vld [vmem:[#allocation98_spill] sm:$0xff]  ;;  %v11787_v42 = vld [vmem:[#allocation100_spill] sm:$0xff] }
  0xb6   :  { %5927 = vmatpush1.bf16.msra.mxu1 %v5926_v7  ;;  %v607_v0 = vand.u32 4294901760, %v606_v17  ;;  %v10994_v15 = vand.u32 4294901760, %v11784_v28  ;;  %v10995_v38 = vand.u32 4294901760, %v11785_v11  ;;  %v1890_v22 = vsub.f32 %v11783_v20, %v10992_v21  ;;  %v11789_v21 = vld [vmem:[#allocation103_spill] sm:$0xff] }
  0xb7   :  { %5545 = vmatprep.subr.bf16.mxu0 %v5544_v26  ;;  %v5928_v57 = vpack.c.bf16 %v1885_v1, %v1873_v9  ;;  %v1879_v27 = vand.u32 4294901760, %v1878_v30  ;;  %v10998_v2 = vand.u32 4294901760, %v11786_v18  ;;  %v11000_v24 = vand.u32 4294901760, %v11787_v42  ;;  %v11788_v1 = vld [vmem:[#allocation102_spill] sm:$0xff] }
  0xb8   :  { %v5546_v23 = vpack.c.bf16 %v607_v0, %v595_v55  ;;  %v612_v7 = vsub.f32 %v11784_v28, %v10994_v15  ;;  %v624_v17 = vsub.f32 %v11785_v11, %v10995_v38  ;;  %v1891_v26 = vand.u32 4294901760, %v1890_v22  ;;  %v11790_v38 = vld [vmem:[#allocation105_spill] sm:$0xff] }
  0xb9   :  { %5929 = vmatprep.subr.bf16.mxu1 %v5928_v57  ;;  %v1896_v9 = vsub.f32 %v11786_v18, %v10998_v2  ;;  %v11004_v30 = vand.u32 4294901760, %v11788_v1  ;;  %v11006_v55 = vand.u32 4294901760, %v11789_v21  ;;  %v1908_v15 = vsub.f32 %v11787_v42, %v11000_v24  ;;  %v11793_v28 = vld [vmem:[#allocation109_spill] sm:$0xff] }
  0xba   :  { %5547 = vmatpush1.bf16.msra.mxu0 %v5546_v23  ;;  %v613_v0 = vand.u32 4294901760, %v612_v7  ;;  %v625_v20 = vand.u32 4294901760, %v624_v17  ;;  %v11007_v32 = vand.u32 4294901760, %v11790_v38  ;;  %v5930_v11 = vpack.c.bf16 %v1891_v26, %v1879_v27  ;;  %v11791_v17 = vld [vmem:[#allocation106_spill] sm:$0xff]  ;;  %v11792_v26 = vld [vmem:[#allocation108_spill] sm:$0xff] }
  0xbb   :  { %v1897_v57 = vand.u32 4294901760, %v1896_v9  ;;  %v618_v22 = vsub.f32 %v11788_v1, %v11004_v30  ;;  %v630_v2 = vsub.f32 %v11789_v21, %v11006_v55  ;;  %v1909_v23 = vand.u32 4294901760, %v1908_v15  ;;  %v11794_v15 = vld [vmem:[#allocation110_spill] sm:$0xff] }
  0xbc   :  { %v5548_v18 = vpack.c.bf16 %v625_v20, %v613_v0  ;;  %v1902_v7 = vsub.f32 %v11790_v38, %v11007_v32  ;;  %v11008_v24 = vand.u32 4294901760, %v11791_v17  ;;  %5931 = vmatpush1.bf16.msra.mxu1 %v5930_v11  ;;  %v11010_v9 = vand.u32 4294901760, %v11792_v26 }
  0xbd   :  { %v619_v42 = vand.u32 4294901760, %v618_v22  ;;  %v631_v27 = vand.u32 4294901760, %v630_v2  ;;  %v11011_v37 = vand.u32 4294901760, %v11793_v28  ;;  %v5932_v30 = vpack.c.bf16 %v1909_v23, %v1897_v57  ;;  %v11795_v22 = vld [vmem:[#allocation112_spill] sm:$0xff]  ;;  %v11796_v23 = vld [vmem:[#allocation114_spill] sm:$0xff] }
  0xbe   :  { %5549 = vmatprep.subr.bf16.mxu0 %v5548_v18  ;;  %v1903_v1 = vand.u32 4294901760, %v1902_v7  ;;  %v1914_v20 = vsub.f32 %v11791_v17, %v11008_v24  ;;  %v11014_v0 = vand.u32 4294901760, %v11794_v15  ;;  %v636_v11 = vsub.f32 %v11792_v26, %v11010_v9  ;;  %v11797_v24 = vld [vmem:[#allocation115_spill] sm:$0xff]  ;;  %v11801_v26 = vld [vmem:[#allocation121_spill] sm:$0xff] }
  0xbf   :  { %v5550_v55 = vpack.c.bf16 %v631_v27, %v619_v42  ;;  %v648_v2 = vsub.f32 %v11793_v28, %v11011_v37  ;;  %v11016_v32 = vand.u32 4294901760, %v11795_v22  ;;  %5933 = vmatprep.subr.bf16.mxu1 %v5932_v30  ;;  %v11020_v7 = vand.u32 4294901760, %v11796_v23  ;;  %v11798_v37 = vld [vmem:[#allocation117_spill] sm:$0xff] }
  0xc0   :  { %v1915_v18 = vand.u32 4294901760, %v1914_v20  ;;  %v1920_v57 = vsub.f32 %v11794_v15, %v11014_v0  ;;  %v11022_v42 = vand.u32 4294901760, %v11797_v24  ;;  %v637_v27 = vand.u32 4294901760, %v636_v11 }
  0xc1   :  { %5551 = vmatpush1.bf16.msra.mxu0 %v5550_v55  ;;  %v649_v17 = vand.u32 4294901760, %v648_v2  ;;  %v1932_v9 = vsub.f32 %v11795_v22, %v11016_v32  ;;  %v11023_v38 = vand.u32 4294901760, %v11798_v37  ;;  %v642_v20 = vsub.f32 %v11796_v23, %v11020_v7  ;;  %v11799_v2 = vld [vmem:[#allocation118_spill] sm:$0xff] }
  0xc2   :  { %v5934_v28 = vpack.c.bf16 %v1915_v18, %v1903_v1  ;;  %v1921_v30 = vand.u32 4294901760, %v1920_v57  ;;  %v654_v0 = vsub.f32 %v11797_v24, %v11022_v42  ;;  %v11024_v32 = vand.u32 4294901760, %v11799_v2  ;;  %v11800_v18 = vld [vmem:[#allocation120_spill] sm:$0xff] }
  0xc3   :  { %v5552_v15 = vpack.c.bf16 %v649_v17, %v637_v27  ;;  %v1933_v55 = vand.u32 4294901760, %v1932_v9  ;;  %v1926_v11 = vsub.f32 %v11798_v37, %v11023_v38  ;;  %v643_v22 = vand.u32 4294901760, %v642_v20  ;;  %v11802_v9 = vld [vmem:[#allocation122_spill] sm:$0xff]  ;;  %v11803_v20 = vld [vmem:[#allocation124_spill] sm:$0xff]  ;;  %v11809_v37 = vld [vmem:[#allocation133_spill] sm:$0xff] }
  0xc4   :  { %5935 = vmatpush1.bf16.msra.mxu1 %v5934_v28  ;;  %v655_v1 = vand.u32 4294901760, %v654_v0  ;;  %v11026_v57 = vand.u32 4294901760, %v11800_v18  ;;  %v11027_v21 = vand.u32 4294901760, %v11801_v26  ;;  %v1938_v17 = vsub.f32 %v11799_v2, %v11024_v32  ;;  %v11805_v32 = vld [vmem:[#allocation127_spill] sm:$0xff] }
  0xc5   :  { %5553 = vmatprep.subr.bf16.mxu0 %v5552_v15  ;;  %v5936_v7 = vpack.c.bf16 %v1933_v55, %v1921_v30  ;;  %v1927_v23 = vand.u32 4294901760, %v1926_v11  ;;  %v11030_v27 = vand.u32 4294901760, %v11802_v9  ;;  %v11032_v38 = vand.u32 4294901760, %v11803_v20  ;;  %v11804_v55 = vld [vmem:[#allocation126_spill] sm:$0xff] }
  0xc6   :  { %v5554_v42 = vpack.c.bf16 %v655_v1, %v643_v22  ;;  %v660_v28 = vsub.f32 %v11800_v18, %v11026_v57  ;;  %v672_v0 = vsub.f32 %v11801_v26, %v11027_v21  ;;  %v1939_v15 = vand.u32 4294901760, %v1938_v17  ;;  %v11806_v21 = vld [vmem:[#allocation129_spill] sm:$0xff] }
  0xc7   :  { %5937 = vmatprep.subr.bf16.mxu1 %v5936_v7  ;;  %v1944_v30 = vsub.f32 %v11802_v9, %v11030_v27  ;;  %v11036_v11 = vand.u32 4294901760, %v11804_v55  ;;  %v11038_v22 = vand.u32 4294901760, %v11805_v32  ;;  %v1956_v57 = vsub.f32 %v11803_v20, %v11032_v38 }
  0xc8   :  { %5555 = vmatpush1.bf16.msra.mxu0 %v5554_v42  ;;  %v661_v1 = vand.u32 4294901760, %v660_v28  ;;  %v673_v2 = vand.u32 4294901760, %v672_v0  ;;  %v11039_v26 = vand.u32 4294901760, %v11806_v21  ;;  %v5938_v18 = vpack.c.bf16 %v1939_v15, %v1927_v23  ;;  %v11807_v0 = vld [vmem:[#allocation130_spill] sm:$0xff]  ;;  %v11808_v15 = vld [vmem:[#allocation132_spill] sm:$0xff] }
  0xc9   :  { %v1945_v7 = vand.u32 4294901760, %v1944_v30  ;;  %v666_v17 = vsub.f32 %v11804_v55, %v11036_v11  ;;  %v678_v27 = vsub.f32 %v11805_v32, %v11038_v22  ;;  %v1957_v42 = vand.u32 4294901760, %v1956_v57  ;;  %v11810_v57 = vld [vmem:[#allocation134_spill] sm:$0xff] }
  0xca   :  { %v5556_v9 = vpack.c.bf16 %v673_v2, %v661_v1  ;;  %v1950_v28 = vsub.f32 %v11806_v21, %v11039_v26  ;;  %v11040_v38 = vand.u32 4294901760, %v11807_v0  ;;  %5939 = vmatpush1.bf16.msra.mxu1 %v5938_v18  ;;  %v11042_v30 = vand.u32 4294901760, %v11808_v15  ;;  %v11817_v21 = vld [vmem:[#allocation145_spill] sm:$0xff] }
  0xcb   :  { %v667_v20 = vand.u32 4294901760, %v666_v17  ;;  %v679_v23 = vand.u32 4294901760, %v678_v27  ;;  %v11043_v24 = vand.u32 4294901760, %v11809_v37  ;;  %v5940_v11 = vpack.c.bf16 %v1957_v42, %v1945_v7  ;;  %v11811_v17 = vld [vmem:[#allocation136_spill] sm:$0xff]  ;;  %v11812_v42 = vld [vmem:[#allocation138_spill] sm:$0xff] }
  0xcc   :  { %5557 = vmatprep.subr.bf16.mxu0 %v5556_v9  ;;  %v1951_v55 = vand.u32 4294901760, %v1950_v28  ;;  %v1962_v2 = vsub.f32 %v11807_v0, %v11040_v38  ;;  %v11046_v1 = vand.u32 4294901760, %v11810_v57  ;;  %v684_v18 = vsub.f32 %v11808_v15, %v11042_v30  ;;  %v11813_v38 = vld [vmem:[#allocation139_spill] sm:$0xff] }
  0xcd   :  { %v5558_v22 = vpack.c.bf16 %v679_v23, %v667_v20  ;;  %v696_v27 = vsub.f32 %v11809_v37, %v11043_v24  ;;  %v11048_v26 = vand.u32 4294901760, %v11811_v17  ;;  %5941 = vmatprep.subr.bf16.mxu1 %v5940_v11  ;;  %v11052_v28 = vand.u32 4294901760, %v11812_v42  ;;  %v11814_v24 = vld [vmem:[#allocation141_spill] sm:$0xff] }
  0xce   :  { %v1963_v9 = vand.u32 4294901760, %v1962_v2  ;;  %v1968_v7 = vsub.f32 %v11810_v57, %v11046_v1  ;;  %v11054_v20 = vand.u32 4294901760, %v11813_v38  ;;  %v685_v23 = vand.u32 4294901760, %v684_v18 }
  0xcf   :  { %5559 = vmatpush1.bf16.msra.mxu0 %v5558_v22  ;;  %v697_v0 = vand.u32 4294901760, %v696_v27  ;;  %v1980_v30 = vsub.f32 %v11811_v17, %v11048_v26  ;;  %v11055_v37 = vand.u32 4294901760, %v11814_v24  ;;  %v690_v2 = vsub.f32 %v11812_v42, %v11052_v28  ;;  %v11815_v27 = vld [vmem:[#allocation142_spill] sm:$0xff] }
  0xd0   :  { %v5942_v15 = vpack.c.bf16 %v1963_v9, %v1951_v55  ;;  %v1969_v11 = vand.u32 4294901760, %v1968_v7  ;;  %v702_v1 = vsub.f32 %v11813_v38, %v11054_v20  ;;  %v11056_v26 = vand.u32 4294901760, %v11815_v27  ;;  %v11816_v9 = vld [vmem:[#allocation144_spill] sm:$0xff] }
  0xd1   :  { %v5560_v57 = vpack.c.bf16 %v697_v0, %v685_v23  ;;  %v1981_v22 = vand.u32 4294901760, %v1980_v30  ;;  %v1974_v18 = vsub.f32 %v11814_v24, %v11055_v37  ;;  %v691_v17 = vand.u32 4294901760, %v690_v2  ;;  %v11818_v30 = vld [vmem:[#allocation146_spill] sm:$0xff]  ;;  %v11819_v2 = vld [vmem:[#allocation148_spill] sm:$0xff]  ;;  %v11825_v24 = vld [vmem:[#allocation157_spill] sm:$0xff] }
  0xd2   :  { %5943 = vmatpush1.bf16.msra.mxu1 %v5942_v15  ;;  %v703_v55 = vand.u32 4294901760, %v702_v1  ;;  %v11058_v7 = vand.u32 4294901760, %v11816_v9  ;;  %v11059_v32 = vand.u32 4294901760, %v11817_v21  ;;  %v1986_v0 = vsub.f32 %v11815_v27, %v11056_v26  ;;  %v11821_v26 = vld [vmem:[#allocation151_spill] sm:$0xff] }
  0xd3   :  { %5561 = vmatprep.subr.bf16.mxu0 %v5560_v57  ;;  %v5944_v28 = vpack.c.bf16 %v1981_v22, %v1969_v11  ;;  %v1975_v42 = vand.u32 4294901760, %v1974_v18  ;;  %v11062_v23 = vand.u32 4294901760, %v11818_v30  ;;  %v11064_v37 = vand.u32 4294901760, %v11819_v2  ;;  %v11820_v22 = vld [vmem:[#allocation150_spill] sm:$0xff] }
  0xd4   :  { %v5562_v20 = vpack.c.bf16 %v703_v55, %v691_v17  ;;  %v708_v15 = vsub.f32 %v11816_v9, %v11058_v7  ;;  %v720_v1 = vsub.f32 %v11817_v21, %v11059_v32  ;;  %v1987_v57 = vand.u32 4294901760, %v1986_v0  ;;  %v11822_v32 = vld [vmem:[#allocation153_spill] sm:$0xff] }
  0xd5   :  { %5945 = vmatprep.subr.bf16.mxu1 %v5944_v28  ;;  %v1992_v11 = vsub.f32 %v11818_v30, %v11062_v23  ;;  %v11068_v18 = vand.u32 4294901760, %v11820_v22  ;;  %v11070_v17 = vand.u32 4294901760, %v11821_v26  ;;  %v2004_v7 = vsub.f32 %v11819_v2, %v11064_v37 }
  0xd6   :  { %5563 = vmatpush1.bf16.msra.mxu0 %v5562_v20  ;;  %v709_v55 = vand.u32 4294901760, %v708_v15  ;;  %v721_v27 = vand.u32 4294901760, %v720_v1  ;;  %v11071_v21 = vand.u32 4294901760, %v11822_v32  ;;  %v5946_v9 = vpack.c.bf16 %v1987_v57, %v1975_v42  ;;  %v11823_v1 = vld [vmem:[#allocation154_spill] sm:$0xff]  ;;  %v11824_v57 = vld [vmem:[#allocation156_spill] sm:$0xff] }
  0xd7   :  { %v1993_v28 = vand.u32 4294901760, %v1992_v11  ;;  %v714_v0 = vsub.f32 %v11820_v22, %v11068_v18  ;;  %v726_v23 = vsub.f32 %v11821_v26, %v11070_v17  ;;  %v2005_v20 = vand.u32 4294901760, %v2004_v7  ;;  %v11826_v7 = vld [vmem:[#allocation158_spill] sm:$0xff] }
  0xd8   :  { %v5564_v30 = vpack.c.bf16 %v721_v27, %v709_v55  ;;  %v1998_v15 = vsub.f32 %v11822_v32, %v11071_v21  ;;  %v11072_v37 = vand.u32 4294901760, %v11823_v1  ;;  %5947 = vmatpush1.bf16.msra.mxu1 %v5946_v9  ;;  %v11074_v11 = vand.u32 4294901760, %v11824_v57  ;;  %v11833_v32 = vld [vmem:[#allocation169_spill] sm:$0xff] }
  0xd9   :  { %v715_v2 = vand.u32 4294901760, %v714_v0  ;;  %v727_v42 = vand.u32 4294901760, %v726_v23  ;;  %v11075_v38 = vand.u32 4294901760, %v11825_v24  ;;  %v5948_v18 = vpack.c.bf16 %v2005_v20, %v1993_v28  ;;  %v11827_v0 = vld [vmem:[#allocation160_spill] sm:$0xff]  ;;  %v11828_v20 = vld [vmem:[#allocation162_spill] sm:$0xff] }
  0xda   :  { %5565 = vmatprep.subr.bf16.mxu0 %v5564_v30  ;;  %v1999_v22 = vand.u32 4294901760, %v1998_v15  ;;  %v2010_v27 = vsub.f32 %v11823_v1, %v11072_v37  ;;  %v11078_v55 = vand.u32 4294901760, %v11826_v7  ;;  %v732_v9 = vsub.f32 %v11824_v57, %v11074_v11  ;;  %v11829_v37 = vld [vmem:[#allocation163_spill] sm:$0xff] }
  0xdb   :  { %v5566_v17 = vpack.c.bf16 %v727_v42, %v715_v2  ;;  %v744_v23 = vsub.f32 %v11825_v24, %v11075_v38  ;;  %v11080_v21 = vand.u32 4294901760, %v11827_v0  ;;  %5949 = vmatprep.subr.bf16.mxu1 %v5948_v18  ;;  %v11084_v15 = vand.u32 4294901760, %v11828_v20  ;;  %v11830_v38 = vld [vmem:[#allocation165_spill] sm:$0xff] }
  0xdc   :  { %v2011_v30 = vand.u32 4294901760, %v2010_v27  ;;  %v2016_v28 = vsub.f32 %v11826_v7, %v11078_v55  ;;  %v11086_v2 = vand.u32 4294901760, %v11829_v37  ;;  %v733_v42 = vand.u32 4294901760, %v732_v9 }
  0xdd   :  { %5567 = vmatpush1.bf16.msra.mxu0 %v5566_v17  ;;  %v745_v1 = vand.u32 4294901760, %v744_v23  ;;  %v2028_v11 = vsub.f32 %v11827_v0, %v11080_v21  ;;  %v11088_v24 = vand.u32 4294901760, %v11830_v38  ;;  %v738_v27 = vsub.f32 %v11828_v20, %v11084_v15  ;;  %v11831_v23 = vld [vmem:[#allocation166_spill] sm:$0xff] }
  0xde   :  { %v5950_v57 = vpack.c.bf16 %v2011_v30, %v1999_v22  ;;  %v2017_v18 = vand.u32 4294901760, %v2016_v28  ;;  %v750_v55 = vsub.f32 %v11829_v37, %v11086_v2  ;;  %v11087_v21 = vand.u32 4294901760, %v11831_v23  ;;  %v11832_v30 = vld [vmem:[#allocation168_spill] sm:$0xff] }
  0xdf   :  { %v5568_v7 = vpack.c.bf16 %v745_v1, %v733_v42  ;;  %v2029_v17 = vand.u32 4294901760, %v2028_v11  ;;  %v2022_v9 = vsub.f32 %v11830_v38, %v11088_v24  ;;  %v739_v0 = vand.u32 4294901760, %v738_v27  ;;  %v11834_v11 = vld [vmem:[#allocation170_spill] sm:$0xff] }
  0xe0   :  { %5951 = vmatpush1.bf16.msra.mxu1 %v5950_v57  ;;  %v751_v22 = vand.u32 4294901760, %v750_v55  ;;  %v11089_v28 = vand.u32 4294901760, %v11832_v30  ;;  %v11090_v26 = vand.u32 4294901760, %v11833_v32  ;;  %v2034_v1 = vsub.f32 %v11831_v23, %v11087_v21  ;;  %v11836_v21 = vld [vmem:[#allocation175_spill] sm:$0xff]  ;;  %v11840_v23 = vld [vmem:[#allocation181_spill] sm:$0xff] }
  0xe1   :  { %5569 = vmatprep.subr.bf16.mxu0 %v5568_v7  ;;  %v5952_v15 = vpack.c.bf16 %v2029_v17, %v2017_v18  ;;  %v2023_v20 = vand.u32 4294901760, %v2022_v9  ;;  %v11093_v42 = vand.u32 4294901760, %v11834_v11  ;;  %v11095_v27 = vand.u32 4294901760, %v7535_v54  ;;  %v11835_v17 = vld [vmem:[#allocation174_spill] sm:$0xff] }
  0xe2   :  { %v5570_v2 = vpack.c.bf16 %v751_v22, %v739_v0  ;;  %v756_v57 = vsub.f32 %v11832_v30, %v11089_v28  ;;  %v768_v55 = vsub.f32 %v11833_v32, %v11090_v26  ;;  %v2035_v7 = vand.u32 4294901760, %v2034_v1  ;;  %v11837_v26 = vld [vmem:[#allocation177_spill] sm:$0xff] }
  0xe3   :  { %5953 = vmatprep.subr.bf16.mxu1 %v5952_v15  ;;  %v2040_v18 = vsub.f32 %v11834_v11, %v11093_v42  ;;  %v11100_v9 = vand.u32 4294901760, %v11835_v17  ;;  %v11102_v0 = vand.u32 4294901760, %v11836_v21  ;;  %v2052_v28 = vsub.f32 %v7535_v54, %v11095_v27 }
  0xe4   :  { %5571 = vmatpush1.bf16.msra.mxu0 %v5570_v2  ;;  %v757_v22 = vand.u32 4294901760, %v756_v57  ;;  %v769_v24 = vand.u32 4294901760, %v768_v55  ;;  %v11107_v32 = vand.u32 4294901760, %v11837_v26  ;;  %v5954_v30 = vpack.c.bf16 %v2035_v7, %v2023_v20  ;;  %v11838_v55 = vld [vmem:[#allocation178_spill] sm:$0xff]  ;;  %v11839_v7 = vld [vmem:[#allocation180_spill] sm:$0xff] }
  0xe5   :  { %v2041_v15 = vand.u32 4294901760, %v2040_v18  ;;  %v762_v1 = vsub.f32 %v11835_v17, %v11100_v9  ;;  %v774_v42 = vsub.f32 %v11836_v21, %v11102_v0  ;;  %v2053_v2 = vand.u32 4294901760, %v2052_v28  ;;  %v11841_v28 = vld [vmem:[#allocation182_spill] sm:$0xff] }
  0xe6   :  { %v5572_v11 = vpack.c.bf16 %v769_v24, %v757_v22  ;;  %v2046_v57 = vsub.f32 %v11837_v26, %v11107_v32  ;;  %v11105_v27 = vand.u32 4294901760, %v11838_v55  ;;  %5955 = vmatpush1.bf16.msra.mxu1 %v5954_v30  ;;  %v11103_v18 = vand.u32 4294901760, %v11839_v7 }
  0xe7   :  { %v763_v54 = vand.u32 4294901760, %v762_v1  ;;  %v775_v20 = vand.u32 4294901760, %v774_v42  ;;  %v11104_v38 = vand.u32 4294901760, %v11840_v23  ;;  %v5956_v9 = vpack.c.bf16 %v2053_v2, %v2041_v15 }
  0xe8   :  { %5573 = vmatprep.subr.bf16.mxu0 %v5572_v11  ;;  %v2047_v17 = vand.u32 4294901760, %v2046_v57  ;;  %v2058_v24 = vsub.f32 %v11838_v55, %v11105_v27  ;;  %v11106_v22 = vand.u32 4294901760, %v11841_v28  ;;  %v780_v30 = vsub.f32 %v11839_v7, %v11103_v18 }
  0xe9   :  { %v5574_v0 = vpack.c.bf16 %v775_v20, %v763_v54  ;;  %v792_v42 = vsub.f32 %v11840_v23, %v11104_v38  ;;  %v11108_v1 = vand.u32 4294901760, %v7563_v60  ;;  %5957 = vmatprep.subr.bf16.mxu1 %v5956_v9  ;;  %v11112_v2 = vand.u32 4294901760, %v7567_v31 }
  0xea   :  { %v2059_v11 = vand.u32 4294901760, %v2058_v24  ;;  %v2064_v15 = vsub.f32 %v11841_v28, %v11106_v22  ;;  %v11124_v54 = vand.u32 4294901760, %v7569_v45  ;;  %v781_v57 = vand.u32 4294901760, %v780_v30 }
  0xeb   :  { %5575 = vmatpush1.bf16.msra.mxu0 %v5574_v0  ;;  %v793_v20 = vand.u32 4294901760, %v792_v42  ;;  %v2076_v18 = vsub.f32 %v7563_v60, %v11108_v1  ;;  %v11119_v38 = vand.u32 4294901760, %v7573_v14  ;;  %v786_v24 = vsub.f32 %v7567_v31, %v11112_v2  ;;  %v11843_v60 = vld [vmem:[#allocation193_spill] sm:$0xff] }
  0xec   :  { %v5958_v27 = vpack.c.bf16 %v2059_v11, %v2047_v17  ;;  %v2065_v9 = vand.u32 4294901760, %v2064_v15  ;;  %v798_v22 = vsub.f32 %v7569_v45, %v11124_v54  ;;  %v11117_v42 = vand.u32 4294901760, %v7575_v36  ;;  %v11842_v11 = vld [vmem:[#allocation192_spill] sm:$0xff] }
  0xed   :  { %v5576_v32 = vpack.c.bf16 %v793_v20, %v781_v57  ;;  %v2077_v0 = vand.u32 4294901760, %v2076_v18  ;;  %v2070_v30 = vsub.f32 %v7573_v14, %v11119_v38  ;;  %v787_v1 = vand.u32 4294901760, %v786_v24  ;;  %v11846_v54 = vld [vmem:[#allocation16_spill] sm:$0xff] }
  0xee   :  { %5959 = vmatpush1.bf16.msra.mxu1 %v5958_v27  ;;  %v799_v17 = vand.u32 4294901760, %v798_v22  ;;  %v11115_v15 = vand.u32 4294901760, %v11842_v11  ;;  %v11116_v28 = vand.u32 4294901760, %v11843_v60  ;;  %v2082_v18 = vsub.f32 %v7575_v36, %v11117_v42  ;;  %v11897_v14 = vld [vmem:[#allocation64_spill] sm:$0xff]  ;;  %v11898_v36 = vld [vmem:[#allocation66_spill] sm:$0xff] }
  0xef   :  { %5577 = vmatprep.subr.bf16.mxu0 %v5576_v32  ;;  %v5960_v2 = vpack.c.bf16 %v2077_v0, %v2065_v9  ;;  %v2071_v31 = vand.u32 4294901760, %v2070_v30  ;;  %v11118_v57 = vand.u32 4294901760, %v7587_v8  ;;  %v11120_v24 = vand.u32 4294901760, %v7594_v59 }
  0xf0   :  { %v5578_v20 = vpack.c.bf16 %v799_v17, %v787_v1  ;;  %v804_v27 = vsub.f32 %v11842_v11, %v11115_v15  ;;  %v816_v22 = vsub.f32 %v11843_v60, %v11116_v28  ;;  %v2083_v32 = vand.u32 4294901760, %v2082_v18  ;;  %v11899_v11 = vld [vmem:[#allocation67_spill] sm:$0xff] }
  0xf1   :  { %5961 = vmatprep.subr.bf16.mxu1 %v5960_v2  ;;  %v2088_v9 = vsub.f32 %v7587_v8, %v11118_v57  ;;  %v11121_v0 = vand.u32 4294901760, %v7598_v47  ;;  %v11122_v1 = vand.u32 4294901760, %v7600_v49  ;;  %v2100_v15 = vsub.f32 %v7594_v59, %v11120_v24  ;;  %v11900_v8 = vld [vmem:[#allocation72_spill] sm:$0xff] }
  0xf2   :  { %5579 = vmatpush1.bf16.msra.mxu0 %v5578_v20  ;;  %v805_v30 = vand.u32 4294901760, %v804_v27  ;;  %v817_v17 = vand.u32 4294901760, %v816_v22  ;;  %v11123_v28 = vand.u32 4294901760, %v7604_v29  ;;  %v5962_v42 = vpack.c.bf16 %v2083_v32, %v2071_v31 }
  0xf3   :  { %v2089_v2 = vand.u32 4294901760, %v2088_v9  ;;  %v810_v18 = vsub.f32 %v7598_v47, %v11121_v0  ;;  %v822_v57 = vsub.f32 %v7600_v49, %v11122_v1  ;;  %v2101_v20 = vand.u32 4294901760, %v2100_v15  ;;  %v11844_v1 = vld [vmem:[#allocation13_spill] sm:$0xff] }
  0xf4   :  { %v5580_v38 = vpack.c.bf16 %v817_v17, %v805_v30  ;;  %v2094_v27 = vsub.f32 %v7604_v29, %v11123_v28  ;;  %v11127_v22 = vand.u32 4294901760, %v7606_v53  ;;  %5963 = vmatpush1.bf16.msra.mxu1 %v5962_v42  ;;  %v5584_v30 = vpack.c.bf16 %v11844_v1, %v7162_v16  ;;  %v11845_v28 = vld [vmem:[#allocation14_spill] sm:$0xff]  ;;  %v11847_v42 = vld [vmem:[#allocation19_spill] sm:$0xff] }
  0xf5   :  { %v811_v24 = vand.u32 4294901760, %v810_v18  ;;  %v823_v31 = vand.u32 4294901760, %v822_v57  ;;  %v5964_v32 = vpack.c.bf16 %v2101_v20, %v2089_v2  ;;  %v5968_v29 = vpack.c.bf16 %v11846_v54, %v11845_v28  ;;  %v11848_v18 = vld [vmem:[#allocation205_spill] sm:$0xff]  ;;  %v11879_v28 = vld [vmem:[#allocation204_spill] sm:$0xff]  ;;  %v11890_v16 = vld [vmem:[#allocation182_spill] sm:$0xff] }
  0xf6   :  { %5581 = vmatprep.subr.bf16.mxu0 %v5580_v38  ;;  %v2095_v9 = vand.u32 4294901760, %v2094_v27  ;;  %v2106_v0 = vsub.f32 %v7606_v53, %v11127_v22  ;;  %v5586_v57 = vpack.c.bf16 %v11847_v42, %v7174_v25  ;;  %v5588_v2 = vpack.c.bf16 %v7191_v46, %v7187_v41  ;;  %v11874_v46 = vld [vmem:[#allocation151_spill] sm:$0xff]  ;;  %v11877_v25 = vld [vmem:[#allocation156_spill] sm:$0xff]  ;;  %v11886_v41 = vld [vmem:[#allocation169_spill] sm:$0xff] }
  0xf7   :  { %v5582_v15 = vpack.c.bf16 %v823_v31, %v811_v24  ;;  %5965 = vmatprep.subr.bf16.mxu1 %v5964_v32  ;;  %v5970_v24 = vpack.c.bf16 %v7185_v40, %v7183_v39  ;;  %v5590_v20 = vpack.c.bf16 %v7206_v61, %v7200_v52  ;;  %v5974_v27 = vpack.c.bf16 %v7212_v4, %v7208_v62  ;;  %v11862_v4 = vld [vmem:[#allocation133_spill] sm:$0xff]  ;;  %v11863_v62 = vld [vmem:[#allocation134_spill] sm:$0xff]  ;;  %v11885_v40 = vld [vmem:[#allocation168_spill] sm:$0xff] }
  0xf8   :  { %v2107_v17 = vand.u32 4294901760, %v2106_v0  ;;  %v5972_v0 = vpack.c.bf16 %v7198_v50, %v7195_v48  ;;  %v5592_v31 = vpack.c.bf16 %v7219_v10, %v7216_v6  ;;  %v5976_v32 = vpack.c.bf16 %v7225_v13, %v7223_v12  ;;  %v11865_v6 = vld [vmem:[#allocation138_spill] sm:$0xff]  ;;  %v11866_v13 = vld [vmem:[#allocation139_spill] sm:$0xff]  ;;  %v11870_v50 = vld [vmem:[#allocation145_spill] sm:$0xff] }
  0xf9   :  { %5583 = vmatpush1.bf16.msra.mxu0 %v5582_v15  ;;  %v5980_v15 = vpack.c.bf16 %v7255_v63, %v7252_v58  ;;  %v11857_v63 = vld [vmem:[#allocation126_spill] sm:$0xff]  ;;  %v11859_v58 = vld [vmem:[#allocation129_spill] sm:$0xff]  ;;  %v11888_v22 = vld [vmem:[#allocation172_spill] sm:$0xff] }
  0xfa   :  { %v5966_v38 = vpack.c.bf16 %v2107_v17, %v2095_v9  ;;  %5585 = vmatprep.subr.bf16.mxu0 %v5584_v30  ;;  %v5978_v9 = vpack.c.bf16 %v7240_v44, %v7238_v43  ;;  %v5596_v30 = vpack.c.bf16 %v7248_v56, %v7244_v51  ;;  %v5598_v17 = vpack.c.bf16 %v7262_v35, %v7258_v19  ;;  %v11852_v44 = vld [vmem:[#allocation118_spill] sm:$0xff]  ;;  %v11856_v51 = vld [vmem:[#allocation124_spill] sm:$0xff]  ;;  %v11858_v35 = vld [vmem:[#allocation127_spill] sm:$0xff] }
  0xfb   :  { %v11855_v56 = vld [vmem:[#allocation122_spill] sm:$0xff]  ;;  %v11864_v43 = vld [vmem:[#allocation136_spill] sm:$0xff]  ;;  %v11878_v10 = vld [vmem:[#allocation157_spill] sm:$0xff] }
  0xfc   :  { %5967 = vmatpush1.bf16.msra.mxu1 %v5966_v38  ;;  %828 = vmatmul.mubr.f32.vlgmr.msra.gmra.mrb[0].mxu0 %v11848_v18  ;;  %v11849_v38 = vld [vmem:[#allocation114_spill] sm:$0xff]  ;;  %v11891_v19 = vld [vmem:[#allocation184_spill] sm:$0xff]  ;;  %v11894_v52 = vld [vmem:[#allocation57_spill] sm:$0xff] }
  0xfd   :  { %5969 = vmatprep.subr.bf16.mxu1 %v5968_v29  ;;  %5587 = vmatpush1.bf16.msra.mxu0 %v5586_v57  ;;  %v5594_v29 = vpack.c.bf16 %v7234_v34, %v7232_v33  ;;  %v5600_v57 = vpack.c.bf16 %v7274_v5, %v7272_v3  ;;  %v11851_v34 = vld [vmem:[#allocation117_spill] sm:$0xff]  ;;  %v11860_v5 = vld [vmem:[#allocation130_spill] sm:$0xff]  ;;  %v11861_v3 = vld [vmem:[#allocation132_spill] sm:$0xff] }
  0xfe   :  { %5589 = vmatprep.subr.bf16.mxu0 %v5588_v2  ;;  %v11850_v2 = vld [vmem:[#allocation115_spill] sm:$0xff]  ;;  %v11854_v33 = vld [vmem:[#allocation121_spill] sm:$0xff]  ;;  %v11868_v12 = vld [vmem:[#allocation142_spill] sm:$0xff]  ;;  %1028 = vmatprep.mubr.f32.mxu0 %v11879_v28 }
  0xff   :  { %2112 = vmatmul.mubr.f32.vlgmr.msra.gmra.mrb[0].mxu1 %v11848_v18  ;;  %v11853_v18 = vld [vmem:[#allocation120_spill] sm:$0xff]  ;;  %v11880_v61 = vld [vmem:[#allocation158_spill] sm:$0xff]  ;;  %v11902_v48 = vld [vmem:[#allocation69_spill] sm:$0xff] }
 0x100   :  { %5971 = vmatpush1.bf16.msra.mxu1 %v5970_v24  ;;  %v11887_v42 = vld [vmem:[#allocation170_spill] sm:$0xff]  ;;  %2312 = vmatprep.mubr.f32.mxu1 %v11879_v28 }
 0x101   :  { %5973 = vmatprep.subr.bf16.mxu1 %v5972_v0  ;;  %5591 = vmatpush1.bf16.msra.mxu0 %v5590_v20  ;;  %v11869_v20 = vld [vmem:[#allocation144_spill] sm:$0xff]  ;;  %v11892_v39 = vld [vmem:[#allocation186_spill] sm:$0xff] }
 0x102   :  { %5593 = vmatprep.subr.bf16.mxu0 %v5592_v31  ;;  %v11881_v0 = vld [vmem:[#allocation160_spill] sm:$0xff]  ;;  %v11889_v31 = vld [vmem:[#allocation174_spill] sm:$0xff] }
 0x103   :  { %v11903_v1 = vld [vmem:[#allocation70_spill] sm:$0xff] }
 0x104   :  { %5975 = vmatpush1.bf16.msra.mxu1 %v5974_v27  ;;  %v5602_v27 = vpack.c.bf16 %v11899_v11, %v11898_v36  ;;  %v5986_v28 = vpack.c.bf16 %v11903_v1, %v11902_v48  ;;  %v11911_v36 = vld [vmem:[#allocation82_spill] sm:$0xff]  ;;  %v11913_v1 = vld [vmem:[#allocation88_spill] sm:$0xff]  ;;  %v11915_v48 = vld [vmem:[#allocation91_spill] sm:$0xff] }
 0x105   :  { %5977 = vmatprep.subr.bf16.mxu1 %v5976_v32  ;;  %5595 = vmatpush1.bf16.msra.mxu0 %v5594_v29  ;;  %v11895_v32 = vld [vmem:[#allocation58_spill] sm:$0xff] }
 0x106   :  { %5597 = vmatprep.subr.bf16.mxu0 %v5596_v30  ;;  %v5982_v24 = vpack.c.bf16 %v11895_v32, %v11894_v52  ;;  %v11896_v29 = vld [vmem:[#allocation62_spill] sm:$0xff]  ;;  %v11901_v30 = vld [vmem:[#allocation73_spill] sm:$0xff]  ;;  %v11905_v32 = vld [vmem:[#allocation76_spill] sm:$0xff] }
 0x107   :  { %v5984_v54 = vpack.c.bf16 %v11897_v14, %v11896_v29  ;;  %v5604_v47 = vpack.c.bf16 %v11901_v30, %v11900_v8  ;;  %v11907_v52 = vld [vmem:[#allocation79_spill] sm:$0xff]  ;;  %v11908_v14 = vld [vmem:[#allocation84_spill] sm:$0xff]  ;;  %v11909_v29 = vld [vmem:[#allocation85_spill] sm:$0xff] }
 0x108   :  { %5979 = vmatpush1.bf16.msra.mxu1 %v5978_v9  ;;  %v11904_v9 = vld [vmem:[#allocation74_spill] sm:$0xff]  ;;  %v5608_v11 = vpack.c.bf16 %v11909_v29, %v11908_v14 }
 0x109   :  { %5981 = vmatprep.subr.bf16.mxu1 %v5980_v15  ;;  %5599 = vmatpush1.bf16.msra.mxu0 %v5598_v17  ;;  %v5988_v15 = vpack.c.bf16 %v11905_v32, %v11904_v9  ;;  %v11906_v17 = vld [vmem:[#allocation78_spill] sm:$0xff]  ;;  %v11916_v32 = vld [vmem:[#allocation96_spill] sm:$0xff]  ;;  %v11917_v9 = vld [vmem:[#allocation97_spill] sm:$0xff] }
 0x10a   :  { %5601 = vmatprep.subr.bf16.mxu0 %v5600_v57  ;;  %v5606_v53 = vpack.c.bf16 %v11907_v52, %v11906_v17  ;;  %v11910_v57 = vld [vmem:[#allocation81_spill] sm:$0xff]  ;;  %v5612_v52 = vpack.c.bf16 %v11917_v9, %v11916_v32  ;;  %v11919_v17 = vld [vmem:[#allocation94_spill] sm:$0xff] }
 0x10b   :  { %v5990_v30 = vpack.c.bf16 %v11911_v36, %v11910_v57  ;;  %v11921_v36 = vld [vmem:[#allocation100_spill] sm:$0xff]  ;;  %v11923_v57 = vld [vmem:[#allocation103_spill] sm:$0xff] }
 0x10c   :  { %5983 = vmatpush1.bf16.msra.mxu1 %v5982_v24  ;;  %v11912_v24 = vld [vmem:[#allocation86_spill] sm:$0xff] }
 0x10d   :  { %5985 = vmatprep.subr.bf16.mxu1 %v5984_v54  ;;  %5603 = vmatpush1.bf16.msra.mxu0 %v5602_v27  ;;  %v5992_v54 = vpack.c.bf16 %v11913_v1, %v11912_v24  ;;  %v11914_v27 = vld [vmem:[#allocation90_spill] sm:$0xff]  ;;  %v11924_v1 = vld [vmem:[#allocation108_spill] sm:$0xff]  ;;  %v11925_v24 = vld [vmem:[#allocation109_spill] sm:$0xff] }
 0x10e   :  { %5605 = vmatprep.subr.bf16.mxu0 %v5604_v47  ;;  %v5610_v8 = vpack.c.bf16 %v11915_v48, %v11914_v27  ;;  %v11918_v47 = vld [vmem:[#allocation93_spill] sm:$0xff]  ;;  %v5616_v48 = vpack.c.bf16 %v11925_v24, %v11924_v1  ;;  %v11927_v27 = vld [vmem:[#allocation106_spill] sm:$0xff] }
 0x10f   :  { %v5994_v29 = vpack.c.bf16 %v11919_v17, %v11918_v47  ;;  %v11929_v17 = vld [vmem:[#allocation112_spill] sm:$0xff] }
 0x110   :  { %5987 = vmatpush1.bf16.msra.mxu1 %v5986_v28  ;;  %v11920_v28 = vld [vmem:[#allocation98_spill] sm:$0xff] }
 0x111   :  { %5989 = vmatprep.subr.bf16.mxu1 %v5988_v15  ;;  %5607 = vmatpush1.bf16.msra.mxu0 %v5606_v53  ;;  %v5996_v15 = vpack.c.bf16 %v11921_v36, %v11920_v28  ;;  %v11922_v53 = vld [vmem:[#allocation102_spill] sm:$0xff] }
 0x112   :  { %5609 = vmatprep.subr.bf16.mxu0 %v5608_v11  ;;  %v5614_v14 = vpack.c.bf16 %v11923_v57, %v11922_v53  ;;  %v11926_v11 = vld [vmem:[#allocation105_spill] sm:$0xff] }
 0x113   :  { %v5998_v9 = vpack.c.bf16 %v11927_v27, %v11926_v11 }
 0x114   :  { %5991 = vmatpush1.bf16.msra.mxu1 %v5990_v30  ;;  %v11928_v30 = vld [vmem:[#allocation110_spill] sm:$0xff] }
 0x115   :  { %5993 = vmatprep.subr.bf16.mxu1 %v5992_v54  ;;  %5611 = vmatpush1.bf16.msra.mxu0 %v5610_v8  ;;  %v6000_v54 = vpack.c.bf16 %v11929_v17, %v11928_v30  ;;  %v11930_v8 = vpack.c.bf16 %v11850_v2, %v11849_v38 }
 0x116   :  { %5613 = vmatprep.subr.bf16.mxu0 %v5612_v52  ;;  %v11931_v52 = vpack.c.bf16 %v11854_v33, %v11853_v18 }
 0x118   :  { %5995 = vmatpush1.bf16.msra.mxu1 %v5994_v29  ;;  %v11932_v29 = vpack.c.bf16 %v11852_v44, %v11851_v34 }
 0x119   :  { %5997 = vmatprep.subr.bf16.mxu1 %v5996_v15  ;;  %5615 = vmatpush1.bf16.msra.mxu0 %v5614_v14  ;;  %v11933_v14 = vpack.c.bf16 %v11856_v51, %v11855_v56  ;;  %v11936_v15 = vpack.c.bf16 %v11860_v5, %v11859_v58 }
 0x11a   :  { %5617 = vmatprep.subr.bf16.mxu0 %v5616_v48  ;;  %v11934_v48 = vpack.c.bf16 %v11858_v35, %v11857_v63 }
 0x11c   :  { %5999 = vmatpush1.bf16.msra.mxu1 %v5998_v9  ;;  %v11935_v9 = vpack.c.bf16 %v11862_v4, %v11861_v3 }
 0x11d   :  { %6001 = vmatprep.subr.bf16.mxu1 %v6000_v54  ;;  %5619 = vmatpush1.bf16.msra.mxu0 %v11930_v8  ;;  %v11937_v54 = vpack.c.bf16 %v11864_v43, %v11863_v62  ;;  %v11938_v8 = vpack.c.bf16 %v11866_v13, %v11865_v6  ;;  %v11949_v13 = vld [vmem:[#allocation153_spill] sm:$0xff] }
 0x11e   :  { %5621 = vmatprep.subr.bf16.mxu0 %v11931_v52  ;;  %v11939_v52 = vpack.c.bf16 %v11870_v50, %v11869_v20 }
 0x120   :  { %6003 = vmatpush1.bf16.msra.mxu1 %v11932_v29  ;;  %v11940_v29 = vld [vmem:[#allocation141_spill] sm:$0xff] }
 0x121   :  { %6005 = vmatprep.subr.bf16.mxu1 %v11933_v14  ;;  %5623 = vmatpush1.bf16.msra.mxu0 %v11934_v48  ;;  %v11941_v14 = vpack.c.bf16 %v11868_v12, %v11940_v29  ;;  %v11942_v48 = vld [vmem:[#allocation148_spill] sm:$0xff] }
 0x122   :  { %5625 = vmatprep.subr.bf16.mxu0 %v11935_v9  ;;  %v11943_v9 = vld [vmem:[#allocation146_spill] sm:$0xff] }
 0x123   :  { %v11944_v5 = vpack.c.bf16 %v11942_v48, %v11943_v9 }
 0x124   :  { %6007 = vmatpush1.bf16.msra.mxu1 %v11936_v15  ;;  %v11945_v15 = vld [vmem:[#allocation150_spill] sm:$0xff] }
 0x125   :  { %6009 = vmatprep.subr.bf16.mxu1 %v11937_v54  ;;  %5627 = vmatpush1.bf16.msra.mxu0 %v11938_v8  ;;  %v11946_v43 = vpack.c.bf16 %v11874_v46, %v11945_v15  ;;  %v11947_v54 = vpack.c.bf16 %v11878_v10, %v11877_v25  ;;  %v11948_v8 = vld [vmem:[#allocation154_spill] sm:$0xff]  ;;  %v11956_v46 = vld [vmem:[#allocation165_spill] sm:$0xff] }
 0x126   :  { %5629 = vmatprep.subr.bf16.mxu0 %v11939_v52  ;;  %v11950_v50 = vpack.c.bf16 %v11948_v8, %v11949_v13  ;;  %v11951_v52 = vpack.c.bf16 %v11881_v0, %v11880_v61 }
 0x128   :  { %6011 = vmatpush1.bf16.msra.mxu1 %v11941_v14  ;;  %v11952_v14 = vld [vmem:[#allocation162_spill] sm:$0xff] }
 0x129   :  { %6013 = vmatprep.subr.bf16.mxu1 %v11944_v5  ;;  %5631 = vmatpush1.bf16.msra.mxu0 %v11946_v43  ;;  %v11953_v48 = vpack.c.bf16 %v11829_v37, %v11952_v14  ;;  %v11954_v5 = vpack.c.bf16 %v11886_v41, %v11885_v40  ;;  %v11955_v43 = vld [vmem:[#allocation166_spill] sm:$0xff]  ;;  %v12073_v41 = vld [vmem:[#allocation37_spill] sm:$0xff] }
 0x12a   :  { %5633 = vmatprep.subr.bf16.mxu0 %v11947_v54  ;;  %v11957_v10 = vpack.c.bf16 %v11955_v43, %v11956_v46  ;;  %v11958_v54 = vpack.c.bf16 %v11888_v22, %v11887_v42  ;;  %v12061_v22 = vld [vmem:[#allocation22_spill] sm:$0xff] }
 0x12c   :  { %6015 = vmatpush1.bf16.msra.mxu1 %v11950_v50  ;;  %v11959_v50 = vpack.c.bf16 %v11836_v21, %v11889_v31  ;;  %v11967_v31 = vld [vmem:[#allocation189_spill] sm:$0xff] }
 0x12d   :  { %6017 = vmatprep.subr.bf16.mxu1 %v11951_v52  ;;  %5635 = vmatpush1.bf16.msra.mxu0 %v11953_v48  ;;  %v11960_v52 = vpack.c.bf16 %v11840_v23, %v11839_v7  ;;  %v11961_v48 = vpack.c.bf16 %v11838_v55, %v11837_v26  ;;  %v12057_v26 = vld [vmem:[#allocation201_spill] sm:$0xff] }
 0x12e   :  { %5637 = vmatprep.subr.bf16.mxu0 %v11954_v5  ;;  %v11962_v5 = vpack.c.bf16 %v11891_v19, %v11890_v16  ;;  %v12051_v16 = vld [vmem:[#allocation19_spill] sm:$0xff] }
 0x130   :  { %6019 = vmatpush1.bf16.msra.mxu1 %v11957_v10  ;;  %v11963_v10 = vpack.c.bf16 %v7569_v45, %v11892_v39  ;;  %v11974_v45 = vld [vmem:[#allocation203_spill] sm:$0xff] }
 0x131   :  { %6021 = vmatprep.subr.bf16.mxu1 %v11958_v54  ;;  %5639 = vmatpush1.bf16.msra.mxu0 %v11959_v50  ;;  %v11964_v54 = vld [vmem:[#allocation192_spill] sm:$0xff]  ;;  %v11966_v50 = vld [vmem:[#allocation190_spill] sm:$0xff] }
 0x132   :  { %5641 = vmatprep.subr.bf16.mxu0 %v11960_v52  ;;  %v11965_v21 = vpack.c.bf16 %v11843_v60, %v11964_v54  ;;  %v11968_v23 = vpack.c.bf16 %v11966_v50, %v11967_v31  ;;  %v11969_v52 = vld [vmem:[#allocation194_spill] sm:$0xff]  ;;  %v11977_v60 = vld [vmem:[#allocation207_spill] sm:$0xff]  ;;  %v11979_v54 = vld [vmem:[#allocation17_spill] sm:$0xff] }
 0x133   :  { %v11970_v7 = vpack.c.bf16 %v7594_v59, %v11969_v52  ;;  %v11981_v59 = vld [vmem:[#allocation206_spill] sm:$0xff] }
 0x134   :  { %6023 = vmatpush1.bf16.msra.mxu1 %v11961_v48  ;;  %v11971_v48 = vld [vmem:[#allocation199_spill] sm:$0xff]  ;;  %v12049_v31 = vld [vmem:[#allocation18_spill] sm:$0xff] }
 0x135   :  { %6025 = vmatprep.subr.bf16.mxu1 %v11962_v5  ;;  %5643 = vmatpush1.bf16.msra.mxu0 %v11963_v10  ;;  %v11972_v19 = vpack.c.bf16 %v7600_v49, %v11971_v48  ;;  %v11973_v5 = vld [vmem:[#allocation11_spill] sm:$0xff]  ;;  %v11975_v10 = vld [vmem:[#allocation202_spill] sm:$0xff]  ;;  %v12040_v49 = vld [vmem:[#allocation13_spill] sm:$0xff] }
 0x136   :  { %5645 = vmatprep.subr.bf16.mxu0 %v11965_v21  ;;  %v11976_v39 = vpack.c.bf16 %v11974_v45, %v11975_v10  ;;  %v11978_v21 = vld [vmem:[#allocation15_spill] sm:$0xff]  ;;  %v11986_v45 = vld [vmem:[#allocation33_spill] sm:$0xff]  ;;  %v11990_v10 = vld [vmem:[#allocation44_spill] sm:$0xff] }
 0x138   :  { %6027 = vmatpush1.bf16.msra.mxu1 %v11968_v23  ;;  %v11980_v23 = vld [vmem:[#allocation24_spill] sm:$0xff] }
 0x139   :  { %6029 = vmatprep.subr.bf16.mxu1 %v11970_v7  ;;  %5647 = vmatpush1.bf16.msra.mxu0 %v11972_v19  ;;  %v11982_v7 = vld [vmem:[#allocation20_spill] sm:$0xff]  ;;  %v11983_v19 = vld [vmem:[#allocation26_spill] sm:$0xff] }
 0x13a   :  { %5649 = vmatprep.subr.bf16.mxu0 %v11973_v5  ;;  %v11984_v5 = vld [vmem:[#allocation30_spill] sm:$0xff] }
 0x13c   :  { %6031 = vmatpush1.bf16.msra.mxu1 %v11976_v39  ;;  %1031 = vmatmul.mubr.f32.vlgmr.msra.gmra.mrb[0].mxu0 %v11977_v60  ;;  %v11985_v39 = vld [vmem:[#allocation35_spill] sm:$0xff] }
 0x13d   :  { %6033 = vmatprep.subr.bf16.mxu1 %v11978_v21  ;;  %5651 = vmatpush1.bf16.msra.mxu0 %v11979_v54  ;;  %v11987_v21 = vld [vmem:[#allocation38_spill] sm:$0xff]  ;;  %v11988_v54 = vld [vmem:[#allocation41_spill] sm:$0xff] }
 0x13e   :  { %5653 = vmatprep.subr.bf16.mxu0 %v11980_v23  ;;  %1168 = vmatprep.mubr.f32.mxu0 %v11981_v59  ;;  %v11989_v23 = vld [vmem:[#allocation47_spill] sm:$0xff] }
 0x13f   :  { %2315 = vmatmul.mubr.f32.vlgmr.msra.gmra.mrb[0].mxu1 %v11977_v60  ;;  %v11991_v60 = vld [vmem:[#allocation50_spill] sm:$0xff] }
 0x140   :  { %6035 = vmatpush1.bf16.msra.mxu1 %v11982_v7  ;;  %2452 = vmatprep.mubr.f32.mxu1 %v11981_v59  ;;  %v11992_v7 = vld [vmem:[#allocation54_spill] sm:$0xff]  ;;  %v11993_v59 = vld [vmem:[#allocation59_spill] sm:$0xff] }
 0x141   :  { %6037 = vmatprep.subr.bf16.mxu1 %v11983_v19  ;;  %5655 = vmatpush1.bf16.msra.mxu0 %v11984_v5  ;;  %v11994_v19 = vld [vmem:[#allocation56_spill] sm:$0xff]  ;;  %v11995_v5 = vld [vmem:[#allocation63_spill] sm:$0xff] }
 0x142   :  { %5657 = vmatprep.subr.bf16.mxu0 %v11985_v39  ;;  %v11996_v39 = vld [vmem:[#allocation65_spill] sm:$0xff] }
 0x144   :  { %6039 = vmatpush1.bf16.msra.mxu1 %v11986_v45  ;;  %v11997_v45 = vld [vmem:[#allocation71_spill] sm:$0xff] }
 0x145   :  { %6041 = vmatprep.subr.bf16.mxu1 %v11987_v21  ;;  %5659 = vmatpush1.bf16.msra.mxu0 %v11988_v54  ;;  %v11998_v21 = vld [vmem:[#allocation68_spill] sm:$0xff]  ;;  %v11999_v54 = vld [vmem:[#allocation75_spill] sm:$0xff] }
 0x146   :  { %5661 = vmatprep.subr.bf16.mxu0 %v11989_v23  ;;  %v12000_v23 = vld [vmem:[#allocation77_spill] sm:$0xff] }
 0x148   :  { %6043 = vmatpush1.bf16.msra.mxu1 %v11990_v10  ;;  %v12001_v10 = vld [vmem:[#allocation83_spill] sm:$0xff] }
 0x149   :  { %6045 = vmatprep.subr.bf16.mxu1 %v11991_v60  ;;  %5663 = vmatpush1.bf16.msra.mxu0 %v11992_v7  ;;  %v12002_v60 = vld [vmem:[#allocation80_spill] sm:$0xff]  ;;  %v12003_v7 = vld [vmem:[#allocation87_spill] sm:$0xff] }
 0x14a   :  { %5665 = vmatprep.subr.bf16.mxu0 %v11993_v59  ;;  %v12004_v59 = vld [vmem:[#allocation89_spill] sm:$0xff] }
 0x14c   :  { %6047 = vmatpush1.bf16.msra.mxu1 %v11994_v19  ;;  %v12005_v19 = vld [vmem:[#allocation95_spill] sm:$0xff] }
 0x14d   :  { %6049 = vmatprep.subr.bf16.mxu1 %v11995_v5  ;;  %5667 = vmatpush1.bf16.msra.mxu0 %v11996_v39  ;;  %v12006_v5 = vld [vmem:[#allocation92_spill] sm:$0xff]  ;;  %v12007_v39 = vld [vmem:[#allocation99_spill] sm:$0xff] }
 0x14e   :  { %5669 = vmatprep.subr.bf16.mxu0 %v11997_v45  ;;  %v12008_v45 = vld [vmem:[#allocation101_spill] sm:$0xff] }
 0x150   :  { %6051 = vmatpush1.bf16.msra.mxu1 %v11998_v21  ;;  %v12009_v21 = vld [vmem:[#allocation107_spill] sm:$0xff] }
 0x151   :  { %6053 = vmatprep.subr.bf16.mxu1 %v11999_v54  ;;  %5671 = vmatpush1.bf16.msra.mxu0 %v12000_v23  ;;  %v12010_v54 = vld [vmem:[#allocation104_spill] sm:$0xff]  ;;  %v12011_v23 = vld [vmem:[#allocation111_spill] sm:$0xff] }
 0x152   :  { %5673 = vmatprep.subr.bf16.mxu0 %v12001_v10  ;;  %v12012_v10 = vld [vmem:[#allocation113_spill] sm:$0xff] }
 0x154   :  { %6055 = vmatpush1.bf16.msra.mxu1 %v12002_v60  ;;  %v12013_v60 = vld [vmem:[#allocation119_spill] sm:$0xff] }
 0x155   :  { %6057 = vmatprep.subr.bf16.mxu1 %v12003_v7  ;;  %5675 = vmatpush1.bf16.msra.mxu0 %v12004_v59  ;;  %v12014_v7 = vld [vmem:[#allocation116_spill] sm:$0xff]  ;;  %v12015_v59 = vld [vmem:[#allocation123_spill] sm:$0xff] }
 0x156   :  { %5677 = vmatprep.subr.bf16.mxu0 %v12005_v19  ;;  %v12016_v19 = vld [vmem:[#allocation125_spill] sm:$0xff] }
 0x158   :  { %6059 = vmatpush1.bf16.msra.mxu1 %v12006_v5  ;;  %v12017_v5 = vld [vmem:[#allocation131_spill] sm:$0xff] }
 0x159   :  { %6061 = vmatprep.subr.bf16.mxu1 %v12007_v39  ;;  %5679 = vmatpush1.bf16.msra.mxu0 %v12008_v45  ;;  %v12018_v39 = vld [vmem:[#allocation128_spill] sm:$0xff]  ;;  %v12019_v45 = vld [vmem:[#allocation135_spill] sm:$0xff] }
 0x15a   :  { %5681 = vmatprep.subr.bf16.mxu0 %v12009_v21  ;;  %v12020_v21 = vld [vmem:[#allocation137_spill] sm:$0xff] }
 0x15c   :  { %6063 = vmatpush1.bf16.msra.mxu1 %v12010_v54  ;;  %v12021_v54 = vld [vmem:[#allocation143_spill] sm:$0xff] }
 0x15d   :  { %6065 = vmatprep.subr.bf16.mxu1 %v12011_v23  ;;  %5683 = vmatpush1.bf16.msra.mxu0 %v12012_v10  ;;  %v12022_v23 = vld [vmem:[#allocation140_spill] sm:$0xff]  ;;  %v12023_v10 = vld [vmem:[#allocation147_spill] sm:$0xff] }
 0x15e   :  { %5685 = vmatprep.subr.bf16.mxu0 %v12013_v60  ;;  %v12024_v60 = vld [vmem:[#allocation149_spill] sm:$0xff] }
 0x160   :  { %6067 = vmatpush1.bf16.msra.mxu1 %v12014_v7  ;;  %v12025_v7 = vld [vmem:[#allocation155_spill] sm:$0xff] }
 0x161   :  { %6069 = vmatprep.subr.bf16.mxu1 %v12015_v59  ;;  %5687 = vmatpush1.bf16.msra.mxu0 %v12016_v19  ;;  %v12026_v59 = vld [vmem:[#allocation152_spill] sm:$0xff]  ;;  %v12027_v19 = vld [vmem:[#allocation159_spill] sm:$0xff] }
 0x162   :  { %5689 = vmatprep.subr.bf16.mxu0 %v12017_v5  ;;  %v12028_v5 = vld [vmem:[#allocation161_spill] sm:$0xff] }
 0x164   :  { %6071 = vmatpush1.bf16.msra.mxu1 %v12018_v39  ;;  %v12029_v39 = vld [vmem:[#allocation167_spill] sm:$0xff] }
 0x165   :  { %6073 = vmatprep.subr.bf16.mxu1 %v12019_v45  ;;  %5691 = vmatpush1.bf16.msra.mxu0 %v12020_v21  ;;  %v12030_v45 = vld [vmem:[#allocation164_spill] sm:$0xff]  ;;  %v12031_v21 = vld [vmem:[#allocation171_spill] sm:$0xff] }
 0x166   :  { %5693 = vmatprep.subr.bf16.mxu0 %v12021_v54  ;;  %v12032_v54 = vld [vmem:[#allocation173_spill] sm:$0xff] }
 0x168   :  { %6075 = vmatpush1.bf16.msra.mxu1 %v12022_v23  ;;  %v12033_v23 = vld [vmem:[#allocation179_spill] sm:$0xff] }
 0x169   :  { %6077 = vmatprep.subr.bf16.mxu1 %v12023_v10  ;;  %5695 = vmatpush1.bf16.msra.mxu0 %v12024_v60  ;;  %v12034_v10 = vld [vmem:[#allocation176_spill] sm:$0xff]  ;;  %v12035_v60 = vld [vmem:[#allocation183_spill] sm:$0xff] }
 0x16a   :  { %5697 = vmatprep.subr.bf16.mxu0 %v12025_v7  ;;  %v12036_v7 = vld [vmem:[#allocation185_spill] sm:$0xff] }
 0x16c   :  { %6079 = vmatpush1.bf16.msra.mxu1 %v12026_v59  ;;  %v12037_v59 = vld [vmem:[#allocation191_spill] sm:$0xff] }
 0x16d   :  { %6081 = vmatprep.subr.bf16.mxu1 %v12027_v19  ;;  %5699 = vmatpush1.bf16.msra.mxu0 %v12028_v5  ;;  %v12038_v19 = vld [vmem:[#allocation12_spill] sm:$0xff] }
 0x16e   :  { %5701 = vmatprep.subr.bf16.mxu0 %v12029_v39  ;;  %v12039_v5 = vand.u32 4294901760, %v12038_v19  ;;  %v12041_v39 = vand.u32 4294901760, %v12040_v49  ;;  %v12053_v19 = vld [vmem:[#allocation23_spill] sm:$0xff] }
 0x16f   :  { %v12054_v49 = vand.u32 4294901760, %v12053_v19 }
 0x170   :  { %6083 = vmatpush1.bf16.msra.mxu1 %v12030_v45  ;;  %v5712_v48 = vpack.c.bf16 %v12041_v39, %v12039_v5  ;;  %v12042_v45 = vld [vmem:[#allocation188_spill] sm:$0xff]  ;;  %v12055_v5 = vld [vmem:[#allocation25_spill] sm:$0xff] }
 0x171   :  { %6085 = vmatprep.subr.bf16.mxu1 %v12031_v21  ;;  %5703 = vmatpush1.bf16.msra.mxu0 %v12032_v54  ;;  %v12043_v21 = vld [vmem:[#allocation196_spill] sm:$0xff]  ;;  %v12044_v54 = vld [vmem:[#allocation198_spill] sm:$0xff]  ;;  %v12056_v39 = vand.u32 4294901760, %v12055_v5  ;;  %v12069_v5 = vld [vmem:[#allocation31_spill] sm:$0xff] }
 0x172   :  { %5705 = vmatprep.subr.bf16.mxu0 %v12033_v23  ;;  %v12045_v23 = vld [vmem:[#allocation14_spill] sm:$0xff] }
 0x173   :  { %v12046_v52 = vand.u32 4294901760, %v12045_v23 }
 0x174   :  { %6087 = vmatpush1.bf16.msra.mxu1 %v12034_v10  ;;  %v12047_v10 = vld [vmem:[#allocation16_spill] sm:$0xff] }
 0x175   :  { %6089 = vmatprep.subr.bf16.mxu1 %v12035_v60  ;;  %5707 = vmatpush1.bf16.msra.mxu0 %v12036_v7  ;;  %v12048_v50 = vand.u32 4294901760, %v12047_v10  ;;  %v12050_v7 = vand.u32 4294901760, %v12049_v31  ;;  %v12062_v10 = vand.u32 4294901760, %v12061_v22  ;;  %v12063_v31 = vld [vmem:[#allocation27_spill] sm:$0xff] }
 0x176   :  { %5709 = vmatprep.subr.bf16.mxu0 %v12037_v59  ;;  %v12052_v59 = vand.u32 4294901760, %v12051_v16  ;;  %v12064_v16 = vand.u32 4294901760, %v12063_v31  ;;  %v12075_v22 = vld [vmem:[#allocation195_spill] sm:$0xff] }
 0x177   :  { %v6096_v60 = vpack.c.bf16 %v12048_v50, %v12046_v52 }
 0x178   :  { %6091 = vmatpush1.bf16.msra.mxu1 %v12042_v45  ;;  %v5714_v55 = vpack.c.bf16 %v12052_v59, %v12050_v7  ;;  %v5716_v45 = vpack.c.bf16 %v12056_v39, %v12054_v49  ;;  %v12065_v59 = vld [vmem:[#allocation28_spill] sm:$0xff]  ;;  %v12067_v7 = vld [vmem:[#allocation29_spill] sm:$0xff]  ;;  %v12070_v49 = vand.u32 4294901760, %v12069_v5 }
 0x179   :  { %6093 = vmatprep.subr.bf16.mxu1 %v12043_v21  ;;  %5711 = vmatpush1.bf16.msra.mxu0 %v12044_v54  ;;  %v12058_v21 = vld [vmem:[#allocation208_spill] sm:$0xff]  ;;  %v12059_v54 = vld [vmem:[#allocation21_spill] sm:$0xff]  ;;  %v12066_v52 = vand.u32 4294901760, %v12065_v59  ;;  %v12068_v19 = vand.u32 4294901760, %v12067_v7  ;;  %v12086_v7 = vld [vmem:[#allocation43_spill] sm:$0xff] }
 0x17a   :  { %5713 = vmatprep.subr.bf16.mxu0 %v5712_v48  ;;  %v12060_v23 = vand.u32 4294901760, %v12059_v54  ;;  %v12074_v54 = vand.u32 4294901760, %v12073_v41 }
 0x17b   :  { %v6100_v48 = vpack.c.bf16 %v12066_v52, %v12064_v16  ;;  %v5718_v39 = vpack.c.bf16 %v12070_v49, %v12068_v19  ;;  %v12087_v19 = vand.u32 4294901760, %v12086_v7 }
 0x17c   :  { %6095 = vmatpush1.bf16.msra.mxu1 %v12057_v26  ;;  %1172 = vmatmul.mubr.f32.vlgmr.msra.gmra.mrb[0].mxu0 %v12058_v21  ;;  %v6098_v50 = vpack.c.bf16 %v12062_v10, %v12060_v23  ;;  %v12071_v26 = vld [vmem:[#allocation36_spill] sm:$0xff]  ;;  %v12078_v23 = vld [vmem:[#allocation34_spill] sm:$0xff] }
 0x17d   :  { %6097 = vmatprep.subr.bf16.mxu1 %v6096_v60  ;;  %5715 = vmatpush1.bf16.msra.mxu0 %v5714_v55  ;;  %v12072_v42 = vand.u32 4294901760, %v12071_v26  ;;  %v12076_v60 = vld [vmem:[#allocation32_spill] sm:$0xff]  ;;  %v12079_v10 = vand.u32 4294901760, %v12078_v23  ;;  %v12092_v23 = vld [vmem:[#allocation45_spill] sm:$0xff] }
 0x17e   :  { %5717 = vmatprep.subr.bf16.mxu0 %v5716_v45  ;;  %1435 = vmatprep.mubr.f32.mxu0 %v12075_v22  ;;  %v12077_v55 = vand.u32 4294901760, %v12076_v60  ;;  %v12080_v45 = vld [vmem:[#allocation39_spill] sm:$0xff]  ;;  %v12082_v26 = vld [vmem:[#allocation40_spill] sm:$0xff] }
 0x17f   :  { %v5720_v40 = vpack.c.bf16 %v12074_v54, %v12072_v42  ;;  %2456 = vmatmul.mubr.f32.vlgmr.msra.gmra.mrb[0].mxu1 %v12058_v21  ;;  %v12081_v16 = vand.u32 4294901760, %v12080_v45  ;;  %v12083_v59 = vand.u32 4294901760, %v12082_v26  ;;  %v12084_v42 = vld [vmem:[#allocation42_spill] sm:$0xff]  ;;  %v12090_v54 = vld [vmem:[#allocation49_spill] sm:$0xff] }
 0x180   :  { %6099 = vmatpush1.bf16.msra.mxu1 %v6098_v50  ;;  %v6102_v31 = vpack.c.bf16 %v12079_v10, %v12077_v55  ;;  %2719 = vmatprep.mubr.f32.mxu1 %v12075_v22  ;;  %v12085_v52 = vand.u32 4294901760, %v12084_v42  ;;  %v12088_v50 = vld [vmem:[#allocation48_spill] sm:$0xff]  ;;  %v12091_v60 = vand.u32 4294901760, %v12090_v54  ;;  %v12106_v54 = vld [vmem:[#allocation61_spill] sm:$0xff] }
 0x181   :  { %6101 = vmatprep.subr.bf16.mxu1 %v6100_v48  ;;  %5719 = vmatpush1.bf16.msra.mxu0 %v5718_v39  ;;  %v6104_v41 = vpack.c.bf16 %v12083_v59, %v12081_v16  ;;  %v12089_v49 = vand.u32 4294901760, %v12088_v50  ;;  %v12093_v48 = vand.u32 4294901760, %v12092_v23  ;;  %v12094_v39 = vld [vmem:[#allocation46_spill] sm:$0xff]  ;;  %v12096_v16 = vld [vmem:[#allocation51_spill] sm:$0xff]  ;;  %v12098_v59 = vld [vmem:[#allocation52_spill] sm:$0xff] }
 0x182   :  { %v5722_v5 = vpack.c.bf16 %v12087_v19, %v12085_v52  ;;  %5721 = vmatprep.subr.bf16.mxu0 %v5720_v40  ;;  %v12095_v10 = vand.u32 4294901760, %v12094_v39  ;;  %v12097_v26 = vand.u32 4294901760, %v12096_v16  ;;  %v12099_v42 = vand.u32 4294901760, %v12098_v59  ;;  %v12100_v52 = vld [vmem:[#allocation53_spill] sm:$0xff]  ;;  %v12102_v19 = vld [vmem:[#allocation55_spill] sm:$0xff]  ;;  %v12112_v16 = vld [vmem:[#allocation62_spill] sm:$0xff] }
 0x183   :  { %v5724_v55 = vpack.c.bf16 %v12091_v60, %v12089_v49  ;;  %v12101_v40 = vand.u32 4294901760, %v12100_v52  ;;  %v12103_v50 = vand.u32 4294901760, %v12102_v19  ;;  %v12104_v49 = vld [vmem:[#allocation60_spill] sm:$0xff]  ;;  %v12107_v60 = vand.u32 4294901760, %v12106_v54  ;;  %v12118_v19 = vld [vmem:[#allocation67_spill] sm:$0xff]  ;;  %v12122_v54 = vld [vmem:[#allocation73_spill] sm:$0xff] }
 0x184   :  { %6103 = vmatpush1.bf16.msra.mxu1 %v6102_v31  ;;  %v6106_v45 = vpack.c.bf16 %v12095_v10, %v12093_v48  ;;  %v6108_v7 = vpack.c.bf16 %v12099_v42, %v12097_v26  ;;  %v12105_v31 = vand.u32 4294901760, %v12104_v49  ;;  %v12108_v48 = vld [vmem:[#allocation57_spill] sm:$0xff]  ;;  %v12113_v26 = vand.u32 4294901760, %v12112_v16  ;;  %v12114_v59 = vld [vmem:[#allocation64_spill] sm:$0xff]  ;;  %v12128_v16 = vld [vmem:[#allocation74_spill] sm:$0xff] }
 0x185   :  { %6105 = vmatprep.subr.bf16.mxu1 %v6104_v41  ;;  %5723 = vmatpush1.bf16.msra.mxu0 %v5722_v5  ;;  %v5726_v21 = vpack.c.bf16 %v12103_v50, %v12101_v40  ;;  %v12109_v41 = vand.u32 4294901760, %v12108_v48  ;;  %v12110_v5 = vld [vmem:[#allocation58_spill] sm:$0xff]  ;;  %v12115_v42 = vand.u32 4294901760, %v12114_v59  ;;  %v12119_v50 = vand.u32 4294901760, %v12118_v19  ;;  %v12130_v59 = vld [vmem:[#allocation76_spill] sm:$0xff]  ;;  %v12134_v19 = vld [vmem:[#allocation79_spill] sm:$0xff] }
 0x186   :  { %5725 = vmatprep.subr.bf16.mxu0 %v5724_v55  ;;  %v5728_v23 = vpack.c.bf16 %v12107_v60, %v12105_v31  ;;  %v12111_v39 = vand.u32 4294901760, %v12110_v5  ;;  %v12116_v40 = vld [vmem:[#allocation66_spill] sm:$0xff]  ;;  %v12120_v31 = vld [vmem:[#allocation72_spill] sm:$0xff]  ;;  %v12123_v60 = vand.u32 4294901760, %v12122_v54  ;;  %v12138_v54 = vld [vmem:[#allocation85_spill] sm:$0xff] }
 0x187   :  { %v6112_v52 = vpack.c.bf16 %v12115_v42, %v12113_v26  ;;  %v12117_v55 = vand.u32 4294901760, %v12116_v40  ;;  %v12129_v26 = vand.u32 4294901760, %v12128_v16  ;;  %v12131_v42 = vand.u32 4294901760, %v12130_v59  ;;  %v12144_v16 = vld [vmem:[#allocation86_spill] sm:$0xff]  ;;  %v12146_v59 = vld [vmem:[#allocation88_spill] sm:$0xff] }
 0x188   :  { %6107 = vmatpush1.bf16.msra.mxu1 %v6106_v45  ;;  %v6110_v10 = vpack.c.bf16 %v12111_v39, %v12109_v41  ;;  %v12121_v45 = vand.u32 4294901760, %v12120_v31  ;;  %v12124_v41 = vld [vmem:[#allocation69_spill] sm:$0xff] }
 0x189   :  { %6109 = vmatprep.subr.bf16.mxu1 %v6108_v7  ;;  %5727 = vmatpush1.bf16.msra.mxu0 %v5726_v21  ;;  %v5730_v49 = vpack.c.bf16 %v12119_v50, %v12117_v55  ;;  %v12125_v7 = vand.u32 4294901760, %v12124_v41  ;;  %v12126_v21 = vld [vmem:[#allocation70_spill] sm:$0xff]  ;;  %v6116_v40 = vpack.c.bf16 %v12131_v42, %v12129_v26  ;;  %v12135_v50 = vand.u32 4294901760, %v12134_v19  ;;  %v12150_v19 = vld [vmem:[#allocation91_spill] sm:$0xff] }
 0x18a   :  { %5729 = vmatprep.subr.bf16.mxu0 %v5728_v23  ;;  %v5732_v48 = vpack.c.bf16 %v12123_v60, %v12121_v45  ;;  %v12127_v5 = vand.u32 4294901760, %v12126_v21  ;;  %v12132_v55 = vld [vmem:[#allocation78_spill] sm:$0xff]  ;;  %v12136_v45 = vld [vmem:[#allocation84_spill] sm:$0xff]  ;;  %v12139_v60 = vand.u32 4294901760, %v12138_v54  ;;  %v12145_v26 = vand.u32 4294901760, %v12144_v16 }
 0x18b   :  { %v12133_v23 = vand.u32 4294901760, %v12132_v55  ;;  %v12147_v42 = vand.u32 4294901760, %v12146_v59 }
 0x18c   :  { %6111 = vmatpush1.bf16.msra.mxu1 %v6110_v10  ;;  %v6114_v39 = vpack.c.bf16 %v12127_v5, %v12125_v7  ;;  %v12137_v10 = vand.u32 4294901760, %v12136_v45  ;;  %v12140_v7 = vld [vmem:[#allocation81_spill] sm:$0xff] }
 0x18d   :  { %6113 = vmatprep.subr.bf16.mxu1 %v6112_v52  ;;  %5731 = vmatpush1.bf16.msra.mxu0 %v5730_v49  ;;  %v5734_v31 = vpack.c.bf16 %v12135_v50, %v12133_v23  ;;  %v12141_v52 = vand.u32 4294901760, %v12140_v7  ;;  %v12142_v49 = vld [vmem:[#allocation82_spill] sm:$0xff]  ;;  %v6120_v55 = vpack.c.bf16 %v12147_v42, %v12145_v26  ;;  %v12151_v50 = vand.u32 4294901760, %v12150_v19 }
 0x18e   :  { %5733 = vmatprep.subr.bf16.mxu0 %v5732_v48  ;;  %v5736_v41 = vpack.c.bf16 %v12139_v60, %v12137_v10  ;;  %v12143_v21 = vand.u32 4294901760, %v12142_v49  ;;  %v12148_v23 = vld [vmem:[#allocation90_spill] sm:$0xff]  ;;  %v12153_v10 = vld [vmem:[#allocation97_spill] sm:$0xff]  ;;  %v12158_v49 = vand.u32 4294901760, %v11920_v28  ;;  %v12164_v42 = vand.u32 4294901760, %v11926_v11 }
 0x18f   :  { %v12149_v48 = vand.u32 4294901760, %v12148_v23  ;;  %v12154_v54 = vand.u32 4294901760, %v12153_v10  ;;  %v12168_v23 = vand.u32 4294901760, %v11849_v38  ;;  %v12171_v11 = vand.u32 4294901760, %v11854_v33 }
 0x190   :  { %6115 = vmatpush1.bf16.msra.mxu1 %v6114_v39  ;;  %v6118_v5 = vpack.c.bf16 %v12143_v21, %v12141_v52  ;;  %v12152_v39 = vand.u32 4294901760, %v11916_v32  ;;  %v12159_v21 = vand.u32 4294901760, %v11921_v36  ;;  %v12161_v32 = vand.u32 4294901760, %v11923_v57 }
 0x191   :  { %6117 = vmatprep.subr.bf16.mxu1 %v6116_v40  ;;  %5735 = vmatpush1.bf16.msra.mxu0 %v5734_v31  ;;  %v5738_v45 = vpack.c.bf16 %v12151_v50, %v12149_v48  ;;  %v12155_v40 = vand.u32 4294901760, %v11918_v47  ;;  %v12156_v31 = vld [vmem:[#allocation94_spill] sm:$0xff]  ;;  %v12163_v47 = vand.u32 4294901760, %v11925_v24  ;;  %v12166_v36 = vand.u32 4294901760, %v11928_v30 }
 0x192   :  { %5737 = vmatprep.subr.bf16.mxu0 %v5736_v41  ;;  %v5740_v60 = vpack.c.bf16 %v12154_v54, %v12152_v39  ;;  %v12157_v7 = vand.u32 4294901760, %v12156_v31  ;;  %v6124_v16 = vpack.c.bf16 %v12159_v21, %v12158_v49  ;;  %v12160_v41 = vand.u32 4294901760, %v11922_v53  ;;  %v12181_v54 = vld [vmem:[#allocation130_spill] sm:$0xff]  ;;  %v12190_v49 = vld [vmem:[#allocation145_spill] sm:$0xff] }
 0x193   :  { %v12167_v53 = vand.u32 4294901760, %v11929_v17  ;;  %v12170_v24 = vand.u32 4294901760, %v11853_v18  ;;  %v12173_v50 = vand.u32 4294901760, %v11852_v44  ;;  %v12174_v17 = vand.u32 4294901760, %v11855_v56 }
 0x194   :  { %6119 = vmatpush1.bf16.msra.mxu1 %v6118_v5  ;;  %v6122_v52 = vpack.c.bf16 %v12157_v7, %v12155_v40  ;;  %v5742_v26 = vpack.c.bf16 %v12161_v32, %v12160_v41  ;;  %v12162_v5 = vand.u32 4294901760, %v11924_v1  ;;  %v12169_v1 = vand.u32 4294901760, %v11850_v2  ;;  %v12187_v7 = vld [vmem:[#allocation139_spill] sm:$0xff] }
 0x195   :  { %6121 = vmatprep.subr.bf16.mxu1 %v6120_v55  ;;  %5739 = vmatpush1.bf16.msra.mxu0 %v5738_v45  ;;  %v12165_v55 = vand.u32 4294901760, %v11927_v27  ;;  %v6128_v57 = vpack.c.bf16 %v12167_v53, %v12166_v36  ;;  %v5748_v19 = vpack.c.bf16 %v12171_v11, %v12170_v24  ;;  %v12172_v27 = vand.u32 4294901760, %v11851_v34  ;;  %v47_v36 = vld [vmem:[#allocation5 + $0x38] sm:$0xff] }
 0x196   :  { %5741 = vmatprep.subr.bf16.mxu0 %v5740_v60  ;;  %v5744_v59 = vpack.c.bf16 %v12163_v47, %v12162_v5  ;;  %v5746_v48 = vpack.c.bf16 %v12169_v1, %v12168_v23  ;;  %v12175_v38 = vand.u32 4294901760, %v11856_v51  ;;  %v12176_v45 = vand.u32 4294901760, %v11857_v63  ;;  %v12184_v63 = vld [vmem:[#allocation136_spill] sm:$0xff]  ;;  %v55_v11 = vld [vmem:[#allocation5 + $0x78] sm:$0xff] }
 0x197   :  { %v6126_v28 = vpack.c.bf16 %v12165_v55, %v12164_v42  ;;  %v6130_v30 = vpack.c.bf16 %v12173_v50, %v12172_v27  ;;  %v12177_v18 = vand.u32 4294901760, %v11858_v35  ;;  %v12178_v33 = vand.u32 4294901760, %v11861_v3  ;;  %v52_v27 = vld [vmem:[#allocation5 + $0x60] sm:$0xff] }
 0x198   :  { %6123 = vmatpush1.bf16.msra.mxu1 %v6122_v52  ;;  %v6132_v2 = vpack.c.bf16 %v12175_v38, %v12174_v17  ;;  %v12179_v34 = vand.u32 4294901760, %v11862_v4  ;;  %v12180_v44 = vand.u32 4294901760, %v11859_v58  ;;  %v12182_v60 = vand.u32 4294901760, %v12181_v54  ;;  %v12211_v38 = vld [vmem:[#allocation168_spill] sm:$0xff]  ;;  %v12221_v54 = vld [vmem:[#allocation175_spill] sm:$0xff] }
 0x199   :  { %6125 = vmatprep.subr.bf16.mxu1 %v6124_v16  ;;  %5743 = vmatpush1.bf16.msra.mxu0 %v5742_v26  ;;  %v5750_v39 = vpack.c.bf16 %v12177_v18, %v12176_v45  ;;  %v12183_v51 = vand.u32 4294901760, %v11863_v62  ;;  %v12185_v40 = vand.u32 4294901760, %v12184_v63  ;;  %v12186_v31 = vand.u32 4294901760, %v11865_v6  ;;  %v12195_v26 = vld [vmem:[#allocation148_spill] sm:$0xff]  ;;  %v12215_v18 = vld [vmem:[#allocation170_spill] sm:$0xff] }
 0x19a   :  { %5745 = vmatprep.subr.bf16.mxu0 %v5744_v59  ;;  %v5752_v10 = vpack.c.bf16 %v12179_v34, %v12178_v33  ;;  %v6134_v56 = vpack.c.bf16 %v12182_v60, %v12180_v44  ;;  %v12188_v3 = vand.u32 4294901760, %v12187_v7  ;;  %v12189_v4 = vand.u32 4294901760, %v11869_v20  ;;  %v12198_v59 = vld [vmem:[#allocation151_spill] sm:$0xff]  ;;  %v45_v20 = vld [vmem:[#allocation5 + $0x28] sm:$0xff]  ;;  %v12219_v44 = vld [vmem:[#allocation174_spill] sm:$0xff] }
 0x19b   :  { %v6136_v35 = vpack.c.bf16 %v12185_v40, %v12183_v51  ;;  %v12191_v58 = vand.u32 4294901760, %v12190_v49  ;;  %v12192_v16 = vand.u32 4294901760, %v11940_v29  ;;  %v12193_v41 = vand.u32 4294901760, %v11868_v12  ;;  %v12217_v33 = vld [vmem:[#allocation172_spill] sm:$0xff]  ;;  %v12225_v51 = vld [vmem:[#allocation178_spill] sm:$0xff]  ;;  %v54_v49 = vld [vmem:[#allocation5 + $0x70] sm:$0xff] }
 0x19c   :  { %6127 = vmatpush1.bf16.msra.mxu1 %v6126_v28  ;;  %v5754_v52 = vpack.c.bf16 %v12188_v3, %v12186_v31  ;;  %v12194_v32 = vand.u32 4294901760, %v11943_v9  ;;  %v12196_v5 = vand.u32 4294901760, %v12195_v26  ;;  %v12197_v47 = vand.u32 4294901760, %v11945_v15  ;;  %v53_v28 = vld [vmem:[#allocation5 + $0x68] sm:$0xff]  ;;  %v12231_v26 = vld [vmem:[#allocation182_spill] sm:$0xff] }
 0x19d   :  { %6129 = vmatprep.subr.bf16.mxu1 %v6128_v57  ;;  %5747 = vmatpush1.bf16.msra.mxu0 %v5746_v48  ;;  %v5756_v21 = vpack.c.bf16 %v12191_v58, %v12189_v4  ;;  %v6138_v62 = vpack.c.bf16 %v12193_v41, %v12192_v16  ;;  %v12199_v42 = vand.u32 4294901760, %v12198_v59  ;;  %v12200_v29 = vand.u32 4294901760, %v11949_v13  ;;  %v12203_v57 = vld [vmem:[#allocation157_spill] sm:$0xff]  ;;  %v12227_v58 = vld [vmem:[#allocation180_spill] sm:$0xff] }
 0x19e   :  { %5749 = vmatprep.subr.bf16.mxu0 %v5748_v19  ;;  %v6140_v6 = vpack.c.bf16 %v12196_v5, %v12194_v32  ;;  %v12201_v12 = vand.u32 4294901760, %v11948_v8  ;;  %v12202_v9 = vand.u32 4294901760, %v11877_v25  ;;  %v12204_v23 = vand.u32 4294901760, %v12203_v57  ;;  %v44_v19 = vld [vmem:[#allocation5 + $0x20] sm:$0xff]  ;;  %v46_v4 = vld [vmem:[#allocation5 + $0x30] sm:$0xff] }
 0x19f   :  { %v5758_v55 = vpack.c.bf16 %v12199_v42, %v12197_v47  ;;  %v12205_v15 = vand.u32 4294901760, %v11880_v61  ;;  %v12206_v48 = vand.u32 4294901760, %v11881_v0  ;;  %v12207_v50 = vand.u32 4294901760, %v11952_v14  ;;  %v12213_v61 = vld [vmem:[#allocation169_spill] sm:$0xff]  ;;  %v12233_v47 = vld [vmem:[#allocation184_spill] sm:$0xff] }
 0x1a0   :  { %6131 = vmatpush1.bf16.msra.mxu1 %v6130_v30  ;;  %v6142_v53 = vpack.c.bf16 %v12201_v12, %v12200_v29  ;;  %v5760_v1 = vpack.c.bf16 %v12204_v23, %v12202_v9  ;;  %v12208_v13 = vand.u32 4294901760, %v11829_v37  ;;  %v12209_v30 = vand.u32 4294901760, %v11956_v46  ;;  %v12229_v16 = vld [vmem:[#allocation181_spill] sm:$0xff]  ;;  %v12237_v12 = vld [vmem:[#allocation187_spill] sm:$0xff]  ;;  %v12241_v23 = vld [vmem:[#allocation190_spill] sm:$0xff] }
 0x1a1   :  { %6133 = vmatprep.subr.bf16.mxu1 %v6132_v2  ;;  %5751 = vmatpush1.bf16.msra.mxu0 %v5750_v39  ;;  %v6144_v24 = vpack.c.bf16 %v12206_v48, %v12205_v15  ;;  %v12210_v25 = vand.u32 4294901760, %v11955_v43  ;;  %v12212_v2 = vand.u32 4294901760, %v12211_v38  ;;  %v12214_v45 = vand.u32 4294901760, %v12213_v61 }
 0x1a2   :  { %5753 = vmatprep.subr.bf16.mxu0 %v5752_v10  ;;  %v5762_v8 = vpack.c.bf16 %v12208_v13, %v12207_v50  ;;  %v12216_v39 = vand.u32 4294901760, %v12215_v18  ;;  %v12218_v34 = vand.u32 4294901760, %v12217_v33  ;;  %v12220_v14 = vand.u32 4294901760, %v12219_v44  ;;  %v12243_v50 = vld [vmem:[#allocation192_spill] sm:$0xff]  ;;  %v12251_v33 = vld [vmem:[#allocation199_spill] sm:$0xff] }
 0x1a3   :  { %v6146_v17 = vpack.c.bf16 %v12210_v25, %v12209_v30  ;;  %v5764_v0 = vpack.c.bf16 %v12214_v45, %v12212_v2  ;;  %v12222_v37 = vand.u32 4294901760, %v12221_v54  ;;  %v12226_v43 = vand.u32 4294901760, %v12225_v51  ;;  %v12245_v30 = vld [vmem:[#allocation193_spill] sm:$0xff]  ;;  %v12247_v2 = vld [vmem:[#allocation194_spill] sm:$0xff]  ;;  %v61_v54 = vld [vmem:[#allocation5 + $0xa8] sm:$0xff] }
 0x1a4   :  { %6135 = vmatpush1.bf16.msra.mxu1 %v6134_v56  ;;  %v6148_v10 = vpack.c.bf16 %v12218_v34, %v12216_v39  ;;  %v12223_v56 = vld [vmem:[#allocation177_spill] sm:$0xff]  ;;  %v2864_v40 = vand.u32 4294901760, %v45_v20  ;;  %v4148_v31 = vand.u32 4294901760, %v47_v36  ;;  %v4152_v7 = vand.u32 4294901760, %v55_v11  ;;  %v12253_v34 = vld [vmem:[#allocation200_spill] sm:$0xff]  ;;  %v12257_v51 = vld [vmem:[#allocation203_spill] sm:$0xff] }
 0x1a5   :  { %6137 = vmatprep.subr.bf16.mxu1 %v6136_v35  ;;  %5755 = vmatpush1.bf16.msra.mxu0 %v5754_v52  ;;  %v5766_v60 = vpack.c.bf16 %v12222_v37, %v12220_v14  ;;  %v12224_v46 = vand.u32 4294901760, %v12223_v56  ;;  %v2868_v35 = vand.u32 4294901760, %v53_v28  ;;  %v2866_v3 = vand.u32 4294901760, %v44_v19  ;;  %v12249_v45 = vld [vmem:[#allocation197_spill] sm:$0xff]  ;;  %v69_v37 = vld [vmem:[#allocation5 + $0xe8] sm:$0xff]  ;;  %v12255_v56 = vld [vmem:[#allocation202_spill] sm:$0xff] }
 0x1a6   :  { %5757 = vmatprep.subr.bf16.mxu0 %v5756_v21  ;;  %v2870_v52 = vand.u32 4294901760, %v52_v27  ;;  %v12228_v21 = vand.u32 4294901760, %v12227_v58  ;;  %v12230_v41 = vand.u32 4294901760, %v12229_v16  ;;  %v12232_v5 = vand.u32 4294901760, %v12231_v26  ;;  %v63_v26 = vld [vmem:[#allocation5 + $0xb8] sm:$0xff] }
 0x1a7   :  { %v8668_v63 = vpack.c.bf16 %v12226_v43, %v12224_v46  ;;  %v12234_v59 = vand.u32 4294901760, %v12233_v47  ;;  %v12238_v9 = vand.u32 4294901760, %v12237_v12  ;;  %v12242_v15 = vand.u32 4294901760, %v12241_v23  ;;  %v60_v12 = vld [vmem:[#allocation5 + $0xa0] sm:$0xff] }
 0x1a8   :  { %6139 = vmatpush1.bf16.msra.mxu1 %v6138_v62  ;;  %v5768_v32 = vpack.c.bf16 %v12230_v41, %v12228_v21  ;;  %v12235_v62 = vld [vmem:[#allocation186_spill] sm:$0xff]  ;;  %v12244_v13 = vand.u32 4294901760, %v12243_v50  ;;  %v12246_v25 = vand.u32 4294901760, %v12245_v30  ;;  %v12248_v61 = vand.u32 4294901760, %v12247_v2  ;;  %v62_v50 = vld [vmem:[#allocation5 + $0xb0] sm:$0xff]  ;;  %v85_v30 = vld [vmem:[#allocation5 + $0x168] sm:$0xff] }
 0x1a9   :  { %6141 = vmatprep.subr.bf16.mxu1 %v6140_v6  ;;  %5759 = vmatpush1.bf16.msra.mxu0 %v5758_v55  ;;  %v8678_v42 = vpack.c.bf16 %v12234_v59, %v12232_v5  ;;  %v12236_v29 = vand.u32 4294901760, %v12235_v62  ;;  %v12239_v6 = vld [vmem:[#allocation189_spill] sm:$0xff]  ;;  %v12250_v18 = vand.u32 4294901760, %v12249_v45  ;;  %v12254_v44 = vand.u32 4294901760, %v12253_v34  ;;  %v71_v5 = vld [vmem:[#allocation5 + $0xf8] sm:$0xff]  ;;  %v84_v45 = vld [vmem:[#allocation5 + $0x160] sm:$0xff] }
 0x1aa   :  { %5761 = vmatprep.subr.bf16.mxu0 %v5760_v1  ;;  %v12240_v55 = vand.u32 4294901760, %v12239_v6  ;;  %v8696_v38 = vpack.c.bf16 %v12246_v25, %v12244_v13  ;;  %v12252_v1 = vand.u32 4294901760, %v12251_v33  ;;  %v12256_v46 = vand.u32 4294901760, %v12255_v56  ;;  %v77_v13 = vld [vmem:[#allocation5 + $0x128] sm:$0xff] }
 0x1ab   :  { %v8684_v57 = vpack.c.bf16 %v12238_v9, %v12236_v29  ;;  %v8702_v39 = vpack.c.bf16 %v12250_v18, %v12248_v61  ;;  %v12258_v43 = vand.u32 4294901760, %v12257_v51  ;;  %v8716_v21 = vpack.c.bf16 %v2868_v35, %v2864_v40  ;;  %v68_v9 = vld [vmem:[#allocation5 + $0xe0] sm:$0xff] }
 0x1ac   :  { %v8690_v48 = vpack.c.bf16 %v12242_v15, %v12240_v55  ;;  %v8708_v14 = vpack.c.bf16 %v12254_v44, %v12252_v1  ;;  %v4150_v16 = vand.u32 4294901760, %v46_v4  ;;  %v4154_v41 = vand.u32 4294901760, %v54_v49  ;;  %6143 = vmatpush1.bf16.msra.mxu1 %v6142_v53  ;;  %v70_v53 = vld [vmem:[#allocation5 + $0xf0] sm:$0xff]  ;;  %v76_v61 = vld [vmem:[#allocation5 + $0x120] sm:$0xff] }
 0x1ad   :  { %v8714_v58 = vpack.c.bf16 %v12258_v43, %v12256_v46  ;;  %12259 = vst [vmem:[#allocation163_spill] sm:$0xff] %v8716_v21  ;;  %v8718_v47 = vsub.f32 %v45_v20, %v2864_v40  ;;  %v8720_v59 = vsub.f32 %v53_v28, %v2868_v35  ;;  %v8722_v62 = vpack.c.bf16 %v4152_v7, %v4148_v31  ;;  %v78_v44 = vld [vmem:[#allocation5 + $0x130] sm:$0xff]  ;;  %v101_v43 = vld [vmem:[#allocation5 + $0x1e8] sm:$0xff] }
 0x1ae   :  { %v8724_v29 = vpack.c.bf16 %v2870_v52, %v2866_v3  ;;  %6145 = vmatprep.subr.bf16.mxu1 %v6144_v24  ;;  %5763 = vmatpush1.bf16.msra.mxu0 %v5762_v8  ;;  %v8726_v6 = vsub.f32 %v47_v36, %v4148_v31  ;;  %v8728_v55 = vsub.f32 %v55_v11, %v4152_v7  ;;  %v2872_v23 = vand.u32 4294901760, %v61_v54  ;;  %v79_v8 = vld [vmem:[#allocation5 + $0x138] sm:$0xff] }
 0x1af   :  { %12260 = vst [vmem:[#allocation114_spill] sm:$0xff] %v8718_v47  ;;  %12261 = vst [vmem:[#allocation115_spill] sm:$0xff] %v8720_v59  ;;  %v2876_v15 = vand.u32 4294901760, %v69_v37  ;;  %5765 = vmatprep.subr.bf16.mxu0 %v5764_v0  ;;  %v8730_v20 = vsub.f32 %v44_v19, %v2866_v3  ;;  %v8732_v28 = vsub.f32 %v52_v27, %v2870_v52  ;;  %v4156_v40 = vand.u32 4294901760, %v63_v26  ;;  %v87_v31 = vld [vmem:[#allocation5 + $0x178] sm:$0xff] }
 0x1b0   :  { %12262 = vst [vmem:[#allocation117_spill] sm:$0xff] %v8722_v62  ;;  %12263 = vst [vmem:[#allocation118_spill] sm:$0xff] %v8724_v29  ;;  %v4160_v35 = vand.u32 4294901760, %v71_v5  ;;  %v8734_v25 = vpack.c.bf16 %v4154_v41, %v4150_v16  ;;  %v8736_v24 = vsub.f32 %v46_v4, %v4150_v16  ;;  %v2874_v36 = vand.u32 4294901760, %v60_v12  ;;  %6147 = vmatpush1.bf16.msra.mxu1 %v6146_v17  ;;  %v95_v16 = vld [vmem:[#allocation5 + $0x1b8] sm:$0xff] }
 0x1b1   :  { %12264 = vst [vmem:[#allocation120_spill] sm:$0xff] %v8726_v6  ;;  %12265 = vst [vmem:[#allocation121_spill] sm:$0xff] %v8728_v55  ;;  %v2878_v11 = vand.u32 4294901760, %v68_v9  ;;  %v8738_v7 = vsub.f32 %v54_v49, %v4154_v41  ;;  %v8740_v0 = vsub.f32 %v61_v54, %v2872_v23  ;;  %v4158_v19 = vand.u32 4294901760, %v62_v50  ;;  %6149 = vmatprep.subr.bf16.mxu1 %v6148_v10  ;;  %v86_v54 = vld [vmem:[#allocation5 + $0x170] sm:$0xff]  ;;  %v103_v41 = vld [vmem:[#allocation5 + $0x1f8] sm:$0xff] }
 0x1b2   :  { %12266 = vst [vmem:[#allocation122_spill] sm:$0xff] %v8730_v20  ;;  %12267 = vst [vmem:[#allocation124_spill] sm:$0xff] %v8732_v28  ;;  %v4162_v27 = vand.u32 4294901760, %v70_v53  ;;  %5767 = vmatpush1.bf16.msra.mxu0 %v5766_v60  ;;  %v8742_v3 = vpack.c.bf16 %v2876_v15, %v2872_v23  ;;  %v8744_v52 = vsub.f32 %v69_v37, %v2876_v15  ;;  %v2880_v2 = vand.u32 4294901760, %v77_v13  ;;  %v93_v37 = vld [vmem:[#allocation5 + $0x1a8] sm:$0xff] }
 0x1b3   :  { %12268 = vst [vmem:[#allocation126_spill] sm:$0xff] %v8734_v25  ;;  %12269 = vst [vmem:[#allocation127_spill] sm:$0xff] %v8736_v24  ;;  %v2884_v4 = vand.u32 4294901760, %v85_v30  ;;  %5769 = vmatprep.subr.bf16.mxu0 %v5768_v32  ;;  %v8746_v18 = vpack.c.bf16 %v4160_v35, %v4156_v40  ;;  %v8748_v17 = vsub.f32 %v63_v26, %v4156_v40  ;;  %v4164_v49 = vand.u32 4294901760, %v79_v8  ;;  %v100_v40 = vld [vmem:[#allocation5 + $0x1e0] sm:$0xff] }
 0x1b4   :  { %12270 = vst [vmem:[#allocation129_spill] sm:$0xff] %v8738_v7  ;;  %12271 = vst [vmem:[#allocation132_spill] sm:$0xff] %v8740_v0  ;;  %v4168_v33 = vand.u32 4294901760, %v87_v31  ;;  %v8750_v1 = vsub.f32 %v71_v5, %v4160_v35  ;;  %v8752_v34 = vpack.c.bf16 %v2878_v11, %v2874_v36  ;;  %v8754_v10 = vsub.f32 %v60_v12, %v2874_v36 }
 0x1b5   :  { %12272 = vst [vmem:[#allocation133_spill] sm:$0xff] %v8742_v3  ;;  %12273 = vst [vmem:[#allocation134_spill] sm:$0xff] %v8744_v52  ;;  %v8756_v60 = vsub.f32 %v68_v9, %v2878_v11  ;;  %6151 = vmatpush1.bf16.msra.mxu1 %v8668_v63  ;;  %v8759_v32 = vpack.c.bf16 %v4162_v27, %v4158_v19  ;;  %v8761_v56 = vsub.f32 %v62_v50, %v4158_v19  ;;  %v92_v50 = vld [vmem:[#allocation5 + $0x1a0] sm:$0xff]  ;;  %v102_v11 = vld [vmem:[#allocation5 + $0x1f0] sm:$0xff] }
 0x1b6   :  { %12274 = vst [vmem:[#allocation138_spill] sm:$0xff] %v8746_v18  ;;  %12275 = vst [vmem:[#allocation142_spill] sm:$0xff] %v8748_v17  ;;  %v2882_v46 = vand.u32 4294901760, %v76_v61  ;;  %v2886_v51 = vand.u32 4294901760, %v84_v45  ;;  %6153 = vmatprep.subr.bf16.mxu1 %v8678_v42  ;;  %5771 = vmatpush1.bf16.msra.mxu0 %v8684_v57  ;;  %v8765_v26 = vsub.f32 %v70_v53, %v4162_v27  ;;  %v4166_v23 = vand.u32 4294901760, %v78_v44  ;;  %v94_v53 = vld [vmem:[#allocation5 + $0x1b0] sm:$0xff] }
 0x1b7   :  { %12276 = vst [vmem:[#allocation144_spill] sm:$0xff] %v8750_v1  ;;  %12277 = vst [vmem:[#allocation156_spill] sm:$0xff] %v8752_v34  ;;  %v8767_v5 = vpack.c.bf16 %v2884_v4, %v2880_v2  ;;  %v8769_v12 = vsub.f32 %v77_v13, %v2880_v2  ;;  %5773 = vmatprep.subr.bf16.mxu0 %v8696_v38  ;;  %v8772_v63 = vsub.f32 %v85_v30, %v2884_v4 }
 0x1b8   :  { %12278 = vst [vmem:[#allocation158_spill] sm:$0xff] %v8754_v10  ;;  %12279 = vst [vmem:[#allocation160_spill] sm:$0xff] %v8756_v60  ;;  %v8774_v9 = vpack.c.bf16 %v4168_v33, %v4164_v49  ;;  %v4170_v15 = vand.u32 4294901760, %v86_v54  ;;  %v2888_v35 = vand.u32 4294901760, %v93_v37  ;;  %v2892_v42 = vand.u32 4294901760, %v101_v43 }
 0x1b9   :  { %12280 = vst [vmem:[#allocation96_spill] sm:$0xff] %v8759_v32  ;;  %12281 = vst [vmem:[#allocation93_spill] sm:$0xff] %v8761_v56  ;;  %v4172_v36 = vand.u32 4294901760, %v95_v16  ;;  %v4176_v57 = vand.u32 4294901760, %v103_v41  ;;  %6155 = vmatpush1.bf16.msra.mxu1 %v8690_v48  ;;  %v8777_v13 = vsub.f32 %v79_v8, %v4164_v49  ;;  %v8779_v19 = vsub.f32 %v87_v31, %v4168_v33  ;;  %v117_v48 = vld [vmem:[#allocation5 + $0x268] sm:$0xff]  ;;  %v12293_v8 = vld [vmem:[#allocation11_spill] sm:$0xff] }
 0x1ba   :  { %12282 = vst [vmem:[#allocation98_spill] sm:$0xff] %v8765_v26  ;;  %12283 = vst [vmem:[#allocation100_spill] sm:$0xff] %v8767_v5  ;;  %v8781_v38 = vpack.c.bf16 %v2886_v51, %v2882_v46  ;;  %v8783_v30 = vsub.f32 %v76_v61, %v2882_v46  ;;  %6157 = vmatprep.subr.bf16.mxu1 %v8702_v39  ;;  %5775 = vmatpush1.bf16.msra.mxu0 %v8708_v14  ;;  %v2890_v4 = vand.u32 4294901760, %v92_v50  ;;  %v111_v46 = vld [vmem:[#allocation5 + $0x238] sm:$0xff] }
 0x1bb   :  { %12284 = vst [vmem:[#allocation102_spill] sm:$0xff] %v8769_v12  ;;  %12285 = vst [vmem:[#allocation103_spill] sm:$0xff] %v8772_v63  ;;  %v8787_v27 = vsub.f32 %v84_v45, %v2886_v51  ;;  %v8789_v2 = vsub.f32 %v78_v44, %v4166_v23  ;;  %v109_v63 = vld [vmem:[#allocation5 + $0x228] sm:$0xff]  ;;  %5777 = vmatprep.subr.bf16.mxu0 %v12293_v8  ;;  %v8792_v31 = vpack.c.bf16 %v4170_v15, %v4166_v23  ;;  %v119_v39 = vld [vmem:[#allocation5 + $0x278] sm:$0xff] }
 0x1bc   :  { %12286 = vst [vmem:[#allocation108_spill] sm:$0xff] %v8774_v9  ;;  %12287 = vst [vmem:[#allocation109_spill] sm:$0xff] %v8777_v13  ;;  %v2894_v9 = vand.u32 4294901760, %v100_v40  ;;  %v8794_v49 = vsub.f32 %v86_v54, %v4170_v15  ;;  %v4174_v61 = vand.u32 4294901760, %v94_v53  ;;  %v4178_v33 = vand.u32 4294901760, %v102_v11  ;;  %v108_v51 = vld [vmem:[#allocation5 + $0x220] sm:$0xff] }
 0x1bd   :  { %12288 = vst [vmem:[#allocation105_spill] sm:$0xff] %v8779_v19  ;;  %12289 = vst [vmem:[#allocation106_spill] sm:$0xff] %v8781_v38  ;;  %v8798_v14 = vsub.f32 %v93_v37, %v2888_v35  ;;  %v8800_v45 = vsub.f32 %v101_v43, %v2892_v42  ;;  %v8802_v44 = vpack.c.bf16 %v4176_v57, %v4172_v36  ;;  %6159 = vmatpush1.bf16.msra.mxu1 %v8714_v58  ;;  %v12300_v23 = vld [vmem:[#allocation205_spill] sm:$0xff]  ;;  %v12303_v37 = vld [vmem:[#allocation15_spill] sm:$0xff] }
 0x1be   :  { %12290 = vst [vmem:[#allocation110_spill] sm:$0xff] %v8783_v30  ;;  %12291 = vst [vmem:[#allocation112_spill] sm:$0xff] %v8787_v27  ;;  %v8796_v30 = vpack.c.bf16 %v2892_v42, %v2888_v35  ;;  %1437 = vmatmul.mubr.f32.vlgmr.msra.gmra.mrb[0].mxu0 %v12300_v23  ;;  %v8806_v54 = vsub.f32 %v95_v16, %v4172_v36  ;;  %v8808_v15 = vsub.f32 %v103_v41, %v4176_v57  ;;  %v110_v27 = vld [vmem:[#allocation5 + $0x230] sm:$0xff] }
 0x1bf   :  { %12292 = vst [vmem:[#allocation141_spill] sm:$0xff] %v8789_v2  ;;  %12294 = vst [vmem:[#allocation146_spill] sm:$0xff] %v8792_v31  ;;  %v116_v2 = vld [vmem:[#allocation5 + $0x260] sm:$0xff]  ;;  %v2896_v8 = vand.u32 4294901760, %v109_v63  ;;  %v118_v19 = vld [vmem:[#allocation5 + $0x270] sm:$0xff]  ;;  %6161 = vmatprep.subr.bf16.mxu1 %v12303_v37  ;;  %v8812_v35 = vpack.c.bf16 %v2894_v9, %v2890_v4  ;;  %v8814_v42 = vsub.f32 %v92_v50, %v2890_v4  ;;  %v4184_v58 = vand.u32 4294901760, %v119_v39 }
 0x1c0   :  { %12295 = vst [vmem:[#allocation150_spill] sm:$0xff] %v8794_v49  ;;  %12296 = vst [vmem:[#allocation154_spill] sm:$0xff] %v8796_v30  ;;  %v2900_v49 = vand.u32 4294901760, %v117_v48  ;;  %v12304_v43 = vld [vmem:[#allocation17_spill] sm:$0xff]  ;;  %1572 = vmatprep.mubr.f32.mxu0 %v12075_v22  ;;  %v8818_v16 = vsub.f32 %v100_v40, %v2894_v9  ;;  %v8820_v41 = vpack.c.bf16 %v4178_v33, %v4174_v61  ;;  %v2898_v36 = vand.u32 4294901760, %v108_v51  ;;  %v133_v37 = vld [vmem:[#allocation5 + $0x2e8] sm:$0xff] }
 0x1c1   :  { %12297 = vst [vmem:[#allocation153_spill] sm:$0xff] %v8798_v14  ;;  %12298 = vst [vmem:[#allocation162_spill] sm:$0xff] %v8800_v45  ;;  %5779 = vmatpush1.bf16.msra.mxu0 %v12304_v43  ;;  %v4180_v45 = vand.u32 4294901760, %v111_v46  ;;  %v12307_v14 = vld [vmem:[#allocation24_spill] sm:$0xff]  ;;  %v2902_v57 = vand.u32 4294901760, %v116_v2  ;;  %2721 = vmatmul.mubr.f32.vlgmr.msra.gmra.mrb[0].mxu1 %v12300_v23  ;;  %v8823_v43 = vsub.f32 %v94_v53, %v4174_v61  ;;  %v4182_v4 = vand.u32 4294901760, %v110_v27 }
 0x1c2   :  { %12299 = vst [vmem:[#allocation166_spill] sm:$0xff] %v8802_v44  ;;  %12301 = vst [vmem:[#allocation165_spill] sm:$0xff] %v8806_v54  ;;  %5781 = vmatprep.subr.bf16.mxu0 %v12307_v14  ;;  %v8825_v50 = vsub.f32 %v102_v11, %v4178_v33  ;;  %v127_v54 = vld [vmem:[#allocation5 + $0x2b8] sm:$0xff]  ;;  %2856 = vmatprep.mubr.f32.mxu1 %v12075_v22  ;;  %v8829_v9 = vpack.c.bf16 %v2900_v49, %v2896_v8  ;;  %v134_v22 = vld [vmem:[#allocation5 + $0x2f0] sm:$0xff] }
 0x1c3   :  { %12302 = vst [vmem:[#allocation12_spill] sm:$0xff] %v8808_v15  ;;  %12305 = vst [vmem:[#allocation13_spill] sm:$0xff] %v8812_v35  ;;  %v125_v15 = vld [vmem:[#allocation5 + $0x2a8] sm:$0xff]  ;;  %v135_v14 = vld [vmem:[#allocation5 + $0x2f8] sm:$0xff]  ;;  %v8831_v40 = vsub.f32 %v109_v63, %v2896_v8  ;;  %v8837_v11 = vpack.c.bf16 %v4184_v58, %v4180_v45  ;;  %v8839_v61 = vsub.f32 %v111_v46, %v4180_v45 }
 0x1c4   :  { %12306 = vst [vmem:[#allocation14_spill] sm:$0xff] %v8814_v42  ;;  %12308 = vst [vmem:[#allocation16_spill] sm:$0xff] %v8818_v16  ;;  %v4186_v42 = vand.u32 4294901760, %v118_v19  ;;  %v12312_v35 = vld [vmem:[#allocation20_spill] sm:$0xff]  ;;  %v8833_v16 = vsub.f32 %v117_v48, %v2900_v49  ;;  %v12316_v44 = vld [vmem:[#allocation26_spill] sm:$0xff]  ;;  %v2904_v33 = vand.u32 4294901760, %v125_v15  ;;  %v8842_v63 = vsub.f32 %v119_v39, %v4184_v58 }
 0x1c5   :  { %12309 = vst [vmem:[#allocation18_spill] sm:$0xff] %v8820_v41  ;;  %12310 = vst [vmem:[#allocation19_spill] sm:$0xff] %v8823_v43  ;;  %6163 = vmatpush1.bf16.msra.mxu1 %v12312_v35  ;;  %v124_v41 = vld [vmem:[#allocation5 + $0x2a0] sm:$0xff]  ;;  %v12317_v53 = vld [vmem:[#allocation30_spill] sm:$0xff]  ;;  %v8844_v48 = vpack.c.bf16 %v2902_v57, %v2898_v36  ;;  %v4188_v49 = vand.u32 4294901760, %v127_v54  ;;  %v4192_v8 = vand.u32 4294901760, %v135_v14  ;;  %v8852_v46 = vsub.f32 %v110_v27, %v4182_v4 }
 0x1c6   :  { %12311 = vst [vmem:[#allocation23_spill] sm:$0xff] %v8825_v50  ;;  %12313 = vst [vmem:[#allocation25_spill] sm:$0xff] %v8829_v9  ;;  %6165 = vmatprep.subr.bf16.mxu1 %v12316_v44  ;;  %5783 = vmatpush1.bf16.msra.mxu0 %v12317_v53  ;;  %v2908_v50 = vand.u32 4294901760, %v133_v37  ;;  %v132_v35 = vld [vmem:[#allocation5 + $0x2e0] sm:$0xff]  ;;  %v126_v43 = vld [vmem:[#allocation5 + $0x2b0] sm:$0xff]  ;;  %v8846_v44 = vsub.f32 %v108_v51, %v2898_v36  ;;  %v8848_v53 = vsub.f32 %v116_v2, %v2902_v57 }
 0x1c7   :  { %12314 = vst [vmem:[#allocation21_spill] sm:$0xff] %v8831_v40  ;;  %12315 = vst [vmem:[#allocation22_spill] sm:$0xff] %v8833_v16  ;;  %v12320_v31 = vld [vmem:[#allocation35_spill] sm:$0xff]  ;;  %v8850_v16 = vpack.c.bf16 %v4186_v42, %v4182_v4  ;;  %v141_v45 = vld [vmem:[#allocation5 + $0x328] sm:$0xff]  ;;  %v4190_v39 = vand.u32 4294901760, %v126_v43  ;;  %v4194_v58 = vand.u32 4294901760, %v134_v22  ;;  %v8857_v2 = vsub.f32 %v118_v19, %v4186_v42 }
 0x1c8   :  { %12318 = vst [vmem:[#allocation27_spill] sm:$0xff] %v8837_v11  ;;  %12319 = vst [vmem:[#allocation28_spill] sm:$0xff] %v8839_v61  ;;  %5785 = vmatprep.subr.bf16.mxu0 %v12320_v31  ;;  %v149_v61 = vld [vmem:[#allocation5 + $0x368] sm:$0xff]  ;;  %v12327_v40 = vld [vmem:[#allocation33_spill] sm:$0xff]  ;;  %v2906_v11 = vand.u32 4294901760, %v124_v41  ;;  %v2910_v31 = vand.u32 4294901760, %v132_v35  ;;  %v8859_v36 = vpack.c.bf16 %v2908_v50, %v2904_v33  ;;  %v8861_v27 = vsub.f32 %v125_v15, %v2904_v33 }
 0x1c9   :  { %12321 = vst [vmem:[#allocation29_spill] sm:$0xff] %v8842_v63  ;;  %12322 = vst [vmem:[#allocation31_spill] sm:$0xff] %v8844_v48  ;;  %6167 = vmatpush1.bf16.msra.mxu1 %v12327_v40  ;;  %v143_v63 = vld [vmem:[#allocation5 + $0x338] sm:$0xff]  ;;  %v12329_v51 = vld [vmem:[#allocation41_spill] sm:$0xff]  ;;  %v8864_v4 = vsub.f32 %v133_v37, %v2908_v50  ;;  %v8866_v40 = vpack.c.bf16 %v4192_v8, %v4188_v49  ;;  %v8868_v13 = vsub.f32 %v127_v54, %v4188_v49 }
 0x1ca   :  { %12323 = vst [vmem:[#allocation36_spill] sm:$0xff] %v8846_v44  ;;  %12324 = vst [vmem:[#allocation37_spill] sm:$0xff] %v8848_v53  ;;  %v151_v48 = vld [vmem:[#allocation5 + $0x378] sm:$0xff]  ;;  %5787 = vmatpush1.bf16.msra.mxu0 %v12329_v51  ;;  %v12333_v57 = vld [vmem:[#allocation47_spill] sm:$0xff]  ;;  %v2916_v53 = vand.u32 4294901760, %v149_v61  ;;  %v4196_v19 = vand.u32 4294901760, %v143_v63  ;;  %v8873_v33 = vpack.c.bf16 %v2910_v31, %v2906_v11  ;;  %v8875_v37 = vsub.f32 %v124_v41, %v2906_v11 }
 0x1cb   :  { %12325 = vst [vmem:[#allocation32_spill] sm:$0xff] %v8850_v16  ;;  %12326 = vst [vmem:[#allocation34_spill] sm:$0xff] %v8852_v46  ;;  %v12328_v9 = vld [vmem:[#allocation38_spill] sm:$0xff]  ;;  %5789 = vmatprep.subr.bf16.mxu0 %v12333_v57  ;;  %v2912_v46 = vand.u32 4294901760, %v141_v45  ;;  %v140_v44 = vld [vmem:[#allocation5 + $0x320] sm:$0xff]  ;;  %v4200_v42 = vand.u32 4294901760, %v151_v48  ;;  %v8877_v50 = vsub.f32 %v132_v35, %v2910_v31  ;;  %v8879_v57 = vpack.c.bf16 %v4194_v58, %v4190_v39 }
 0x1cc   :  { %6169 = vmatprep.subr.bf16.mxu1 %v12328_v9  ;;  %12330 = vst [vmem:[#allocation39_spill] sm:$0xff] %v8857_v2  ;;  %12331 = vst [vmem:[#allocation40_spill] sm:$0xff] %v8859_v36  ;;  %v148_v16 = vld [vmem:[#allocation5 + $0x360] sm:$0xff]  ;;  %v8870_v9 = vsub.f32 %v135_v14, %v4192_v8  ;;  %v142_v51 = vld [vmem:[#allocation5 + $0x330] sm:$0xff]  ;;  %v8883_v14 = vsub.f32 %v126_v43, %v4190_v39  ;;  %v8885_v49 = vsub.f32 %v134_v22, %v4194_v58 }
 0x1cd   :  { %12332 = vst [vmem:[#allocation42_spill] sm:$0xff] %v8861_v27  ;;  %12334 = vst [vmem:[#allocation43_spill] sm:$0xff] %v8864_v4  ;;  %v150_v2 = vld [vmem:[#allocation5 + $0x370] sm:$0xff]  ;;  %v12338_v15 = vld [vmem:[#allocation44_spill] sm:$0xff]  ;;  %v2914_v8 = vand.u32 4294901760, %v140_v44  ;;  %v8888_v11 = vpack.c.bf16 %v2916_v53, %v2912_v46  ;;  %v8890_v35 = vsub.f32 %v141_v45, %v2912_v46  ;;  %v4198_v31 = vand.u32 4294901760, %v142_v51 }
 0x1ce   :  { %12335 = vst [vmem:[#allocation48_spill] sm:$0xff] %v8866_v40  ;;  %12336 = vst [vmem:[#allocation49_spill] sm:$0xff] %v8868_v13  ;;  %6171 = vmatpush1.bf16.msra.mxu1 %v12338_v15  ;;  %v157_v4 = vld [vmem:[#allocation5 + $0x3a8] sm:$0xff]  ;;  %v12343_v27 = vld [vmem:[#allocation50_spill] sm:$0xff]  ;;  %v8896_v43 = vsub.f32 %v143_v63, %v4196_v19  ;;  %v8898_v22 = vsub.f32 %v151_v48, %v4200_v42 }
 0x1cf   :  { %12337 = vst [vmem:[#allocation45_spill] sm:$0xff] %v8870_v9  ;;  %12339 = vst [vmem:[#allocation46_spill] sm:$0xff] %v8873_v33  ;;  %6173 = vmatprep.subr.bf16.mxu1 %v12343_v27  ;;  %v12344_v54 = vld [vmem:[#allocation54_spill] sm:$0xff]  ;;  %v2918_v9 = vand.u32 4294901760, %v148_v16  ;;  %v165_v15 = vld [vmem:[#allocation5 + $0x3e8] sm:$0xff]  ;;  %v8892_v27 = vsub.f32 %v149_v61, %v2916_v53  ;;  %v8905_v63 = vsub.f32 %v140_v44, %v2914_v8 }
 0x1d0   :  { %12340 = vst [vmem:[#allocation51_spill] sm:$0xff] %v8875_v37  ;;  %12341 = vst [vmem:[#allocation52_spill] sm:$0xff] %v8877_v50  ;;  %5791 = vmatpush1.bf16.msra.mxu0 %v12344_v54  ;;  %v159_v13 = vld [vmem:[#allocation5 + $0x3b8] sm:$0xff]  ;;  %v12347_v41 = vld [vmem:[#allocation59_spill] sm:$0xff]  ;;  %v4202_v50 = vand.u32 4294901760, %v150_v2  ;;  %v8894_v54 = vpack.c.bf16 %v4200_v42, %v4196_v19 }
 0x1d1   :  { %12342 = vst [vmem:[#allocation53_spill] sm:$0xff] %v8879_v57  ;;  %12345 = vst [vmem:[#allocation55_spill] sm:$0xff] %v8883_v14  ;;  %v167_v33 = vld [vmem:[#allocation5 + $0x3f8] sm:$0xff]  ;;  %5793 = vmatprep.subr.bf16.mxu0 %v12347_v41  ;;  %v156_v39 = vld [vmem:[#allocation5 + $0x3a0] sm:$0xff]  ;;  %v2920_v14 = vand.u32 4294901760, %v157_v4  ;;  %v2924_v41 = vand.u32 4294901760, %v165_v15  ;;  %v8903_v53 = vpack.c.bf16 %v2918_v9, %v2914_v8  ;;  %v8907_v48 = vsub.f32 %v148_v16, %v2918_v9 }
 0x1d2   :  { %12346 = vst [vmem:[#allocation60_spill] sm:$0xff] %v8885_v49  ;;  %12348 = vst [vmem:[#allocation61_spill] sm:$0xff] %v8888_v11  ;;  %v164_v58 = vld [vmem:[#allocation5 + $0x3e0] sm:$0xff]  ;;  %v12354_v49 = vld [vmem:[#allocation56_spill] sm:$0xff]  ;;  %v4204_v37 = vand.u32 4294901760, %v159_v13  ;;  %v4208_v57 = vand.u32 4294901760, %v167_v33  ;;  %v8914_v40 = vsub.f32 %v150_v2, %v4202_v50 }
 0x1d3   :  { %12349 = vst [vmem:[#allocation57_spill] sm:$0xff] %v8890_v35  ;;  %12350 = vst [vmem:[#allocation58_spill] sm:$0xff] %v8892_v27  ;;  %6175 = vmatpush1.bf16.msra.mxu1 %v12354_v49  ;;  %v158_v46 = vld [vmem:[#allocation5 + $0x3b0] sm:$0xff]  ;;  %v12355_v35 = vld [vmem:[#allocation63_spill] sm:$0xff]  ;;  %v8910_v49 = vpack.c.bf16 %v4202_v50, %v4198_v31  ;;  %v2926_v27 = vand.u32 4294901760, %v164_v58  ;;  %v8919_v9 = vpack.c.bf16 %v2924_v41, %v2920_v14 }
 0x1d4   :  { %12351 = vst [vmem:[#allocation62_spill] sm:$0xff] %v8894_v54  ;;  %12352 = vst [vmem:[#allocation64_spill] sm:$0xff] %v8896_v43  ;;  %v166_v45 = vld [vmem:[#allocation5 + $0x3f0] sm:$0xff]  ;;  %6177 = vmatprep.subr.bf16.mxu1 %v12355_v35  ;;  %v173_v19 = vld [vmem:[#allocation5 + $0x428] sm:$0xff]  ;;  %v2922_v43 = vand.u32 4294901760, %v156_v39  ;;  %v4206_v44 = vand.u32 4294901760, %v158_v46 }
 0x1d5   :  { %12353 = vst [vmem:[#allocation66_spill] sm:$0xff] %v8898_v22  ;;  %v12356_v61 = vld [vmem:[#allocation65_spill] sm:$0xff]  ;;  %12357 = vst [vmem:[#allocation67_spill] sm:$0xff] %v8903_v53  ;;  %v12360_v42 = vld [vmem:[#allocation71_spill] sm:$0xff]  ;;  %v8912_v22 = vsub.f32 %v142_v51, %v4198_v31  ;;  %v4210_v8 = vand.u32 4294901760, %v166_v45  ;;  %v8925_v51 = vsub.f32 %v159_v13, %v4204_v37 }
 0x1d6   :  { %5795 = vmatpush1.bf16.msra.mxu0 %v12356_v61  ;;  %12358 = vst [vmem:[#allocation72_spill] sm:$0xff] %v8905_v63  ;;  %12359 = vst [vmem:[#allocation73_spill] sm:$0xff] %v8907_v48  ;;  %v181_v54 = vld [vmem:[#allocation5 + $0x468] sm:$0xff]  ;;  %v175_v11 = vld [vmem:[#allocation5 + $0x438] sm:$0xff]  ;;  %v8916_v61 = vsub.f32 %v157_v4, %v2920_v14  ;;  %v8923_v48 = vpack.c.bf16 %v4208_v57, %v4204_v37  ;;  %v2928_v4 = vand.u32 4294901760, %v173_v19 }
 0x1d7   :  { %5797 = vmatprep.subr.bf16.mxu0 %v12360_v42  ;;  %12361 = vst [vmem:[#allocation69_spill] sm:$0xff] %v8910_v49  ;;  %12362 = vst [vmem:[#allocation70_spill] sm:$0xff] %v8912_v22  ;;  %v183_v35 = vld [vmem:[#allocation5 + $0x478] sm:$0xff]  ;;  %v12365_v16 = vld [vmem:[#allocation68_spill] sm:$0xff]  ;;  %v8921_v42 = vsub.f32 %v165_v15, %v2924_v41  ;;  %v2932_v50 = vand.u32 4294901760, %v181_v54  ;;  %v8930_v15 = vsub.f32 %v167_v33, %v4208_v57 }
 0x1d8   :  { %12363 = vst [vmem:[#allocation74_spill] sm:$0xff] %v8914_v40  ;;  %12364 = vst [vmem:[#allocation76_spill] sm:$0xff] %v8916_v61  ;;  %6179 = vmatpush1.bf16.msra.mxu1 %v12365_v16  ;;  %v172_v31 = vld [vmem:[#allocation5 + $0x420] sm:$0xff]  ;;  %v12371_v2 = vld [vmem:[#allocation77_spill] sm:$0xff]  ;;  %v4212_v61 = vand.u32 4294901760, %v175_v11  ;;  %v4216_v40 = vand.u32 4294901760, %v183_v35  ;;  %v8932_v41 = vpack.c.bf16 %v2926_v27, %v2922_v43  ;;  %v8934_v13 = vsub.f32 %v156_v39, %v2922_v43 }
 0x1d9   :  { %12366 = vst [vmem:[#allocation78_spill] sm:$0xff] %v8919_v9  ;;  %12367 = vst [vmem:[#allocation79_spill] sm:$0xff] %v8921_v42  ;;  %v180_v22 = vld [vmem:[#allocation5 + $0x460] sm:$0xff]  ;;  %v174_v49 = vld [vmem:[#allocation5 + $0x430] sm:$0xff]  ;;  %v8936_v37 = vsub.f32 %v164_v58, %v2926_v27  ;;  %v2930_v42 = vand.u32 4294901760, %v172_v31  ;;  %v8943_v33 = vsub.f32 %v166_v45, %v4210_v8  ;;  %v8945_v57 = vsub.f32 %v173_v19, %v2928_v4 }
 0x1da   :  { %12368 = vst [vmem:[#allocation84_spill] sm:$0xff] %v8923_v48  ;;  %12369 = vst [vmem:[#allocation85_spill] sm:$0xff] %v8925_v51  ;;  %v12370_v63 = vld [vmem:[#allocation75_spill] sm:$0xff]  ;;  %5799 = vmatpush1.bf16.msra.mxu0 %v12371_v2  ;;  %v182_v16 = vld [vmem:[#allocation5 + $0x470] sm:$0xff]  ;;  %v8940_v2 = vsub.f32 %v158_v46, %v4206_v44  ;;  %v2934_v48 = vand.u32 4294901760, %v180_v22  ;;  %v4214_v43 = vand.u32 4294901760, %v174_v49  ;;  %v8951_v46 = vsub.f32 %v181_v54, %v2932_v50 }
 0x1db   :  { %6181 = vmatprep.subr.bf16.mxu1 %v12370_v63  ;;  %v12372_v14 = vld [vmem:[#allocation83_spill] sm:$0xff]  ;;  %12373 = vst [vmem:[#allocation81_spill] sm:$0xff] %v8930_v15  ;;  %12374 = vst [vmem:[#allocation82_spill] sm:$0xff] %v8932_v41  ;;  %v189_v51 = vld [vmem:[#allocation5 + $0x4a8] sm:$0xff]  ;;  %v8938_v63 = vpack.c.bf16 %v4210_v8, %v4206_v44  ;;  %v4218_v39 = vand.u32 4294901760, %v182_v16  ;;  %v8953_v44 = vpack.c.bf16 %v4216_v40, %v4212_v61 }
 0x1dc   :  { %5801 = vmatprep.subr.bf16.mxu0 %v12372_v14  ;;  %12375 = vst [vmem:[#allocation86_spill] sm:$0xff] %v8934_v13  ;;  %12376 = vst [vmem:[#allocation88_spill] sm:$0xff] %v8936_v37  ;;  %v197_v9 = vld [vmem:[#allocation5 + $0x4e8] sm:$0xff]  ;;  %v191_v53 = vld [vmem:[#allocation5 + $0x4b8] sm:$0xff]  ;;  %v8949_v14 = vpack.c.bf16 %v2932_v50, %v2928_v4  ;;  %v8956_v15 = vsub.f32 %v175_v11, %v4212_v61  ;;  %v8960_v4 = vpack.c.bf16 %v2934_v48, %v2930_v42 }
 0x1dd   :  { %12377 = vst [vmem:[#allocation90_spill] sm:$0xff] %v8938_v63  ;;  %12378 = vst [vmem:[#allocation91_spill] sm:$0xff] %v8940_v2  ;;  %v199_v36 = vld [vmem:[#allocation5 + $0x4f8] sm:$0xff]  ;;  %v12379_v30 = vld [vmem:[#allocation80_spill] sm:$0xff]  ;;  %v2940_v45 = vand.u32 4294901760, %v197_v9  ;;  %v4220_v19 = vand.u32 4294901760, %v191_v53  ;;  %v8962_v54 = vsub.f32 %v172_v31, %v2930_v42 }
 0x1de   :  { %6183 = vmatpush1.bf16.msra.mxu1 %v12379_v30  ;;  %12380 = vst [vmem:[#allocation97_spill] sm:$0xff] %v8943_v33  ;;  %12381 = vst [vmem:[#allocation94_spill] sm:$0xff] %v8945_v57  ;;  %v12382_v27 = vld [vmem:[#allocation87_spill] sm:$0xff]  ;;  %v12383_v58 = vld [vmem:[#allocation89_spill] sm:$0xff]  ;;  %v2936_v30 = vand.u32 4294901760, %v189_v51  ;;  %v4224_v8 = vand.u32 4294901760, %v199_v36 }
 0x1df   :  { %6185 = vmatprep.subr.bf16.mxu1 %v12382_v27  ;;  %5803 = vmatpush1.bf16.msra.mxu0 %v12383_v58  ;;  %12384 = vst [vmem:[#allocation130_spill] sm:$0xff] %v8949_v14  ;;  %12385 = vst [vmem:[#allocation136_spill] sm:$0xff] %v8951_v46  ;;  %v188_v2 = vld [vmem:[#allocation5 + $0x4a0] sm:$0xff]  ;;  %v190_v57 = vld [vmem:[#allocation5 + $0x4b0] sm:$0xff]  ;;  %v8958_v27 = vsub.f32 %v183_v35, %v4216_v40  ;;  %v8965_v58 = vsub.f32 %v180_v22, %v2934_v48 }
 0x1e0   :  { %12386 = vst [vmem:[#allocation139_spill] sm:$0xff] %v8953_v44  ;;  %v196_v37 = vld [vmem:[#allocation5 + $0x4e0] sm:$0xff]  ;;  %v198_v33 = vld [vmem:[#allocation5 + $0x4f0] sm:$0xff]  ;;  %12388 = vst [vmem:[#allocation145_spill] sm:$0xff] %v8956_v15  ;;  %v8967_v46 = vpack.c.bf16 %v4218_v39, %v4214_v43  ;;  %v8971_v40 = vsub.f32 %v174_v49, %v4214_v43  ;;  %v8973_v35 = vsub.f32 %v182_v16, %v4218_v39  ;;  %v4222_v61 = vand.u32 4294901760, %v190_v57 }
 0x1e1   :  { %v12387_v13 = vld [vmem:[#allocation95_spill] sm:$0xff]  ;;  %12389 = vst [vmem:[#allocation148_spill] sm:$0xff] %v8958_v27  ;;  %12390 = vst [vmem:[#allocation151_spill] sm:$0xff] %v8960_v4  ;;  %v12392_v50 = vld [vmem:[#allocation92_spill] sm:$0xff]  ;;  %v2942_v44 = vand.u32 4294901760, %v196_v37  ;;  %v4226_v42 = vand.u32 4294901760, %v198_v33  ;;  %v8976_v48 = vpack.c.bf16 %v2940_v45, %v2936_v30  ;;  %v8982_v27 = vpack.c.bf16 %v4224_v8, %v4220_v19 }
 0x1e2   :  { %5805 = vmatprep.subr.bf16.mxu0 %v12387_v13  ;;  %12391 = vst [vmem:[#allocation157_spill] sm:$0xff] %v8962_v54  ;;  %6187 = vmatpush1.bf16.msra.mxu1 %v12392_v50  ;;  %12393 = vst [vmem:[#allocation168_spill] sm:$0xff] %v8965_v58  ;;  %v2938_v13 = vand.u32 4294901760, %v188_v2  ;;  %v205_v63 = vld [vmem:[#allocation5 + $0x528] sm:$0xff]  ;;  %v12395_v41 = vld [vmem:[#allocation99_spill] sm:$0xff]  ;;  %v8978_v58 = vsub.f32 %v189_v51, %v2936_v30  ;;  %v8980_v54 = vsub.f32 %v197_v9, %v2940_v45 }
 0x1e3   :  { %12394 = vst [vmem:[#allocation169_spill] sm:$0xff] %v8967_v46  ;;  %v213_v14 = vld [vmem:[#allocation5 + $0x568] sm:$0xff]  ;;  %6189 = vmatprep.subr.bf16.mxu1 %v12395_v41  ;;  %v12396_v11 = vld [vmem:[#allocation101_spill] sm:$0xff]  ;;  %12397 = vst [vmem:[#allocation170_spill] sm:$0xff] %v8971_v40  ;;  %v8984_v49 = vsub.f32 %v191_v53, %v4220_v19  ;;  %v8986_v16 = vsub.f32 %v199_v36, %v4224_v8  ;;  %v2944_v43 = vand.u32 4294901760, %v205_v63 }
 0x1e4   :  { %5807 = vmatpush1.bf16.msra.mxu0 %v12396_v11  ;;  %12398 = vst [vmem:[#allocation172_spill] sm:$0xff] %v8973_v35  ;;  %v207_v31 = vld [vmem:[#allocation5 + $0x538] sm:$0xff]  ;;  %v12399_v22 = vld [vmem:[#allocation107_spill] sm:$0xff]  ;;  %12400 = vst [vmem:[#allocation174_spill] sm:$0xff] %v8976_v48  ;;  %v2948_v39 = vand.u32 4294901760, %v213_v14  ;;  %v8991_v51 = vsub.f32 %v188_v2, %v2938_v13  ;;  %v8995_v36 = vsub.f32 %v196_v37, %v2942_v44 }
 0x1e5   :  { %v215_v50 = vld [vmem:[#allocation5 + $0x578] sm:$0xff]  ;;  %5809 = vmatprep.subr.bf16.mxu0 %v12399_v22  ;;  %12401 = vst [vmem:[#allocation175_spill] sm:$0xff] %v8978_v58  ;;  %12402 = vst [vmem:[#allocation177_spill] sm:$0xff] %v8980_v54  ;;  %v204_v41 = vld [vmem:[#allocation5 + $0x520] sm:$0xff]  ;;  %v8989_v22 = vpack.c.bf16 %v2942_v44, %v2938_v13  ;;  %v4228_v9 = vand.u32 4294901760, %v207_v31  ;;  %v8997_v19 = vpack.c.bf16 %v4226_v42, %v4222_v61 }
 0x1e6   :  { %12403 = vst [vmem:[#allocation178_spill] sm:$0xff] %v8982_v27  ;;  %v212_v11 = vld [vmem:[#allocation5 + $0x560] sm:$0xff]  ;;  %12404 = vst [vmem:[#allocation180_spill] sm:$0xff] %v8984_v49  ;;  %v206_v35 = vld [vmem:[#allocation5 + $0x530] sm:$0xff]  ;;  %v4232_v30 = vand.u32 4294901760, %v215_v50  ;;  %v2946_v8 = vand.u32 4294901760, %v204_v41  ;;  %v9002_v2 = vsub.f32 %v198_v33, %v4226_v42  ;;  %v9004_v46 = vpack.c.bf16 %v2948_v39, %v2944_v43 }
 0x1e7   :  { %12405 = vst [vmem:[#allocation181_spill] sm:$0xff] %v8986_v16  ;;  %v214_v40 = vld [vmem:[#allocation5 + $0x570] sm:$0xff]  ;;  %v12406_v15 = vld [vmem:[#allocation104_spill] sm:$0xff]  ;;  %12407 = vst [vmem:[#allocation182_spill] sm:$0xff] %v8989_v22  ;;  %v2950_v16 = vand.u32 4294901760, %v212_v11  ;;  %v4230_v13 = vand.u32 4294901760, %v206_v35 }
 0x1e8   :  { %6191 = vmatpush1.bf16.msra.mxu1 %v12406_v15  ;;  %12408 = vst [vmem:[#allocation184_spill] sm:$0xff] %v8991_v51  ;;  %v221_v45 = vld [vmem:[#allocation5 + $0x5a8] sm:$0xff]  ;;  %v12409_v58 = vld [vmem:[#allocation111_spill] sm:$0xff]  ;;  %v12410_v53 = vld [vmem:[#allocation113_spill] sm:$0xff]  ;;  %v9000_v15 = vsub.f32 %v190_v57, %v4222_v61  ;;  %v4234_v51 = vand.u32 4294901760, %v214_v40  ;;  %v9013_v57 = vsub.f32 %v207_v31, %v4228_v9  ;;  %v9015_v33 = vsub.f32 %v215_v50, %v4232_v30 }
 0x1e9   :  { %v229_v54 = vld [vmem:[#allocation5 + $0x5e8] sm:$0xff]  ;;  %6193 = vmatprep.subr.bf16.mxu1 %v12409_v58  ;;  %5811 = vmatpush1.bf16.msra.mxu0 %v12410_v53  ;;  %12411 = vst [vmem:[#allocation186_spill] sm:$0xff] %v8995_v36  ;;  %12412 = vst [vmem:[#allocation187_spill] sm:$0xff] %v8997_v19  ;;  %v12413_v49 = vld [vmem:[#allocation119_spill] sm:$0xff]  ;;  %v9006_v58 = vsub.f32 %v205_v63, %v2944_v43  ;;  %v2952_v37 = vand.u32 4294901760, %v221_v45  ;;  %v9009_v19 = vsub.f32 %v213_v14, %v2948_v39 }
 0x1ea   :  { %5813 = vmatprep.subr.bf16.mxu0 %v12413_v49  ;;  %12414 = vst [vmem:[#allocation189_spill] sm:$0xff] %v9000_v15  ;;  %12415 = vst [vmem:[#allocation190_spill] sm:$0xff] %v9002_v2  ;;  %v223_v22 = vld [vmem:[#allocation5 + $0x5b8] sm:$0xff]  ;;  %v2956_v44 = vand.u32 4294901760, %v229_v54  ;;  %v220_v53 = vld [vmem:[#allocation5 + $0x5a0] sm:$0xff]  ;;  %v9011_v49 = vpack.c.bf16 %v4232_v30, %v4228_v9  ;;  %v9019_v63 = vpack.c.bf16 %v2950_v16, %v2946_v8 }
 0x1eb   :  { %v231_v27 = vld [vmem:[#allocation5 + $0x5f8] sm:$0xff]  ;;  %12416 = vst [vmem:[#allocation192_spill] sm:$0xff] %v9004_v46  ;;  %12417 = vst [vmem:[#allocation193_spill] sm:$0xff] %v9006_v58  ;;  %v12418_v36 = vld [vmem:[#allocation116_spill] sm:$0xff]  ;;  %v9021_v43 = vsub.f32 %v204_v41, %v2946_v8  ;;  %v4236_v58 = vand.u32 4294901760, %v223_v22  ;;  %v9024_v31 = vsub.f32 %v212_v11, %v2950_v16  ;;  %v9026_v50 = vpack.c.bf16 %v4234_v51, %v4230_v13 }
 0x1ec   :  { %6195 = vmatpush1.bf16.msra.mxu1 %v12418_v36  ;;  %12419 = vst [vmem:[#allocation194_spill] sm:$0xff] %v9009_v19  ;;  %12420 = vst [vmem:[#allocation197_spill] sm:$0xff] %v9011_v49  ;;  %v228_v61 = vld [vmem:[#allocation5 + $0x5e0] sm:$0xff]  ;;  %v222_v42 = vld [vmem:[#allocation5 + $0x5b0] sm:$0xff]  ;;  %v4240_v36 = vand.u32 4294901760, %v231_v27  ;;  %v9028_v9 = vsub.f32 %v206_v35, %v4230_v13  ;;  %v2954_v30 = vand.u32 4294901760, %v220_v53  ;;  %v9034_v41 = vsub.f32 %v221_v45, %v2952_v37 }
 0x1ed   :  { %12421 = vst [vmem:[#allocation199_spill] sm:$0xff] %v9013_v57  ;;  %12422 = vst [vmem:[#allocation200_spill] sm:$0xff] %v9015_v33  ;;  %v12423_v2 = vld [vmem:[#allocation123_spill] sm:$0xff]  ;;  %v12424_v15 = vld [vmem:[#allocation125_spill] sm:$0xff]  ;;  %v2958_v8 = vand.u32 4294901760, %v228_v61  ;;  %v9043_v45 = vsub.f32 %v223_v22, %v4236_v58 }
 0x1ee   :  { %6197 = vmatprep.subr.bf16.mxu1 %v12423_v2  ;;  %5815 = vmatpush1.bf16.msra.mxu0 %v12424_v15  ;;  %12425 = vst [vmem:[#allocation202_spill] sm:$0xff] %v9019_v63  ;;  %12426 = vst [vmem:[#allocation203_spill] sm:$0xff] %v9021_v43  ;;  %v230_v14 = vld [vmem:[#allocation5 + $0x5f0] sm:$0xff]  ;;  %v237_v39 = vld [vmem:[#allocation5 + $0x628] sm:$0xff]  ;;  %v9030_v2 = vsub.f32 %v214_v40, %v4234_v51  ;;  %v9032_v15 = vpack.c.bf16 %v2956_v44, %v2952_v37  ;;  %v4238_v63 = vand.u32 4294901760, %v222_v42 }
 0x1ef   :  { %v245_v19 = vld [vmem:[#allocation5 + $0x668] sm:$0xff]  ;;  %v12427_v49 = vld [vmem:[#allocation131_spill] sm:$0xff]  ;;  %12428 = vst [vmem:[#allocation11_spill] sm:$0xff] %v9024_v31  ;;  %12429 = vst [vmem:[#allocation15_spill] sm:$0xff] %v9026_v50  ;;  %v2960_v11 = vand.u32 4294901760, %v237_v39  ;;  %v9039_v40 = vsub.f32 %v229_v54, %v2956_v44  ;;  %v9041_v51 = vpack.c.bf16 %v4240_v36, %v4236_v58  ;;  %v9050_v48 = vpack.c.bf16 %v2958_v8, %v2954_v30 }
 0x1f0   :  { %5817 = vmatprep.subr.bf16.mxu0 %v12427_v49  ;;  %12430 = vst [vmem:[#allocation17_spill] sm:$0xff] %v9028_v9  ;;  %12431 = vst [vmem:[#allocation24_spill] sm:$0xff] %v9030_v2  ;;  %v239_v43 = vld [vmem:[#allocation5 + $0x638] sm:$0xff]  ;;  %v12434_v57 = vld [vmem:[#allocation128_spill] sm:$0xff]  ;;  %v4242_v49 = vand.u32 4294901760, %v230_v14  ;;  %v2964_v16 = vand.u32 4294901760, %v245_v19 }
 0x1f1   :  { %12432 = vst [vmem:[#allocation20_spill] sm:$0xff] %v9032_v15  ;;  %12433 = vst [vmem:[#allocation26_spill] sm:$0xff] %v9034_v41  ;;  %v247_v33 = vld [vmem:[#allocation5 + $0x678] sm:$0xff]  ;;  %6199 = vmatpush1.bf16.msra.mxu1 %v12434_v57  ;;  %v236_v31 = vld [vmem:[#allocation5 + $0x620] sm:$0xff]  ;;  %v9046_v41 = vsub.f32 %v231_v27, %v4240_v36  ;;  %v9048_v57 = vsub.f32 %v220_v53, %v2954_v30  ;;  %v4244_v2 = vand.u32 4294901760, %v239_v43 }
 0x1f2   :  { %v244_v50 = vld [vmem:[#allocation5 + $0x660] sm:$0xff]  ;;  %v12436_v13 = vld [vmem:[#allocation137_spill] sm:$0xff]  ;;  %12437 = vst [vmem:[#allocation30_spill] sm:$0xff] %v9039_v40  ;;  %12438 = vst [vmem:[#allocation35_spill] sm:$0xff] %v9041_v51  ;;  %v4248_v9 = vand.u32 4294901760, %v247_v33  ;;  %v2962_v54 = vand.u32 4294901760, %v236_v31  ;;  %v9055_v58 = vpack.c.bf16 %v4242_v49, %v4238_v63  ;;  %v9057_v27 = vsub.f32 %v222_v42, %v4238_v63 }
 0x1f3   :  { %v12435_v35 = vld [vmem:[#allocation135_spill] sm:$0xff]  ;;  %5819 = vmatpush1.bf16.msra.mxu0 %v12436_v13  ;;  %12439 = vst [vmem:[#allocation33_spill] sm:$0xff] %v9043_v45  ;;  %12441 = vst [vmem:[#allocation38_spill] sm:$0xff] %v9046_v41  ;;  %v238_v15 = vld [vmem:[#allocation5 + $0x630] sm:$0xff]  ;;  %v2966_v44 = vand.u32 4294901760, %v244_v50  ;;  %v9059_v53 = vsub.f32 %v230_v14, %v4242_v49  ;;  %v9061_v36 = vpack.c.bf16 %v2964_v16, %v2960_v11 }
 0x1f4   :  { %6201 = vmatprep.subr.bf16.mxu1 %v12435_v35  ;;  %v12440_v37 = vld [vmem:[#allocation143_spill] sm:$0xff]  ;;  %12442 = vst [vmem:[#allocation41_spill] sm:$0xff] %v9048_v57  ;;  %v246_v46 = vld [vmem:[#allocation5 + $0x670] sm:$0xff]  ;;  %12443 = vst [vmem:[#allocation47_spill] sm:$0xff] %v9050_v48  ;;  %v9052_v35 = vsub.f32 %v228_v61, %v2958_v8  ;;  %v9065_v8 = vsub.f32 %v237_v39, %v2960_v11  ;;  %v4246_v41 = vand.u32 4294901760, %v238_v15 }
 0x1f5   :  { %5821 = vmatprep.subr.bf16.mxu0 %v12440_v37  ;;  %v253_v13 = vld [vmem:[#allocation5 + $0x6a8] sm:$0xff]  ;;  %12446 = vst [vmem:[#allocation50_spill] sm:$0xff] %v9055_v58  ;;  %12447 = vst [vmem:[#allocation54_spill] sm:$0xff] %v9057_v27  ;;  %v255_v37 = vld [vmem:[#allocation5 + $0x6b8] sm:$0xff]  ;;  %v9070_v63 = vpack.c.bf16 %v4248_v9, %v4244_v2  ;;  %v9072_v14 = vsub.f32 %v239_v43, %v4244_v2  ;;  %v9076_v39 = vpack.c.bf16 %v2966_v44, %v2962_v54 }
 0x1f6   :  { %12444 = vst [vmem:[#allocation44_spill] sm:$0xff] %v9052_v35  ;;  %v261_v40 = vld [vmem:[#allocation5 + $0x6e8] sm:$0xff]  ;;  %12448 = vst [vmem:[#allocation59_spill] sm:$0xff] %v9059_v53  ;;  %v263_v57 = vld [vmem:[#allocation5 + $0x6f8] sm:$0xff]  ;;  %v9067_v35 = vsub.f32 %v245_v19, %v2964_v16  ;;  %v2968_v49 = vand.u32 4294901760, %v253_v13  ;;  %v4252_v19 = vand.u32 4294901760, %v255_v37 }
 0x1f7   :  { %v12445_v22 = vld [vmem:[#allocation140_spill] sm:$0xff]  ;;  %12449 = vst [vmem:[#allocation56_spill] sm:$0xff] %v9061_v36  ;;  %v12450_v30 = vld [vmem:[#allocation147_spill] sm:$0xff]  ;;  %v12451_v61 = vld [vmem:[#allocation149_spill] sm:$0xff]  ;;  %v2972_v53 = vand.u32 4294901760, %v261_v40  ;;  %v9074_v36 = vsub.f32 %v247_v33, %v4248_v9  ;;  %v4256_v11 = vand.u32 4294901760, %v263_v57  ;;  %v9087_v9 = vsub.f32 %v238_v15, %v4246_v41 }
 0x1f8   :  { %6203 = vmatpush1.bf16.msra.mxu1 %v12445_v22  ;;  %5823 = vmatpush1.bf16.msra.mxu0 %v12451_v61  ;;  %12452 = vst [vmem:[#allocation63_spill] sm:$0xff] %v9065_v8  ;;  %12453 = vst [vmem:[#allocation65_spill] sm:$0xff] %v9067_v35  ;;  %v4250_v22 = vand.u32 4294901760, %v246_v46  ;;  %v252_v45 = vld [vmem:[#allocation5 + $0x6a0] sm:$0xff]  ;;  %v254_v27 = vld [vmem:[#allocation5 + $0x6b0] sm:$0xff]  ;;  %v9079_v61 = vsub.f32 %v236_v31, %v2962_v54  ;;  %v9081_v35 = vsub.f32 %v244_v50, %v2966_v44 }
 0x1f9   :  { %6205 = vmatprep.subr.bf16.mxu1 %v12450_v30  ;;  %v260_v58 = vld [vmem:[#allocation5 + $0x6e0] sm:$0xff]  ;;  %12455 = vst [vmem:[#allocation71_spill] sm:$0xff] %v9070_v63  ;;  %12456 = vst [vmem:[#allocation68_spill] sm:$0xff] %v9072_v14  ;;  %v262_v30 = vld [vmem:[#allocation5 + $0x6f0] sm:$0xff]  ;;  %v9092_v54 = vpack.c.bf16 %v2972_v53, %v2968_v49  ;;  %v9094_v44 = vsub.f32 %v253_v13, %v2968_v49  ;;  %v9103_v51 = vsub.f32 %v263_v57, %v4256_v11 }
 0x1fa   :  { %v12454_v42 = vld [vmem:[#allocation155_spill] sm:$0xff]  ;;  %12457 = vst [vmem:[#allocation75_spill] sm:$0xff] %v9074_v36  ;;  %12458 = vst [vmem:[#allocation77_spill] sm:$0xff] %v9076_v39  ;;  %v12459_v16 = vld [vmem:[#allocation152_spill] sm:$0xff]  ;;  %v2974_v8 = vand.u32 4294901760, %v260_v58  ;;  %v9085_v33 = vpack.c.bf16 %v4250_v22, %v4246_v41  ;;  %v4254_v36 = vand.u32 4294901760, %v254_v27  ;;  %v9090_v50 = vsub.f32 %v246_v46, %v4250_v22 }
 0x1fb   :  { %5825 = vmatprep.subr.bf16.mxu0 %v12454_v42  ;;  %12460 = vst [vmem:[#allocation83_spill] sm:$0xff] %v9079_v61  ;;  %12461 = vst [vmem:[#allocation80_spill] sm:$0xff] %v9081_v35  ;;  %v2970_v42 = vand.u32 4294901760, %v252_v45  ;;  %v269_v43 = vld [vmem:[#allocation5 + $0x728] sm:$0xff]  ;;  %v12462_v14 = vld [vmem:[#allocation159_spill] sm:$0xff]  ;;  %v4258_v39 = vand.u32 4294901760, %v262_v30  ;;  %v9096_v35 = vsub.f32 %v261_v40, %v2972_v53 }
 0x1fc   :  { %6207 = vmatpush1.bf16.msra.mxu1 %v12459_v16  ;;  %v277_v2 = vld [vmem:[#allocation5 + $0x768] sm:$0xff]  ;;  %v12463_v63 = vld [vmem:[#allocation161_spill] sm:$0xff]  ;;  %12464 = vst [vmem:[#allocation87_spill] sm:$0xff] %v9085_v33  ;;  %12465 = vst [vmem:[#allocation89_spill] sm:$0xff] %v9087_v9  ;;  %v2976_v15 = vand.u32 4294901760, %v269_v43  ;;  %v9116_v57 = vsub.f32 %v254_v27, %v4254_v36 }
 0x1fd   :  { %6209 = vmatprep.subr.bf16.mxu1 %v12462_v14  ;;  %5827 = vmatpush1.bf16.msra.mxu0 %v12463_v63  ;;  %v271_v48 = vld [vmem:[#allocation5 + $0x738] sm:$0xff]  ;;  %v12466_v31 = vld [vmem:[#allocation167_spill] sm:$0xff]  ;;  %12467 = vst [vmem:[#allocation95_spill] sm:$0xff] %v9090_v50  ;;  %12468 = vst [vmem:[#allocation92_spill] sm:$0xff] %v9092_v54  ;;  %v9098_v14 = vpack.c.bf16 %v4256_v11, %v4252_v19  ;;  %v9100_v63 = vsub.f32 %v255_v37, %v4252_v19  ;;  %v2980_v41 = vand.u32 4294901760, %v277_v2 }
 0x1fe   :  { %v279_v16 = vld [vmem:[#allocation5 + $0x778] sm:$0xff]  ;;  %5829 = vmatprep.subr.bf16.mxu0 %v12466_v31  ;;  %12469 = vst [vmem:[#allocation99_spill] sm:$0xff] %v9094_v44  ;;  %12470 = vst [vmem:[#allocation101_spill] sm:$0xff] %v9096_v35  ;;  %v268_v9 = vld [vmem:[#allocation5 + $0x720] sm:$0xff]  ;;  %v9105_v46 = vpack.c.bf16 %v2974_v8, %v2970_v42  ;;  %v4260_v22 = vand.u32 4294901760, %v271_v48  ;;  %v9109_v37 = vsub.f32 %v252_v45, %v2970_v42 }
 0x1ff   :  { %12471 = vst [vmem:[#allocation107_spill] sm:$0xff] %v9098_v14  ;;  %12472 = vst [vmem:[#allocation104_spill] sm:$0xff] %v9100_v63  ;;  %v276_v61 = vld [vmem:[#allocation5 + $0x760] sm:$0xff]  ;;  %v12473_v33 = vld [vmem:[#allocation164_spill] sm:$0xff]  ;;  %v4264_v31 = vand.u32 4294901760, %v279_v16  ;;  %v9111_v19 = vsub.f32 %v260_v58, %v2974_v8  ;;  %v9113_v63 = vpack.c.bf16 %v4258_v39, %v4254_v36  ;;  %v9118_v11 = vsub.f32 %v262_v30, %v4258_v39 }
 0x200   :  { %6211 = vmatpush1.bf16.msra.mxu1 %v12473_v33  ;;  %12474 = vst [vmem:[#allocation111_spill] sm:$0xff] %v9103_v51  ;;  %12475 = vst [vmem:[#allocation113_spill] sm:$0xff] %v9105_v46  ;;  %v270_v13 = vld [vmem:[#allocation5 + $0x730] sm:$0xff]  ;;  %v12476_v40 = vld [vmem:[#allocation171_spill] sm:$0xff]  ;;  %v2978_v51 = vand.u32 4294901760, %v268_v9  ;;  %v2982_v44 = vand.u32 4294901760, %v276_v61  ;;  %v9120_v14 = vpack.c.bf16 %v2980_v41, %v2976_v15  ;;  %v9122_v45 = vsub.f32 %v269_v43, %v2976_v15 }
 0x201   :  { %v278_v49 = vld [vmem:[#allocation5 + $0x770] sm:$0xff]  ;;  %6213 = vmatprep.subr.bf16.mxu1 %v12476_v40  ;;  %12478 = vst [vmem:[#allocation119_spill] sm:$0xff] %v9109_v37  ;;  %12479 = vst [vmem:[#allocation116_spill] sm:$0xff] %v9111_v19  ;;  %v285_v35 = vld [vmem:[#allocation5 + $0x7a8] sm:$0xff]  ;;  %v4262_v58 = vand.u32 4294901760, %v270_v13  ;;  %v9127_v27 = vpack.c.bf16 %v4264_v31, %v4260_v22  ;;  %v9129_v36 = vsub.f32 %v271_v48, %v4260_v22 }
 0x202   :  { %v12477_v53 = vld [vmem:[#allocation173_spill] sm:$0xff]  ;;  %12480 = vst [vmem:[#allocation123_spill] sm:$0xff] %v9113_v63  ;;  %v12481_v33 = vld [vmem:[#allocation179_spill] sm:$0xff]  ;;  %12482 = vst [vmem:[#allocation125_spill] sm:$0xff] %v9116_v57  ;;  %v4266_v8 = vand.u32 4294901760, %v278_v49  ;;  %v9131_v30 = vsub.f32 %v279_v16, %v4264_v31  ;;  %v9142_v48 = vsub.f32 %v268_v9, %v2978_v51  ;;  %v9144_v31 = vsub.f32 %v276_v61, %v2982_v44 }
 0x203   :  { %5831 = vmatpush1.bf16.msra.mxu0 %v12477_v53  ;;  %12483 = vst [vmem:[#allocation131_spill] sm:$0xff] %v9118_v11  ;;  %v293_v50 = vld [vmem:[#allocation5 + $0x7e8] sm:$0xff]  ;;  %v287_v46 = vld [vmem:[#allocation5 + $0x7b8] sm:$0xff]  ;;  %12484 = vst [vmem:[#allocation128_spill] sm:$0xff] %v9120_v14 }
 0x204   :  { %5833 = vmatprep.subr.bf16.mxu0 %v12481_v33  ;;  %v295_v40 = vld [vmem:[#allocation5 + $0x7f8] sm:$0xff]  ;;  %12485 = vst [vmem:[#allocation135_spill] sm:$0xff] %v9122_v45  ;;  %v284_v42 = vld [vmem:[#allocation5 + $0x7a0] sm:$0xff]  ;;  %v12486_v19 = vld [vmem:[#allocation176_spill] sm:$0xff]  ;;  %v9125_v33 = vsub.f32 %v277_v2, %v2980_v41  ;;  %v2984_v45 = vand.u32 4294901760, %v285_v35  ;;  %v2988_v57 = vand.u32 4294901760, %v293_v50  ;;  %v9140_v41 = vpack.c.bf16 %v2982_v44, %v2978_v51 }
 0x205   :  { %v292_v53 = vld [vmem:[#allocation5 + $0x7e0] sm:$0xff]  ;;  %6215 = vmatpush1.bf16.msra.mxu1 %v12486_v19  ;;  %12488 = vst [vmem:[#allocation143_spill] sm:$0xff] %v9127_v27  ;;  %12489 = vst [vmem:[#allocation140_spill] sm:$0xff] %v9129_v36  ;;  %v9133_v39 = vld [vmem:[#allocation5 + $0x7b0] sm:$0xff]  ;;  %v4268_v37 = vand.u32 4294901760, %v287_v46  ;;  %v4272_v19 = vand.u32 4294901760, %v295_v40  ;;  %v9153_v27 = vsub.f32 %v278_v49, %v4266_v8 }
 0x206   :  { %12487 = vst [vmem:[#allocation137_spill] sm:$0xff] %v9125_v33  ;;  %12490 = vst [vmem:[#allocation147_spill] sm:$0xff] %v9131_v30  ;;  %v9135_v11 = vld [vmem:[#allocation5 + $0x7f0] sm:$0xff]  ;;  %v12491_v43 = vld [vmem:[#allocation183_spill] sm:$0xff]  ;;  %v2986_v16 = vand.u32 4294901760, %v284_v42  ;;  %v2990_v22 = vand.u32 4294901760, %v292_v53  ;;  %v9146_v30 = vpack.c.bf16 %v4266_v8, %v4262_v58  ;;  %v9151_v33 = vsub.f32 %v270_v13, %v4262_v58 }
 0x207   :  { %6217 = vmatprep.subr.bf16.mxu1 %v12491_v43  ;;  %v12492_v15 = vld [vmem:[#allocation185_spill] sm:$0xff]  ;;  %v12493_v2 = vld [vmem:[#allocation191_spill] sm:$0xff]  ;;  %12494 = vst [vmem:[#allocation149_spill] sm:$0xff] %v9140_v41  ;;  %12495 = vst [vmem:[#allocation155_spill] sm:$0xff] %v9142_v48  ;;  %v11340_v51 = vand.u32 4294901760, %v8718_v47  ;;  %v9160_v44 = vpack.c.bf16 %v2988_v57, %v2984_v45  ;;  %v9164_v43 = vpack.c.bf16 %v4272_v19, %v4268_v37 }
 0x208   :  { %5835 = vmatpush1.bf16.msra.mxu0 %v12492_v15  ;;  %12496 = vst [vmem:[#allocation152_spill] sm:$0xff] %v9144_v31  ;;  %12497 = vst [vmem:[#allocation159_spill] sm:$0xff] %v9146_v30  ;;  %v11341_v15 = vand.u32 4294901760, %v9135_v11  ;;  %v12498_v36 = vld [vmem:[#allocation188_spill] sm:$0xff]  ;;  %v12503_v61 = vld [vmem:[#allocation198_spill] sm:$0xff]  ;;  %v9162_v31 = vsub.f32 %v293_v50, %v2988_v57  ;;  %v9168_v13 = vsub.f32 %v287_v46, %v4268_v37  ;;  %v11343_v57 = vand.u32 4294901760, %v8726_v6 }
 0x209   :  { %5837 = vmatprep.subr.bf16.mxu0 %v12493_v2  ;;  %6219 = vmatpush1.bf16.msra.mxu1 %v12498_v36  ;;  %12499 = vst [vmem:[#allocation161_spill] sm:$0xff] %v9151_v33  ;;  %12500 = vst [vmem:[#allocation167_spill] sm:$0xff] %v9153_v27  ;;  %v9155_v2 = vsub.f32 %v285_v35, %v2984_v45  ;;  %v12502_v9 = vld [vmem:[#allocation196_spill] sm:$0xff]  ;;  %v11342_v36 = vand.u32 4294901760, %v8720_v59  ;;  %v9170_v35 = vsub.f32 %v295_v40, %v4272_v19  ;;  %v12514_v46 = vld [vmem:[#allocation201_spill] sm:$0xff] }
 0x20a   :  { %6221 = vmatprep.subr.bf16.mxu1 %v12502_v9  ;;  %12504 = vst [vmem:[#allocation171_spill] sm:$0xff] %v9160_v44  ;;  %12505 = vst [vmem:[#allocation173_spill] sm:$0xff] %v9162_v31  ;;  %v9172_v49 = vpack.c.bf16 %v2990_v22, %v2986_v16  ;;  %v9174_v58 = vsub.f32 %v284_v42, %v2986_v16  ;;  %v9176_v8 = vsub.f32 %v292_v53, %v2990_v22  ;;  %v12640_v31 = vld [vmem:[#allocation76_spill] sm:$0xff] }
 0x20b   :  { %12501 = vst [vmem:[#allocation164_spill] sm:$0xff] %v9155_v2  ;;  %12506 = vst [vmem:[#allocation179_spill] sm:$0xff] %v9164_v43  ;;  %v12512_v45 = vand.u32 4294901760, %v9133_v39  ;;  %v11344_v9 = vand.u32 4294901760, %v8728_v55  ;;  %v9191_v37 = vsub.f32 %v8718_v47, %v11340_v51  ;;  %v11345_v40 = vand.u32 4294901760, %v8730_v20  ;;  %v12584_v47 = vld [vmem:[#allocation78_spill] sm:$0xff] }
 0x20c   :  { %5839 = vmatpush1.bf16.msra.mxu0 %v12503_v61  ;;  %12507 = vst [vmem:[#allocation176_spill] sm:$0xff] %v9168_v13  ;;  %12508 = vst [vmem:[#allocation183_spill] sm:$0xff] %v9170_v35  ;;  %v11346_v42 = vand.u32 4294901760, %v8732_v28  ;;  %v9201_v19 = vsub.f32 %v8720_v59, %v11342_v36  ;;  %v11351_v16 = vand.u32 4294901760, %v8738_v7  ;;  %v4296_v36 = vsub.f32 %v8726_v6, %v11343_v57  ;;  %v12582_v59 = vld [vmem:[#allocation62_spill] sm:$0xff]  ;;  %v12636_v35 = vld [vmem:[#allocation197_spill] sm:$0xff] }
 0x20d   :  { %6225 = vmatprep.subr.bf16.mxu0 %v8716_v21  ;;  %12509 = vst [vmem:[#allocation185_spill] sm:$0xff] %v9172_v49  ;;  %12510 = vst [vmem:[#allocation191_spill] sm:$0xff] %v9174_v58  ;;  %v9182_v50 = vpack.c.bf16 %v11341_v15, %v12512_v45  ;;  %6223 = vmatpush1.bf16.msra.mxu1 %v12514_v46  ;;  %v12515_v45 = vld [vmem:[#allocation209_spill] sm:$0xff]  ;;  %v4308_v61 = vsub.f32 %v8728_v55, %v11344_v9  ;;  %v3013_v15 = vand.u32 4294901760, %v9191_v37  ;;  %v12580_v55 = vld [vmem:[#allocation36_spill] sm:$0xff] }
 0x20e   :  { %12511 = vst [vmem:[#allocation188_spill] sm:$0xff] %v9176_v8  ;;  %6609 = vmatprep.subr.bf16.mxu1 %v8722_v62  ;;  %v3018_v53 = vsub.f32 %v8730_v20, %v11345_v40  ;;  %v3030_v57 = vsub.f32 %v8732_v28, %v11346_v42  ;;  %v12516_v9 = vand.u32 4294901760, %v8736_v24  ;;  %v3025_v37 = vand.u32 4294901760, %v9201_v19  ;;  %v12577_v20 = vld [vmem:[#allocation53_spill] sm:$0xff]  ;;  %v12619_v58 = vld [vmem:[#allocation178_spill] sm:$0xff] }
 0x20f   :  { %12513 = vst [vmem:[#allocation196_spill] sm:$0xff] %v9182_v50  ;;  %1574 = vmatmul.mubr.f32.vlgmr.msra.gmra.mrb[0].mxu0 %v12300_v23  ;;  %v12517_v40 = vand.u32 4294901760, %v8740_v0  ;;  %v12518_v42 = vand.u32 4294901760, %v8744_v52  ;;  %v12520_v19 = vand.u32 4294901760, %v8750_v1  ;;  %v12524_v62 = vand.u32 4294901760, %v8765_v26 }
 0x210   :  { %6227 = vmatpush1.bf16.msra.mxu0 %v8724_v29  ;;  %2997 = vmatprep.mubr.f32.mxu0 %v12515_v45  ;;  %v4302_v22 = vsub.f32 %v8736_v24, %v12516_v9  ;;  %v12519_v9 = vand.u32 4294901760, %v8748_v17  ;;  %v4297_v29 = vand.u32 4294901760, %v4296_v36 }
 0x211   :  { %6229 = vmatprep.subr.bf16.mxu0 %v8742_v3  ;;  %2858 = vmatmul.mubr.f32.vlgmr.msra.gmra.mrb[0].mxu1 %v12300_v23  ;;  %v3036_v46 = vsub.f32 %v8740_v0, %v12517_v40  ;;  %v3048_v51 = vsub.f32 %v8744_v52, %v12518_v42  ;;  %v12522_v40 = vand.u32 4294901760, %v8756_v60  ;;  %v12523_v42 = vand.u32 4294901760, %v8761_v56  ;;  %v12559_v23 = vld [vmem:[#allocation21_spill] sm:$0xff]  ;;  %v12560_v52 = vld [vmem:[#allocation32_spill] sm:$0xff] }
 0x212   :  { %6611 = vmatpush1.bf16.msra.mxu1 %v8734_v25  ;;  %4281 = vmatprep.mubr.f32.mxu1 %v12515_v45  ;;  %v4314_v45 = vsub.f32 %v8738_v7, %v11351_v16  ;;  %v12521_v16 = vand.u32 4294901760, %v8754_v10  ;;  %v12526_v7 = vld [vmem:[#allocation108_spill] sm:$0xff]  ;;  %v4303_v36 = vand.u32 4294901760, %v4302_v22  ;;  %v12531_v22 = vand.u32 4294901760, %v9133_v39 }
 0x213   :  { %6613 = vmatprep.subr.bf16.mxu1 %v8746_v18  ;;  %v4332_v18 = vsub.f32 %v8750_v1, %v12520_v19  ;;  %v3054_v3 = vsub.f32 %v8756_v60, %v12522_v40  ;;  %v4309_v19 = vand.u32 4294901760, %v4308_v61  ;;  %v3019_v1 = vand.u32 4294901760, %v3018_v53  ;;  %v12527_v60 = vld [vmem:[#allocation154_spill] sm:$0xff]  ;;  %v12563_v0 = vld [vmem:[#allocation48_spill] sm:$0xff] }
 0x214   :  { %6231 = vmatpush1.bf16.msra.mxu0 %v8752_v34  ;;  %v4320_v34 = vsub.f32 %v8748_v17, %v12519_v9  ;;  %v3042_v25 = vsub.f32 %v8754_v10, %v12521_v16  ;;  %v4338_v9 = vsub.f32 %v8765_v26, %v12524_v62  ;;  %v3031_v16 = vand.u32 4294901760, %v3030_v57  ;;  %v12525_v10 = vld [vmem:[#allocation103_spill] sm:$0xff]  ;;  %v12529_v17 = vld [vmem:[#allocation109_spill] sm:$0xff] }
 0x215   :  { %6233 = vmatprep.subr.bf16.mxu0 %v8767_v5  ;;  %v4326_v5 = vsub.f32 %v8761_v56, %v12523_v42  ;;  %v4315_v40 = vand.u32 4294901760, %v4314_v45  ;;  %v3037_v42 = vand.u32 4294901760, %v3036_v46  ;;  %v3049_v56 = vand.u32 4294901760, %v3048_v51  ;;  %v12536_v45 = vld [vmem:[#allocation166_spill] sm:$0xff] }
 0x216   :  { %6615 = vmatpush1.bf16.msra.mxu1 %v8759_v32  ;;  %v4321_v62 = vand.u32 4294901760, %v4320_v34  ;;  %v4333_v26 = vand.u32 4294901760, %v4332_v18  ;;  %v3043_v21 = vand.u32 4294901760, %v3042_v25  ;;  %v3055_v24 = vand.u32 4294901760, %v3054_v3  ;;  %v12534_v3 = vld [vmem:[#allocation105_spill] sm:$0xff] }
 0x217   :  { %6617 = vmatprep.subr.bf16.mxu1 %v12526_v7  ;;  %v4327_v32 = vand.u32 4294901760, %v4326_v5  ;;  %v4339_v61 = vand.u32 4294901760, %v4338_v9  ;;  %v12528_v57 = vand.u32 4294901760, %v8769_v12  ;;  %v9280_v51 = vsub.f32 %v9133_v39, %v12531_v22  ;;  %v12535_v5 = vld [vmem:[#allocation110_spill] sm:$0xff]  ;;  %v12537_v9 = vld [vmem:[#allocation13_spill] sm:$0xff] }
 0x218   :  { %6235 = vmatpush1.bf16.msra.mxu0 %v8781_v38  ;;  %v12530_v38 = vld [vmem:[#allocation146_spill] sm:$0xff]  ;;  %v12533_v18 = vand.u32 4294901760, %v12525_v10  ;;  %v9296_v39 = vpack.c.bf16 %v3025_v37, %v3013_v15  ;;  %v9298_v22 = vpack.c.bf16 %v4309_v19, %v4297_v29  ;;  %v9302_v34 = vpack.c.bf16 %v3031_v16, %v3019_v1  ;;  %v12552_v15 = vld [vmem:[#allocation40_spill] sm:$0xff] }
 0x219   :  { %6237 = vmatprep.subr.bf16.mxu0 %v12527_v60  ;;  %v9273_v53 = vsub.f32 %v8769_v12, %v12528_v57  ;;  %12532 = vst [vmem:[#allocation198_spill] sm:$0xff] %v9280_v51  ;;  %v12538_v57 = vand.u32 4294901760, %v9135_v11  ;;  %v12541_v60 = vld [vmem:[#allocation25_spill] sm:$0xff]  ;;  %v9304_v46 = vpack.c.bf16 %v4315_v40, %v4303_v36  ;;  %v12542_v29 = vand.u32 4294901760, %v12529_v17  ;;  %v12543_v19 = vld [vmem:[#allocation18_spill] sm:$0xff]  ;;  %v12547_v36 = vld [vmem:[#allocation27_spill] sm:$0xff] }
 0x21a   :  { %6619 = vmatpush1.bf16.msra.mxu1 %v12530_v38  ;;  %v9285_v25 = vsub.f32 %v12525_v10, %v12533_v18  ;;  %v12540_v38 = vld [vmem:[#allocation112_spill] sm:$0xff]  ;;  %v9310_v10 = vpack.c.bf16 %v3055_v24, %v3043_v21  ;;  %v12545_v21 = vand.u32 4294901760, %v12535_v5  ;;  %v12548_v40 = vld [vmem:[#allocation31_spill] sm:$0xff] }
 0x21b   :  { %6621 = vmatprep.subr.bf16.mxu1 %v12536_v45  ;;  %v9294_v7 = vsub.f32 %v9135_v11, %v12538_v57  ;;  %v11388_v18 = vand.u32 4294901760, %v12540_v38  ;;  %v9306_v45 = vpack.c.bf16 %v3049_v56, %v3037_v42  ;;  %v9312_v11 = vpack.c.bf16 %v4339_v61, %v4327_v32  ;;  %v12546_v32 = vld [vmem:[#allocation141_spill] sm:$0xff]  ;;  %v12554_v16 = vld [vmem:[#allocation12_spill] sm:$0xff]  ;;  %v12558_v12 = vld [vmem:[#allocation23_spill] sm:$0xff] }
 0x21c   :  { %6239 = vmatpush1.bf16.msra.mxu0 %v12537_v9  ;;  %v9308_v9 = vpack.c.bf16 %v4333_v26, %v4321_v62  ;;  %v9318_v37 = vsub.f32 %v12529_v17, %v12542_v29  ;;  %v12544_v56 = vand.u32 4294901760, %v12534_v3  ;;  %v9330_v24 = vsub.f32 %v12535_v5, %v12545_v21  ;;  %v12549_v62 = vld [vmem:[#allocation150_spill] sm:$0xff]  ;;  %v12550_v57 = vld [vmem:[#allocation153_spill] sm:$0xff] }
 0x21d   :  { %12539 = vst [vmem:[#allocation201_spill] sm:$0xff] %v9294_v7  ;;  %6241 = vmatprep.subr.bf16.mxu0 %v12541_v60  ;;  %v9338_v42 = vsub.f32 %v12540_v38, %v11388_v18  ;;  %v12553_v21 = vld [vmem:[#allocation165_spill] sm:$0xff]  ;;  %v12557_v18 = vld [vmem:[#allocation19_spill] sm:$0xff]  ;;  %v12561_v60 = vand.u32 4294901760, %v12546_v32  ;;  %v12565_v29 = vand.u32 4294901760, %v12549_v62 }
 0x21e   :  { %6623 = vmatpush1.bf16.msra.mxu1 %v12543_v19  ;;  %v9325_v26 = vsub.f32 %v12534_v3, %v12544_v56  ;;  %v12551_v56 = vld [vmem:[#allocation162_spill] sm:$0xff]  ;;  %v4345_v17 = vand.u32 4294901760, %v9318_v37  ;;  %v3067_v19 = vand.u32 4294901760, %v9330_v24  ;;  %v12569_v3 = vand.u32 4294901760, %v12553_v21 }
 0x21f   :  { %6625 = vmatprep.subr.bf16.mxu1 %v12547_v36  ;;  %v12555_v36 = vld [vmem:[#allocation14_spill] sm:$0xff]  ;;  %v4350_v5 = vsub.f32 %v12546_v32, %v12561_v60  ;;  %v3079_v61 = vand.u32 4294901760, %v9338_v42  ;;  %v4362_v38 = vsub.f32 %v12549_v62, %v12565_v29  ;;  %v12568_v32 = vld [vmem:[#allocation61_spill] sm:$0xff]  ;;  %v12570_v42 = vand.u32 4294901760, %v12554_v16 }
 0x220   :  { %6243 = vmatpush1.bf16.msra.mxu0 %v12548_v40  ;;  %v12556_v40 = vld [vmem:[#allocation16_spill] sm:$0xff]  ;;  %v4357_v1 = vand.u32 4294901760, %v9325_v26  ;;  %v12564_v37 = vld [vmem:[#allocation46_spill] sm:$0xff]  ;;  %v12566_v26 = vand.u32 4294901760, %v12550_v57  ;;  %v12571_v29 = vand.u32 4294901760, %v12555_v36 }
 0x221   :  { %6245 = vmatprep.subr.bf16.mxu0 %v12552_v15  ;;  %v12562_v15 = vld [vmem:[#allocation22_spill] sm:$0xff] }
 0x222   :  { %6627 = vmatpush1.bf16.msra.mxu1 %v12560_v52  ;;  %v3084_v24 = vsub.f32 %v12550_v57, %v12566_v26  ;;  %v12567_v52 = vand.u32 4294901760, %v12551_v56  ;;  %v3090_v62 = vsub.f32 %v12555_v36, %v12571_v29  ;;  %v12572_v26 = vand.u32 4294901760, %v12556_v40 }
 0x223   :  { %6629 = vmatprep.subr.bf16.mxu1 %v12563_v0  ;;  %v4380_v0 = vsub.f32 %v12554_v16, %v12570_v42  ;;  %v12576_v16 = vld [vmem:[#allocation28_spill] sm:$0xff]  ;;  %v12578_v29 = vand.u32 4294901760, %v12562_v15 }
 0x224   :  { %6247 = vmatpush1.bf16.msra.mxu0 %v12564_v37  ;;  %v3096_v60 = vsub.f32 %v12551_v56, %v12567_v52  ;;  %v4368_v37 = vsub.f32 %v12553_v21, %v12569_v3  ;;  %v3102_v57 = vsub.f32 %v12556_v40, %v12572_v26  ;;  %v12573_v52 = vand.u32 4294901760, %v12557_v18  ;;  %v12579_v40 = vld [vmem:[#allocation29_spill] sm:$0xff] }
 0x225   :  { %6249 = vmatprep.subr.bf16.mxu0 %v12568_v32  ;;  %v12574_v56 = vand.u32 4294901760, %v12558_v12  ;;  %v12575_v21 = vand.u32 4294901760, %v12559_v23  ;;  %v3120_v26 = vsub.f32 %v12562_v15, %v12578_v29  ;;  %v4381_v7 = vand.u32 4294901760, %v4380_v0 }
 0x226   :  { %v4374_v32 = vsub.f32 %v12557_v18, %v12573_v52  ;;  %6631 = vmatpush1.bf16.msra.mxu1 %v12577_v20  ;;  %v12581_v18 = vld [vmem:[#allocation37_spill] sm:$0xff]  ;;  %v3097_v28 = vand.u32 4294901760, %v3096_v60  ;;  %v4369_v20 = vand.u32 4294901760, %v4368_v37  ;;  %v3091_v51 = vand.u32 4294901760, %v3090_v62  ;;  %v12590_v37 = vld [vmem:[#allocation84_spill] sm:$0xff]  ;;  %v12591_v60 = vld [vmem:[#allocation82_spill] sm:$0xff] }
 0x227   :  { %v4386_v3 = vsub.f32 %v12558_v12, %v12574_v56  ;;  %v3108_v42 = vsub.f32 %v12559_v23, %v12575_v21  ;;  %6633 = vmatprep.subr.bf16.mxu1 %v12582_v59  ;;  %v12583_v56 = vld [vmem:[#allocation67_spill] sm:$0xff]  ;;  %v4351_v12 = vand.u32 4294901760, %v4350_v5  ;;  %v4363_v21 = vand.u32 4294901760, %v4362_v38  ;;  %v12586_v59 = vld [vmem:[#allocation69_spill] sm:$0xff] }
 0x228   :  { %6251 = vmatpush1.bf16.msra.mxu0 %v12583_v56  ;;  %v3085_v23 = vand.u32 4294901760, %v3084_v24  ;;  %v3103_v29 = vand.u32 4294901760, %v3102_v57  ;;  %v4375_v15 = vand.u32 4294901760, %v4374_v32  ;;  %v12585_v52 = vand.u32 4294901760, %v12576_v16 }
 0x229   :  { %6253 = vmatprep.subr.bf16.mxu0 %v12584_v47  ;;  %v4387_v36 = vand.u32 4294901760, %v4386_v3  ;;  %v3109_v8 = vand.u32 4294901760, %v3108_v42  ;;  %v3121_v5 = vand.u32 4294901760, %v3120_v26  ;;  %v12587_v38 = vand.u32 4294901760, %v12579_v40  ;;  %v12596_v47 = vld [vmem:[#allocation42_spill] sm:$0xff] }
 0x22a   :  { %v9407_v6 = vsub.f32 %v12576_v16, %v12585_v52  ;;  %6635 = vmatpush1.bf16.msra.mxu1 %v12586_v59  ;;  %v12588_v0 = vand.u32 4294901760, %v12580_v55  ;;  %v12589_v32 = vand.u32 4294901760, %v12581_v18  ;;  %v12592_v3 = vand.u32 4294901760, %v9273_v53  ;;  %v12594_v52 = vld [vmem:[#allocation34_spill] sm:$0xff]  ;;  %v12595_v59 = vld [vmem:[#allocation39_spill] sm:$0xff]  ;;  %v12618_v16 = vld [vmem:[#allocation73_spill] sm:$0xff] }
 0x22b   :  { %v9413_v24 = vsub.f32 %v12579_v40, %v12587_v38  ;;  %6637 = vmatprep.subr.bf16.mxu1 %v12590_v37  ;;  %v12593_v42 = vand.u32 4294901760, %v9285_v25  ;;  %v11426_v38 = vand.u32 4294901760, %v12594_v52  ;;  %v9441_v37 = vpack.c.bf16 %v4363_v21, %v4351_v12  ;;  %v12617_v40 = vld [vmem:[#allocation72_spill] sm:$0xff] }
 0x22c   :  { %v9418_v62 = vsub.f32 %v12580_v55, %v12588_v0  ;;  %v9423_v57 = vsub.f32 %v12581_v18, %v12589_v32  ;;  %6255 = vmatpush1.bf16.msra.mxu0 %v12591_v60  ;;  %v12597_v55 = vld [vmem:[#allocation130_spill] sm:$0xff]  ;;  %v9437_v32 = vpack.c.bf16 %v4357_v1, %v4345_v17  ;;  %v9439_v18 = vpack.c.bf16 %v3079_v61, %v3067_v19  ;;  %v12606_v61 = vld [vmem:[#allocation49_spill] sm:$0xff]  ;;  %v12609_v19 = vld [vmem:[#allocation52_spill] sm:$0xff] }
 0x22d   :  { %v9431_v26 = vpack.c.bf16 %v12593_v42, %v12592_v3  ;;  %6257 = vmatprep.subr.bf16.mxu0 %v12597_v55  ;;  %v9443_v60 = vpack.c.bf16 %v3097_v28, %v3085_v23  ;;  %v9445_v53 = vpack.c.bf16 %v4381_v7, %v4369_v20  ;;  %v9447_v25 = vpack.c.bf16 %v3103_v29, %v3091_v51  ;;  %v12599_v0 = vld [vmem:[#allocation90_spill] sm:$0xff]  ;;  %v12601_v28 = vld [vmem:[#allocation139_spill] sm:$0xff]  ;;  %v12607_v29 = vld [vmem:[#allocation45_spill] sm:$0xff] }
 0x22e   :  { %v9449_v3 = vpack.c.bf16 %v4387_v36, %v4375_v15  ;;  %6639 = vmatpush1.bf16.msra.mxu1 %v12599_v0  ;;  %v9453_v56 = vpack.c.bf16 %v3121_v5, %v3109_v8  ;;  %v9463_v20 = vsub.f32 %v12594_v52, %v11426_v38  ;;  %v12602_v7 = vand.u32 4294901760, %v12595_v59  ;;  %v12604_v15 = vld [vmem:[#allocation43_spill] sm:$0xff]  ;;  %v12605_v36 = vld [vmem:[#allocation174_spill] sm:$0xff]  ;;  %v12612_v0 = vld [vmem:[#allocation57_spill] sm:$0xff] }
 0x22f   :  { %6641 = vmatprep.subr.bf16.mxu1 %v12601_v28  ;;  %v12603_v8 = vand.u32 4294901760, %v12596_v47  ;;  %v12608_v38 = vld [vmem:[#allocation51_spill] sm:$0xff]  ;;  %v12614_v52 = vld [vmem:[#allocation169_spill] sm:$0xff]  ;;  %v12615_v1 = vld [vmem:[#allocation64_spill] sm:$0xff]  ;;  %v12623_v5 = vand.u32 4294901760, %v12606_v61  ;;  %v12624_v21 = vand.u32 4294901760, %v12607_v29 }
 0x230   :  { %12598 = vst [vmem:[#allocation209_spill] sm:$0xff] %v9449_v3  ;;  %12600 = vst [vmem:[#allocation211_spill] sm:$0xff] %v9453_v56  ;;  %6259 = vmatpush1.bf16.msra.mxu0 %v8960_v4  ;;  %v9468_v23 = vsub.f32 %v12595_v59, %v12602_v7  ;;  %v12610_v42 = vld [vmem:[#allocation55_spill] sm:$0xff]  ;;  %v12611_v4 = vld [vmem:[#allocation60_spill] sm:$0xff]  ;;  %v4399_v28 = vand.u32 4294901760, %v9463_v20  ;;  %v12621_v7 = vand.u32 4294901760, %v12604_v15 }
 0x231   :  { %v9473_v51 = vsub.f32 %v12596_v47, %v12603_v8  ;;  %6261 = vmatprep.subr.bf16.mxu0 %v12605_v36  ;;  %v12613_v8 = vld [vmem:[#allocation58_spill] sm:$0xff]  ;;  %v4416_v12 = vsub.f32 %v12606_v61, %v12623_v5  ;;  %v12625_v20 = vand.u32 4294901760, %v12608_v38  ;;  %v12629_v61 = vand.u32 4294901760, %v12612_v0  ;;  %v12643_v56 = vld [vmem:[#allocation35_spill] sm:$0xff] }
 0x232   :  { %6643 = vmatpush1.bf16.msra.mxu1 %v12614_v52  ;;  %v12616_v47 = vld [vmem:[#allocation66_spill] sm:$0xff]  ;;  %v4411_v55 = vand.u32 4294901760, %v9468_v23  ;;  %v3144_v36 = vsub.f32 %v12604_v15, %v12621_v7  ;;  %v12622_v52 = vld [vmem:[#allocation192_spill] sm:$0xff]  ;;  %v12627_v7 = vand.u32 4294901760, %v12610_v42  ;;  %v12628_v15 = vand.u32 4294901760, %v12611_v4 }
 0x233   :  { %6645 = vmatprep.subr.bf16.mxu1 %v12619_v58  ;;  %v12620_v17 = vld [vmem:[#allocation182_spill] sm:$0xff]  ;;  %v3133_v59 = vand.u32 4294901760, %v9473_v51  ;;  %v3138_v23 = vsub.f32 %v12608_v38, %v12625_v20  ;;  %v12626_v51 = vand.u32 4294901760, %v12609_v19  ;;  %v12631_v38 = vld [vmem:[#allocation187_spill] sm:$0xff] }
 0x234   :  { %6263 = vmatpush1.bf16.msra.mxu0 %v12620_v17  ;;  %v4428_v17 = vsub.f32 %v12607_v29, %v12624_v21  ;;  %v4434_v5 = vsub.f32 %v12611_v4, %v12628_v15  ;;  %v3156_v21 = vsub.f32 %v12612_v0, %v12629_v61  ;;  %v12630_v29 = vand.u32 4294901760, %v12613_v8 }
 0x235   :  { %6265 = vmatprep.subr.bf16.mxu0 %v12622_v52  ;;  %v3150_v58 = vsub.f32 %v12609_v19, %v12626_v51  ;;  %v4422_v52 = vsub.f32 %v12610_v42, %v12627_v7  ;;  %v12632_v51 = vand.u32 4294901760, %v12615_v1  ;;  %v12633_v7 = vand.u32 4294901760, %v12616_v47 }
 0x236   :  { %v3168_v20 = vsub.f32 %v12613_v8, %v12630_v29  ;;  %6647 = vmatpush1.bf16.msra.mxu1 %v12631_v38  ;;  %v12634_v15 = vand.u32 4294901760, %v12617_v40  ;;  %v12635_v61 = vand.u32 4294901760, %v12618_v16  ;;  %v12637_v29 = vld [vmem:[#allocation202_spill] sm:$0xff]  ;;  %v3145_v38 = vand.u32 4294901760, %v3144_v36 }
 0x237   :  { %v4440_v19 = vsub.f32 %v12615_v1, %v12632_v51  ;;  %v4452_v42 = vsub.f32 %v12616_v47, %v12633_v7  ;;  %6649 = vmatprep.subr.bf16.mxu1 %v12636_v35  ;;  %v12638_v8 = vld [vmem:[#allocation70_spill] sm:$0xff]  ;;  %v12641_v7 = vld [vmem:[#allocation20_spill] sm:$0xff]  ;;  %v4417_v47 = vand.u32 4294901760, %v4416_v12  ;;  %v4429_v27 = vand.u32 4294901760, %v4428_v17  ;;  %v12642_v35 = vld [vmem:[#allocation15_spill] sm:$0xff] }
 0x238   :  { %v3162_v4 = vsub.f32 %v12617_v40, %v12634_v15  ;;  %v3174_v0 = vsub.f32 %v12618_v16, %v12635_v61  ;;  %6267 = vmatpush1.bf16.msra.mxu0 %v12637_v29  ;;  %v12639_v51 = vld [vmem:[#allocation74_spill] sm:$0xff]  ;;  %v3139_v15 = vand.u32 4294901760, %v3138_v23  ;;  %v3151_v40 = vand.u32 4294901760, %v3150_v58  ;;  %v12644_v1 = vld [vmem:[#allocation47_spill] sm:$0xff] }
 0x239   :  { %6269 = vmatprep.subr.bf16.mxu0 %v12641_v7  ;;  %v4423_v33 = vand.u32 4294901760, %v4422_v52  ;;  %v4435_v48 = vand.u32 4294901760, %v4434_v5  ;;  %v3157_v61 = vand.u32 4294901760, %v3156_v21  ;;  %v3169_v16 = vand.u32 4294901760, %v3168_v20  ;;  %v12671_v7 = vld [vmem:[#allocation168_spill] sm:$0xff] }
 0x23a   :  { %6651 = vmatpush1.bf16.msra.mxu1 %v12642_v35  ;;  %v4441_v29 = vand.u32 4294901760, %v4440_v19  ;;  %v4453_v36 = vand.u32 4294901760, %v4452_v42  ;;  %v3163_v3 = vand.u32 4294901760, %v3162_v4  ;;  %v3175_v13 = vand.u32 4294901760, %v3174_v0  ;;  %v12648_v19 = vld [vmem:[#allocation79_spill] sm:$0xff]  ;;  %v12649_v4 = vld [vmem:[#allocation56_spill] sm:$0xff] }
 0x23b   :  { %6653 = vmatprep.subr.bf16.mxu1 %v12643_v56  ;;  %v12645_v2 = vand.u32 4294901760, %v12638_v8  ;;  %v12646_v58 = vand.u32 4294901760, %v12639_v51  ;;  %v12647_v12 = vand.u32 4294901760, %v12640_v31  ;;  %v12650_v0 = vand.u32 4294901760, %v9407_v6  ;;  %v12654_v56 = vld [vmem:[#allocation85_spill] sm:$0xff] }
 0x23c   :  { %6271 = vmatpush1.bf16.msra.mxu0 %v12644_v1  ;;  %v12651_v5 = vand.u32 4294901760, %v9413_v24  ;;  %v12653_v20 = vand.u32 4294901760, %v9423_v57  ;;  %v9571_v35 = vpack.c.bf16 %v3145_v38, %v3133_v59  ;;  %v9573_v42 = vpack.c.bf16 %v4429_v27, %v4417_v47  ;;  %v12655_v24 = vld [vmem:[#allocation50_spill] sm:$0xff]  ;;  %v12658_v59 = vld [vmem:[#allocation77_spill] sm:$0xff] }
 0x23d   :  { %v4446_v17 = vsub.f32 %v12638_v8, %v12645_v2  ;;  %v4458_v52 = vsub.f32 %v12639_v51, %v12646_v58  ;;  %v3180_v23 = vsub.f32 %v12640_v31, %v12647_v12  ;;  %6273 = vmatprep.subr.bf16.mxu0 %v12649_v4  ;;  %v12652_v2 = vand.u32 4294901760, %v9418_v62 }
 0x23e   :  { %v9560_v21 = vpack.c.bf16 %v12651_v5, %v12650_v0  ;;  %v9568_v58 = vpack.c.bf16 %v4411_v55, %v4399_v28  ;;  %v11457_v12 = vand.u32 4294901760, %v12654_v56  ;;  %v9575_v4 = vpack.c.bf16 %v3151_v40, %v3139_v15  ;;  %6655 = vmatpush1.bf16.msra.mxu1 %v12655_v24  ;;  %v12656_v55 = vld [vmem:[#allocation81_spill] sm:$0xff]  ;;  %v12657_v5 = vld [vmem:[#allocation71_spill] sm:$0xff]  ;;  %v12675_v28 = vld [vmem:[#allocation170_spill] sm:$0xff] }
 0x23f   :  { %v9566_v1 = vpack.c.bf16 %v12653_v20, %v12652_v2  ;;  %v9577_v6 = vpack.c.bf16 %v4435_v48, %v4423_v33  ;;  %v9580_v0 = vpack.c.bf16 %v3169_v16, %v3157_v61  ;;  %v9582_v62 = vpack.c.bf16 %v4453_v36, %v4441_v29  ;;  %6657 = vmatprep.subr.bf16.mxu1 %v12657_v5  ;;  %v12660_v16 = vld [vmem:[#allocation86_spill] sm:$0xff]  ;;  %v12662_v15 = vld [vmem:[#allocation91_spill] sm:$0xff]  ;;  %v12663_v36 = vld [vmem:[#allocation97_spill] sm:$0xff] }
 0x240   :  { %v9584_v57 = vpack.c.bf16 %v3175_v13, %v3163_v3  ;;  %6275 = vmatpush1.bf16.msra.mxu0 %v12658_v59  ;;  %v4447_v47 = vand.u32 4294901760, %v4446_v17  ;;  %v4459_v27 = vand.u32 4294901760, %v4458_v52  ;;  %v3181_v40 = vand.u32 4294901760, %v3180_v23  ;;  %v12661_v3 = vld [vmem:[#allocation88_spill] sm:$0xff]  ;;  %v12664_v52 = vld [vmem:[#allocation94_spill] sm:$0xff]  ;;  %v12670_v24 = vld [vmem:[#allocation157_spill] sm:$0xff] }
 0x241   :  { %v12659_v33 = vand.u32 4294901760, %v12648_v19  ;;  %6277 = vmatprep.subr.bf16.mxu0 %v9092_v54  ;;  %v9596_v13 = vsub.f32 %v12654_v56, %v11457_v12  ;;  %v12665_v2 = vld [vmem:[#allocation136_spill] sm:$0xff]  ;;  %v12667_v54 = vld [vmem:[#allocation87_spill] sm:$0xff]  ;;  %v12668_v59 = vand.u32 4294901760, %v12656_v55  ;;  %v12673_v17 = vld [vmem:[#allocation113_spill] sm:$0xff]  ;;  %v12677_v38 = vand.u32 4294901760, %v12660_v16 }
 0x242   :  { %6659 = vmatpush1.bf16.msra.mxu1 %v12667_v54  ;;  %v12669_v5 = vld [vmem:[#allocation148_spill] sm:$0xff]  ;;  %v12672_v56 = vld [vmem:[#allocation107_spill] sm:$0xff]  ;;  %v9614_v23 = vpack.c.bf16 %v4459_v27, %v4447_v47  ;;  %v12678_v61 = vand.u32 4294901760, %v12661_v3  ;;  %v12679_v47 = vand.u32 4294901760, %v12662_v15  ;;  %v12681_v51 = vand.u32 4294901760, %v12664_v52 }
 0x243   :  { %v3192_v48 = vsub.f32 %v12648_v19, %v12659_v33  ;;  %v12666_v33 = vld [vmem:[#allocation145_spill] sm:$0xff]  ;;  %v4476_v12 = vsub.f32 %v12656_v55, %v12668_v59  ;;  %6661 = vmatprep.subr.bf16.mxu1 %v12672_v56  ;;  %v12676_v54 = vld [vmem:[#allocation172_spill] sm:$0xff]  ;;  %v4465_v59 = vand.u32 4294901760, %v9596_v13  ;;  %v3186_v29 = vsub.f32 %v12660_v16, %v12677_v38 }
 0x244   :  { %6279 = vmatpush1.bf16.msra.mxu0 %v12673_v17  ;;  %12674 = vst [vmem:[#allocation212_spill] sm:$0xff] %v9614_v23  ;;  %v3198_v56 = vsub.f32 %v12661_v3, %v12678_v61  ;;  %v4470_v27 = vsub.f32 %v12662_v15, %v12679_v47  ;;  %v3204_v13 = vsub.f32 %v12664_v52, %v12681_v51  ;;  %v12683_v17 = vand.u32 4294901760, %v12666_v33  ;;  %v12687_v3 = vld [vmem:[#allocation175_spill] sm:$0xff] }
 0x245   :  { %v3193_v20 = vand.u32 4294901760, %v3192_v48  ;;  %6281 = vmatprep.subr.bf16.mxu0 %v9120_v14  ;;  %v12680_v48 = vand.u32 4294901760, %v12663_v36  ;;  %v12682_v14 = vand.u32 4294901760, %v12665_v2  ;;  %v12684_v47 = vand.u32 4294901760, %v12669_v5 }
 0x246   :  { %v4488_v61 = vsub.f32 %v12666_v33, %v12683_v17  ;;  %6663 = vmatpush1.bf16.msra.mxu1 %v9113_v63  ;;  %v12686_v51 = vand.u32 4294901760, %v12671_v7  ;;  %v4477_v63 = vand.u32 4294901760, %v4476_v12  ;;  %v12689_v33 = vand.u32 4294901760, %v12675_v28 }
 0x247   :  { %v4482_v8 = vsub.f32 %v12663_v36, %v12680_v48  ;;  %v3216_v38 = vsub.f32 %v12665_v2, %v12682_v14  ;;  %v4500_v15 = vsub.f32 %v12669_v5, %v12684_v47  ;;  %v12685_v48 = vand.u32 4294901760, %v12670_v24  ;;  %v12688_v2 = vld [vmem:[#allocation143_spill] sm:$0xff] }
 0x248   :  { %v3222_v52 = vsub.f32 %v12671_v7, %v12686_v51  ;;  %6665 = vmatprep.subr.bf16.mxu1 %v12688_v2  ;;  %6283 = vmatpush1.bf16.msra.mxu0 %v9140_v41  ;;  %v9654_v17 = vpack.c.bf16 %v3193_v20, %v3181_v40  ;;  %v4494_v47 = vsub.f32 %v12675_v28, %v12689_v33  ;;  %v12690_v5 = vand.u32 4294901760, %v12676_v54 }
 0x249   :  { %v3210_v36 = vsub.f32 %v12670_v24, %v12685_v48  ;;  %6285 = vmatprep.subr.bf16.mxu0 %v9160_v44  ;;  %v3187_v51 = vand.u32 4294901760, %v3186_v29  ;;  %v3199_v7 = vand.u32 4294901760, %v3198_v56  ;;  %v4471_v14 = vand.u32 4294901760, %v4470_v27  ;;  %v12691_v24 = vld [vmem:[#allocation177_spill] sm:$0xff] }
 0x24a   :  { %v4506_v48 = vsub.f32 %v12676_v54, %v12690_v5  ;;  %v11485_v2 = vand.u32 4294901760, %v12691_v24  ;;  %v4483_v16 = vand.u32 4294901760, %v4482_v8  ;;  %v3205_v41 = vand.u32 4294901760, %v3204_v13  ;;  %6667 = vmatpush1.bf16.msra.mxu1 %v9146_v30  ;;  %v12693_v8 = vld [vmem:[#allocation180_spill] sm:$0xff]  ;;  %v12694_v13 = vld [vmem:[#allocation181_spill] sm:$0xff]  ;;  %v12767_v54 = vld [vmem:[#allocation191_spill] sm:$0xff] }
 0x24b   :  { %v3217_v40 = vand.u32 4294901760, %v3216_v38  ;;  %v4489_v20 = vand.u32 4294901760, %v4488_v61  ;;  %v4501_v12 = vand.u32 4294901760, %v4500_v15  ;;  %v3211_v55 = vand.u32 4294901760, %v3210_v36  ;;  %6669 = vmatprep.subr.bf16.mxu1 %v9164_v43  ;;  %v12695_v36 = vld [vmem:[#allocation184_spill] sm:$0xff]  ;;  %v12697_v43 = vld [vmem:[#allocation189_spill] sm:$0xff] }
 0x24c   :  { %v3223_v33 = vand.u32 4294901760, %v3222_v52  ;;  %v12692_v19 = vand.u32 4294901760, %v12687_v3  ;;  %6287 = vmatpush1.bf16.msra.mxu0 %v9172_v49  ;;  %v4495_v56 = vand.u32 4294901760, %v4494_v47  ;;  %v4507_v29 = vand.u32 4294901760, %v4506_v48  ;;  %v12696_v52 = vld [vmem:[#allocation186_spill] sm:$0xff] }
 0x24d   :  { %6289 = vmatprep.subr.bf16.mxu0 %v9296_v39  ;;  %v9678_v15 = vsub.f32 %v12691_v24, %v11485_v2  ;;  %v11489_v61 = vand.u32 4294901760, %v12696_v52  ;;  %v11488_v30 = vand.u32 4294901760, %v12697_v43  ;;  %v9683_v49 = vpack.c.bf16 %v4477_v63, %v4465_v59  ;;  %v12701_v38 = vld [vmem:[#allocation190_spill] sm:$0xff]  ;;  %v12756_v24 = vld [vmem:[#allocation209_spill] sm:$0xff] }
 0x24e   :  { %v9668_v5 = vsub.f32 %v12687_v3, %v12692_v19  ;;  %v9685_v47 = vpack.c.bf16 %v3199_v7, %v3187_v51  ;;  %v9687_v48 = vpack.c.bf16 %v4483_v16, %v4471_v14  ;;  %v11493_v27 = vand.u32 4294901760, %v12701_v38  ;;  %6671 = vmatpush1.bf16.msra.mxu1 %v9182_v50  ;;  %v12702_v39 = vld [vmem:[#allocation210_spill] sm:$0xff]  ;;  %v12716_v7 = vld [vmem:[#allocation11_spill] sm:$0xff]  ;;  %v12765_v3 = vld [vmem:[#allocation176_spill] sm:$0xff] }
 0x24f   :  { %12698 = vst [vmem:[#allocation213_spill] sm:$0xff] %v9683_v49  ;;  %3003 = vmatmul.mubr.f32.vlgmr.msra.gmra.mrb[2].mxu0 %v12702_v39  ;;  %v9692_v2 = vpack.c.bf16 %v3217_v40, %v3205_v41  ;;  %v9694_v44 = vpack.c.bf16 %v4501_v12, %v4489_v20  ;;  %v9696_v19 = vpack.c.bf16 %v3223_v33, %v3211_v55  ;;  %v12707_v16 = vand.u32 4294901760, %v12693_v8  ;;  %v12710_v20 = vld [vmem:[#allocation195_spill] sm:$0xff]  ;;  %v12711_v12 = vld [vmem:[#allocation193_spill] sm:$0xff]  ;;  %v12719_v33 = vld [vmem:[#allocation26_spill] sm:$0xff] }
 0x250   :  { %12699 = vst [vmem:[#allocation214_spill] sm:$0xff] %v9685_v47  ;;  %12700 = vst [vmem:[#allocation215_spill] sm:$0xff] %v9687_v48  ;;  %6673 = vmatprep.subr.bf16.mxu1 %v9298_v22  ;;  %6291 = vmatpush1.bf16.msra.mxu0 %v9302_v34  ;;  %v9700_v63 = vpack.c.bf16 %v4507_v29, %v4495_v56  ;;  %v12708_v41 = vand.u32 4294901760, %v12694_v13  ;;  %v12709_v34 = vand.u32 4294901760, %v12695_v36  ;;  %v12712_v56 = vld [vmem:[#allocation194_spill] sm:$0xff]  ;;  %v12718_v29 = vld [vmem:[#allocation24_spill] sm:$0xff] }
 0x251   :  { %12703 = vst [vmem:[#allocation210_spill] sm:$0xff] %v9692_v2  ;;  %12704 = vst [vmem:[#allocation216_spill] sm:$0xff] %v9694_v44  ;;  %v9706_v59 = vsub.f32 %v12693_v8, %v12707_v16  ;;  %6293 = vmatprep.subr.bf16.mxu0 %v9306_v45  ;;  %v9723_v51 = vsub.f32 %v12696_v52, %v11489_v61  ;;  %v9728_v40 = vsub.f32 %v12697_v43, %v11488_v30  ;;  %v12713_v16 = vld [vmem:[#allocation199_spill] sm:$0xff]  ;;  %v12731_v48 = vld [vmem:[#allocation38_spill] sm:$0xff] }
 0x252   :  { %12705 = vst [vmem:[#allocation217_spill] sm:$0xff] %v9696_v19  ;;  %12706 = vst [vmem:[#allocation218_spill] sm:$0xff] %v9700_v63  ;;  %v9711_v14 = vsub.f32 %v12694_v13, %v12708_v41  ;;  %v9718_v55 = vsub.f32 %v12695_v36, %v12709_v34  ;;  %3394 = vmatprep.mubr.f32.mxu0 %v12710_v20  ;;  %4287 = vmatmul.mubr.f32.vlgmr.msra.gmra.mrb[2].mxu1 %v12702_v39  ;;  %v12714_v34 = vld [vmem:[#allocation200_spill] sm:$0xff]  ;;  %v12715_v61 = vld [vmem:[#allocation203_spill] sm:$0xff]  ;;  %v12775_v23 = vand.u32 4294901760, %v9668_v5 }
 0x253   :  { %v9735_v45 = vsub.f32 %v12701_v38, %v11493_v27  ;;  %6675 = vmatpush1.bf16.msra.mxu1 %v9304_v46  ;;  %v12717_v39 = vld [vmem:[#allocation17_spill] sm:$0xff]  ;;  %4678 = vmatprep.mubr.f32.mxu1 %v12710_v20  ;;  %v12720_v20 = vld [vmem:[#allocation30_spill] sm:$0xff]  ;;  %v12721_v27 = vand.u32 4294901760, %v12711_v12  ;;  %v12722_v46 = vand.u32 4294901760, %v12712_v56  ;;  %v12724_v22 = vand.u32 4294901760, %v12714_v34  ;;  %v12740_v44 = vld [vmem:[#allocation68_spill] sm:$0xff] }
 0x254   :  { %6677 = vmatprep.subr.bf16.mxu1 %v9308_v9  ;;  %6295 = vmatpush1.bf16.msra.mxu0 %v9310_v10  ;;  %v12733_v2 = vld [vmem:[#allocation41_spill] sm:$0xff]  ;;  %v12745_v43 = vld [vmem:[#allocation95_spill] sm:$0xff]  ;;  %v12751_v8 = vld [vmem:[#allocation116_spill] sm:$0xff] }
 0x255   :  { %6297 = vmatprep.subr.bf16.mxu0 %v9431_v26  ;;  %v9761_v41 = vsub.f32 %v12711_v12, %v12721_v27  ;;  %v9766_v30 = vsub.f32 %v12712_v56, %v12722_v46  ;;  %v12723_v26 = vand.u32 4294901760, %v12713_v16  ;;  %v9777_v10 = vsub.f32 %v12714_v34, %v12724_v22  ;;  %v12750_v52 = vld [vmem:[#allocation119_spill] sm:$0xff]  ;;  %v12752_v13 = vld [vmem:[#allocation125_spill] sm:$0xff]  ;;  %v12763_v36 = vld [vmem:[#allocation164_spill] sm:$0xff] }
 0x256   :  { %v12725_v27 = vand.u32 4294901760, %v12715_v61  ;;  %v12726_v46 = vand.u32 4294901760, %v12716_v7  ;;  %v12759_v49 = vld [vmem:[#allocation155_spill] sm:$0xff]  ;;  %v12761_v12 = vld [vmem:[#allocation161_spill] sm:$0xff]  ;;  %v12769_v34 = vld [vmem:[#allocation198_spill] sm:$0xff] }
 0x257   :  { %v9771_v31 = vsub.f32 %v12713_v16, %v12723_v26  ;;  %6679 = vmatpush1.bf16.msra.mxu1 %v9312_v11  ;;  %v12727_v26 = vand.u32 4294901760, %v12717_v39  ;;  %v12728_v11 = vand.u32 4294901760, %v12718_v29  ;;  %v12735_v16 = vld [vmem:[#allocation54_spill] sm:$0xff]  ;;  %v12762_v38 = vld [vmem:[#allocation167_spill] sm:$0xff]  ;;  %v12764_v56 = vld [vmem:[#allocation173_spill] sm:$0xff] }
 0x258   :  { %v9782_v50 = vsub.f32 %v12715_v61, %v12725_v27  ;;  %v9787_v9 = vsub.f32 %v12716_v7, %v12726_v46  ;;  %6681 = vmatprep.subr.bf16.mxu1 %v9437_v32  ;;  %6299 = vmatpush1.bf16.msra.mxu0 %v9439_v18  ;;  %v12729_v27 = vand.u32 4294901760, %v12719_v33  ;;  %v12730_v46 = vld [vmem:[#allocation33_spill] sm:$0xff]  ;;  %v12732_v32 = vand.u32 4294901760, %v12720_v20  ;;  %v12737_v7 = vld [vmem:[#allocation63_spill] sm:$0xff] }
 0x259   :  { %v9792_v63 = vsub.f32 %v12717_v39, %v12727_v26  ;;  %v9799_v22 = vsub.f32 %v12718_v29, %v12728_v11  ;;  %6301 = vmatprep.subr.bf16.mxu0 %v9443_v60  ;;  %v12736_v26 = vld [vmem:[#allocation59_spill] sm:$0xff]  ;;  %v12770_v11 = vld [vmem:[#allocation201_spill] sm:$0xff]  ;;  %v3253_v61 = vand.u32 4294901760, %v9761_v41  ;;  %v3265_v39 = vand.u32 4294901760, %v9766_v30 }
 0x25a   :  { %v9804_v19 = vsub.f32 %v12719_v33, %v12729_v27  ;;  %v9812_v18 = vsub.f32 %v12720_v20, %v12732_v32  ;;  %v12738_v27 = vld [vmem:[#allocation65_spill] sm:$0xff]  ;;  %v12739_v29 = vld [vmem:[#allocation211_spill] sm:$0xff]  ;;  %v12768_v32 = vld [vmem:[#allocation188_spill] sm:$0xff]  ;;  %v3259_v28 = vand.u32 4294901760, %v9782_v50  ;;  %v3271_v60 = vand.u32 4294901760, %v9787_v9 }
 0x25b   :  { %6683 = vmatpush1.bf16.msra.mxu1 %v9441_v37  ;;  %v12734_v37 = vld [vmem:[#allocation44_spill] sm:$0xff]  ;;  %v12741_v33 = vld [vmem:[#allocation75_spill] sm:$0xff]  ;;  %v4555_v47 = vand.u32 4294901760, %v9799_v22  ;;  %v12772_v30 = vand.u32 4294901760, %v12731_v48  ;;  %v12773_v9 = vand.u32 4294901760, %v12733_v2 }
 0x25c   :  { %6685 = vmatprep.subr.bf16.mxu1 %v9445_v53  ;;  %6303 = vmatpush1.bf16.msra.mxu0 %v9447_v25  ;;  %v12742_v20 = vld [vmem:[#allocation83_spill] sm:$0xff]  ;;  %v12743_v53 = vld [vmem:[#allocation80_spill] sm:$0xff]  ;;  %v12744_v25 = vld [vmem:[#allocation89_spill] sm:$0xff] }
 0x25d   :  { %6305 = vmatprep.subr.bf16.mxu0 %v12739_v29  ;;  %v12753_v29 = vld [vmem:[#allocation131_spill] sm:$0xff]  ;;  %v3282_v22 = vsub.f32 %v12733_v2, %v12773_v9  ;;  %v12780_v9 = vand.u32 4294901760, %v9723_v51 }
 0x25f   :  { %6687 = vmatpush1.bf16.msra.mxu1 %v12756_v24  ;;  %v4543_v24 = vand.u32 4294901760, %v9792_v63  ;;  %v3277_v63 = vand.u32 4294901760, %v9804_v19  ;;  %v12778_v19 = vand.u32 4294901760, %v9711_v14 }
 0x260   :  { %6689 = vmatprep.subr.bf16.mxu1 %v9560_v21  ;;  %6307 = vmatpush1.bf16.msra.mxu0 %v9566_v1  ;;  %v4537_v21 = vand.u32 4294901760, %v9771_v31  ;;  %v4549_v1 = vand.u32 4294901760, %v9777_v10  ;;  %v4572_v31 = vsub.f32 %v12731_v48, %v12772_v30  ;;  %v12779_v10 = vand.u32 4294901760, %v9718_v55 }
 0x261   :  { %6309 = vmatprep.subr.bf16.mxu0 %v9571_v35  ;;  %v12771_v35 = vand.u32 4294901760, %v12730_v46  ;;  %v9938_v14 = vpack.c.bf16 %v4555_v47, %v4543_v24  ;;  %v11516_v24 = vand.u32 4294901760, %v12741_v33 }
 0x262   :  { %v9924_v2 = vpack.c.bf16 %v12780_v9, %v12779_v10  ;;  %v4573_v51 = vand.u32 4294901760, %v4572_v31  ;;  %v12783_v10 = vand.u32 4294901760, %v12735_v16  ;;  %v12789_v9 = vld [vmem:[#allocation214_spill] sm:$0xff]  ;;  %v12791_v31 = vld [vmem:[#allocation111_spill] sm:$0xff] }
 0x263   :  { %6691 = vmatpush1.bf16.msra.mxu1 %v9568_v58  ;;  %v4560_v41 = vsub.f32 %v12730_v46, %v12771_v35  ;;  %v3289_v58 = vand.u32 4294901760, %v9812_v18  ;;  %v12774_v35 = vand.u32 4294901760, %v12734_v37 }
 0x264   :  { %6693 = vmatprep.subr.bf16.mxu1 %v9573_v42  ;;  %6311 = vmatpush1.bf16.msra.mxu0 %v9575_v4  ;;  %v12776_v42 = vand.u32 4294901760, %v9678_v15  ;;  %v12777_v4 = vand.u32 4294901760, %v9706_v59  ;;  %v9932_v15 = vpack.c.bf16 %v3265_v39, %v3253_v61  ;;  %v9936_v59 = vpack.c.bf16 %v3271_v60, %v3259_v28 }
 0x265   :  { %v3294_v30 = vsub.f32 %v12734_v37, %v12774_v35  ;;  %6313 = vmatprep.subr.bf16.mxu0 %v9580_v0  ;;  %v12781_v35 = vand.u32 4294901760, %v9728_v40  ;;  %v12782_v0 = vand.u32 4294901760, %v9735_v45  ;;  %v4561_v55 = vand.u32 4294901760, %v4560_v41  ;;  %v12785_v41 = vld [vmem:[#allocation99_spill] sm:$0xff] }
 0x266   :  { %v6324_v50 = vpack.c.bf16 %v12776_v42, %v12775_v23  ;;  %v9918_v18 = vpack.c.bf16 %v12778_v19, %v12777_v4  ;;  %v9934_v23 = vpack.c.bf16 %v4549_v1, %v4537_v21  ;;  %v4566_v40 = vsub.f32 %v12735_v16, %v12783_v10  ;;  %v12788_v19 = vld [vmem:[#allocation213_spill] sm:$0xff]  ;;  %v12790_v10 = vld [vmem:[#allocation104_spill] sm:$0xff] }
 0x267   :  { %v9930_v5 = vpack.c.bf16 %v12782_v0, %v12781_v35  ;;  %6695 = vmatpush1.bf16.msra.mxu1 %v9577_v6  ;;  %v12784_v45 = vand.u32 4294901760, %v12736_v26  ;;  %v9949_v28 = vpack.c.bf16 %v3289_v58, %v3277_v63  ;;  %v3283_v61 = vand.u32 4294901760, %v3282_v22  ;;  %v12786_v63 = vld [vmem:[#allocation212_spill] sm:$0xff] }
 0x268   :  { %6697 = vmatprep.subr.bf16.mxu1 %v9582_v62  ;;  %6315 = vmatpush1.bf16.msra.mxu0 %v9584_v57  ;;  %v3295_v47 = vand.u32 4294901760, %v3294_v30  ;;  %v11522_v6 = vand.u32 4294901760, %v12737_v7  ;;  %v11518_v39 = vand.u32 4294901760, %v12738_v27  ;;  %v11517_v60 = vand.u32 4294901760, %v12740_v44  ;;  %v12787_v30 = vld [vmem:[#allocation101_spill] sm:$0xff] }
 0x269   :  { %v4578_v42 = vsub.f32 %v12736_v26, %v12784_v45  ;;  %6317 = vmatprep.subr.bf16.mxu0 %v9654_v17  ;;  %v11520_v21 = vand.u32 4294901760, %v12742_v20  ;;  %v11519_v62 = vand.u32 4294901760, %v12743_v53  ;;  %v11521_v57 = vand.u32 4294901760, %v12744_v25 }
 0x26a   :  { %v11523_v1 = vand.u32 4294901760, %v12745_v43  ;;  %v9962_v58 = vpack.c.bf16 %v4573_v51, %v4561_v55  ;;  %v4567_v17 = vand.u32 4294901760, %v4566_v40  ;;  %v11524_v4 = vand.u32 4294901760, %v12787_v30  ;;  %v12792_v55 = vld [vmem:[#allocation210_spill] sm:$0xff] }
 0x26b   :  { %6699 = vmatpush1.bf16.msra.mxu1 %v12786_v63  ;;  %v4579_v22 = vand.u32 4294901760, %v4578_v42  ;;  %v9967_v35 = vpack.c.bf16 %v3295_v47, %v3283_v61  ;;  %v3300_v0 = vsub.f32 %v12737_v7, %v11522_v6  ;;  %v11529_v45 = vand.u32 4294901760, %v12790_v10  ;;  %v12795_v6 = vld [vmem:[#allocation216_spill] sm:$0xff]  ;;  %v12796_v63 = vld [vmem:[#allocation217_spill] sm:$0xff] }
 0x26c   :  { %6701 = vmatprep.subr.bf16.mxu1 %v12788_v19  ;;  %6319 = vmatpush1.bf16.msra.mxu0 %v12789_v9  ;;  %v3312_v51 = vsub.f32 %v12738_v27, %v11518_v39  ;;  %v4584_v40 = vsub.f32 %v12740_v44, %v11517_v60  ;;  %v4596_v42 = vsub.f32 %v12741_v33, %v11516_v24  ;;  %v12794_v60 = vld [vmem:[#allocation215_spill] sm:$0xff] }
 0x26d   :  { %6321 = vmatprep.subr.bf16.mxu0 %v12792_v55  ;;  %v3306_v61 = vsub.f32 %v12742_v20, %v11520_v21  ;;  %v3318_v47 = vsub.f32 %v12743_v53, %v11519_v62  ;;  %v4590_v19 = vsub.f32 %v12744_v25, %v11521_v57  ;;  %v4602_v9 = vsub.f32 %v12745_v43, %v11523_v1 }
 0x26e   :  { %v12793_v55 = vand.u32 4294901760, %v12785_v41  ;;  %v10000_v39 = vpack.c.bf16 %v4579_v22, %v4567_v17  ;;  %v3336_v62 = vsub.f32 %v12787_v30, %v11524_v4  ;;  %v3301_v1 = vand.u32 4294901760, %v3300_v0  ;;  %v12798_v0 = vld [vmem:[#allocation218_spill] sm:$0xff] }
 0x26f   :  { %6703 = vmatpush1.bf16.msra.mxu1 %v12794_v60  ;;  %v12797_v60 = vand.u32 4294901760, %v12791_v31  ;;  %v3313_v4 = vand.u32 4294901760, %v3312_v51  ;;  %v4585_v21 = vand.u32 4294901760, %v4584_v40  ;;  %v4597_v25 = vand.u32 4294901760, %v4596_v42  ;;  %v12802_v42 = vld [vmem:[#allocation135_spill] sm:$0xff] }
 0x270   :  { %v3324_v24 = vsub.f32 %v12785_v41, %v12793_v55  ;;  %6705 = vmatprep.subr.bf16.mxu1 %v12795_v6  ;;  %6323 = vmatpush1.bf16.msra.mxu0 %v12796_v63  ;;  %v4608_v55 = vsub.f32 %v12790_v10, %v11529_v45  ;;  %v3307_v57 = vand.u32 4294901760, %v3306_v61  ;;  %v3319_v43 = vand.u32 4294901760, %v3318_v47 }
 0x271   :  { %v4620_v17 = vsub.f32 %v12791_v31, %v12797_v60  ;;  %6325 = vmatprep.subr.bf16.mxu0 %v6324_v50  ;;  %v4591_v6 = vand.u32 4294901760, %v4590_v19  ;;  %v4603_v41 = vand.u32 4294901760, %v4602_v9  ;;  %v3337_v30 = vand.u32 4294901760, %v3336_v62  ;;  %v12803_v19 = vld [vmem:[#allocation137_spill] sm:$0xff]  ;;  %v12805_v50 = vld [vmem:[#allocation147_spill] sm:$0xff] }
 0x272   :  { %v3325_v63 = vand.u32 4294901760, %v3324_v24  ;;  %v12799_v45 = vand.u32 4294901760, %v12750_v52  ;;  %v12800_v60 = vand.u32 4294901760, %v12751_v8  ;;  %v4609_v51 = vand.u32 4294901760, %v4608_v55 }
 0x273   :  { %6707 = vmatpush1.bf16.msra.mxu1 %v12798_v0  ;;  %v4621_v40 = vand.u32 4294901760, %v4620_v17  ;;  %v12801_v24 = vand.u32 4294901760, %v12752_v13  ;;  %v6720_v47 = vpack.c.bf16 %v4597_v25, %v4585_v21  ;;  %v11547_v9 = vand.u32 4294901760, %v12803_v19  ;;  %v12804_v0 = vld [vmem:[#allocation140_spill] sm:$0xff] }
 0x274   :  { %v3330_v10 = vsub.f32 %v12750_v52, %v12799_v45  ;;  %v3342_v22 = vsub.f32 %v12751_v8, %v12800_v60  ;;  %6709 = vmatprep.subr.bf16.mxu1 %v9918_v18  ;;  %6327 = vmatpush1.bf16.msra.mxu0 %v9924_v2  ;;  %v6336_v45 = vpack.c.bf16 %v3313_v4, %v3301_v1  ;;  %v11541_v60 = vand.u32 4294901760, %v12804_v0  ;;  %v12806_v17 = vld [vmem:[#allocation152_spill] sm:$0xff] }
 0x275   :  { %v10029_v62 = vsub.f32 %v12752_v13, %v12801_v24  ;;  %6329 = vmatprep.subr.bf16.mxu0 %v9932_v15  ;;  %v6338_v18 = vpack.c.bf16 %v3319_v43, %v3307_v57  ;;  %v11535_v2 = vand.u32 4294901760, %v12805_v50  ;;  %v11533_v55 = vand.u32 4294901760, %v12759_v49 }
 0x276   :  { %v11534_v52 = vand.u32 4294901760, %v12806_v17  ;;  %v6722_v24 = vpack.c.bf16 %v4603_v41, %v4591_v6  ;;  %v3331_v13 = vand.u32 4294901760, %v3330_v10  ;;  %v3343_v61 = vand.u32 4294901760, %v3342_v22 }
 0x277   :  { %6711 = vmatpush1.bf16.msra.mxu1 %v9930_v5  ;;  %v12807_v15 = vand.u32 4294901760, %v12753_v29  ;;  %v6340_v43 = vpack.c.bf16 %v3337_v30, %v3325_v63  ;;  %v6724_v21 = vpack.c.bf16 %v4621_v40, %v4609_v51  ;;  %v4615_v57 = vand.u32 4294901760, %v10029_v62 }
 0x278   :  { %6713 = vmatprep.subr.bf16.mxu1 %v9934_v23  ;;  %6331 = vmatpush1.bf16.msra.mxu0 %v9936_v59  ;;  %v12808_v1 = vand.u32 4294901760, %v12802_v42  ;;  %v3360_v5 = vsub.f32 %v12803_v19, %v11547_v9  ;;  %v4632_v23 = vsub.f32 %v12804_v0, %v11541_v60  ;;  %v11540_v59 = vand.u32 4294901760, %v12763_v36 }
 0x279   :  { %v4626_v25 = vsub.f32 %v12753_v29, %v12807_v15  ;;  %6333 = vmatprep.subr.bf16.mxu0 %v9949_v28  ;;  %v11539_v41 = vand.u32 4294901760, %v12764_v56  ;;  %v4644_v30 = vsub.f32 %v12805_v50, %v11535_v2  ;;  %v3354_v28 = vsub.f32 %v12759_v49, %v11533_v55  ;;  %v12809_v15 = vld [vmem:[#allocation183_spill] sm:$0xff] }
 0x27a   :  { %v3348_v4 = vsub.f32 %v12802_v42, %v12808_v1  ;;  %v3366_v10 = vsub.f32 %v12806_v17, %v11534_v52  ;;  %v11538_v22 = vand.u32 4294901760, %v12761_v12  ;;  %v6342_v6 = vpack.c.bf16 %v3343_v61, %v3331_v13 }
 0x27b   :  { %6715 = vmatpush1.bf16.msra.mxu1 %v9938_v14  ;;  %v4627_v63 = vand.u32 4294901760, %v4626_v25  ;;  %v11537_v51 = vand.u32 4294901760, %v12762_v38  ;;  %v11536_v40 = vand.u32 4294901760, %v12765_v3  ;;  %v11542_v1 = vand.u32 4294901760, %v12809_v15 }
 0x27c   :  { %6717 = vmatprep.subr.bf16.mxu1 %v9962_v58  ;;  %6335 = vmatpush1.bf16.msra.mxu0 %v9967_v35  ;;  %v3349_v62 = vand.u32 4294901760, %v3348_v4  ;;  %v11543_v55 = vand.u32 4294901760, %v12767_v54  ;;  %v11546_v52 = vand.u32 4294901760, %v12768_v32  ;;  %v3361_v2 = vand.u32 4294901760, %v3360_v5 }
 0x27d   :  { %6337 = vmatprep.subr.bf16.mxu0 %v6336_v45  ;;  %v4633_v14 = vand.u32 4294901760, %v4632_v23  ;;  %v3372_v13 = vsub.f32 %v12763_v36, %v11540_v59  ;;  %v3384_v58 = vsub.f32 %v12764_v56, %v11539_v41  ;;  %v4645_v61 = vand.u32 4294901760, %v4644_v30 }
 0x27e   :  { %v3355_v35 = vand.u32 4294901760, %v3354_v28  ;;  %v3367_v25 = vand.u32 4294901760, %v3366_v10  ;;  %v4638_v4 = vsub.f32 %v12761_v12, %v11538_v22  ;;  %v4650_v45 = vsub.f32 %v12762_v38, %v11537_v51 }
 0x27f   :  { %6719 = vmatpush1.bf16.msra.mxu1 %v10000_v39  ;;  %v4656_v5 = vsub.f32 %v12765_v3, %v11536_v40  ;;  %v11545_v23 = vand.u32 4294901760, %v12769_v34  ;;  %v11544_v30 = vand.u32 4294901760, %v12770_v11  ;;  %v4668_v28 = vsub.f32 %v12809_v15, %v11542_v1 }
 0x280   :  { %6721 = vmatprep.subr.bf16.mxu1 %v6720_v47  ;;  %6339 = vmatpush1.bf16.msra.mxu0 %v6338_v18  ;;  %v3378_v39 = vsub.f32 %v12767_v54, %v11543_v55  ;;  %v3390_v10 = vsub.f32 %v12768_v32, %v11546_v52  ;;  %v6344_v40 = vpack.c.bf16 %v3361_v2, %v3349_v62  ;;  %v3373_v51 = vand.u32 4294901760, %v3372_v13  ;;  %v12835_v52 = vld [vmem:[#allocation162_spill] sm:$0xff] }
 0x281   :  { %6341 = vmatprep.subr.bf16.mxu0 %v6340_v43  ;;  %v3385_v22 = vand.u32 4294901760, %v3384_v58  ;;  %v6726_v41 = vpack.c.bf16 %v4627_v63, %v4615_v57  ;;  %v6728_v59 = vpack.c.bf16 %v4645_v61, %v4633_v14  ;;  %v6346_v47 = vpack.c.bf16 %v3367_v25, %v3355_v35  ;;  %v12810_v35 = vld [vmem:[#allocation114_spill] sm:$0xff]  ;;  %v12811_v25 = vld [vmem:[#allocation115_spill] sm:$0xff] }
 0x282   :  { %v4639_v18 = vand.u32 4294901760, %v4638_v4  ;;  %v4651_v60 = vand.u32 4294901760, %v4650_v45  ;;  %v4662_v1 = vsub.f32 %v12769_v34, %v11545_v23  ;;  %v4674_v55 = vsub.f32 %v12770_v11, %v11544_v30  ;;  %v12813_v45 = vld [vmem:[#allocation121_spill] sm:$0xff] }
 0x283   :  { %6723 = vmatpush1.bf16.msra.mxu1 %v6722_v24  ;;  %v4657_v43 = vand.u32 4294901760, %v4656_v5  ;;  %v4669_v2 = vand.u32 4294901760, %v4668_v28  ;;  %v3379_v62 = vand.u32 4294901760, %v3378_v39  ;;  %v3391_v13 = vand.u32 4294901760, %v3390_v10  ;;  %v12819_v5 = vld [vmem:[#allocation127_spill] sm:$0xff]  ;;  %v12820_v28 = vld [vmem:[#allocation129_spill] sm:$0xff] }
 0x284   :  { %6725 = vmatprep.subr.bf16.mxu1 %v6724_v21  ;;  %6343 = vmatpush1.bf16.msra.mxu0 %v6342_v6  ;;  %v6348_v57 = vpack.c.bf16 %v3385_v22, %v3373_v51  ;;  %v6730_v24 = vpack.c.bf16 %v4651_v60, %v4639_v18  ;;  %v4663_v63 = vand.u32 4294901760, %v4662_v1  ;;  %v4675_v14 = vand.u32 4294901760, %v4674_v55  ;;  %v12812_v6 = vld [vmem:[#allocation120_spill] sm:$0xff]  ;;  %v12814_v22 = vld [vmem:[#allocation122_spill] sm:$0xff]  ;;  %v12818_v1 = vld [vmem:[#allocation205_spill] sm:$0xff] }
 0x285   :  { %6345 = vmatprep.subr.bf16.mxu0 %v6344_v40  ;;  %v6732_v58 = vpack.c.bf16 %v4669_v2, %v4657_v43  ;;  %v6350_v61 = vpack.c.bf16 %v3391_v13, %v3379_v62  ;;  %v6352_v4 = vpack.c.bf16 %v12811_v25, %v12810_v35  ;;  %v6736_v40 = vpack.c.bf16 %v12813_v45, %v12812_v6  ;;  %v12816_v55 = vld [vmem:[#allocation132_spill] sm:$0xff]  ;;  %v12821_v10 = vld [vmem:[#allocation142_spill] sm:$0xff]  ;;  %v12834_v23 = vld [vmem:[#allocation153_spill] sm:$0xff] }
 0x286   :  { %v6734_v21 = vpack.c.bf16 %v4675_v14, %v4663_v63  ;;  %v6738_v39 = vpack.c.bf16 %v12820_v28, %v12819_v5  ;;  %v12823_v43 = vld [vmem:[#allocation158_spill] sm:$0xff]  ;;  %v12824_v2 = vld [vmem:[#allocation160_spill] sm:$0xff]  ;;  %v12828_v14 = vld [vmem:[#allocation93_spill] sm:$0xff]  ;;  %v6364_v9 = vpack.c.bf16 %v12835_v52, %v12834_v23 }
 0x287   :  { %6727 = vmatpush1.bf16.msra.mxu1 %v6726_v41  ;;  %v12815_v41 = vld [vmem:[#allocation124_spill] sm:$0xff]  ;;  %v6358_v62 = vpack.c.bf16 %v12824_v2, %v12823_v43  ;;  %v12825_v13 = vld [vmem:[#allocation102_spill] sm:$0xff] }
 0x288   :  { %6729 = vmatprep.subr.bf16.mxu1 %v6728_v59  ;;  %6347 = vmatpush1.bf16.msra.mxu0 %v6346_v47  ;;  %v6354_v60 = vpack.c.bf16 %v12815_v41, %v12814_v22  ;;  %v12817_v59 = vld [vmem:[#allocation134_spill] sm:$0xff]  ;;  %v12822_v47 = vld [vmem:[#allocation144_spill] sm:$0xff] }
 0x289   :  { %6349 = vmatprep.subr.bf16.mxu0 %v6348_v57  ;;  %v6356_v51 = vpack.c.bf16 %v12817_v59, %v12816_v55  ;;  %v6740_v18 = vpack.c.bf16 %v12822_v47, %v12821_v10  ;;  %v12826_v57 = vld [vmem:[#allocation103_spill] sm:$0xff]  ;;  %v12827_v63 = vld [vmem:[#allocation204_spill] sm:$0xff] }
 0x28b   :  { %6731 = vmatpush1.bf16.msra.mxu1 %v6730_v24  ;;  %v6360_v24 = vpack.c.bf16 %v12826_v57, %v12825_v13 }
 0x28c   :  { %6733 = vmatprep.subr.bf16.mxu1 %v6732_v58  ;;  %6351 = vmatpush1.bf16.msra.mxu0 %v6350_v61  ;;  %v12829_v58 = vld [vmem:[#allocation98_spill] sm:$0xff] }
 0x28d   :  { %6353 = vmatprep.subr.bf16.mxu0 %v6352_v4  ;;  %v6742_v61 = vpack.c.bf16 %v12829_v58, %v12828_v14  ;;  %v12830_v4 = vld [vmem:[#allocation109_spill] sm:$0xff]  ;;  %v12841_v14 = vld [vmem:[#allocation16_spill] sm:$0xff] }
 0x28e   :  { %v12838_v58 = vld [vmem:[#allocation165_spill] sm:$0xff] }
 0x28f   :  { %6735 = vmatpush1.bf16.msra.mxu1 %v6734_v21  ;;  %3396 = vmatmul.mubr.f32.vlgmr.msra.gmra.mrb[2].mxu0 %v12818_v1  ;;  %v12831_v21 = vld [vmem:[#allocation105_spill] sm:$0xff] }
 0x290   :  { %6737 = vmatprep.subr.bf16.mxu1 %v6736_v40  ;;  %6355 = vmatpush1.bf16.msra.mxu0 %v6354_v60  ;;  %v6744_v40 = vpack.c.bf16 %v12831_v21, %v12830_v4  ;;  %v12832_v60 = vld [vmem:[#allocation110_spill] sm:$0xff]  ;;  %v12842_v21 = vld [vmem:[#allocation21_spill] sm:$0xff] }
 0x291   :  { %6357 = vmatprep.subr.bf16.mxu0 %v6356_v51  ;;  %3596 = vmatprep.mubr.f32.mxu0 %v12827_v63  ;;  %v12833_v51 = vld [vmem:[#allocation112_spill] sm:$0xff]  ;;  %v12843_v4 = vld [vmem:[#allocation22_spill] sm:$0xff] }
 0x292   :  { %4680 = vmatmul.mubr.f32.vlgmr.msra.gmra.mrb[2].mxu1 %v12818_v1  ;;  %v6362_v30 = vpack.c.bf16 %v12833_v51, %v12832_v60  ;;  %v12836_v1 = vld [vmem:[#allocation141_spill] sm:$0xff]  ;;  %v6368_v51 = vpack.c.bf16 %v12843_v4, %v12842_v21  ;;  %v12845_v60 = vld [vmem:[#allocation23_spill] sm:$0xff] }
 0x293   :  { %6739 = vmatpush1.bf16.msra.mxu1 %v6738_v39  ;;  %4880 = vmatprep.mubr.f32.mxu1 %v12827_v63  ;;  %v12837_v39 = vld [vmem:[#allocation150_spill] sm:$0xff]  ;;  %v12839_v63 = vld [vmem:[#allocation12_spill] sm:$0xff] }
 0x294   :  { %6741 = vmatprep.subr.bf16.mxu1 %v6740_v18  ;;  %6359 = vmatpush1.bf16.msra.mxu0 %v6358_v62  ;;  %v6746_v57 = vpack.c.bf16 %v12837_v39, %v12836_v1  ;;  %v6748_v18 = vpack.c.bf16 %v12839_v63, %v12838_v58  ;;  %v12840_v62 = vld [vmem:[#allocation14_spill] sm:$0xff]  ;;  %v12847_v39 = vld [vmem:[#allocation29_spill] sm:$0xff]  ;;  %v12851_v58 = vld [vmem:[#allocation43_spill] sm:$0xff] }
 0x295   :  { %6361 = vmatprep.subr.bf16.mxu0 %v6360_v24  ;;  %v6366_v13 = vpack.c.bf16 %v12841_v14, %v12840_v62  ;;  %v12844_v24 = vld [vmem:[#allocation19_spill] sm:$0xff]  ;;  %v12849_v1 = vld [vmem:[#allocation37_spill] sm:$0xff]  ;;  %v12850_v63 = vld [vmem:[#allocation42_spill] sm:$0xff] }
 0x296   :  { %v6750_v52 = vpack.c.bf16 %v12845_v60, %v12844_v24  ;;  %v6372_v14 = vpack.c.bf16 %v12851_v58, %v12850_v63  ;;  %v12853_v62 = vld [vmem:[#allocation39_spill] sm:$0xff]  ;;  %v12855_v60 = vld [vmem:[#allocation45_spill] sm:$0xff]  ;;  %v12857_v24 = vld [vmem:[#allocation52_spill] sm:$0xff] }
 0x297   :  { %6743 = vmatpush1.bf16.msra.mxu1 %v6742_v61  ;;  %v12846_v61 = vld [vmem:[#allocation28_spill] sm:$0xff] }
 0x298   :  { %6745 = vmatprep.subr.bf16.mxu1 %v6744_v40  ;;  %6363 = vmatpush1.bf16.msra.mxu0 %v6362_v30  ;;  %v6752_v40 = vpack.c.bf16 %v12847_v39, %v12846_v61  ;;  %v12848_v30 = vld [vmem:[#allocation36_spill] sm:$0xff]  ;;  %v12858_v39 = vld [vmem:[#allocation57_spill] sm:$0xff]  ;;  %v12859_v61 = vld [vmem:[#allocation58_spill] sm:$0xff] }
 0x299   :  { %6365 = vmatprep.subr.bf16.mxu0 %v6364_v9  ;;  %v6370_v23 = vpack.c.bf16 %v12849_v1, %v12848_v30  ;;  %v12852_v9 = vld [vmem:[#allocation34_spill] sm:$0xff]  ;;  %v6376_v1 = vpack.c.bf16 %v12859_v61, %v12858_v39  ;;  %v12861_v30 = vld [vmem:[#allocation60_spill] sm:$0xff] }
 0x29a   :  { %v6754_v4 = vpack.c.bf16 %v12853_v62, %v12852_v9  ;;  %v12863_v62 = vld [vmem:[#allocation66_spill] sm:$0xff]  ;;  %v12865_v9 = vld [vmem:[#allocation73_spill] sm:$0xff] }
 0x29b   :  { %6747 = vmatpush1.bf16.msra.mxu1 %v6746_v57  ;;  %v12854_v57 = vld [vmem:[#allocation49_spill] sm:$0xff] }
 0x29c   :  { %6749 = vmatprep.subr.bf16.mxu1 %v6748_v18  ;;  %6367 = vmatpush1.bf16.msra.mxu0 %v6366_v13  ;;  %v6756_v18 = vpack.c.bf16 %v12855_v60, %v12854_v57  ;;  %v12856_v13 = vld [vmem:[#allocation51_spill] sm:$0xff]  ;;  %v12866_v60 = vld [vmem:[#allocation76_spill] sm:$0xff] }
 0x29d   :  { %6369 = vmatprep.subr.bf16.mxu0 %v6368_v51  ;;  %v6374_v21 = vpack.c.bf16 %v12857_v24, %v12856_v13  ;;  %v12860_v51 = vld [vmem:[#allocation55_spill] sm:$0xff]  ;;  %v12869_v13 = vld [vmem:[#allocation74_spill] sm:$0xff] }
 0x29e   :  { %v6758_v58 = vpack.c.bf16 %v12861_v30, %v12860_v51  ;;  %v12867_v57 = vld [vmem:[#allocation79_spill] sm:$0xff]  ;;  %v12871_v30 = vld [vmem:[#allocation81_spill] sm:$0xff]  ;;  %v12873_v51 = vld [vmem:[#allocation88_spill] sm:$0xff] }
 0x29f   :  { %6751 = vmatpush1.bf16.msra.mxu1 %v6750_v52  ;;  %v12862_v52 = vld [vmem:[#allocation64_spill] sm:$0xff]  ;;  %v6380_v24 = vpack.c.bf16 %v12867_v57, %v12866_v60 }
 0x2a0   :  { %6753 = vmatprep.subr.bf16.mxu1 %v6752_v40  ;;  %6371 = vmatpush1.bf16.msra.mxu0 %v6370_v23  ;;  %v6760_v40 = vpack.c.bf16 %v12863_v62, %v12862_v52  ;;  %v12864_v23 = vld [vmem:[#allocation72_spill] sm:$0xff]  ;;  %v12874_v62 = vld [vmem:[#allocation94_spill] sm:$0xff] }
 0x2a1   :  { %6373 = vmatprep.subr.bf16.mxu0 %v6372_v14  ;;  %v6378_v63 = vpack.c.bf16 %v12865_v9, %v12864_v23  ;;  %v12868_v14 = vld [vmem:[#allocation70_spill] sm:$0xff]  ;;  %v12875_v52 = vld [vmem:[#allocation136_spill] sm:$0xff]  ;;  %v12877_v23 = vld [vmem:[#allocation97_spill] sm:$0xff] }
 0x2a2   :  { %v6762_v61 = vpack.c.bf16 %v12869_v13, %v12868_v14  ;;  %v6384_v9 = vpack.c.bf16 %v12875_v52, %v12874_v62  ;;  %v12879_v13 = vld [vmem:[#allocation148_spill] sm:$0xff]  ;;  %v12886_v52 = vld [vmem:[#allocation170_spill] sm:$0xff] }
 0x2a3   :  { %6755 = vmatpush1.bf16.msra.mxu1 %v6754_v4  ;;  %v12870_v4 = vld [vmem:[#allocation85_spill] sm:$0xff]  ;;  %v12881_v14 = vld [vmem:[#allocation168_spill] sm:$0xff] }
 0x2a4   :  { %6757 = vmatprep.subr.bf16.mxu1 %v6756_v18  ;;  %6375 = vmatpush1.bf16.msra.mxu0 %v6374_v21  ;;  %v6764_v18 = vpack.c.bf16 %v12871_v30, %v12870_v4  ;;  %v12872_v21 = vld [vmem:[#allocation86_spill] sm:$0xff] }
 0x2a5   :  { %6377 = vmatprep.subr.bf16.mxu0 %v6376_v1  ;;  %v6382_v39 = vpack.c.bf16 %v12873_v51, %v12872_v21  ;;  %v12876_v1 = vld [vmem:[#allocation91_spill] sm:$0xff] }
 0x2a6   :  { %v6766_v57 = vpack.c.bf16 %v12877_v23, %v12876_v1  ;;  %v12883_v51 = vld [vmem:[#allocation175_spill] sm:$0xff] }
 0x2a7   :  { %6759 = vmatpush1.bf16.msra.mxu1 %v6758_v58  ;;  %v12878_v58 = vld [vmem:[#allocation145_spill] sm:$0xff] }
 0x2a8   :  { %6761 = vmatprep.subr.bf16.mxu1 %v6760_v40  ;;  %6379 = vmatpush1.bf16.msra.mxu0 %v6378_v63  ;;  %v6768_v40 = vpack.c.bf16 %v12879_v13, %v12878_v58  ;;  %v12880_v63 = vld [vmem:[#allocation157_spill] sm:$0xff]  ;;  %v12891_v13 = vld [vmem:[#allocation186_spill] sm:$0xff]  ;;  %v12892_v58 = vld [vmem:[#allocation184_spill] sm:$0xff] }
 0x2a9   :  { %6381 = vmatprep.subr.bf16.mxu0 %v6380_v24  ;;  %v6386_v60 = vpack.c.bf16 %v12881_v14, %v12880_v63  ;;  %v12882_v24 = vld [vmem:[#allocation177_spill] sm:$0xff]  ;;  %v12893_v1 = vpack.c.bf16 %v12891_v13, %v12892_v58 }
 0x2aa   :  { %v12884_v21 = vpack.c.bf16 %v12882_v24, %v12883_v51  ;;  %v12898_v14 = vld [vmem:[#allocation189_spill] sm:$0xff]  ;;  %v12901_v51 = vld [vmem:[#allocation199_spill] sm:$0xff] }
 0x2ab   :  { %6763 = vmatpush1.bf16.msra.mxu1 %v6762_v61  ;;  %v12885_v61 = vld [vmem:[#allocation172_spill] sm:$0xff]  ;;  %v12910_v58 = vld [vmem:[#allocation17_spill] sm:$0xff] }
 0x2ac   :  { %6765 = vmatprep.subr.bf16.mxu1 %v6764_v18  ;;  %6383 = vmatpush1.bf16.msra.mxu0 %v6382_v39  ;;  %v12887_v62 = vpack.c.bf16 %v12885_v61, %v12886_v52  ;;  %v12888_v18 = vld [vmem:[#allocation181_spill] sm:$0xff]  ;;  %v12889_v39 = vld [vmem:[#allocation180_spill] sm:$0xff]  ;;  %v12904_v52 = vld [vmem:[#allocation203_spill] sm:$0xff] }
 0x2ad   :  { %6385 = vmatprep.subr.bf16.mxu0 %v6384_v9  ;;  %v12890_v23 = vpack.c.bf16 %v12888_v18, %v12889_v39  ;;  %v12894_v9 = vld [vmem:[#allocation194_spill] sm:$0xff] }
 0x2ae   :  { %v12907_v39 = vld [vmem:[#allocation26_spill] sm:$0xff] }
 0x2af   :  { %6767 = vmatpush1.bf16.msra.mxu1 %v6766_v57  ;;  %v12895_v57 = vld [vmem:[#allocation193_spill] sm:$0xff] }
 0x2b0   :  { %6769 = vmatprep.subr.bf16.mxu1 %v6768_v40  ;;  %6387 = vmatpush1.bf16.msra.mxu0 %v6386_v60  ;;  %v12896_v40 = vpack.c.bf16 %v12894_v9, %v12895_v57  ;;  %v12897_v60 = vld [vmem:[#allocation190_spill] sm:$0xff] }
 0x2b1   :  { %6389 = vmatprep.subr.bf16.mxu0 %v12884_v21  ;;  %v12899_v24 = vpack.c.bf16 %v12897_v60, %v12898_v14  ;;  %v12900_v21 = vld [vmem:[#allocation200_spill] sm:$0xff] }
 0x2b2   :  { %v12902_v61 = vpack.c.bf16 %v12900_v21, %v12901_v51 }
 0x2b3   :  { %6771 = vmatpush1.bf16.msra.mxu1 %v12887_v62  ;;  %v12903_v62 = vld [vmem:[#allocation11_spill] sm:$0xff] }
 0x2b4   :  { %6773 = vmatprep.subr.bf16.mxu1 %v12890_v23  ;;  %6391 = vmatpush1.bf16.msra.mxu0 %v12893_v1  ;;  %v12905_v18 = vpack.c.bf16 %v12903_v62, %v12904_v52  ;;  %v12906_v23 = vld [vmem:[#allocation30_spill] sm:$0xff]  ;;  %v12909_v1 = vld [vmem:[#allocation24_spill] sm:$0xff] }
 0x2b5   :  { %6393 = vmatprep.subr.bf16.mxu0 %v12896_v40  ;;  %v12908_v13 = vpack.c.bf16 %v12906_v23, %v12907_v39  ;;  %v12911_v9 = vpack.c.bf16 %v12909_v1, %v12910_v58  ;;  %v12912_v40 = vpack.c.bf16 %v12731_v48, %v12730_v46  ;;  %v12920_v48 = vld [vmem:[#allocation99_spill] sm:$0xff] }
 0x2b7   :  { %6775 = vmatpush1.bf16.msra.mxu1 %v12899_v24  ;;  %v12913_v24 = vld [vmem:[#allocation41_spill] sm:$0xff] }
 0x2b8   :  { %6777 = vmatprep.subr.bf16.mxu1 %v12902_v61  ;;  %6395 = vmatpush1.bf16.msra.mxu0 %v12905_v18  ;;  %v12914_v21 = vpack.c.bf16 %v12734_v37, %v12913_v24  ;;  %v12915_v61 = vpack.c.bf16 %v12738_v27, %v12737_v7  ;;  %v12916_v18 = vpack.c.bf16 %v12736_v26, %v12735_v16  ;;  %v12923_v24 = vld [vmem:[#allocation89_spill] sm:$0xff] }
 0x2b9   :  { %6397 = vmatprep.subr.bf16.mxu0 %v12908_v13  ;;  %v12917_v13 = vpack.c.bf16 %v12741_v33, %v12740_v44 }
 0x2bb   :  { %6779 = vmatpush1.bf16.msra.mxu1 %v12911_v9  ;;  %v12918_v9 = vpack.c.bf16 %v12743_v53, %v12742_v20 }
 0x2bc   :  { %6781 = vmatprep.subr.bf16.mxu1 %v12912_v40  ;;  %6399 = vmatpush1.bf16.msra.mxu0 %v12914_v21  ;;  %v12919_v40 = vld [vmem:[#allocation101_spill] sm:$0xff]  ;;  %v12922_v21 = vld [vmem:[#allocation95_spill] sm:$0xff] }
 0x2bd   :  { %6401 = vmatprep.subr.bf16.mxu0 %v12915_v61  ;;  %v12921_v37 = vpack.c.bf16 %v12919_v40, %v12920_v48  ;;  %v12924_v27 = vpack.c.bf16 %v12922_v21, %v12923_v24  ;;  %v12925_v61 = vld [vmem:[#allocation104_spill] sm:$0xff] }
 0x2be   :  { %v12926_v26 = vpack.c.bf16 %v12791_v31, %v12925_v61 }
 0x2bf   :  { %6783 = vmatpush1.bf16.msra.mxu1 %v12916_v18  ;;  %v12927_v18 = vld [vmem:[#allocation119_spill] sm:$0xff] }
 0x2c0   :  { %6785 = vmatprep.subr.bf16.mxu1 %v12917_v13  ;;  %6403 = vmatpush1.bf16.msra.mxu0 %v12918_v9  ;;  %v12928_v33 = vpack.c.bf16 %v12751_v8, %v12927_v18  ;;  %v12929_v13 = vpack.c.bf16 %v12803_v19, %v12802_v42  ;;  %v12930_v9 = vld [vmem:[#allocation125_spill] sm:$0xff] }
 0x2c1   :  { %6405 = vmatprep.subr.bf16.mxu0 %v12921_v37  ;;  %v12931_v40 = vpack.c.bf16 %v12753_v29, %v12930_v9  ;;  %v12932_v37 = vpack.c.bf16 %v12805_v50, %v12804_v0 }
 0x2c3   :  { %6787 = vmatpush1.bf16.msra.mxu1 %v12924_v27  ;;  %v12933_v27 = vpack.c.bf16 %v12806_v17, %v12759_v49 }
 0x2c4   :  { %6789 = vmatprep.subr.bf16.mxu1 %v12926_v26  ;;  %6407 = vmatpush1.bf16.msra.mxu0 %v12928_v33  ;;  %v12934_v26 = vpack.c.bf16 %v12764_v56, %v12763_v36  ;;  %v12935_v33 = vpack.c.bf16 %v12762_v38, %v12761_v12  ;;  %v12940_v56 = vld [vmem:[#allocation207_spill] sm:$0xff]  ;;  %v12942_v38 = vld [vmem:[#allocation118_spill] sm:$0xff] }
 0x2c5   :  { %6409 = vmatprep.subr.bf16.mxu0 %v12929_v13  ;;  %v12936_v13 = vpack.c.bf16 %v12809_v15, %v12765_v3  ;;  %v12944_v15 = vld [vmem:[#allocation206_spill] sm:$0xff] }
 0x2c7   :  { %6791 = vmatpush1.bf16.msra.mxu1 %v12931_v40  ;;  %v12937_v40 = vpack.c.bf16 %v12768_v32, %v12767_v54 }
 0x2c8   :  { %6793 = vmatprep.subr.bf16.mxu1 %v12932_v37  ;;  %6411 = vmatpush1.bf16.msra.mxu0 %v12933_v27  ;;  %v12938_v37 = vld [vmem:[#allocation163_spill] sm:$0xff]  ;;  %v12939_v27 = vpack.c.bf16 %v12770_v11, %v12769_v34  ;;  %v12949_v11 = vld [vmem:[#allocation96_spill] sm:$0xff]  ;;  %v12953_v34 = vld [vmem:[#allocation146_spill] sm:$0xff] }
 0x2c9   :  { %6413 = vmatprep.subr.bf16.mxu0 %v12934_v26  ;;  %v12941_v26 = vld [vmem:[#allocation117_spill] sm:$0xff] }
 0x2cb   :  { %6795 = vmatpush1.bf16.msra.mxu1 %v12935_v33  ;;  %v12943_v33 = vld [vmem:[#allocation133_spill] sm:$0xff] }
 0x2cc   :  { %6797 = vmatprep.subr.bf16.mxu1 %v12936_v13  ;;  %6415 = vmatpush1.bf16.msra.mxu0 %v12937_v40  ;;  %v12945_v13 = vld [vmem:[#allocation126_spill] sm:$0xff] }
 0x2cd   :  { %6417 = vmatprep.subr.bf16.mxu0 %v12938_v37  ;;  %v12946_v40 = vld [vmem:[#allocation138_spill] sm:$0xff]  ;;  %v12947_v37 = vld [vmem:[#allocation156_spill] sm:$0xff] }
 0x2cf   :  { %6799 = vmatpush1.bf16.msra.mxu1 %v12939_v27  ;;  %3599 = vmatmul.mubr.f32.vlgmr.msra.gmra.mrb[2].mxu0 %v12940_v56  ;;  %v12948_v27 = vld [vmem:[#allocation100_spill] sm:$0xff] }
 0x2d0   :  { %6801 = vmatprep.subr.bf16.mxu1 %v12941_v26  ;;  %6419 = vmatpush1.bf16.msra.mxu0 %v12942_v38  ;;  %v12950_v26 = vld [vmem:[#allocation108_spill] sm:$0xff]  ;;  %v12951_v38 = vld [vmem:[#allocation106_spill] sm:$0xff] }
 0x2d1   :  { %6421 = vmatprep.subr.bf16.mxu0 %v12943_v33  ;;  %3736 = vmatprep.mubr.f32.mxu0 %v12944_v15  ;;  %v12952_v33 = vld [vmem:[#allocation154_spill] sm:$0xff] }
 0x2d2   :  { %4883 = vmatmul.mubr.f32.vlgmr.msra.gmra.mrb[2].mxu1 %v12940_v56  ;;  %v12954_v56 = vld [vmem:[#allocation166_spill] sm:$0xff] }
 0x2d3   :  { %6803 = vmatpush1.bf16.msra.mxu1 %v12945_v13  ;;  %5020 = vmatprep.mubr.f32.mxu1 %v12944_v15  ;;  %v12955_v13 = vld [vmem:[#allocation13_spill] sm:$0xff] }
 0x2d4   :  { %6805 = vmatprep.subr.bf16.mxu1 %v12946_v40  ;;  %6423 = vmatpush1.bf16.msra.mxu0 %v12947_v37  ;;  %v12956_v15 = vld [vmem:[#allocation25_spill] sm:$0xff]  ;;  %v12957_v40 = vld [vmem:[#allocation18_spill] sm:$0xff]  ;;  %v12958_v37 = vld [vmem:[#allocation27_spill] sm:$0xff] }
 0x2d5   :  { %6425 = vmatprep.subr.bf16.mxu0 %v12948_v27  ;;  %v12959_v27 = vld [vmem:[#allocation31_spill] sm:$0xff] }
 0x2d7   :  { %6807 = vmatpush1.bf16.msra.mxu1 %v12949_v11  ;;  %v12960_v11 = vld [vmem:[#allocation40_spill] sm:$0xff] }
 0x2d8   :  { %6809 = vmatprep.subr.bf16.mxu1 %v12950_v26  ;;  %6427 = vmatpush1.bf16.msra.mxu0 %v12951_v38  ;;  %v12961_v38 = vld [vmem:[#allocation32_spill] sm:$0xff] }
 0x2d9   :  { %6429 = vmatprep.subr.bf16.mxu0 %v12952_v33 }
 0x2db   :  { %6811 = vmatpush1.bf16.msra.mxu1 %v12953_v34  ;;  %v12962_v34 = vld [vmem:[#allocation48_spill] sm:$0xff] }
 0x2dc   :  { %6813 = vmatprep.subr.bf16.mxu1 %v12954_v56  ;;  %6431 = vmatpush1.bf16.msra.mxu0 %v12955_v13  ;;  %v12963_v56 = vld [vmem:[#allocation46_spill] sm:$0xff] }
 0x2dd   :  { %6433 = vmatprep.subr.bf16.mxu0 %v12956_v15  ;;  %v12964_v15 = vld [vmem:[#allocation61_spill] sm:$0xff] }
 0x2df   :  { %6815 = vmatpush1.bf16.msra.mxu1 %v12957_v40 }
 0x2e0   :  { %6817 = vmatprep.subr.bf16.mxu1 %v12958_v37  ;;  %6435 = vmatpush1.bf16.msra.mxu0 %v12959_v27  ;;  %v12965_v37 = vld [vmem:[#allocation53_spill] sm:$0xff]  ;;  %v12966_v27 = vld [vmem:[#allocation62_spill] sm:$0xff] }
 0x2e1   :  { %6437 = vmatprep.subr.bf16.mxu0 %v12960_v11  ;;  %v12967_v11 = vld [vmem:[#allocation67_spill] sm:$0xff] }
 0x2e2   :  { %v1575_v26 = vpop.f32.mrb[0].mxu0 }
 0x2e3   :  { %6819 = vmatpush1.bf16.msra.mxu1 %v12961_v38  ;;  %5432 = vst [vmem:[#allocation7] sm:$0xff] %v1575_v26  ;;  %v1577_v33 = vpop.f32.mrb[1].mxu0  ;;  %v12968_v38 = vld [vmem:[#allocation78_spill] sm:$0xff]  ;;  %v12969_v26 = vld [vmem:[#allocation69_spill] sm:$0xff] }
 0x2e4   :  { %5433 = vst [vmem:[#allocation7 + $0x8] sm:$0xff] %v1577_v33  ;;  %6821 = vmatprep.subr.bf16.mxu1 %v12962_v34  ;;  %6439 = vmatpush1.bf16.msra.mxu0 %v12963_v56  ;;  %v2859_v13 = vpop.f32.mrb[0].mxu1  ;;  %v12970_v33 = vld [vmem:[#allocation84_spill] sm:$0xff]  ;;  %v12971_v34 = vld [vmem:[#allocation82_spill] sm:$0xff] }
 0x2e5   :  { %6441 = vmatprep.subr.bf16.mxu0 %v12964_v15  ;;  %5434 = vst [vmem:[#allocation7 + $0x10] sm:$0xff] %v2859_v13  ;;  %v2861_v40 = vpop.f32.mrb[1].mxu1  ;;  %v12972_v56 = vld [vmem:[#allocation130_spill] sm:$0xff]  ;;  %v12974_v13 = vld [vmem:[#allocation139_spill] sm:$0xff] }
 0x2e6   :  { %5435 = vst [vmem:[#allocation7 + $0x18] sm:$0xff] %v2861_v40  ;;  %v12973_v15 = vld [vmem:[#allocation90_spill] sm:$0xff]  ;;  %v12975_v40 = vld [vmem:[#allocation151_spill] sm:$0xff] }
 0x2e7   :  { %6823 = vmatpush1.bf16.msra.mxu1 %v12965_v37  ;;  %v12976_v37 = vld [vmem:[#allocation174_spill] sm:$0xff] }
 0x2e8   :  { %6825 = vmatprep.subr.bf16.mxu1 %v12966_v27  ;;  %6443 = vmatpush1.bf16.msra.mxu0 %v12967_v11  ;;  %v12977_v27 = vld [vmem:[#allocation169_spill] sm:$0xff]  ;;  %v12978_v11 = vld [vmem:[#allocation178_spill] sm:$0xff] }
 0x2e9   :  { %6445 = vmatprep.subr.bf16.mxu0 %v12968_v38  ;;  %v12979_v38 = vld [vmem:[#allocation182_spill] sm:$0xff] }
 0x2eb   :  { %6827 = vmatpush1.bf16.msra.mxu1 %v12969_v26  ;;  %v12980_v26 = vld [vmem:[#allocation192_spill] sm:$0xff] }
 0x2ec   :  { %6829 = vmatprep.subr.bf16.mxu1 %v12970_v33  ;;  %6447 = vmatpush1.bf16.msra.mxu0 %v12971_v34  ;;  %v12981_v33 = vld [vmem:[#allocation187_spill] sm:$0xff]  ;;  %v12982_v34 = vld [vmem:[#allocation197_spill] sm:$0xff] }
 0x2ed   :  { %6449 = vmatprep.subr.bf16.mxu0 %v12972_v56  ;;  %v12983_v56 = vld [vmem:[#allocation202_spill] sm:$0xff] }
 0x2ef   :  { %6831 = vmatpush1.bf16.msra.mxu1 %v12973_v15  ;;  %v12984_v15 = vld [vmem:[#allocation20_spill] sm:$0xff] }
 0x2f0   :  { %6833 = vmatprep.subr.bf16.mxu1 %v12974_v13  ;;  %6451 = vmatpush1.bf16.msra.mxu0 %v12975_v40  ;;  %v12985_v13 = vld [vmem:[#allocation15_spill] sm:$0xff] }
 0x2f1   :  { %6453 = vmatprep.subr.bf16.mxu0 %v12976_v37  ;;  %v12986_v40 = vld [vmem:[#allocation35_spill] sm:$0xff] }
 0x2f2   :  { %v12987_v37 = vld [vmem:[#allocation47_spill] sm:$0xff] }
 0x2f3   :  { %6835 = vmatpush1.bf16.msra.mxu1 %v12977_v27  ;;  %v12988_v27 = vld [vmem:[#allocation56_spill] sm:$0xff] }
 0x2f4   :  { %6837 = vmatprep.subr.bf16.mxu1 %v12978_v11  ;;  %6455 = vmatpush1.bf16.msra.mxu0 %v12979_v38  ;;  %v12989_v11 = vld [vmem:[#allocation50_spill] sm:$0xff]  ;;  %v12990_v38 = vld [vmem:[#allocation71_spill] sm:$0xff] }
 0x2f5   :  { %6457 = vmatprep.subr.bf16.mxu0 %v12980_v26  ;;  %v12991_v26 = vld [vmem:[#allocation77_spill] sm:$0xff] }
 0x2f7   :  { %6839 = vmatpush1.bf16.msra.mxu1 %v12981_v33  ;;  %v12992_v33 = vld [vmem:[#allocation92_spill] sm:$0xff] }
 0x2f8   :  { %6841 = vmatprep.subr.bf16.mxu1 %v12982_v34  ;;  %6459 = vmatpush1.bf16.msra.mxu0 %v12983_v56  ;;  %v12993_v34 = vld [vmem:[#allocation87_spill] sm:$0xff] }
 0x2f9   :  { %6461 = vmatprep.subr.bf16.mxu0 %v12984_v15  ;;  %v12994_v56 = vld [vmem:[#allocation107_spill] sm:$0xff]  ;;  %v12995_v15 = vld [vmem:[#allocation113_spill] sm:$0xff] }
 0x2fb   :  { %6843 = vmatpush1.bf16.msra.mxu1 %v12985_v13  ;;  %v12996_v13 = vld [vmem:[#allocation128_spill] sm:$0xff] }
 0x2fc   :  { %6845 = vmatprep.subr.bf16.mxu1 %v12986_v40  ;;  %6463 = vmatpush1.bf16.msra.mxu0 %v12987_v37  ;;  %v12997_v40 = vld [vmem:[#allocation123_spill] sm:$0xff] }
 0x2fd   :  { %6465 = vmatprep.subr.bf16.mxu0 %v12988_v27  ;;  %v12998_v37 = vld [vmem:[#allocation143_spill] sm:$0xff]  ;;  %v12999_v27 = vld [vmem:[#allocation149_spill] sm:$0xff] }
 0x2ff   :  { %6847 = vmatpush1.bf16.msra.mxu1 %v12989_v11  ;;  %v13000_v11 = vld [vmem:[#allocation171_spill] sm:$0xff] }
 0x300   :  { %6849 = vmatprep.subr.bf16.mxu1 %v12990_v38  ;;  %6467 = vmatpush1.bf16.msra.mxu0 %v12991_v26  ;;  %v13001_v26 = vand.u32 4294901760, %v12810_v35  ;;  %v13010_v35 = vand.u32 4294901760, %v12816_v55  ;;  %v13019_v55 = vand.u32 4294901760, %v12824_v2 }
 0x301   :  { %6469 = vmatprep.subr.bf16.mxu0 %v12992_v33  ;;  %v13002_v33 = vand.u32 4294901760, %v12811_v25  ;;  %v13011_v25 = vand.u32 4294901760, %v12817_v59 }
 0x303   :  { %6851 = vmatpush1.bf16.msra.mxu1 %v12993_v34  ;;  %v6480_v38 = vpack.c.bf16 %v13002_v33, %v13001_v26  ;;  %v13003_v34 = vld [vmem:[#allocation159_spill] sm:$0xff]  ;;  %v6484_v26 = vpack.c.bf16 %v13011_v25, %v13010_v35  ;;  %v13012_v33 = vld [vmem:[#allocation196_spill] sm:$0xff] }
 0x304   :  { %6853 = vmatprep.subr.bf16.mxu1 %v12994_v56  ;;  %6471 = vmatpush1.bf16.msra.mxu0 %v12995_v15  ;;  %v13004_v56 = vld [vmem:[#allocation179_spill] sm:$0xff]  ;;  %v13005_v15 = vld [vmem:[#allocation185_spill] sm:$0xff] }
 0x305   :  { %6473 = vmatprep.subr.bf16.mxu0 %v12996_v13  ;;  %v13006_v13 = vand.u32 4294901760, %v12812_v6  ;;  %v13014_v6 = vand.u32 4294901760, %v12819_v5  ;;  %v13022_v35 = vld [vmem:[#allocation103_spill] sm:$0xff] }
 0x306   :  { %v13023_v5 = vand.u32 4294901760, %v13022_v35  ;;  %v13039_v35 = vld [vmem:[#allocation162_spill] sm:$0xff] }
 0x307   :  { %6855 = vmatpush1.bf16.msra.mxu1 %v12997_v40  ;;  %v13007_v40 = vand.u32 4294901760, %v12813_v45  ;;  %v13015_v45 = vand.u32 4294901760, %v12820_v28  ;;  %v13024_v28 = vld [vmem:[#allocation195_spill] sm:$0xff] }
 0x308   :  { %6857 = vmatprep.subr.bf16.mxu1 %v12998_v37  ;;  %6475 = vmatpush1.bf16.msra.mxu0 %v12999_v27  ;;  %v13008_v27 = vand.u32 4294901760, %v12814_v22  ;;  %v13016_v22 = vand.u32 4294901760, %v12821_v10 }
 0x309   :  { %6477 = vmatprep.subr.bf16.mxu0 %v13000_v11  ;;  %v6864_v37 = vpack.c.bf16 %v13007_v40, %v13006_v13  ;;  %v13009_v11 = vand.u32 4294901760, %v12815_v41  ;;  %v6866_v13 = vpack.c.bf16 %v13015_v45, %v13014_v6  ;;  %v13018_v41 = vand.u32 4294901760, %v12823_v43  ;;  %v13029_v43 = vld [vmem:[#allocation109_spill] sm:$0xff] }
 0x30a   :  { %v13030_v2 = vand.u32 4294901760, %v13029_v43  ;;  %v13045_v43 = vld [vmem:[#allocation165_spill] sm:$0xff] }
 0x30b   :  { %6859 = vmatpush1.bf16.msra.mxu1 %v13003_v34  ;;  %v6482_v32 = vpack.c.bf16 %v13009_v11, %v13008_v27  ;;  %v6486_v59 = vpack.c.bf16 %v13019_v55, %v13018_v41  ;;  %v13020_v27 = vld [vmem:[#allocation102_spill] sm:$0xff]  ;;  %v13035_v55 = vld [vmem:[#allocation112_spill] sm:$0xff] }
 0x30c   :  { %6861 = vmatprep.subr.bf16.mxu1 %v13004_v56  ;;  %6479 = vmatpush1.bf16.msra.mxu0 %v13005_v15  ;;  %v13013_v56 = vld [vmem:[#allocation208_spill] sm:$0xff]  ;;  %v13021_v40 = vand.u32 4294901760, %v13020_v27  ;;  %v13036_v27 = vand.u32 4294901760, %v13035_v55 }
 0x30d   :  { %6481 = vmatprep.subr.bf16.mxu0 %v6480_v38  ;;  %v13017_v38 = vand.u32 4294901760, %v12822_v47  ;;  %v13027_v47 = vld [vmem:[#allocation98_spill] sm:$0xff]  ;;  %v13051_v55 = vld [vmem:[#allocation16_spill] sm:$0xff] }
 0x30e   :  { %v6488_v25 = vpack.c.bf16 %v13023_v5, %v13021_v40  ;;  %v13040_v5 = vand.u32 4294901760, %v13039_v35  ;;  %v13055_v35 = vld [vmem:[#allocation22_spill] sm:$0xff] }
 0x30f   :  { %6863 = vmatpush1.bf16.msra.mxu1 %v13012_v33  ;;  %3740 = vmatmul.mubr.f32.vlgmr.msra.gmra.mrb[2].mxu0 %v13013_v56  ;;  %v6868_v11 = vpack.c.bf16 %v13017_v38, %v13016_v22  ;;  %v13033_v38 = vld [vmem:[#allocation110_spill] sm:$0xff] }
 0x310   :  { %6865 = vmatprep.subr.bf16.mxu1 %v6864_v37  ;;  %6483 = vmatpush1.bf16.msra.mxu0 %v6482_v32  ;;  %v13025_v32 = vld [vmem:[#allocation93_spill] sm:$0xff]  ;;  %v13028_v37 = vand.u32 4294901760, %v13027_v47  ;;  %v13034_v41 = vand.u32 4294901760, %v13033_v38 }
 0x311   :  { %6485 = vmatprep.subr.bf16.mxu0 %v6484_v26  ;;  %4003 = vmatprep.mubr.f32.mxu0 %v13024_v28  ;;  %v13026_v10 = vand.u32 4294901760, %v13025_v32  ;;  %v13031_v26 = vld [vmem:[#allocation105_spill] sm:$0xff] }
 0x312   :  { %5024 = vmatmul.mubr.f32.vlgmr.msra.gmra.mrb[2].mxu1 %v13013_v56  ;;  %v13032_v45 = vand.u32 4294901760, %v13031_v26  ;;  %v6490_v56 = vpack.c.bf16 %v13036_v27, %v13034_v41  ;;  %v13047_v26 = vld [vmem:[#allocation12_spill] sm:$0xff]  ;;  %v13049_v41 = vld [vmem:[#allocation14_spill] sm:$0xff]  ;;  %v13052_v27 = vand.u32 4294901760, %v13051_v55  ;;  %v13067_v55 = vld [vmem:[#allocation37_spill] sm:$0xff] }
 0x313   :  { %6867 = vmatpush1.bf16.msra.mxu1 %v6866_v13  ;;  %v6870_v6 = vpack.c.bf16 %v13028_v37, %v13026_v10  ;;  %5287 = vmatprep.mubr.f32.mxu1 %v13024_v28  ;;  %v13037_v13 = vld [vmem:[#allocation153_spill] sm:$0xff] }
 0x314   :  { %6869 = vmatprep.subr.bf16.mxu1 %v6868_v11  ;;  %6487 = vmatpush1.bf16.msra.mxu0 %v6486_v59  ;;  %v6872_v22 = vpack.c.bf16 %v13032_v45, %v13030_v2  ;;  %v13038_v40 = vand.u32 4294901760, %v13037_v13  ;;  %v13041_v10 = vld [vmem:[#allocation141_spill] sm:$0xff]  ;;  %v13043_v59 = vld [vmem:[#allocation150_spill] sm:$0xff]  ;;  %v13046_v2 = vand.u32 4294901760, %v13045_v43  ;;  %v13048_v45 = vand.u32 4294901760, %v13047_v26  ;;  %v13061_v43 = vld [vmem:[#allocation28_spill] sm:$0xff] }
 0x315   :  { %6489 = vmatprep.subr.bf16.mxu0 %v6488_v25  ;;  %v13042_v11 = vand.u32 4294901760, %v13041_v10  ;;  %v13044_v47 = vand.u32 4294901760, %v13043_v59  ;;  %v13050_v25 = vand.u32 4294901760, %v13049_v41  ;;  %v13063_v26 = vld [vmem:[#allocation29_spill] sm:$0xff] }
 0x316   :  { %v6492_v32 = vpack.c.bf16 %v13040_v5, %v13038_v40  ;;  %v6876_v38 = vpack.c.bf16 %v13048_v45, %v13046_v2  ;;  %v13053_v40 = vld [vmem:[#allocation21_spill] sm:$0xff]  ;;  %v13056_v5 = vand.u32 4294901760, %v13055_v35  ;;  %v13062_v2 = vand.u32 4294901760, %v13061_v43  ;;  %v13071_v35 = vld [vmem:[#allocation43_spill] sm:$0xff] }
 0x317   :  { %6871 = vmatpush1.bf16.msra.mxu1 %v6870_v6  ;;  %v6874_v37 = vpack.c.bf16 %v13044_v47, %v13042_v11  ;;  %v6494_v13 = vpack.c.bf16 %v13052_v27, %v13050_v25  ;;  %v13054_v6 = vand.u32 4294901760, %v13053_v40  ;;  %v13057_v11 = vld [vmem:[#allocation19_spill] sm:$0xff]  ;;  %v13064_v45 = vand.u32 4294901760, %v13063_v26  ;;  %v13065_v25 = vld [vmem:[#allocation36_spill] sm:$0xff]  ;;  %v13077_v43 = vld [vmem:[#allocation49_spill] sm:$0xff] }
 0x318   :  { %6873 = vmatprep.subr.bf16.mxu1 %v6872_v22  ;;  %6491 = vmatpush1.bf16.msra.mxu0 %v6490_v56  ;;  %v13058_v22 = vand.u32 4294901760, %v13057_v11  ;;  %v13059_v56 = vld [vmem:[#allocation23_spill] sm:$0xff]  ;;  %v13068_v27 = vand.u32 4294901760, %v13067_v55  ;;  %v13079_v26 = vld [vmem:[#allocation45_spill] sm:$0xff]  ;;  %v13083_v55 = vld [vmem:[#allocation52_spill] sm:$0xff] }
 0x319   :  { %6493 = vmatprep.subr.bf16.mxu0 %v6492_v32  ;;  %v6496_v10 = vpack.c.bf16 %v13056_v5, %v13054_v6  ;;  %v13060_v59 = vand.u32 4294901760, %v13059_v56  ;;  %v6880_v41 = vpack.c.bf16 %v13064_v45, %v13062_v2  ;;  %v13066_v32 = vand.u32 4294901760, %v13065_v25  ;;  %v13069_v6 = vld [vmem:[#allocation42_spill] sm:$0xff] }
 0x31a   :  { %v13072_v5 = vand.u32 4294901760, %v13071_v35  ;;  %v13078_v2 = vand.u32 4294901760, %v13077_v43  ;;  %v13080_v45 = vand.u32 4294901760, %v13079_v26  ;;  %v13087_v35 = vld [vmem:[#allocation58_spill] sm:$0xff]  ;;  %v13093_v43 = vld [vmem:[#allocation64_spill] sm:$0xff] }
 0x31b   :  { %6875 = vmatpush1.bf16.msra.mxu1 %v6874_v37  ;;  %v6878_v47 = vpack.c.bf16 %v13060_v59, %v13058_v22  ;;  %v6498_v40 = vpack.c.bf16 %v13068_v27, %v13066_v32  ;;  %v13070_v37 = vand.u32 4294901760, %v13069_v6  ;;  %v13073_v22 = vld [vmem:[#allocation34_spill] sm:$0xff]  ;;  %v13081_v32 = vld [vmem:[#allocation51_spill] sm:$0xff]  ;;  %v13084_v27 = vand.u32 4294901760, %v13083_v55  ;;  %v13099_v55 = vld [vmem:[#allocation73_spill] sm:$0xff] }
 0x31c   :  { %6877 = vmatprep.subr.bf16.mxu1 %v6876_v38  ;;  %6495 = vmatpush1.bf16.msra.mxu0 %v6494_v13  ;;  %v13074_v38 = vand.u32 4294901760, %v13073_v22  ;;  %v13075_v13 = vld [vmem:[#allocation39_spill] sm:$0xff]  ;;  %v6884_v25 = vpack.c.bf16 %v13080_v45, %v13078_v2  ;;  %v13094_v2 = vand.u32 4294901760, %v13093_v43  ;;  %v13095_v26 = vld [vmem:[#allocation66_spill] sm:$0xff]  ;;  %v13109_v43 = vand.u32 4294901760, %v12870_v4 }
 0x31d   :  { %6497 = vmatprep.subr.bf16.mxu0 %v6496_v10  ;;  %v6500_v11 = vpack.c.bf16 %v13072_v5, %v13070_v37  ;;  %v13076_v56 = vand.u32 4294901760, %v13075_v13  ;;  %v13082_v10 = vand.u32 4294901760, %v13081_v32  ;;  %v13085_v37 = vld [vmem:[#allocation57_spill] sm:$0xff]  ;;  %v13088_v5 = vand.u32 4294901760, %v13087_v35  ;;  %v13103_v35 = vld [vmem:[#allocation79_spill] sm:$0xff] }
 0x31e   :  { %v13096_v45 = vand.u32 4294901760, %v13095_v26 }
 0x31f   :  { %6879 = vmatpush1.bf16.msra.mxu1 %v6878_v47  ;;  %v6882_v59 = vpack.c.bf16 %v13076_v56, %v13074_v38  ;;  %v6502_v6 = vpack.c.bf16 %v13084_v27, %v13082_v10  ;;  %v13086_v47 = vand.u32 4294901760, %v13085_v37  ;;  %v13089_v38 = vld [vmem:[#allocation55_spill] sm:$0xff]  ;;  %v13097_v10 = vld [vmem:[#allocation72_spill] sm:$0xff]  ;;  %v13100_v27 = vand.u32 4294901760, %v13099_v55 }
 0x320   :  { %6881 = vmatprep.subr.bf16.mxu1 %v6880_v41  ;;  %6499 = vmatpush1.bf16.msra.mxu0 %v6498_v40  ;;  %v13090_v41 = vand.u32 4294901760, %v13089_v38  ;;  %v13091_v40 = vld [vmem:[#allocation60_spill] sm:$0xff]  ;;  %v6888_v32 = vpack.c.bf16 %v13096_v45, %v13094_v2  ;;  %v13110_v2 = vand.u32 4294901760, %v12871_v30  ;;  %v13111_v45 = vld [vmem:[#allocation86_spill] sm:$0xff]  ;;  %v13123_v30 = vld [vmem:[#allocation145_spill] sm:$0xff] }
 0x321   :  { %6501 = vmatprep.subr.bf16.mxu0 %v6500_v11  ;;  %v6504_v22 = vpack.c.bf16 %v13088_v5, %v13086_v47  ;;  %v13092_v13 = vand.u32 4294901760, %v13091_v40  ;;  %v13098_v11 = vand.u32 4294901760, %v13097_v10  ;;  %v13101_v47 = vld [vmem:[#allocation76_spill] sm:$0xff]  ;;  %v13104_v5 = vand.u32 4294901760, %v13103_v35 }
 0x322   :  { %v6892_v26 = vpack.c.bf16 %v13110_v2, %v13109_v43  ;;  %v13113_v10 = vld [vmem:[#allocation88_spill] sm:$0xff] }
 0x323   :  { %6883 = vmatpush1.bf16.msra.mxu1 %v6882_v59  ;;  %v6886_v56 = vpack.c.bf16 %v13092_v13, %v13090_v41  ;;  %v6506_v37 = vpack.c.bf16 %v13100_v27, %v13098_v11  ;;  %v13102_v59 = vand.u32 4294901760, %v13101_v47  ;;  %v13105_v41 = vld [vmem:[#allocation70_spill] sm:$0xff]  ;;  %v13114_v11 = vand.u32 4294901760, %v13113_v10  ;;  %v13117_v47 = vld [vmem:[#allocation136_spill] sm:$0xff]  ;;  %v13130_v10 = vld [vmem:[#allocation175_spill] sm:$0xff] }
 0x324   :  { %6885 = vmatprep.subr.bf16.mxu1 %v6884_v25  ;;  %6503 = vmatpush1.bf16.msra.mxu0 %v6502_v6  ;;  %v13106_v25 = vand.u32 4294901760, %v13105_v41  ;;  %v13107_v6 = vld [vmem:[#allocation74_spill] sm:$0xff]  ;;  %v13128_v2 = vld [vmem:[#allocation168_spill] sm:$0xff] }
 0x325   :  { %6505 = vmatprep.subr.bf16.mxu0 %v6504_v22  ;;  %v6508_v38 = vpack.c.bf16 %v13104_v5, %v13102_v59  ;;  %v13108_v40 = vand.u32 4294901760, %v13107_v6  ;;  %v13112_v22 = vand.u32 4294901760, %v13111_v45  ;;  %v13115_v27 = vld [vmem:[#allocation94_spill] sm:$0xff]  ;;  %v13118_v59 = vand.u32 4294901760, %v13117_v47  ;;  %v13119_v5 = vld [vmem:[#allocation91_spill] sm:$0xff]  ;;  %v13125_v6 = vld [vmem:[#allocation148_spill] sm:$0xff] }
 0x326   :  { %v13129_v45 = vand.u32 4294901760, %v13128_v2  ;;  %v13134_v47 = vld [vmem:[#allocation170_spill] sm:$0xff] }
 0x327   :  { %6887 = vmatpush1.bf16.msra.mxu1 %v6886_v56  ;;  %v6890_v13 = vpack.c.bf16 %v13108_v40, %v13106_v25  ;;  %v6510_v55 = vpack.c.bf16 %v13114_v11, %v13112_v22  ;;  %v13116_v56 = vand.u32 4294901760, %v13115_v27  ;;  %v13124_v25 = vand.u32 4294901760, %v13123_v30  ;;  %v13132_v11 = vld [vmem:[#allocation177_spill] sm:$0xff]  ;;  %v13147_v2 = vld [vmem:[#allocation194_spill] sm:$0xff] }
 0x328   :  { %6889 = vmatprep.subr.bf16.mxu1 %v6888_v32  ;;  %6507 = vmatpush1.bf16.msra.mxu0 %v6506_v37  ;;  %v13120_v32 = vand.u32 4294901760, %v13119_v5  ;;  %v13121_v37 = vld [vmem:[#allocation97_spill] sm:$0xff]  ;;  %v13126_v40 = vand.u32 4294901760, %v13125_v6  ;;  %v13133_v27 = vand.u32 4294901760, %v13132_v11  ;;  %v13144_v6 = vld [vmem:[#allocation186_spill] sm:$0xff]  ;;  %v13151_v11 = vand.u32 4294901760, %v12901_v51 }
 0x329   :  { %6509 = vmatprep.subr.bf16.mxu0 %v6508_v38  ;;  %v6512_v35 = vpack.c.bf16 %v13118_v59, %v13116_v56  ;;  %v13122_v41 = vand.u32 4294901760, %v13121_v37  ;;  %v13127_v38 = vand.u32 4294901760, %v12880_v63  ;;  %v13140_v63 = vld [vmem:[#allocation181_spill] sm:$0xff] }
 0x32a   :  { %v6896_v43 = vpack.c.bf16 %v13126_v40, %v13124_v25  ;;  %v13142_v25 = vld [vmem:[#allocation184_spill] sm:$0xff]  ;;  %v13145_v40 = vand.u32 4294901760, %v13144_v6  ;;  %v13168_v6 = vld [vmem:[#allocation65_spill] sm:$0xff] }
 0x32b   :  { %6891 = vmatpush1.bf16.msra.mxu1 %v6890_v13  ;;  %v6894_v4 = vpack.c.bf16 %v13122_v41, %v13120_v32  ;;  %v6514_v22 = vpack.c.bf16 %v13129_v45, %v13127_v38  ;;  %v13131_v13 = vand.u32 4294901760, %v13130_v10  ;;  %v13138_v32 = vld [vmem:[#allocation180_spill] sm:$0xff]  ;;  %v13141_v41 = vand.u32 4294901760, %v13140_v63 }
 0x32c   :  { %6893 = vmatprep.subr.bf16.mxu1 %v6892_v26  ;;  %6511 = vmatpush1.bf16.msra.mxu0 %v6510_v55  ;;  %v13135_v26 = vand.u32 4294901760, %v13134_v47  ;;  %v13136_v55 = vld [vmem:[#allocation172_spill] sm:$0xff]  ;;  %v13139_v37 = vand.u32 4294901760, %v13138_v32  ;;  %v13148_v45 = vand.u32 4294901760, %v13147_v2  ;;  %v13159_v32 = vand.u32 4294901760, %v12909_v1 }
 0x32d   :  { %6513 = vmatprep.subr.bf16.mxu0 %v6512_v35  ;;  %v6516_v56 = vpack.c.bf16 %v13133_v27, %v13131_v13  ;;  %v13137_v59 = vand.u32 4294901760, %v13136_v55  ;;  %v13143_v35 = vand.u32 4294901760, %v13142_v25  ;;  %v13152_v27 = vld [vmem:[#allocation200_spill] sm:$0xff]  ;;  %v13170_v1 = vand.u32 4294901760, %v12735_v16 }
 0x32e   :  { %v6900_v30 = vpack.c.bf16 %v13141_v41, %v13139_v37  ;;  %v13153_v47 = vand.u32 4294901760, %v13152_v27  ;;  %v13160_v37 = vand.u32 4294901760, %v12730_v46  ;;  %v13163_v41 = vld [vmem:[#allocation41_spill] sm:$0xff]  ;;  %v13165_v25 = vld [vmem:[#allocation44_spill] sm:$0xff]  ;;  %v13173_v2 = vand.u32 4294901760, %v12740_v44 }
 0x32f   :  { %6895 = vmatpush1.bf16.msra.mxu1 %v6894_v4  ;;  %v6898_v5 = vpack.c.bf16 %v13137_v59, %v13135_v26  ;;  %v6518_v38 = vpack.c.bf16 %v13145_v40, %v13143_v35  ;;  %v13146_v4 = vand.u32 4294901760, %v12895_v57  ;;  %v13155_v57 = vand.u32 4294901760, %v12903_v62  ;;  %v13179_v27 = vld [vmem:[#allocation101_spill] sm:$0xff] }
 0x330   :  { %6897 = vmatprep.subr.bf16.mxu1 %v6896_v43  ;;  %6515 = vmatpush1.bf16.msra.mxu0 %v6514_v22  ;;  %v13149_v43 = vand.u32 4294901760, %v12898_v14  ;;  %v13150_v22 = vand.u32 4294901760, %v12897_v60  ;;  %v6904_v26 = vpack.c.bf16 %v13153_v47, %v13151_v11  ;;  %v13156_v59 = vand.u32 4294901760, %v12907_v39 }
 0x331   :  { %6517 = vmatprep.subr.bf16.mxu0 %v6516_v56  ;;  %v6520_v10 = vpack.c.bf16 %v13148_v45, %v13146_v4  ;;  %v13154_v56 = vand.u32 4294901760, %v12904_v52  ;;  %v13157_v14 = vand.u32 4294901760, %v12906_v23  ;;  %v13158_v60 = vand.u32 4294901760, %v12910_v58  ;;  %v13161_v52 = vld [vmem:[#allocation38_spill] sm:$0xff]  ;;  %v13174_v45 = vld [vmem:[#allocation75_spill] sm:$0xff] }
 0x332   :  { %v6902_v13 = vpack.c.bf16 %v13150_v22, %v13149_v43  ;;  %v13162_v63 = vand.u32 4294901760, %v13161_v52  ;;  %v13166_v39 = vand.u32 4294901760, %v13165_v25  ;;  %v13167_v23 = vand.u32 4294901760, %v12737_v7  ;;  %v13205_v25 = vld [vmem:[#allocation188_spill] sm:$0xff] }
 0x333   :  { %6899 = vmatpush1.bf16.msra.mxu1 %v6898_v5  ;;  %v6522_v55 = vpack.c.bf16 %v13155_v57, %v13154_v56  ;;  %v6524_v5 = vpack.c.bf16 %v13157_v14, %v13156_v59  ;;  %v6906_v51 = vpack.c.bf16 %v13159_v32, %v13158_v60  ;;  %v13169_v58 = vand.u32 4294901760, %v13168_v6 }
 0x334   :  { %6901 = vmatprep.subr.bf16.mxu1 %v6900_v30  ;;  %6519 = vmatpush1.bf16.msra.mxu0 %v6518_v38  ;;  %v6908_v62 = vpack.c.bf16 %v13162_v63, %v13160_v37  ;;  %v13164_v30 = vand.u32 4294901760, %v13163_v41  ;;  %v13171_v38 = vld [vmem:[#allocation59_spill] sm:$0xff]  ;;  %v13176_v22 = vand.u32 4294901760, %v12742_v20  ;;  %v13177_v7 = vand.u32 4294901760, %v12743_v53  ;;  %v13196_v37 = vld [vmem:[#allocation173_spill] sm:$0xff] }
 0x335   :  { %6521 = vmatprep.subr.bf16.mxu0 %v6520_v10  ;;  %v6528_v40 = vpack.c.bf16 %v13169_v58, %v13167_v23  ;;  %v13172_v4 = vand.u32 4294901760, %v13171_v38  ;;  %v13175_v10 = vand.u32 4294901760, %v13174_v45  ;;  %v13178_v11 = vand.u32 4294901760, %v12920_v48  ;;  %v13199_v63 = vld [vmem:[#allocation167_spill] sm:$0xff]  ;;  %v13215_v38 = vld [vmem:[#allocation133_spill] sm:$0xff]  ;;  %v13219_v45 = vld [vmem:[#allocation100_spill] sm:$0xff] }
 0x336   :  { %v6526_v35 = vpack.c.bf16 %v13166_v39, %v13164_v30  ;;  %v13180_v16 = vand.u32 4294901760, %v13179_v27  ;;  %v13182_v56 = vand.u32 4294901760, %v12922_v21  ;;  %v13183_v57 = vand.u32 4294901760, %v12925_v61  ;;  %v13226_v27 = vld [vmem:[#allocation13_spill] sm:$0xff] }
 0x337   :  { %6903 = vmatpush1.bf16.msra.mxu1 %v6902_v13  ;;  %v6910_v46 = vpack.c.bf16 %v13172_v4, %v13170_v1  ;;  %v6912_v43 = vpack.c.bf16 %v13175_v10, %v13173_v2  ;;  %v6530_v13 = vpack.c.bf16 %v13177_v7, %v13176_v22  ;;  %v13184_v20 = vand.u32 4294901760, %v12791_v31  ;;  %v13213_v1 = vld [vmem:[#allocation117_spill] sm:$0xff]  ;;  %v13216_v4 = vld [vmem:[#allocation126_spill] sm:$0xff]  ;;  %v13218_v2 = vld [vmem:[#allocation156_spill] sm:$0xff] }
 0x338   :  { %6905 = vmatprep.subr.bf16.mxu1 %v6904_v26  ;;  %6523 = vmatpush1.bf16.msra.mxu0 %v6522_v55  ;;  %v6532_v47 = vpack.c.bf16 %v13180_v16, %v13178_v11  ;;  %v13181_v26 = vand.u32 4294901760, %v12923_v24  ;;  %v13185_v55 = vand.u32 4294901760, %v12927_v18  ;;  %v13186_v48 = vand.u32 4294901760, %v12751_v8  ;;  %v13220_v10 = vld [vmem:[#allocation96_spill] sm:$0xff]  ;;  %v13222_v22 = vld [vmem:[#allocation106_spill] sm:$0xff] }
 0x339   :  { %6525 = vmatprep.subr.bf16.mxu0 %v6524_v5  ;;  %v6916_v53 = vpack.c.bf16 %v13184_v20, %v13183_v57  ;;  %v13187_v14 = vand.u32 4294901760, %v12802_v42  ;;  %v13188_v24 = vand.u32 4294901760, %v12803_v19  ;;  %v13189_v21 = vand.u32 4294901760, %v12930_v9  ;;  %v13223_v7 = vld [vmem:[#allocation154_spill] sm:$0xff]  ;;  %v13233_v57 = vld [vmem:[#allocation48_spill] sm:$0xff] }
 0x33a   :  { %v6914_v44 = vpack.c.bf16 %v13182_v56, %v13181_v26  ;;  %v6534_v59 = vpack.c.bf16 %v13186_v48, %v13185_v55  ;;  %v13190_v60 = vand.u32 4294901760, %v12753_v29  ;;  %v13191_v31 = vand.u32 4294901760, %v12804_v0  ;;  %v13225_v11 = vld [vmem:[#allocation166_spill] sm:$0xff]  ;;  %v13230_v26 = vld [vmem:[#allocation31_spill] sm:$0xff]  ;;  %v13231_v56 = vld [vmem:[#allocation40_spill] sm:$0xff] }
 0x33b   :  { %6907 = vmatpush1.bf16.msra.mxu1 %v6906_v51  ;;  %v6536_v5 = vpack.c.bf16 %v13188_v24, %v13187_v14  ;;  %v13192_v18 = vand.u32 4294901760, %v12805_v50  ;;  %v13193_v32 = vand.u32 4294901760, %v12759_v49  ;;  %v13194_v42 = vand.u32 4294901760, %v12806_v17  ;;  %v13202_v49 = vld [vmem:[#allocation183_spill] sm:$0xff]  ;;  %v13228_v16 = vld [vmem:[#allocation18_spill] sm:$0xff]  ;;  %v13236_v55 = vld [vmem:[#allocation53_spill] sm:$0xff] }
 0x33c   :  { %6909 = vmatprep.subr.bf16.mxu1 %v6908_v62  ;;  %6527 = vmatpush1.bf16.msra.mxu0 %v6526_v35  ;;  %v6918_v61 = vpack.c.bf16 %v13190_v60, %v13189_v21  ;;  %v13195_v19 = vand.u32 4294901760, %v12763_v36  ;;  %v13197_v9 = vand.u32 4294901760, %v13196_v37  ;;  %v13198_v29 = vand.u32 4294901760, %v12761_v12  ;;  %v13207_v35 = vld [vmem:[#allocation198_spill] sm:$0xff]  ;;  %v13209_v12 = vld [vmem:[#allocation201_spill] sm:$0xff]  ;;  %v13252_v37 = vld [vmem:[#allocation187_spill] sm:$0xff] }
 0x33d   :  { %6529 = vmatprep.subr.bf16.mxu0 %v6528_v40  ;;  %v6920_v8 = vpack.c.bf16 %v13192_v18, %v13191_v31  ;;  %v6538_v51 = vpack.c.bf16 %v13194_v42, %v13193_v32  ;;  %v13200_v62 = vand.u32 4294901760, %v13199_v63  ;;  %v13201_v50 = vand.u32 4294901760, %v12765_v3  ;;  %v13211_v40 = vld [vmem:[#allocation163_spill] sm:$0xff]  ;;  %v13212_v3 = vld [vmem:[#allocation205_spill] sm:$0xff]  ;;  %v13234_v20 = vld [vmem:[#allocation46_spill] sm:$0xff] }
 0x33e   :  { %v6540_v52 = vpack.c.bf16 %v13197_v9, %v13195_v19  ;;  %v13203_v41 = vand.u32 4294901760, %v13202_v49  ;;  %v13204_v30 = vand.u32 4294901760, %v12767_v54  ;;  %v13206_v36 = vand.u32 4294901760, %v13205_v25  ;;  %v13214_v54 = vld [vmem:[#allocation118_spill] sm:$0xff]  ;;  %v13240_v24 = vld [vmem:[#allocation69_spill] sm:$0xff]  ;;  %v13245_v31 = vld [vmem:[#allocation139_spill] sm:$0xff] }
 0x33f   :  { %6911 = vmatpush1.bf16.msra.mxu1 %v6910_v46  ;;  %v6922_v0 = vpack.c.bf16 %v13200_v62, %v13198_v29  ;;  %v13208_v23 = vand.u32 4294901760, %v13207_v35  ;;  %v13210_v6 = vand.u32 4294901760, %v13209_v12  ;;  %v13217_v46 = vld [vmem:[#allocation138_spill] sm:$0xff]  ;;  %v13246_v18 = vld [vmem:[#allocation151_spill] sm:$0xff]  ;;  %v13248_v32 = vld [vmem:[#allocation169_spill] sm:$0xff] }
 0x340   :  { %6913 = vmatprep.subr.bf16.mxu1 %v6912_v43  ;;  %6531 = vmatpush1.bf16.msra.mxu0 %v6530_v13  ;;  %v6924_v17 = vpack.c.bf16 %v13203_v41, %v13201_v50  ;;  %v6542_v39 = vpack.c.bf16 %v13206_v36, %v13204_v30  ;;  %v13221_v43 = vld [vmem:[#allocation108_spill] sm:$0xff]  ;;  %v13224_v13 = vld [vmem:[#allocation146_spill] sm:$0xff]  ;;  %v13253_v9 = vld [vmem:[#allocation197_spill] sm:$0xff] }
 0x341   :  { %6533 = vmatprep.subr.bf16.mxu0 %v6532_v47  ;;  %v6926_v58 = vpack.c.bf16 %v13210_v6, %v13208_v23  ;;  %v13229_v47 = vld [vmem:[#allocation27_spill] sm:$0xff]  ;;  %v13237_v48 = vld [vmem:[#allocation62_spill] sm:$0xff]  ;;  %v13251_v19 = vld [vmem:[#allocation192_spill] sm:$0xff] }
 0x342   :  { %v13239_v14 = vld [vmem:[#allocation78_spill] sm:$0xff]  ;;  %v13255_v29 = vld [vmem:[#allocation20_spill] sm:$0xff]  ;;  %v13256_v63 = vld [vmem:[#allocation15_spill] sm:$0xff] }
 0x343   :  { %6915 = vmatpush1.bf16.msra.mxu1 %v6914_v44  ;;  %v13232_v44 = vld [vmem:[#allocation32_spill] sm:$0xff]  ;;  %v13242_v21 = vld [vmem:[#allocation82_spill] sm:$0xff]  ;;  %v13257_v62 = vld [vmem:[#allocation35_spill] sm:$0xff] }
 0x344   :  { %6917 = vmatprep.subr.bf16.mxu1 %v6916_v53  ;;  %6535 = vmatpush1.bf16.msra.mxu0 %v6534_v59  ;;  %v13235_v53 = vld [vmem:[#allocation61_spill] sm:$0xff]  ;;  %v13238_v59 = vld [vmem:[#allocation67_spill] sm:$0xff]  ;;  %v13243_v60 = vld [vmem:[#allocation130_spill] sm:$0xff] }
 0x345   :  { %6537 = vmatprep.subr.bf16.mxu0 %v6536_v5  ;;  %v13241_v5 = vld [vmem:[#allocation84_spill] sm:$0xff]  ;;  %v13249_v42 = vld [vmem:[#allocation178_spill] sm:$0xff]  ;;  %v13261_v41 = vld [vmem:[#allocation71_spill] sm:$0xff] }
 0x346   :  { %v13259_v50 = vld [vmem:[#allocation56_spill] sm:$0xff]  ;;  %v13260_v49 = vld [vmem:[#allocation50_spill] sm:$0xff]  ;;  %v13264_v25 = vld [vmem:[#allocation87_spill] sm:$0xff] }
 0x347   :  { %6919 = vmatpush1.bf16.msra.mxu1 %v6918_v61  ;;  %v13244_v61 = vld [vmem:[#allocation90_spill] sm:$0xff]  ;;  %v13263_v30 = vld [vmem:[#allocation92_spill] sm:$0xff]  ;;  %v13265_v36 = vld [vmem:[#allocation107_spill] sm:$0xff] }
 0x348   :  { %6921 = vmatprep.subr.bf16.mxu1 %v6920_v8  ;;  %6539 = vmatpush1.bf16.msra.mxu0 %v6538_v51  ;;  %v13247_v8 = vld [vmem:[#allocation174_spill] sm:$0xff]  ;;  %v13267_v35 = vld [vmem:[#allocation128_spill] sm:$0xff]  ;;  %v13268_v23 = vld [vmem:[#allocation123_spill] sm:$0xff] }
 0x349   :  { %6541 = vmatprep.subr.bf16.mxu0 %v6540_v52  ;;  %v13250_v51 = vld [vmem:[#allocation182_spill] sm:$0xff]  ;;  %v13269_v12 = vld [vmem:[#allocation143_spill] sm:$0xff]  ;;  %v13270_v6 = vld [vmem:[#allocation149_spill] sm:$0xff] }
 0x34a   :  { %v13254_v52 = vld [vmem:[#allocation202_spill] sm:$0xff] }
 0x34b   :  { %6923 = vmatpush1.bf16.msra.mxu1 %v6922_v0  ;;  %v13258_v0 = vld [vmem:[#allocation47_spill] sm:$0xff] }
 0x34c   :  { %6925 = vmatprep.subr.bf16.mxu1 %v6924_v17  ;;  %6543 = vmatpush1.bf16.msra.mxu0 %v6542_v39  ;;  %v13262_v17 = vld [vmem:[#allocation77_spill] sm:$0xff] }
 0x34d   :  { %6545 = vmatprep.subr.bf16.mxu0 %v13211_v40  ;;  %v13266_v39 = vld [vmem:[#allocation113_spill] sm:$0xff]  ;;  %v13272_v40 = vld [vmem:[#allocation179_spill] sm:$0xff] }
 0x34f   :  { %6927 = vmatpush1.bf16.msra.mxu1 %v6926_v58  ;;  %4005 = vmatmul.mubr.f32.vlgmr.msra.gmra.mrb[2].mxu0 %v13212_v3  ;;  %v13271_v58 = vld [vmem:[#allocation171_spill] sm:$0xff] }
 0x350   :  { %6929 = vmatprep.subr.bf16.mxu1 %v13213_v1  ;;  %6547 = vmatpush1.bf16.msra.mxu0 %v13214_v54 }
 0x351   :  { %6549 = vmatprep.subr.bf16.mxu0 %v13215_v38  ;;  %4140 = vmatprep.mubr.f32.mxu0 %v13024_v28 }
 0x352   :  { %5289 = vmatmul.mubr.f32.vlgmr.msra.gmra.mrb[2].mxu1 %v13212_v3 }
 0x353   :  { %6931 = vmatpush1.bf16.msra.mxu1 %v13216_v4  ;;  %5424 = vmatprep.mubr.f32.mxu1 %v13024_v28  ;;  %v13227_v28 = vld [vmem:[#allocation25_spill] sm:$0xff] }
 0x354   :  { %6933 = vmatprep.subr.bf16.mxu1 %v13217_v46  ;;  %6551 = vmatpush1.bf16.msra.mxu0 %v13218_v2 }
 0x355   :  { %6553 = vmatprep.subr.bf16.mxu0 %v13219_v45 }
 0x357   :  { %6935 = vmatpush1.bf16.msra.mxu1 %v13220_v10 }
 0x358   :  { %6937 = vmatprep.subr.bf16.mxu1 %v13221_v43  ;;  %6555 = vmatpush1.bf16.msra.mxu0 %v13222_v22 }
 0x359   :  { %6557 = vmatprep.subr.bf16.mxu0 %v13223_v7 }
 0x35b   :  { %6939 = vmatpush1.bf16.msra.mxu1 %v13224_v13 }
 0x35c   :  { %6941 = vmatprep.subr.bf16.mxu1 %v13225_v11  ;;  %6559 = vmatpush1.bf16.msra.mxu0 %v13226_v27 }
 0x35d   :  { %6561 = vmatprep.subr.bf16.mxu0 %v13227_v28 }
 0x35f   :  { %6943 = vmatpush1.bf16.msra.mxu1 %v13228_v16 }
 0x360   :  { %6945 = vmatprep.subr.bf16.mxu1 %v13229_v47  ;;  %6563 = vmatpush1.bf16.msra.mxu0 %v13230_v26 }
 0x361   :  { %6565 = vmatprep.subr.bf16.mxu0 %v13231_v56 }
 0x363   :  { %6947 = vmatpush1.bf16.msra.mxu1 %v13232_v44 }
 0x364   :  { %6949 = vmatprep.subr.bf16.mxu1 %v13233_v57  ;;  %6567 = vmatpush1.bf16.msra.mxu0 %v13234_v20 }
 0x365   :  { %6569 = vmatprep.subr.bf16.mxu0 %v13235_v53 }
 0x367   :  { %6951 = vmatpush1.bf16.msra.mxu1 %v13236_v55 }
 0x368   :  { %6953 = vmatprep.subr.bf16.mxu1 %v13237_v48  ;;  %6571 = vmatpush1.bf16.msra.mxu0 %v13238_v59 }
 0x369   :  { %6573 = vmatprep.subr.bf16.mxu0 %v13239_v14 }
 0x36b   :  { %6955 = vmatpush1.bf16.msra.mxu1 %v13240_v24 }
 0x36c   :  { %6957 = vmatprep.subr.bf16.mxu1 %v13241_v5  ;;  %6575 = vmatpush1.bf16.msra.mxu0 %v13242_v21 }
 0x36d   :  { %6577 = vmatprep.subr.bf16.mxu0 %v13243_v60 }
 0x36f   :  { %6959 = vmatpush1.bf16.msra.mxu1 %v13244_v61 }
 0x370   :  { %6961 = vmatprep.subr.bf16.mxu1 %v13245_v31  ;;  %6579 = vmatpush1.bf16.msra.mxu0 %v13246_v18 }
 0x371   :  { %6581 = vmatprep.subr.bf16.mxu0 %v13247_v8 }
 0x373   :  { %6963 = vmatpush1.bf16.msra.mxu1 %v13248_v32 }
 0x374   :  { %6965 = vmatprep.subr.bf16.mxu1 %v13249_v42  ;;  %6583 = vmatpush1.bf16.msra.mxu0 %v13250_v51 }
 0x375   :  { %6585 = vmatprep.subr.bf16.mxu0 %v13251_v19 }
 0x377   :  { %6967 = vmatpush1.bf16.msra.mxu1 %v13252_v37 }
 0x378   :  { %6969 = vmatprep.subr.bf16.mxu1 %v13253_v9  ;;  %6587 = vmatpush1.bf16.msra.mxu0 %v13254_v52 }
 0x379   :  { %6589 = vmatprep.subr.bf16.mxu0 %v13255_v29 }
 0x37b   :  { %6971 = vmatpush1.bf16.msra.mxu1 %v13256_v63 }
 0x37c   :  { %6973 = vmatprep.subr.bf16.mxu1 %v13257_v62  ;;  %6591 = vmatpush1.bf16.msra.mxu0 %v13258_v0 }
 0x37d   :  { %6593 = vmatprep.subr.bf16.mxu0 %v13259_v50 }
 0x37f   :  { %6975 = vmatpush1.bf16.msra.mxu1 %v13260_v49 }
 0x380   :  { %6977 = vmatprep.subr.bf16.mxu1 %v13261_v41  ;;  %6595 = vmatpush1.bf16.msra.mxu0 %v13262_v17 }
 0x381   :  { %6597 = vmatprep.subr.bf16.mxu0 %v13263_v30 }
 0x383   :  { %6979 = vmatpush1.bf16.msra.mxu1 %v13264_v25 }
 0x384   :  { %6981 = vmatprep.subr.bf16.mxu1 %v13265_v36  ;;  %6599 = vmatpush1.bf16.msra.mxu0 %v13266_v39 }
 0x385   :  { %6601 = vmatprep.subr.bf16.mxu0 %v13267_v35 }
 0x387   :  { %6983 = vmatpush1.bf16.msra.mxu1 %v13268_v23 }
 0x388   :  { %6985 = vmatprep.subr.bf16.mxu1 %v13269_v12  ;;  %6603 = vmatpush1.bf16.msra.mxu0 %v13270_v6 }
 0x389   :  { %6605 = vmatprep.subr.bf16.mxu0 %v13271_v58 }
 0x38b   :  { %6987 = vmatpush1.bf16.msra.mxu1 %v13003_v34 }
 0x38c   :  { %6989 = vmatprep.subr.bf16.mxu1 %v13272_v40  ;;  %6607 = vmatpush1.bf16.msra.mxu0 %v13005_v15 }
 0x38f   :  { %6991 = vmatpush1.bf16.msra.mxu1 %v13012_v33  ;;  %4142 = vmatmul.mubr.f32.vlgmr.msra.gmra.mrb[2].mxu0 %v13212_v3 }
 0x392   :  { %5426 = vmatmul.mubr.f32.vlgmr.msra.gmra.mrb[2].mxu1 %v13212_v3 }
 0x462   :  { %v4143_v1 = vpop.f32.mrb[2].mxu0 }
 0x463   :  { %5436 = vst [vmem:[#allocation7 + $0x20] sm:$0xff] %v4143_v1  ;;  %v4145_v54 = vpop.f32.mrb[3].mxu0 }
 0x464   :  { %5437 = vst [vmem:[#allocation7 + $0x28] sm:$0xff] %v4145_v54 }
 0x465   :  { %v5427_v38 = vpop.f32.mrb[2].mxu1 }
 0x466   :  { %5438 = vst [vmem:[#allocation7 + $0x30] sm:$0xff] %v5427_v38  ;;  %v5429_v34 = vpop.f32.mrb[3].mxu1 }
 0x467   :  { %5439 = vst [vmem:[#allocation7 + $0x38] sm:$0xff] %v5429_v34 }
 0x468   :  { %7092 = shalt.err (!%p7089_p6)
}
 0x469   :  { %s7093_s10 = scalar_lea.hbm %s10681_s2, 1024 }
 0x46a   :  { %p7094_p7 = scmp.ne.s32.totalorder %s10681_s2, %s7093_s10  ;;  %p7097_p8 = scmp.lt.u32.totalorder %s7093_s10, %s10681_s2 }
 0x46c   :  { %p7099_p9 = pnand %p7097_p8, %p7094_p7 }
 0x46e   :  { %7102 = shalt.err (!%p7099_p9)
}
 0x46f   :  { %5449 = dma.vmem_to_hbm [thread:$0]  %s5447_s6, 1024, %s10681_s2, [#allocation4]  }
 0x470   :  { %7107 = dma.done.wait [#allocation4], 1024  }
 0x471   :  { %7108 = vsyncadd [#allocation4], 4294966272 }
 0x472   :  { %5453 = vsyncpa [#allocation3], 1 }
 0x473   :  { %5454 = vsyncpa [#allocation6], 1 }
 0x474   :  { %5455 = vsyncpa [#allocation4], 1 }

</bundles_post_ra>
